<compile_context>
chip_gen: v5e
topology: v5e:2x2
jax: 0.10.0
libtpu: 0.0.40
codegen_flags: <defaults>
</compile_context>

<pallas_src>
import functools

import jax
import jax.numpy as jnp
from jax.experimental import pallas as pl
from jax.experimental.pallas import tpu as pltpu


DIM = 64
HEADS = 8


# ----------------------------------------------------------------------------
# In-kernel helper: 3x3 "same" conv + folded BN + ReLU as one im2col matmul.
# ----------------------------------------------------------------------------
def _conv3x3_bn_relu(x4, w_ref, scale_ref, bias_ref):
    # x4:        (B, H, W, C) float32 value
    # w_ref:     (9*C, Cout)  bfloat16 ref (HWIO weights flattened tap-major)
    # scale_ref: (1, Cout)    float32 ref (folded BN scale)
    # bias_ref:  (1, Cout)    float32 ref (folded BN bias)
    # returns    (B*H*W, Cout) float32
    B, H, W, C = x4.shape
    xb = x4.astype(jnp.bfloat16)

    # Zero padding built in VMEM (no HBM-level pad).
    zr = jnp.zeros((B, 1, W, C), jnp.bfloat16)
    xp = jnp.concatenate([zr, xb, zr], axis=1)            # (B, H+2, W, C)
    zc = jnp.zeros((B, H + 2, 1, C), jnp.bfloat16)
    xp = jnp.concatenate([zc, xp, zc], axis=2)            # (B, H+2, W+2, C)

    # im2col: 9 shifted taps concatenated on the lane axis -> one MXU matmul.
    cols = []
    for dy in range(3):
        for dx in range(3):
            cols.append(xp[:, dy:dy + H, dx:dx + W, :].reshape(B * H * W, C))
    patches = jnp.concatenate(cols, axis=-1)              # (B*H*W, 9*C) bf16

    acc = jnp.dot(patches, w_ref[...], preferred_element_type=jnp.float32)
    out = acc * scale_ref[...] + bias_ref[...]
    return jnp.maximum(out, 0.0)                          # (B*H*W, Cout) f32


# ----------------------------------------------------------------------------
# Fully fused Trans / Grafting forward kernel.
# ----------------------------------------------------------------------------
def _trans_kernel(H, W, nh,
                  r_ref, s_ref,
                  wcx_ref, scx_ref, bcx_ref,
                  wcy_ref, scy_ref, bcy_ref,
                  wk_ref, bk_ref,
                  wq_ref, bq_ref,
                  wv_ref, bv_ref,
                  wp_ref, bp_ref,
                  hmask_ref,
                  w2a_ref, s2a_ref, b2a_ref,
                  w2b_ref, s2b_ref, b2b_ref,
                  o_ref):
    B, C, N = r_ref.shape
    bf16 = jnp.bfloat16

    # NCHW-flat (B, C, N) -> token major (B*N, C): two cheap 64x64 transposes.
    x_in = jnp.concatenate([r_ref[b].T for b in range(B)], axis=0)  # (B*N, C)
    y_in = jnp.concatenate([s_ref[b].T for b in range(B)], axis=0)

    # convx / convy (+ folded BN + ReLU)
    x2d = _conv3x3_bn_relu(x_in.reshape(B, H, W, C), wcx_ref, scx_ref, bcx_ref)
    y2d = _conv3x3_bn_relu(y_in.reshape(B, H, W, C), wcy_ref, scy_ref, bcy_ref)

    # ---- Grafting cross attention: q, v from x; k from y ----
    xb = x2d.astype(bf16)
    yb = y2d.astype(bf16)
    k2d = jnp.dot(yb, wk_ref[...], preferred_element_type=jnp.float32) + bk_ref[...]
    q2d = jnp.dot(xb, wq_ref[...], preferred_element_type=jnp.float32) + bq_ref[...]
    v2d = jnp.dot(xb, wv_ref[...], preferred_element_type=jnp.float32) + bv_ref[...]

    q3 = q2d.reshape(B, N, C)
    k3 = k2d.reshape(B, N, C).astype(bf16)
    v3 = v2d.reshape(B, N, C).astype(bf16)

    # Per-head 0/1 channel-selector rows, (nh, C).
    hmask = hmask_ref[...]

    # Stack head-masked copies of q along the row axis: row block h holds the
    # queries restricted to head h's channels, so the per-head QK^T becomes a
    # single K=C matmul and softmax is a plain row softmax over the keys.
    q_stack = jnp.concatenate(
        [q3 * hmask[h:h + 1, :] for h in range(nh)], axis=1)        # (B, nh*N, C)

    logits = jnp.einsum('bic,bmc->bim', q_stack.astype(bf16), k3,
                        preferred_element_type=jnp.float32)         # (B, nh*N, N)
    mx = jnp.max(logits, axis=-1, keepdims=True)
    p = jnp.exp(logits - mx)
    p = p * pl.reciprocal(jnp.sum(p, axis=-1, keepdims=True), approx=True)

    ctx = jnp.einsum('bim,bmc->bic', p.astype(bf16), v3,
                     preferred_element_type=jnp.float32)            # (B, nh*N, C)

    # Row block h contributes only head h's channels -> merge heads back.
    attn = ctx[:, 0:N, :] * hmask[0:1, :]
    for h in range(1, nh):
        attn = attn + ctx[:, h * N:(h + 1) * N, :] * hmask[h:h + 1, :]
    attn2d = attn.reshape(B * N, C)

    proj = jnp.dot(attn2d.astype(bf16), wp_ref[...],
                   preferred_element_type=jnp.float32) + bp_ref[...]
    a2d = proj + x2d                                                # + sc1 residual

    # ---- conv2 (two conv+BN+ReLU) + residual ----
    t2d = _conv3x3_bn_relu(a2d.reshape(B, H, W, C), w2a_ref, s2a_ref, b2a_ref)
    t2d = _conv3x3_bn_relu(t2d.reshape(B, H, W, C), w2b_ref, s2b_ref, b2b_ref)
    out2d = t2d + a2d                                               # (B*N, C)

    # Token major -> NCHW-flat (B, C, N).
    out3 = out2d.reshape(B, N, C)
    for b in range(B):
        o_ref[b] = out3[b].T


# ----------------------------------------------------------------------------
# Wrapper: NCHW in, NCHW out; all weight reshapes / casts / scale folding here.
# ----------------------------------------------------------------------------
def trans_forward(params, r_nchw, s_nchw):
    B, C, H, W = r_nchw.shape
    N = H * W
    nh = HEADS
    hd = C // nh
    scale = hd ** (-0.5)
    f32, bf16 = jnp.float32, jnp.bfloat16

    def conv_args(p):
        return (p["w"].reshape(9 * C, C).astype(bf16),
                p["scale"].reshape(1, C).astype(f32),
                p["bias"].reshape(1, C).astype(f32))

    wcx, scx, bcx = conv_args(params["convx"])
    wcy, scy, bcy = conv_args(params["convy"])
    w2a, s2a, b2a = conv_args(params["conv2a"])
    w2b, s2b, b2b = conv_args(params["conv2b"])

    wk = params["k"]["w"].astype(bf16)
    bk = params["k"]["b"].reshape(1, C).astype(f32)
    wqv, bqv = params["qv"]["w"], params["qv"]["b"]
    wq = (wqv[:, :C] * scale).astype(bf16)       # fold softmax scale into q
    bq = (bqv[:C] * scale).reshape(1, C).astype(f32)
    wv = wqv[:, C:].astype(bf16)
    bv = bqv[C:].reshape(1, C).astype(f32)
    wp = params["proj"]["w"].astype(bf16)
    bp = params["proj"]["b"].reshape(1, C).astype(f32)

    hmask = (jnp.arange(nh)[:, None] ==
             (jnp.arange(C)[None, :] // hd)).astype(f32)            # (nh, C)

    args = (r_nchw.reshape(B, C, N), s_nchw.reshape(B, C, N),
            wcx, scx, bcx, wcy, scy, bcy,
            wk, bk, wq, bq, wv, bv, wp, bp,
            hmask,
            w2a, s2a, b2a, w2b, s2b, b2b)

    vmem = pl.BlockSpec(memory_space=pltpu.MemorySpace.VMEM)
    out_bcn = pl.pallas_call(
        functools.partial(_trans_kernel, H, W, nh),
        out_shape=jax.ShapeDtypeStruct((B, C, N), f32),
        in_specs=[vmem] * len(args),
        out_specs=vmem,
    )(*args)
    return out_bcn.reshape(B, C, H, W)


# ----------------------------------------------------------------------------
# Deterministic parameter construction (kaiming-normal, like weight_init).
# ----------------------------------------------------------------------------
def _kaiming_conv(key, cin, cout, k=3):
    std = (2.0 / (cin * k * k)) ** 0.5
    return jax.random.normal(key, (k, k, cin, cout), jnp.float32) * std


def _kaiming_linear(key, cin, cout):
    std = (2.0 / cin) ** 0.5
    return jax.random.normal(key, (cin, cout), jnp.float32) * std


def _fold_bn(conv_bias, cout, eps=1e-5):
    # gamma=1, beta=0, running_mean=0, running_var=1 (weight_init + eval mode)
    s = jnp.ones((cout,), jnp.float32) * jax.lax.rsqrt(jnp.ones((cout,)) + eps)
    return s, (conv_bias - 0.0) * s


def make_trans_params(key, dim=DIM):
    keys = jax.random.split(key, 8)
    params = {}
    for name, kk in zip(["convx", "convy", "conv2a", "conv2b"], keys[:4]):
        w = _kaiming_conv(kk, dim, dim)
        scale, bias = _fold_bn(jnp.zeros((dim,), jnp.float32), dim)
        params[name] = dict(w=w, scale=scale, bias=bias)
    params["k"] = dict(w=_kaiming_linear(keys[4], dim, dim),
                       b=jnp.zeros((dim,), jnp.float32))
    params["qv"] = dict(w=_kaiming_linear(keys[5], dim, 2 * dim),
                        b=jnp.zeros((2 * dim,), jnp.float32))
    params["proj"] = dict(w=_kaiming_linear(keys[6], dim, dim),
                          b=jnp.zeros((dim,), jnp.float32))
    return params


# ----------------------------------------------------------------------------
# Pure-JAX float32 reference (mirrors the PyTorch forward) for self-check.
# ----------------------------------------------------------------------------
def trans_reference(params, r_nchw, s_nchw):
    B, C, H, W = r_nchw.shape
    nh, hd = HEADS, C // HEADS
    scale = hd ** (-0.5)

    def conv_bn_relu(x_nhwc, p):
        y = jax.lax.conv_general_dilated(
            x_nhwc, p["w"], window_strides=(1, 1), padding="SAME",
            dimension_numbers=("NHWC", "HWIO", "NHWC"))
        return jax.nn.relu(y * p["scale"] + p["bias"])

    x = conv_bn_relu(jnp.transpose(r_nchw, (0, 2, 3, 1)), params["convx"])
    y = conv_bn_relu(jnp.transpose(s_nchw, (0, 2, 3, 1)), params["convy"])
    N = H * W
    xf = x.reshape(B, N, C)
    yf = y.reshape(B, N, C)

    k = yf @ params["k"]["w"] + params["k"]["b"]
    qv = xf @ params["qv"]["w"] + params["qv"]["b"]
    q, v = qv[..., :C], qv[..., C:]
    qh = q.reshape(B, N, nh, hd).transpose(0, 2, 1, 3)
    kh = k.reshape(B, N, nh, hd).transpose(0, 2, 1, 3)
    vh = v.reshape(B, N, nh, hd).transpose(0, 2, 1, 3)
    a = jnp.einsum("bhnd,bhmd->bhnm", qh, kh) * scale
    a = jax.nn.softmax(a, axis=-1)
    o = jnp.einsum("bhnm,bhmd->bhnd", a, vh)
    o = o.transpose(0, 2, 1, 3).reshape(B, N, C)
    att = o @ params["proj"]["w"] + params["proj"]["b"] + xf

    img = att.reshape(B, H, W, C)
    t = conv_bn_relu(img, params["conv2a"])
    t = conv_bn_relu(t, params["conv2b"])
    out = t + img
    return jnp.transpose(out, (0, 3, 1, 2))


if __name__ == "__main__":
    key = jax.random.PRNGKey(0)
    k_params, k_r, k_s = jax.random.split(key, 3)

    B, C, H, W = 2, DIM, 8, 8           # Grafting is hardwired to dim=64
    r = jax.random.normal(k_r, (B, C, H, W), jnp.float32)
    s = jax.random.normal(k_s, (B, C, H, W), jnp.float32)
    params = make_trans_params(k_params, dim=C)

    fwd = jax.jit(trans_forward)
    out = jax.block_until_ready(fwd(params, r, s))

    assert out.shape == (B, C, H, W)
    assert bool(jnp.all(jnp.isfinite(out)))

    ref = trans_reference(params, r, s)
    err = float(jnp.max(jnp.abs(out - ref)) / (jnp.max(jnp.abs(ref)) + 1e-6))
    assert err < 0.1, f"mismatch vs reference: normalized max err {err:.4f}"

    print("KERNEL_OK")
</pallas_src>

<mosaic_0001>
module attributes {stable_mosaic.version = 11 : i64} {
  func.func @_trans_kernel(%arg0: memref<2x64x64xf32, #tpu.memory_space<vmem>>, %arg1: memref<2x64x64xf32, #tpu.memory_space<vmem>>, %arg2: memref<576x64xbf16, #tpu.memory_space<vmem>>, %arg3: memref<1x64xf32, #tpu.memory_space<vmem>>, %arg4: memref<1x64xf32, #tpu.memory_space<vmem>>, %arg5: memref<576x64xbf16, #tpu.memory_space<vmem>>, %arg6: memref<1x64xf32, #tpu.memory_space<vmem>>, %arg7: memref<1x64xf32, #tpu.memory_space<vmem>>, %arg8: memref<64x64xbf16, #tpu.memory_space<vmem>>, %arg9: memref<1x64xf32, #tpu.memory_space<vmem>>, %arg10: memref<64x64xbf16, #tpu.memory_space<vmem>>, %arg11: memref<1x64xf32, #tpu.memory_space<vmem>>, %arg12: memref<64x64xbf16, #tpu.memory_space<vmem>>, %arg13: memref<1x64xf32, #tpu.memory_space<vmem>>, %arg14: memref<64x64xbf16, #tpu.memory_space<vmem>>, %arg15: memref<1x64xf32, #tpu.memory_space<vmem>>, %arg16: memref<8x64xf32, #tpu.memory_space<vmem>>, %arg17: memref<576x64xbf16, #tpu.memory_space<vmem>>, %arg18: memref<1x64xf32, #tpu.memory_space<vmem>>, %arg19: memref<1x64xf32, #tpu.memory_space<vmem>>, %arg20: memref<576x64xbf16, #tpu.memory_space<vmem>>, %arg21: memref<1x64xf32, #tpu.memory_space<vmem>>, %arg22: memref<1x64xf32, #tpu.memory_space<vmem>>, %arg23: memref<2x64x64xf32, #tpu.memory_space<vmem>>) attributes {dimension_semantics = [], scalar_prefetch = 0 : i64, scratch_operands = 0 : i64, tpu.core_type = #tpu.core_type<tc>} {
    %c0 = arith.constant 0 : index
    %c0_0 = arith.constant 0 : index
    %c0_1 = arith.constant 0 : index
    %0 = vector.load %arg0[%c0, %c0_0, %c0_1] : memref<2x64x64xf32, #tpu.memory_space<vmem>>, vector<1x64x64xf32>
    %1 = vector.shape_cast %0 : vector<1x64x64xf32> to vector<64x64xf32>
    %2 = tpu.transpose %1, [1, 0] : vector<64x64xf32> -> vector<64x64xf32>
    %c1 = arith.constant 1 : index
    %c0_2 = arith.constant 0 : index
    %c0_3 = arith.constant 0 : index
    %3 = vector.load %arg0[%c1, %c0_2, %c0_3] : memref<2x64x64xf32, #tpu.memory_space<vmem>>, vector<1x64x64xf32>
    %4 = vector.shape_cast %3 : vector<1x64x64xf32> to vector<64x64xf32>
    %5 = tpu.transpose %4, [1, 0] : vector<64x64xf32> -> vector<64x64xf32>
    %6 = tpu.concatenate %2, %5 in 0 : vector<64x64xf32>, vector<64x64xf32> -> vector<128x64xf32>
    %c0_4 = arith.constant 0 : index
    %c0_5 = arith.constant 0 : index
    %c0_6 = arith.constant 0 : index
    %7 = vector.load %arg1[%c0_4, %c0_5, %c0_6] : memref<2x64x64xf32, #tpu.memory_space<vmem>>, vector<1x64x64xf32>
    %8 = vector.shape_cast %7 : vector<1x64x64xf32> to vector<64x64xf32>
    %9 = tpu.transpose %8, [1, 0] : vector<64x64xf32> -> vector<64x64xf32>
    %c1_7 = arith.constant 1 : index
    %c0_8 = arith.constant 0 : index
    %c0_9 = arith.constant 0 : index
    %10 = vector.load %arg1[%c1_7, %c0_8, %c0_9] : memref<2x64x64xf32, #tpu.memory_space<vmem>>, vector<1x64x64xf32>
    %11 = vector.shape_cast %10 : vector<1x64x64xf32> to vector<64x64xf32>
    %12 = tpu.transpose %11, [1, 0] : vector<64x64xf32> -> vector<64x64xf32>
    %13 = tpu.concatenate %9, %12 in 0 : vector<64x64xf32>, vector<64x64xf32> -> vector<128x64xf32>
    %14 = vector.shape_cast %6 : vector<128x64xf32> to vector<2x8x8x64xf32>
    %15 = arith.truncf %14 : vector<2x8x8x64xf32> to vector<2x8x8x64xbf16>
    %cst = arith.constant 0.000000e+00 : bf16
    %16 = vector.broadcast %cst : bf16 to vector<2x1x8x64xbf16>
    %17 = tpu.concatenate %16, %15, %16 in 1 : vector<2x1x8x64xbf16>, vector<2x8x8x64xbf16>, vector<2x1x8x64xbf16> -> vector<2x10x8x64xbf16>
    %cst_10 = arith.constant 0.000000e+00 : bf16
    %18 = vector.broadcast %cst_10 : bf16 to vector<2x10x1x64xbf16>
    %19 = tpu.concatenate %18, %17, %18 in 2 : vector<2x10x1x64xbf16>, vector<2x10x8x64xbf16>, vector<2x10x1x64xbf16> -> vector<2x10x10x64xbf16>
    %20 = vector.extract_strided_slice %19 {offsets = [0, 0, 0, 0], sizes = [2, 8, 8, 64], strides = [1, 1, 1, 1]} : vector<2x10x10x64xbf16> to vector<2x8x8x64xbf16>
    %21 = vector.shape_cast %20 : vector<2x8x8x64xbf16> to vector<128x64xbf16>
    %22 = vector.extract_strided_slice %19 {offsets = [0, 0, 1, 0], sizes = [2, 8, 8, 64], strides = [1, 1, 1, 1]} : vector<2x10x10x64xbf16> to vector<2x8x8x64xbf16>
    %23 = vector.shape_cast %22 : vector<2x8x8x64xbf16> to vector<128x64xbf16>
    %24 = vector.extract_strided_slice %19 {offsets = [0, 0, 2, 0], sizes = [2, 8, 8, 64], strides = [1, 1, 1, 1]} : vector<2x10x10x64xbf16> to vector<2x8x8x64xbf16>
    %25 = vector.shape_cast %24 : vector<2x8x8x64xbf16> to vector<128x64xbf16>
    %26 = vector.extract_strided_slice %19 {offsets = [0, 1, 0, 0], sizes = [2, 8, 8, 64], strides = [1, 1, 1, 1]} : vector<2x10x10x64xbf16> to vector<2x8x8x64xbf16>
    %27 = vector.shape_cast %26 : vector<2x8x8x64xbf16> to vector<128x64xbf16>
    %28 = vector.extract_strided_slice %19 {offsets = [0, 1, 1, 0], sizes = [2, 8, 8, 64], strides = [1, 1, 1, 1]} : vector<2x10x10x64xbf16> to vector<2x8x8x64xbf16>
    %29 = vector.shape_cast %28 : vector<2x8x8x64xbf16> to vector<128x64xbf16>
    %30 = vector.extract_strided_slice %19 {offsets = [0, 1, 2, 0], sizes = [2, 8, 8, 64], strides = [1, 1, 1, 1]} : vector<2x10x10x64xbf16> to vector<2x8x8x64xbf16>
    %31 = vector.shape_cast %30 : vector<2x8x8x64xbf16> to vector<128x64xbf16>
    %32 = vector.extract_strided_slice %19 {offsets = [0, 2, 0, 0], sizes = [2, 8, 8, 64], strides = [1, 1, 1, 1]} : vector<2x10x10x64xbf16> to vector<2x8x8x64xbf16>
    %33 = vector.shape_cast %32 : vector<2x8x8x64xbf16> to vector<128x64xbf16>
    %34 = vector.extract_strided_slice %19 {offsets = [0, 2, 1, 0], sizes = [2, 8, 8, 64], strides = [1, 1, 1, 1]} : vector<2x10x10x64xbf16> to vector<2x8x8x64xbf16>
    %35 = vector.shape_cast %34 : vector<2x8x8x64xbf16> to vector<128x64xbf16>
    %36 = vector.extract_strided_slice %19 {offsets = [0, 2, 2, 0], sizes = [2, 8, 8, 64], strides = [1, 1, 1, 1]} : vector<2x10x10x64xbf16> to vector<2x8x8x64xbf16>
    %37 = vector.shape_cast %36 : vector<2x8x8x64xbf16> to vector<128x64xbf16>
    %38 = tpu.concatenate %21, %23, %25, %27, %29, %31, %33, %35, %37 in 1 : vector<128x64xbf16>, vector<128x64xbf16>, vector<128x64xbf16>, vector<128x64xbf16>, vector<128x64xbf16>, vector<128x64xbf16>, vector<128x64xbf16>, vector<128x64xbf16>, vector<128x64xbf16> -> vector<128x576xbf16>
    %c0_11 = arith.constant 0 : index
    %c0_12 = arith.constant 0 : index
    %39 = vector.load %arg2[%c0_11, %c0_12] : memref<576x64xbf16, #tpu.memory_space<vmem>>, vector<576x64xbf16>
    %cst_13 = arith.constant dense<0.000000e+00> : vector<128x64xf32>
    %40 = tpu.matmul %38, %39, %cst_13 {dimension_numbers = #tpu.dot_dimension_numbers<[1], [0], [0], [1], [0, 0, 1, 1], [], []>} : vector<128x576xbf16>, vector<576x64xbf16>, vector<128x64xf32> -> vector<128x64xf32>
    %c0_14 = arith.constant 0 : index
    %c0_15 = arith.constant 0 : index
    %41 = vector.load %arg3[%c0_14, %c0_15] : memref<1x64xf32, #tpu.memory_space<vmem>>, vector<1x64xf32>
    %42 = vector.broadcast %41 : vector<1x64xf32> to vector<128x64xf32>
    %43 = arith.mulf %40, %42 : vector<128x64xf32>
    %c0_16 = arith.constant 0 : index
    %c0_17 = arith.constant 0 : index
    %44 = vector.load %arg4[%c0_16, %c0_17] : memref<1x64xf32, #tpu.memory_space<vmem>>, vector<1x64xf32>
    %45 = vector.broadcast %44 : vector<1x64xf32> to vector<128x64xf32>
    %46 = arith.addf %43, %45 : vector<128x64xf32>
    %cst_18 = arith.constant 0.000000e+00 : f32
    %47 = vector.broadcast %cst_18 : f32 to vector<128x64xf32>
    %48 = arith.maximumf %46, %47 : vector<128x64xf32>
    %49 = vector.shape_cast %13 : vector<128x64xf32> to vector<2x8x8x64xf32>
    %50 = arith.truncf %49 : vector<2x8x8x64xf32> to vector<2x8x8x64xbf16>
    %cst_19 = arith.constant 0.000000e+00 : bf16
    %51 = vector.broadcast %cst_19 : bf16 to vector<2x1x8x64xbf16>
    %52 = tpu.concatenate %51, %50, %51 in 1 : vector<2x1x8x64xbf16>, vector<2x8x8x64xbf16>, vector<2x1x8x64xbf16> -> vector<2x10x8x64xbf16>
    %cst_20 = arith.constant 0.000000e+00 : bf16
    %53 = vector.broadcast %cst_20 : bf16 to vector<2x10x1x64xbf16>
    %54 = tpu.concatenate %53, %52, %53 in 2 : vector<2x10x1x64xbf16>, vector<2x10x8x64xbf16>, vector<2x10x1x64xbf16> -> vector<2x10x10x64xbf16>
    %55 = vector.extract_strided_slice %54 {offsets = [0, 0, 0, 0], sizes = [2, 8, 8, 64], strides = [1, 1, 1, 1]} : vector<2x10x10x64xbf16> to vector<2x8x8x64xbf16>
    %56 = vector.shape_cast %55 : vector<2x8x8x64xbf16> to vector<128x64xbf16>
    %57 = vector.extract_strided_slice %54 {offsets = [0, 0, 1, 0], sizes = [2, 8, 8, 64], strides = [1, 1, 1, 1]} : vector<2x10x10x64xbf16> to vector<2x8x8x64xbf16>
    %58 = vector.shape_cast %57 : vector<2x8x8x64xbf16> to vector<128x64xbf16>
    %59 = vector.extract_strided_slice %54 {offsets = [0, 0, 2, 0], sizes = [2, 8, 8, 64], strides = [1, 1, 1, 1]} : vector<2x10x10x64xbf16> to vector<2x8x8x64xbf16>
    %60 = vector.shape_cast %59 : vector<2x8x8x64xbf16> to vector<128x64xbf16>
    %61 = vector.extract_strided_slice %54 {offsets = [0, 1, 0, 0], sizes = [2, 8, 8, 64], strides = [1, 1, 1, 1]} : vector<2x10x10x64xbf16> to vector<2x8x8x64xbf16>
    %62 = vector.shape_cast %61 : vector<2x8x8x64xbf16> to vector<128x64xbf16>
    %63 = vector.extract_strided_slice %54 {offsets = [0, 1, 1, 0], sizes = [2, 8, 8, 64], strides = [1, 1, 1, 1]} : vector<2x10x10x64xbf16> to vector<2x8x8x64xbf16>
    %64 = vector.shape_cast %63 : vector<2x8x8x64xbf16> to vector<128x64xbf16>
    %65 = vector.extract_strided_slice %54 {offsets = [0, 1, 2, 0], sizes = [2, 8, 8, 64], strides = [1, 1, 1, 1]} : vector<2x10x10x64xbf16> to vector<2x8x8x64xbf16>
    %66 = vector.shape_cast %65 : vector<2x8x8x64xbf16> to vector<128x64xbf16>
    %67 = vector.extract_strided_slice %54 {offsets = [0, 2, 0, 0], sizes = [2, 8, 8, 64], strides = [1, 1, 1, 1]} : vector<2x10x10x64xbf16> to vector<2x8x8x64xbf16>
    %68 = vector.shape_cast %67 : vector<2x8x8x64xbf16> to vector<128x64xbf16>
    %69 = vector.extract_strided_slice %54 {offsets = [0, 2, 1, 0], sizes = [2, 8, 8, 64], strides = [1, 1, 1, 1]} : vector<2x10x10x64xbf16> to vector<2x8x8x64xbf16>
    %70 = vector.shape_cast %69 : vector<2x8x8x64xbf16> to vector<128x64xbf16>
    %71 = vector.extract_strided_slice %54 {offsets = [0, 2, 2, 0], sizes = [2, 8, 8, 64], strides = [1, 1, 1, 1]} : vector<2x10x10x64xbf16> to vector<2x8x8x64xbf16>
    %72 = vector.shape_cast %71 : vector<2x8x8x64xbf16> to vector<128x64xbf16>
    %73 = tpu.concatenate %56, %58, %60, %62, %64, %66, %68, %70, %72 in 1 : vector<128x64xbf16>, vector<128x64xbf16>, vector<128x64xbf16>, vector<128x64xbf16>, vector<128x64xbf16>, vector<128x64xbf16>, vector<128x64xbf16>, vector<128x64xbf16>, vector<128x64xbf16> -> vector<128x576xbf16>
    %c0_21 = arith.constant 0 : index
    %c0_22 = arith.constant 0 : index
    %74 = vector.load %arg5[%c0_21, %c0_22] : memref<576x64xbf16, #tpu.memory_space<vmem>>, vector<576x64xbf16>
    %cst_23 = arith.constant dense<0.000000e+00> : vector<128x64xf32>
    %75 = tpu.matmul %73, %74, %cst_23 {dimension_numbers = #tpu.dot_dimension_numbers<[1], [0], [0], [1], [0, 0, 1, 1], [], []>} : vector<128x576xbf16>, vector<576x64xbf16>, vector<128x64xf32> -> vector<128x64xf32>
    %c0_24 = arith.constant 0 : index
    %c0_25 = arith.constant 0 : index
    %76 = vector.load %arg6[%c0_24, %c0_25] : memref<1x64xf32, #tpu.memory_space<vmem>>, vector<1x64xf32>
    %77 = vector.broadcast %76 : vector<1x64xf32> to vector<128x64xf32>
    %78 = arith.mulf %75, %77 : vector<128x64xf32>
    %c0_26 = arith.constant 0 : index
    %c0_27 = arith.constant 0 : index
    %79 = vector.load %arg7[%c0_26, %c0_27] : memref<1x64xf32, #tpu.memory_space<vmem>>, vector<1x64xf32>
    %80 = vector.broadcast %79 : vector<1x64xf32> to vector<128x64xf32>
    %81 = arith.addf %78, %80 : vector<128x64xf32>
    %cst_28 = arith.constant 0.000000e+00 : f32
    %82 = vector.broadcast %cst_28 : f32 to vector<128x64xf32>
    %83 = arith.maximumf %81, %82 : vector<128x64xf32>
    %84 = arith.truncf %48 : vector<128x64xf32> to vector<128x64xbf16>
    %85 = arith.truncf %83 : vector<128x64xf32> to vector<128x64xbf16>
    %c0_29 = arith.constant 0 : index
    %c0_30 = arith.constant 0 : index
    %86 = vector.load %arg8[%c0_29, %c0_30] : memref<64x64xbf16, #tpu.memory_space<vmem>>, vector<64x64xbf16>
    %cst_31 = arith.constant dense<0.000000e+00> : vector<128x64xf32>
    %87 = tpu.matmul %85, %86, %cst_31 {dimension_numbers = #tpu.dot_dimension_numbers<[1], [0], [0], [1], [0, 0, 1, 1], [], []>} : vector<128x64xbf16>, vector<64x64xbf16>, vector<128x64xf32> -> vector<128x64xf32>
    %c0_32 = arith.constant 0 : index
    %c0_33 = arith.constant 0 : index
    %88 = vector.load %arg9[%c0_32, %c0_33] : memref<1x64xf32, #tpu.memory_space<vmem>>, vector<1x64xf32>
    %89 = vector.broadcast %88 : vector<1x64xf32> to vector<128x64xf32>
    %90 = arith.addf %87, %89 : vector<128x64xf32>
    %c0_34 = arith.constant 0 : index
    %c0_35 = arith.constant 0 : index
    %91 = vector.load %arg10[%c0_34, %c0_35] : memref<64x64xbf16, #tpu.memory_space<vmem>>, vector<64x64xbf16>
    %cst_36 = arith.constant dense<0.000000e+00> : vector<128x64xf32>
    %92 = tpu.matmul %84, %91, %cst_36 {dimension_numbers = #tpu.dot_dimension_numbers<[1], [0], [0], [1], [0, 0, 1, 1], [], []>} : vector<128x64xbf16>, vector<64x64xbf16>, vector<128x64xf32> -> vector<128x64xf32>
    %c0_37 = arith.constant 0 : index
    %c0_38 = arith.constant 0 : index
    %93 = vector.load %arg11[%c0_37, %c0_38] : memref<1x64xf32, #tpu.memory_space<vmem>>, vector<1x64xf32>
    %94 = vector.broadcast %93 : vector<1x64xf32> to vector<128x64xf32>
    %95 = arith.addf %92, %94 : vector<128x64xf32>
    %c0_39 = arith.constant 0 : index
    %c0_40 = arith.constant 0 : index
    %96 = vector.load %arg12[%c0_39, %c0_40] : memref<64x64xbf16, #tpu.memory_space<vmem>>, vector<64x64xbf16>
    %cst_41 = arith.constant dense<0.000000e+00> : vector<128x64xf32>
    %97 = tpu.matmul %84, %96, %cst_41 {dimension_numbers = #tpu.dot_dimension_numbers<[1], [0], [0], [1], [0, 0, 1, 1], [], []>} : vector<128x64xbf16>, vector<64x64xbf16>, vector<128x64xf32> -> vector<128x64xf32>
    %c0_42 = arith.constant 0 : index
    %c0_43 = arith.constant 0 : index
    %98 = vector.load %arg13[%c0_42, %c0_43] : memref<1x64xf32, #tpu.memory_space<vmem>>, vector<1x64xf32>
    %99 = vector.broadcast %98 : vector<1x64xf32> to vector<128x64xf32>
    %100 = arith.addf %97, %99 : vector<128x64xf32>
    %101 = vector.shape_cast %95 : vector<128x64xf32> to vector<2x64x64xf32>
    %102 = vector.shape_cast %90 : vector<128x64xf32> to vector<2x64x64xf32>
    %103 = arith.truncf %102 : vector<2x64x64xf32> to vector<2x64x64xbf16>
    %104 = vector.shape_cast %100 : vector<128x64xf32> to vector<2x64x64xf32>
    %105 = arith.truncf %104 : vector<2x64x64xf32> to vector<2x64x64xbf16>
    %c0_44 = arith.constant 0 : index
    %c0_45 = arith.constant 0 : index
    %106 = vector.load %arg16[%c0_44, %c0_45] : memref<8x64xf32, #tpu.memory_space<vmem>>, vector<8x64xf32>
    %107 = vector.extract_strided_slice %106 {offsets = [0, 0], sizes = [1, 64], strides = [1, 1]} : vector<8x64xf32> to vector<1x64xf32>
    %108 = vector.shape_cast %107 : vector<1x64xf32> to vector<1x1x64xf32>
    %109 = vector.broadcast %108 : vector<1x1x64xf32> to vector<2x64x64xf32>
    %110 = arith.mulf %101, %109 : vector<2x64x64xf32>
    %111 = vector.extract_strided_slice %106 {offsets = [1, 0], sizes = [1, 64], strides = [1, 1]} : vector<8x64xf32> to vector<1x64xf32>
    %112 = vector.shape_cast %111 : vector<1x64xf32> to vector<1x1x64xf32>
    %113 = vector.broadcast %112 : vector<1x1x64xf32> to vector<2x64x64xf32>
    %114 = arith.mulf %101, %113 : vector<2x64x64xf32>
    %115 = vector.extract_strided_slice %106 {offsets = [2, 0], sizes = [1, 64], strides = [1, 1]} : vector<8x64xf32> to vector<1x64xf32>
    %116 = vector.shape_cast %115 : vector<1x64xf32> to vector<1x1x64xf32>
    %117 = vector.broadcast %116 : vector<1x1x64xf32> to vector<2x64x64xf32>
    %118 = arith.mulf %101, %117 : vector<2x64x64xf32>
    %119 = vector.extract_strided_slice %106 {offsets = [3, 0], sizes = [1, 64], strides = [1, 1]} : vector<8x64xf32> to vector<1x64xf32>
    %120 = vector.shape_cast %119 : vector<1x64xf32> to vector<1x1x64xf32>
    %121 = vector.broadcast %120 : vector<1x1x64xf32> to vector<2x64x64xf32>
    %122 = arith.mulf %101, %121 : vector<2x64x64xf32>
    %123 = vector.extract_strided_slice %106 {offsets = [4, 0], sizes = [1, 64], strides = [1, 1]} : vector<8x64xf32> to vector<1x64xf32>
    %124 = vector.shape_cast %123 : vector<1x64xf32> to vector<1x1x64xf32>
    %125 = vector.broadcast %124 : vector<1x1x64xf32> to vector<2x64x64xf32>
    %126 = arith.mulf %101, %125 : vector<2x64x64xf32>
    %127 = vector.extract_strided_slice %106 {offsets = [5, 0], sizes = [1, 64], strides = [1, 1]} : vector<8x64xf32> to vector<1x64xf32>
    %128 = vector.shape_cast %127 : vector<1x64xf32> to vector<1x1x64xf32>
    %129 = vector.broadcast %128 : vector<1x1x64xf32> to vector<2x64x64xf32>
    %130 = arith.mulf %101, %129 : vector<2x64x64xf32>
    %131 = vector.extract_strided_slice %106 {offsets = [6, 0], sizes = [1, 64], strides = [1, 1]} : vector<8x64xf32> to vector<1x64xf32>
    %132 = vector.shape_cast %131 : vector<1x64xf32> to vector<1x1x64xf32>
    %133 = vector.broadcast %132 : vector<1x1x64xf32> to vector<2x64x64xf32>
    %134 = arith.mulf %101, %133 : vector<2x64x64xf32>
    %135 = vector.extract_strided_slice %106 {offsets = [7, 0], sizes = [1, 64], strides = [1, 1]} : vector<8x64xf32> to vector<1x64xf32>
    %136 = vector.shape_cast %135 : vector<1x64xf32> to vector<1x1x64xf32>
    %137 = vector.broadcast %136 : vector<1x1x64xf32> to vector<2x64x64xf32>
    %138 = arith.mulf %101, %137 : vector<2x64x64xf32>
    %139 = tpu.concatenate %110, %114, %118, %122, %126, %130, %134, %138 in 1 : vector<2x64x64xf32>, vector<2x64x64xf32>, vector<2x64x64xf32>, vector<2x64x64xf32>, vector<2x64x64xf32>, vector<2x64x64xf32>, vector<2x64x64xf32>, vector<2x64x64xf32> -> vector<2x512x64xf32>
    %140 = arith.truncf %139 : vector<2x512x64xf32> to vector<2x512x64xbf16>
    "tpu.trace_start"() <{level = 10 : i32, message = "bic,bmc->bim"}> : () -> ()
    %cst_46 = arith.constant dense<0.000000e+00> : vector<2x512x64xf32>
    %141 = tpu.matmul %140, %103, %cst_46 {dimension_numbers = #tpu.dot_dimension_numbers<[2], [2], [1], [1], [0, 0, 0, 1, 1, 1], [0], [0]>} : vector<2x512x64xbf16>, vector<2x64x64xbf16>, vector<2x512x64xf32> -> vector<2x512x64xf32>
    "tpu.trace_stop"() : () -> ()
    %cst_47 = arith.constant dense<0xFF800000> : vector<2x512xf32>
    %142 = vector.multi_reduction <maximumf>, %141, %cst_47 [2] : vector<2x512x64xf32> to vector<2x512xf32>
    %143 = vector.shape_cast %142 : vector<2x512xf32> to vector<2x512x1xf32>
    %144 = vector.broadcast %143 : vector<2x512x1xf32> to vector<2x512x64xf32>
    %145 = arith.subf %141, %144 : vector<2x512x64xf32>
    %146 = math.exp %145 : vector<2x512x64xf32>
    %cst_48 = arith.constant dense<0.000000e+00> : vector<2x512xf32>
    %147 = vector.multi_reduction <add>, %146, %cst_48 [2] : vector<2x512x64xf32> to vector<2x512xf32>
    %148 = vector.shape_cast %147 : vector<2x512xf32> to vector<2x512x1xf32>
    %149 = tpu.reciprocal %148 {approx = true} : vector<2x512x1xf32> -> vector<2x512x1xf32>
    %150 = vector.broadcast %149 : vector<2x512x1xf32> to vector<2x512x64xf32>
    %151 = arith.mulf %146, %150 : vector<2x512x64xf32>
    %152 = arith.truncf %151 : vector<2x512x64xf32> to vector<2x512x64xbf16>
    "tpu.trace_start"() <{level = 10 : i32, message = "bim,bmc->bic"}> : () -> ()
    %cst_49 = arith.constant dense<0.000000e+00> : vector<2x512x64xf32>
    %153 = tpu.matmul %152, %105, %cst_49 {dimension_numbers = #tpu.dot_dimension_numbers<[2], [1], [1], [2], [0, 0, 0, 1, 1, 2], [0], [0]>} : vector<2x512x64xbf16>, vector<2x64x64xbf16>, vector<2x512x64xf32> -> vector<2x512x64xf32>
    "tpu.trace_stop"() : () -> ()
    %154 = vector.extract_strided_slice %153 {offsets = [0, 0, 0], sizes = [2, 64, 64], strides = [1, 1, 1]} : vector<2x512x64xf32> to vector<2x64x64xf32>
    %155 = vector.extract_strided_slice %106 {offsets = [0, 0], sizes = [1, 64], strides = [1, 1]} : vector<8x64xf32> to vector<1x64xf32>
    %156 = vector.shape_cast %155 : vector<1x64xf32> to vector<1x1x64xf32>
    %157 = vector.broadcast %156 : vector<1x1x64xf32> to vector<2x64x64xf32>
    %158 = arith.mulf %154, %157 : vector<2x64x64xf32>
    %159 = vector.extract_strided_slice %153 {offsets = [0, 64, 0], sizes = [2, 64, 64], strides = [1, 1, 1]} : vector<2x512x64xf32> to vector<2x64x64xf32>
    %160 = vector.extract_strided_slice %106 {offsets = [1, 0], sizes = [1, 64], strides = [1, 1]} : vector<8x64xf32> to vector<1x64xf32>
    %161 = vector.shape_cast %160 : vector<1x64xf32> to vector<1x1x64xf32>
    %162 = vector.broadcast %161 : vector<1x1x64xf32> to vector<2x64x64xf32>
    %163 = arith.mulf %159, %162 : vector<2x64x64xf32>
    %164 = arith.addf %158, %163 : vector<2x64x64xf32>
    %165 = vector.extract_strided_slice %153 {offsets = [0, 128, 0], sizes = [2, 64, 64], strides = [1, 1, 1]} : vector<2x512x64xf32> to vector<2x64x64xf32>
    %166 = vector.extract_strided_slice %106 {offsets = [2, 0], sizes = [1, 64], strides = [1, 1]} : vector<8x64xf32> to vector<1x64xf32>
    %167 = vector.shape_cast %166 : vector<1x64xf32> to vector<1x1x64xf32>
    %168 = vector.broadcast %167 : vector<1x1x64xf32> to vector<2x64x64xf32>
    %169 = arith.mulf %165, %168 : vector<2x64x64xf32>
    %170 = arith.addf %164, %169 : vector<2x64x64xf32>
    %171 = vector.extract_strided_slice %153 {offsets = [0, 192, 0], sizes = [2, 64, 64], strides = [1, 1, 1]} : vector<2x512x64xf32> to vector<2x64x64xf32>
    %172 = vector.extract_strided_slice %106 {offsets = [3, 0], sizes = [1, 64], strides = [1, 1]} : vector<8x64xf32> to vector<1x64xf32>
    %173 = vector.shape_cast %172 : vector<1x64xf32> to vector<1x1x64xf32>
    %174 = vector.broadcast %173 : vector<1x1x64xf32> to vector<2x64x64xf32>
    %175 = arith.mulf %171, %174 : vector<2x64x64xf32>
    %176 = arith.addf %170, %175 : vector<2x64x64xf32>
    %177 = vector.extract_strided_slice %153 {offsets = [0, 256, 0], sizes = [2, 64, 64], strides = [1, 1, 1]} : vector<2x512x64xf32> to vector<2x64x64xf32>
    %178 = vector.extract_strided_slice %106 {offsets = [4, 0], sizes = [1, 64], strides = [1, 1]} : vector<8x64xf32> to vector<1x64xf32>
    %179 = vector.shape_cast %178 : vector<1x64xf32> to vector<1x1x64xf32>
    %180 = vector.broadcast %179 : vector<1x1x64xf32> to vector<2x64x64xf32>
    %181 = arith.mulf %177, %180 : vector<2x64x64xf32>
    %182 = arith.addf %176, %181 : vector<2x64x64xf32>
    %183 = vector.extract_strided_slice %153 {offsets = [0, 320, 0], sizes = [2, 64, 64], strides = [1, 1, 1]} : vector<2x512x64xf32> to vector<2x64x64xf32>
    %184 = vector.extract_strided_slice %106 {offsets = [5, 0], sizes = [1, 64], strides = [1, 1]} : vector<8x64xf32> to vector<1x64xf32>
    %185 = vector.shape_cast %184 : vector<1x64xf32> to vector<1x1x64xf32>
    %186 = vector.broadcast %185 : vector<1x1x64xf32> to vector<2x64x64xf32>
    %187 = arith.mulf %183, %186 : vector<2x64x64xf32>
    %188 = arith.addf %182, %187 : vector<2x64x64xf32>
    %189 = vector.extract_strided_slice %153 {offsets = [0, 384, 0], sizes = [2, 64, 64], strides = [1, 1, 1]} : vector<2x512x64xf32> to vector<2x64x64xf32>
    %190 = vector.extract_strided_slice %106 {offsets = [6, 0], sizes = [1, 64], strides = [1, 1]} : vector<8x64xf32> to vector<1x64xf32>
    %191 = vector.shape_cast %190 : vector<1x64xf32> to vector<1x1x64xf32>
    %192 = vector.broadcast %191 : vector<1x1x64xf32> to vector<2x64x64xf32>
    %193 = arith.mulf %189, %192 : vector<2x64x64xf32>
    %194 = arith.addf %188, %193 : vector<2x64x64xf32>
    %195 = vector.extract_strided_slice %153 {offsets = [0, 448, 0], sizes = [2, 64, 64], strides = [1, 1, 1]} : vector<2x512x64xf32> to vector<2x64x64xf32>
    %196 = vector.extract_strided_slice %106 {offsets = [7, 0], sizes = [1, 64], strides = [1, 1]} : vector<8x64xf32> to vector<1x64xf32>
    %197 = vector.shape_cast %196 : vector<1x64xf32> to vector<1x1x64xf32>
    %198 = vector.broadcast %197 : vector<1x1x64xf32> to vector<2x64x64xf32>
    %199 = arith.mulf %195, %198 : vector<2x64x64xf32>
    %200 = arith.addf %194, %199 : vector<2x64x64xf32>
    %201 = vector.shape_cast %200 : vector<2x64x64xf32> to vector<128x64xf32>
    %202 = arith.truncf %201 : vector<128x64xf32> to vector<128x64xbf16>
    %c0_50 = arith.constant 0 : index
    %c0_51 = arith.constant 0 : index
    %203 = vector.load %arg14[%c0_50, %c0_51] : memref<64x64xbf16, #tpu.memory_space<vmem>>, vector<64x64xbf16>
    %cst_52 = arith.constant dense<0.000000e+00> : vector<128x64xf32>
    %204 = tpu.matmul %202, %203, %cst_52 {dimension_numbers = #tpu.dot_dimension_numbers<[1], [0], [0], [1], [0, 0, 1, 1], [], []>} : vector<128x64xbf16>, vector<64x64xbf16>, vector<128x64xf32> -> vector<128x64xf32>
    %c0_53 = arith.constant 0 : index
    %c0_54 = arith.constant 0 : index
    %205 = vector.load %arg15[%c0_53, %c0_54] : memref<1x64xf32, #tpu.memory_space<vmem>>, vector<1x64xf32>
    %206 = vector.broadcast %205 : vector<1x64xf32> to vector<128x64xf32>
    %207 = arith.addf %204, %206 : vector<128x64xf32>
    %208 = arith.addf %207, %48 : vector<128x64xf32>
    %209 = vector.shape_cast %208 : vector<128x64xf32> to vector<2x8x8x64xf32>
    %210 = arith.truncf %209 : vector<2x8x8x64xf32> to vector<2x8x8x64xbf16>
    %cst_55 = arith.constant 0.000000e+00 : bf16
    %211 = vector.broadcast %cst_55 : bf16 to vector<2x1x8x64xbf16>
    %212 = tpu.concatenate %211, %210, %211 in 1 : vector<2x1x8x64xbf16>, vector<2x8x8x64xbf16>, vector<2x1x8x64xbf16> -> vector<2x10x8x64xbf16>
    %cst_56 = arith.constant 0.000000e+00 : bf16
    %213 = vector.broadcast %cst_56 : bf16 to vector<2x10x1x64xbf16>
    %214 = tpu.concatenate %213, %212, %213 in 2 : vector<2x10x1x64xbf16>, vector<2x10x8x64xbf16>, vector<2x10x1x64xbf16> -> vector<2x10x10x64xbf16>
    %215 = vector.extract_strided_slice %214 {offsets = [0, 0, 0, 0], sizes = [2, 8, 8, 64], strides = [1, 1, 1, 1]} : vector<2x10x10x64xbf16> to vector<2x8x8x64xbf16>
    %216 = vector.shape_cast %215 : vector<2x8x8x64xbf16> to vector<128x64xbf16>
    %217 = vector.extract_strided_slice %214 {offsets = [0, 0, 1, 0], sizes = [2, 8, 8, 64], strides = [1, 1, 1, 1]} : vector<2x10x10x64xbf16> to vector<2x8x8x64xbf16>
    %218 = vector.shape_cast %217 : vector<2x8x8x64xbf16> to vector<128x64xbf16>
    %219 = vector.extract_strided_slice %214 {offsets = [0, 0, 2, 0], sizes = [2, 8, 8, 64], strides = [1, 1, 1, 1]} : vector<2x10x10x64xbf16> to vector<2x8x8x64xbf16>
    %220 = vector.shape_cast %219 : vector<2x8x8x64xbf16> to vector<128x64xbf16>
    %221 = vector.extract_strided_slice %214 {offsets = [0, 1, 0, 0], sizes = [2, 8, 8, 64], strides = [1, 1, 1, 1]} : vector<2x10x10x64xbf16> to vector<2x8x8x64xbf16>
    %222 = vector.shape_cast %221 : vector<2x8x8x64xbf16> to vector<128x64xbf16>
    %223 = vector.extract_strided_slice %214 {offsets = [0, 1, 1, 0], sizes = [2, 8, 8, 64], strides = [1, 1, 1, 1]} : vector<2x10x10x64xbf16> to vector<2x8x8x64xbf16>
    %224 = vector.shape_cast %223 : vector<2x8x8x64xbf16> to vector<128x64xbf16>
    %225 = vector.extract_strided_slice %214 {offsets = [0, 1, 2, 0], sizes = [2, 8, 8, 64], strides = [1, 1, 1, 1]} : vector<2x10x10x64xbf16> to vector<2x8x8x64xbf16>
    %226 = vector.shape_cast %225 : vector<2x8x8x64xbf16> to vector<128x64xbf16>
    %227 = vector.extract_strided_slice %214 {offsets = [0, 2, 0, 0], sizes = [2, 8, 8, 64], strides = [1, 1, 1, 1]} : vector<2x10x10x64xbf16> to vector<2x8x8x64xbf16>
    %228 = vector.shape_cast %227 : vector<2x8x8x64xbf16> to vector<128x64xbf16>
    %229 = vector.extract_strided_slice %214 {offsets = [0, 2, 1, 0], sizes = [2, 8, 8, 64], strides = [1, 1, 1, 1]} : vector<2x10x10x64xbf16> to vector<2x8x8x64xbf16>
    %230 = vector.shape_cast %229 : vector<2x8x8x64xbf16> to vector<128x64xbf16>
    %231 = vector.extract_strided_slice %214 {offsets = [0, 2, 2, 0], sizes = [2, 8, 8, 64], strides = [1, 1, 1, 1]} : vector<2x10x10x64xbf16> to vector<2x8x8x64xbf16>
    %232 = vector.shape_cast %231 : vector<2x8x8x64xbf16> to vector<128x64xbf16>
    %233 = tpu.concatenate %216, %218, %220, %222, %224, %226, %228, %230, %232 in 1 : vector<128x64xbf16>, vector<128x64xbf16>, vector<128x64xbf16>, vector<128x64xbf16>, vector<128x64xbf16>, vector<128x64xbf16>, vector<128x64xbf16>, vector<128x64xbf16>, vector<128x64xbf16> -> vector<128x576xbf16>
    %c0_57 = arith.constant 0 : index
    %c0_58 = arith.constant 0 : index
    %234 = vector.load %arg17[%c0_57, %c0_58] : memref<576x64xbf16, #tpu.memory_space<vmem>>, vector<576x64xbf16>
    %cst_59 = arith.constant dense<0.000000e+00> : vector<128x64xf32>
    %235 = tpu.matmul %233, %234, %cst_59 {dimension_numbers = #tpu.dot_dimension_numbers<[1], [0], [0], [1], [0, 0, 1, 1], [], []>} : vector<128x576xbf16>, vector<576x64xbf16>, vector<128x64xf32> -> vector<128x64xf32>
    %c0_60 = arith.constant 0 : index
    %c0_61 = arith.constant 0 : index
    %236 = vector.load %arg18[%c0_60, %c0_61] : memref<1x64xf32, #tpu.memory_space<vmem>>, vector<1x64xf32>
    %237 = vector.broadcast %236 : vector<1x64xf32> to vector<128x64xf32>
    %238 = arith.mulf %235, %237 : vector<128x64xf32>
    %c0_62 = arith.constant 0 : index
    %c0_63 = arith.constant 0 : index
    %239 = vector.load %arg19[%c0_62, %c0_63] : memref<1x64xf32, #tpu.memory_space<vmem>>, vector<1x64xf32>
    %240 = vector.broadcast %239 : vector<1x64xf32> to vector<128x64xf32>
    %241 = arith.addf %238, %240 : vector<128x64xf32>
    %cst_64 = arith.constant 0.000000e+00 : f32
    %242 = vector.broadcast %cst_64 : f32 to vector<128x64xf32>
    %243 = arith.maximumf %241, %242 : vector<128x64xf32>
    %244 = vector.shape_cast %243 : vector<128x64xf32> to vector<2x8x8x64xf32>
    %245 = arith.truncf %244 : vector<2x8x8x64xf32> to vector<2x8x8x64xbf16>
    %cst_65 = arith.constant 0.000000e+00 : bf16
    %246 = vector.broadcast %cst_65 : bf16 to vector<2x1x8x64xbf16>
    %247 = tpu.concatenate %246, %245, %246 in 1 : vector<2x1x8x64xbf16>, vector<2x8x8x64xbf16>, vector<2x1x8x64xbf16> -> vector<2x10x8x64xbf16>
    %cst_66 = arith.constant 0.000000e+00 : bf16
    %248 = vector.broadcast %cst_66 : bf16 to vector<2x10x1x64xbf16>
    %249 = tpu.concatenate %248, %247, %248 in 2 : vector<2x10x1x64xbf16>, vector<2x10x8x64xbf16>, vector<2x10x1x64xbf16> -> vector<2x10x10x64xbf16>
    %250 = vector.extract_strided_slice %249 {offsets = [0, 0, 0, 0], sizes = [2, 8, 8, 64], strides = [1, 1, 1, 1]} : vector<2x10x10x64xbf16> to vector<2x8x8x64xbf16>
    %251 = vector.shape_cast %250 : vector<2x8x8x64xbf16> to vector<128x64xbf16>
    %252 = vector.extract_strided_slice %249 {offsets = [0, 0, 1, 0], sizes = [2, 8, 8, 64], strides = [1, 1, 1, 1]} : vector<2x10x10x64xbf16> to vector<2x8x8x64xbf16>
    %253 = vector.shape_cast %252 : vector<2x8x8x64xbf16> to vector<128x64xbf16>
    %254 = vector.extract_strided_slice %249 {offsets = [0, 0, 2, 0], sizes = [2, 8, 8, 64], strides = [1, 1, 1, 1]} : vector<2x10x10x64xbf16> to vector<2x8x8x64xbf16>
    %255 = vector.shape_cast %254 : vector<2x8x8x64xbf16> to vector<128x64xbf16>
    %256 = vector.extract_strided_slice %249 {offsets = [0, 1, 0, 0], sizes = [2, 8, 8, 64], strides = [1, 1, 1, 1]} : vector<2x10x10x64xbf16> to vector<2x8x8x64xbf16>
    %257 = vector.shape_cast %256 : vector<2x8x8x64xbf16> to vector<128x64xbf16>
    %258 = vector.extract_strided_slice %249 {offsets = [0, 1, 1, 0], sizes = [2, 8, 8, 64], strides = [1, 1, 1, 1]} : vector<2x10x10x64xbf16> to vector<2x8x8x64xbf16>
    %259 = vector.shape_cast %258 : vector<2x8x8x64xbf16> to vector<128x64xbf16>
    %260 = vector.extract_strided_slice %249 {offsets = [0, 1, 2, 0], sizes = [2, 8, 8, 64], strides = [1, 1, 1, 1]} : vector<2x10x10x64xbf16> to vector<2x8x8x64xbf16>
    %261 = vector.shape_cast %260 : vector<2x8x8x64xbf16> to vector<128x64xbf16>
    %262 = vector.extract_strided_slice %249 {offsets = [0, 2, 0, 0], sizes = [2, 8, 8, 64], strides = [1, 1, 1, 1]} : vector<2x10x10x64xbf16> to vector<2x8x8x64xbf16>
    %263 = vector.shape_cast %262 : vector<2x8x8x64xbf16> to vector<128x64xbf16>
    %264 = vector.extract_strided_slice %249 {offsets = [0, 2, 1, 0], sizes = [2, 8, 8, 64], strides = [1, 1, 1, 1]} : vector<2x10x10x64xbf16> to vector<2x8x8x64xbf16>
    %265 = vector.shape_cast %264 : vector<2x8x8x64xbf16> to vector<128x64xbf16>
    %266 = vector.extract_strided_slice %249 {offsets = [0, 2, 2, 0], sizes = [2, 8, 8, 64], strides = [1, 1, 1, 1]} : vector<2x10x10x64xbf16> to vector<2x8x8x64xbf16>
    %267 = vector.shape_cast %266 : vector<2x8x8x64xbf16> to vector<128x64xbf16>
    %268 = tpu.concatenate %251, %253, %255, %257, %259, %261, %263, %265, %267 in 1 : vector<128x64xbf16>, vector<128x64xbf16>, vector<128x64xbf16>, vector<128x64xbf16>, vector<128x64xbf16>, vector<128x64xbf16>, vector<128x64xbf16>, vector<128x64xbf16>, vector<128x64xbf16> -> vector<128x576xbf16>
    %c0_67 = arith.constant 0 : index
    %c0_68 = arith.constant 0 : index
    %269 = vector.load %arg20[%c0_67, %c0_68] : memref<576x64xbf16, #tpu.memory_space<vmem>>, vector<576x64xbf16>
    %cst_69 = arith.constant dense<0.000000e+00> : vector<128x64xf32>
    %270 = tpu.matmul %268, %269, %cst_69 {dimension_numbers = #tpu.dot_dimension_numbers<[1], [0], [0], [1], [0, 0, 1, 1], [], []>} : vector<128x576xbf16>, vector<576x64xbf16>, vector<128x64xf32> -> vector<128x64xf32>
    %c0_70 = arith.constant 0 : index
    %c0_71 = arith.constant 0 : index
    %271 = vector.load %arg21[%c0_70, %c0_71] : memref<1x64xf32, #tpu.memory_space<vmem>>, vector<1x64xf32>
    %272 = vector.broadcast %271 : vector<1x64xf32> to vector<128x64xf32>
    %273 = arith.mulf %270, %272 : vector<128x64xf32>
    %c0_72 = arith.constant 0 : index
    %c0_73 = arith.constant 0 : index
    %274 = vector.load %arg22[%c0_72, %c0_73] : memref<1x64xf32, #tpu.memory_space<vmem>>, vector<1x64xf32>
    %275 = vector.broadcast %274 : vector<1x64xf32> to vector<128x64xf32>
    %276 = arith.addf %273, %275 : vector<128x64xf32>
    %cst_74 = arith.constant 0.000000e+00 : f32
    %277 = vector.broadcast %cst_74 : f32 to vector<128x64xf32>
    %278 = arith.maximumf %276, %277 : vector<128x64xf32>
    %279 = arith.addf %278, %208 : vector<128x64xf32>
    %280 = vector.shape_cast %279 : vector<128x64xf32> to vector<2x64x64xf32>
    %281 = vector.extract_strided_slice %280 {offsets = [0, 0, 0], sizes = [1, 64, 64], strides = [1, 1, 1]} : vector<2x64x64xf32> to vector<1x64x64xf32>
    %282 = vector.shape_cast %281 : vector<1x64x64xf32> to vector<64x64xf32>
    %283 = tpu.transpose %282, [1, 0] : vector<64x64xf32> -> vector<64x64xf32>
    %c0_75 = arith.constant 0 : index
    %c0_76 = arith.constant 0 : index
    %c0_77 = arith.constant 0 : index
    %284 = vector.load %arg23[%c0_75, %c0_76, %c0_77] : memref<2x64x64xf32, #tpu.memory_space<vmem>>, vector<1x64x64xf32>
    %285 = vector.shape_cast %284 : vector<1x64x64xf32> to vector<64x64xf32>
    %286 = vector.shape_cast %283 : vector<64x64xf32> to vector<1x64x64xf32>
    tpu.vector_store %arg23[%c0_75, %c0_76, %c0_77], %286 {strides = array<i32>} : memref<2x64x64xf32, #tpu.memory_space<vmem>>, vector<1x64x64xf32>,
    %287 = vector.extract_strided_slice %280 {offsets = [1, 0, 0], sizes = [1, 64, 64], strides = [1, 1, 1]} : vector<2x64x64xf32> to vector<1x64x64xf32>
    %288 = vector.shape_cast %287 : vector<1x64x64xf32> to vector<64x64xf32>
    %289 = tpu.transpose %288, [1, 0] : vector<64x64xf32> -> vector<64x64xf32>
    %c1_78 = arith.constant 1 : index
    %c0_79 = arith.constant 0 : index
    %c0_80 = arith.constant 0 : index
    %290 = vector.load %arg23[%c1_78, %c0_79, %c0_80] : memref<2x64x64xf32, #tpu.memory_space<vmem>>, vector<1x64x64xf32>
    %291 = vector.shape_cast %290 : vector<1x64x64xf32> to vector<64x64xf32>
    %292 = vector.shape_cast %289 : vector<64x64xf32> to vector<1x64x64xf32>
    tpu.vector_store %arg23[%c1_78, %c0_79, %c0_80], %292 {strides = array<i32>} : memref<2x64x64xf32, #tpu.memory_space<vmem>>, vector<1x64x64xf32>,
    return
  }
}

</mosaic_0001>

<bundles_post_ra>
// kernel: trans_forward.1
= control target key start
LH: loop header
LB: loop body
LE: loop exit
PB: predicated region body
PF: predicated region fallthrough
CT: control target
= control target key end

     0   :  { %vm389_vm0 = vcmask 1040384   ;;  %vm390_vm1 = vsmask.f32 256  ;;  %v19636_v24 = vmov 0  ;;  %vm409_vm3 = vcmask 1044480   ;;  %s19284_s0 = inlined_call_operand.vmem [shape: f32[2,64,64], index: 0, kind: input, shape index: {}]   ;;  %s19285_s2 = inlined_call_operand.vmem [shape: bf16[576,64], index: 2, kind: input, shape index: {}]   ;;  %s19286_s1 = inlined_call_operand.vmem [shape: f32[2,64,64], index: 1, kind: input, shape index: {}]   ;;  %s19287_s3 = inlined_call_operand.vmem [shape: f32[1,64], index: 3, kind: input, shape index: {}]   ;;  %s19288_s4 = inlined_call_operand.vmem [shape: f32[1,64], index: 4, kind: input, shape index: {}]   ;;  %s19289_s5 = inlined_call_operand.vmem [shape: bf16[576,64], index: 5, kind: input, shape index: {}]   ;;  %s19290_s6 = inlined_call_operand.vmem [shape: f32[1,64], index: 6, kind: input, shape index: {}]   ;;  %s19291_s7 = inlined_call_operand.vmem [shape: f32[1,64], index: 7, kind: input, shape index: {}]   ;;  %s19292_s12 = inlined_call_operand.vmem [shape: bf16[64,64], index: 12, kind: input, shape index: {}]   ;;  %s19293_s10 = inlined_call_operand.vmem [shape: bf16[64,64], index: 10, kind: input, shape index: {}]   ;;  %s19294_s8 = inlined_call_operand.vmem [shape: bf16[64,64], index: 8, kind: input, shape index: {}]   ;;  %s19295_s13 = inlined_call_operand.vmem [shape: f32[1,64], index: 13, kind: input, shape index: {}]   ;;  %s19296_s11 = inlined_call_operand.vmem [shape: f32[1,64], index: 11, kind: input, shape index: {}]   ;;  %s19297_s9 = inlined_call_operand.vmem [shape: f32[1,64], index: 9, kind: input, shape index: {}]   ;;  %s19298_s16 = inlined_call_operand.vmem [shape: f32[8,64], index: 16, kind: input, shape index: {}]   ;;  %s19299_s14 = inlined_call_operand.vmem [shape: bf16[64,64], index: 14, kind: input, shape index: {}]   ;;  %s19300_s17 = inlined_call_operand.vmem [shape: bf16[576,64], index: 17, kind: input, shape index: {}]   ;;  %s19301_s15 = inlined_call_operand.vmem [shape: f32[1,64], index: 15, kind: input, shape index: {}]   ;;  %s19302_s18 = inlined_call_operand.vmem [shape: f32[1,64], index: 18, kind: input, shape index: {}]   ;;  %s19303_s19 = inlined_call_operand.vmem [shape: f32[1,64], index: 19, kind: input, shape index: {}]   ;;  %s19304_s20 = inlined_call_operand.vmem [shape: bf16[576,64], index: 20, kind: input, shape index: {}]   ;;  %s19305_s21 = inlined_call_operand.vmem [shape: f32[1,64], index: 21, kind: input, shape index: {}]   ;;  %s19306_s22 = inlined_call_operand.vmem [shape: f32[1,64], index: 22, kind: input, shape index: {}]   ;;  %s19307_s23 = inlined_call_operand.vmem [shape: f32[2,64,64], index: 23, kind: output, shape index: {}]  }
   0x1   :  { %19627 = sst [smem:[#allocation108_spill]] %s19284_s0  ;;  %vm12130_vm2 = vmand %vm389_vm0, %vm390_vm1  ;;  %vm410_vm4 = vsmask.f32 4352  ;;  %v11960_v25 = vmov 0   ;;  %v19639_v27 = vmov 0  ;;  %v19645_v62 = vmov 0 }
   0x2   :  { %19628 = sst [smem:[#allocation109_spill]] %s19285_s2  ;;  %v19637_v24 = vsel %vm12130_vm2, 4294967295, %v19636_v24  ;;  %v256_v26 = vrot.slane %v11960_v25, 7  ;;  %vm12134_vm5 = vmand %vm409_vm3, %vm410_vm4  ;;  %vm504_vm6 = vsmask.f32 3328  ;;  %vm717_vm9 = vcmask 1042432  }
   0x3   :  { %19629 = sst [smem:[#allocation110_spill]] %s19286_s1  ;;  %19638 = vst [vmem:[#allocation2_spill] sm:$0xff] %v19637_v24  ;;  %v19640_v27 = vsel %vm12134_vm5, 4294967295, %v19639_v27  ;;  %vm505_vm7 = vsmask.f32 7440  ;;  %vm718_vm10 = vcmask 1046532  }
   0x4   :  { %19630 = sst [smem:[#allocation111_spill]] %s19287_s3  ;;  %19641 = vst [vmem:[#allocation3_spill] sm:$0xff] %v19640_v27  ;;  %v392_v28 = vsel %vm12130_vm2, 0, %v256_v26  ;;  %vm12157_vm8 = vmor %vm504_vm6, %vm505_vm7  ;;  %vm966_vm12 = vcmask 523264  }
   0x5   :  { %19631 = sst [smem:[#allocation112_spill]] %s19288_s4  ;;  %v412_v29 = vsel %vm12134_vm5, %v392_v28, 0  ;;  %v19646_v62 = vsel %vm12157_vm8, 4294967295, %v19645_v62  ;;  %vm12525_vm11 = vmor %vm717_vm9, %vm718_vm10 }
   0x6   :  { %19632 = sst [smem:[#allocation113_spill]] %s19289_s5  ;;  %v12142_v30 = vunpack.c.l.b16 %v412_v29  ;;  %v445_v35 = vunpack.c.h.b16 %v412_v29  ;;  %19647 = vst [vmem:[#allocation7_spill] sm:$0xff] %v19646_v62 }
   0x7   :  { %19633 = sst [smem:[#allocation114_spill]] %s19290_s6 }
   0x8   :  { %19634 = sst [smem:[#allocation115_spill]] %s19291_s7  ;;  %19642 = vst [vmem:[#allocation4_spill] sm:$0xff] %v12142_v30  ;;  %v12146_v31 = vpack.c.b16 %v12142_v30, %v12142_v30  ;;  %v12150_v44 = vpack.c.b16 %v445_v35, %v445_v35 }
   0x9   :  { %s19635_s24 = sld [smem:[#allocation108_spill]] }
   0xa   :  { %19643 = vst [vmem:[#allocation5_spill] sm:$0xff] %v12146_v31  ;;  %v508_v32 = vshrl.u32 %v12146_v31, 16  ;;  %v511_v33 = vshll.u32 %v12146_v31, 16  ;;  %v517_v48 = vshll.u32 %v12150_v44, 16  ;;  %s19677_s1 = sld [smem:[#allocation109_spill]] }
   0xb   :  { %19644 = vst [vmem:[#allocation6_spill] sm:$0xff] %v12150_v44  ;;  %s19691_s25 = sld [smem:[#allocation110_spill]] }
   0xc   :  { %v510_v40 = vrot.slane %v508_v32, 4  ;;  %v513_v41 = vrot.slane %v511_v33, 5  ;;  %v519_v59 = vrot.slane %v517_v48, 5  ;;  %s19724_s6 = sld [smem:[#allocation113_spill]] }
   0xd   :  { %s19814_s5 = sld [smem:[#allocation111_spill]] }
   0xe   :  { %v514_v47 = vor.u32 %v513_v41, %v510_v40  ;;  %s19846_s27 = sld [smem:[#allocation115_spill]] }
   0xf   :  { %v75_v0 = vld [vmem:[%s19635_s24] sm:$0xff]  ;;  %v76_v3 = vld [vmem:[%s19635_s24 + $0x8] sm:$0xff]  ;;  %v77_v6 = vld [vmem:[%s19635_s24 + $0x10] sm:$0xff] }
  0x10   :  { %v10295_v1 = vld [vmem:[%s19635_s24 + $0x40] sm:$0xff]  ;;  %v10296_v4 = vld [vmem:[%s19635_s24 + $0x48] sm:$0xff]  ;;  %v10297_v7 = vld [vmem:[%s19635_s24 + $0x50] sm:$0xff]  ;;  %v515_v58 = vrot.slane %v514_v47, 4 }
  0x11   :  { %v11379_v2 = vpack.i.bf16 %v10295_v1, %v75_v0  ;;  %v11381_v5 = vpack.i.bf16 %v10296_v4, %v76_v3  ;;  %v11383_v8 = vpack.i.bf16 %v10297_v7, %v77_v6  ;;  %v78_v9 = vld [vmem:[%s19635_s24 + $0x18] sm:$0xff]  ;;  %v79_v12 = vld [vmem:[%s19635_s24 + $0x20] sm:$0xff]  ;;  %v80_v15 = vld [vmem:[%s19635_s24 + $0x28] sm:$0xff] }
  0x12   :  { %v10298_v10 = vld [vmem:[%s19635_s24 + $0x58] sm:$0xff]  ;;  %v10299_v13 = vld [vmem:[%s19635_s24 + $0x60] sm:$0xff]  ;;  %v10300_v16 = vld [vmem:[%s19635_s24 + $0x68] sm:$0xff]  ;;  %v520_v6 = vsel %vm12157_vm8, %v515_v58, %v519_v59 }
  0x13   :  { %11380 = vxpose.xlu0.b32.start [1/8] (short) (narrow) %v11379_v2, 64  ;;  %v11385_v11 = vpack.i.bf16 %v10298_v10, %v78_v9  ;;  %v11387_v14 = vpack.i.bf16 %v10299_v13, %v79_v12  ;;  %v11389_v17 = vpack.i.bf16 %v10300_v16, %v80_v15  ;;  %v81_v18 = vld [vmem:[%s19635_s24 + $0x30] sm:$0xff]  ;;  %v82_v21 = vld [vmem:[%s19635_s24 + $0x38] sm:$0xff]  ;;  %v12187_v25 = vunpack.c.l.b16 %v520_v6 }
  0x14   :  { %v10301_v19 = vld [vmem:[%s19635_s24 + $0x70] sm:$0xff]  ;;  %v10302_v22 = vld [vmem:[%s19635_s24 + $0x78] sm:$0xff]  ;;  %s11961_s24 = smov 64  }
  0x15   :  { %v11391_v20 = vpack.i.bf16 %v10301_v19, %v81_v18  ;;  %v11393_v23 = vpack.i.bf16 %v10302_v22, %v82_v21  ;;  %19650 = vst [vmem:[#allocation10_spill] sm:$0xff] %v12187_v25 }
  0x1b   :  { %11382 = vxpose.xlu0.b32.cont [2/8] (short) (narrow) %v11381_v5, 64 }
  0x23   :  { %11384 = vxpose.xlu0.b32.cont [3/8] (short) (narrow) %v11383_v8, 64 }
  0x2b   :  { %11386 = vxpose.xlu0.b32.cont [4/8] (short) (narrow) %v11385_v11, 64 }
  0x33   :  { %11388 = vxpose.xlu0.b32.cont [5/8] (short) (narrow) %v11387_v14, 64 }
  0x3b   :  { %11390 = vxpose.xlu0.b32.cont [6/8] (short) (narrow) %v11389_v17, 64 }
  0x43   :  { %11392 = vxpose.xlu0.b32.cont [7/8] (short) (narrow) %v11391_v20, 64 }
  0x4b   :  { %11394 = vxpose.xlu0.b32.end [8/8] (short) (narrow) %v11393_v23, 64 }
  0xb7   :  { %v11395_v34 = vpop.trf.xlu0 }
  0xb8   :  { %v11399_v36 = vunpack.i.h.bf16 %v11395_v34  ;;  %v11396_v37 = vunpack.i.l.bf16 %v11395_v34 }
  0xba   :  { %v245_v38 = vpack.c.bf16 %v11399_v36, %v11399_v36  ;;  %v237_v39 = vpack.c.bf16 %v11396_v37, %v11396_v37 }
  0xbc   :  { %v317_v42 = vshrl.u32 %v245_v38, 16  ;;  %v261_v43 = vshrl.u32 %v237_v39, 16  ;;  %v320_v49 = vshll.u32 %v245_v38, 16  ;;  %v264_v50 = vshll.u32 %v237_v39, 16 }
  0xbe   :  { %v319_v45 = vrot.slane %v317_v42, 7  ;;  %v263_v46 = vrot.slane %v261_v43, 7 }
  0xbf   :  { %v11400_v51 = vpop.trf.xlu0 }
  0xc0   :  { %v11404_v52 = vunpack.i.h.bf16 %v11400_v51  ;;  %v11401_v53 = vunpack.i.l.bf16 %v11400_v51  ;;  %v322_v54 = vor.u32 %v320_v49, %v319_v45  ;;  %v266_v55 = vor.u32 %v264_v50, %v263_v46 }
  0xc2   :  { %v246_v56 = vpack.c.bf16 %v11404_v52, %v11404_v52  ;;  %v238_v57 = vpack.c.bf16 %v11401_v53, %v11401_v53  ;;  %v401_v60 = vsel %vm12130_vm2, 0, %v322_v54  ;;  %v393_v61 = vsel %vm12130_vm2, 0, %v266_v55 }
  0xc3   :  { %v421_v1 = vsel %vm12134_vm5, %v401_v60, 0  ;;  %v413_v2 = vsel %vm12134_vm5, %v393_v61, 0 }
  0xc4   :  { %v324_v63 = vshrl.u32 %v246_v56, 16  ;;  %v268_v0 = vshrl.u32 %v238_v57, 16  ;;  %v461_v5 = vunpack.c.h.b16 %v421_v1  ;;  %v327_v7 = vshll.u32 %v246_v56, 16 }
  0xc5   :  { %v271_v8 = vshll.u32 %v238_v57, 16  ;;  %v12167_v10 = vunpack.c.l.b16 %v421_v1  ;;  %v12169_v11 = vunpack.c.l.b16 %v413_v2  ;;  %v447_v17 = vunpack.c.h.b16 %v413_v2 }
  0xc6   :  { %v326_v3 = vrot.slane %v324_v63, 7  ;;  %v270_v4 = vrot.slane %v268_v0, 7  ;;  %v12171_v15 = vpack.c.b16 %v461_v5, %v461_v5 }
  0xc7   :  { %v11405_v9 = vpop.trf.xlu0  ;;  %19648 = vst [vmem:[#allocation8_spill] sm:$0xff] %v12167_v10  ;;  %v12181_v22 = vpack.c.b16 %v12169_v11, %v12169_v11  ;;  %v12185_v23 = vpack.c.b16 %v12167_v10, %v12167_v10  ;;  %v12194_v32 = vpack.c.b16 %v447_v17, %v447_v17 }
  0xc8   :  { %19649 = vst [vmem:[#allocation9_spill] sm:$0xff] %v12169_v11  ;;  %v11409_v12 = vunpack.i.h.bf16 %v11405_v9  ;;  %v11406_v13 = vunpack.i.l.bf16 %v11405_v9  ;;  %v329_v14 = vor.u32 %v327_v7, %v326_v3  ;;  %v273_v16 = vor.u32 %v271_v8, %v270_v4 }
  0xc9   :  { %v629_v28 = vshll.u32 %v12171_v15, 16  ;;  %v522_v40 = vshrl.u32 %v12181_v22, 16  ;;  %v525_v41 = vshll.u32 %v12181_v22, 16  ;;  %v531_v54 = vshll.u32 %v12194_v32, 16 }
  0xca   :  { %v12173_v18 = vpack.c.bf16 %v11409_v12, %v11409_v12  ;;  %v239_v19 = vpack.c.bf16 %v11406_v13, %v11406_v13  ;;  %v402_v20 = vsel %vm12130_vm2, 0, %v329_v14  ;;  %v394_v21 = vsel %vm12130_vm2, 0, %v273_v16 }
  0xcb   :  { %v422_v26 = vsel %vm12134_vm5, %v402_v20, 0  ;;  %v414_v29 = vsel %vm12134_vm5, %v394_v21, 0  ;;  %v524_v55 = vrot.slane %v522_v40, 4  ;;  %v527_v56 = vrot.slane %v525_v41, 5 }
  0xcc   :  { %v331_v33 = vshrl.u32 %v12173_v18, 16  ;;  %v275_v34 = vshrl.u32 %v239_v19, 16  ;;  %v12197_v35 = vunpack.c.l.b16 %v422_v26  ;;  %v463_v36 = vunpack.c.h.b16 %v422_v26 }
  0xcd   :  { %v334_v37 = vshll.u32 %v12173_v18, 16  ;;  %v12200_v39 = vunpack.c.l.b16 %v414_v29  ;;  %v278_v45 = vshll.u32 %v239_v19, 16  ;;  %v449_v48 = vunpack.c.h.b16 %v414_v29 }
  0xce   :  { %19651 = vst [vmem:[#allocation11_spill] sm:$0xff] %v12197_v35  ;;  %v12204_v46 = vpack.c.b16 %v463_v36, %v463_v36  ;;  %v900_v47 = vpack.c.b16 %v12197_v35, %v12167_v10  ;;  %v277_v49 = vrot.slane %v275_v34, 7  ;;  %v333_v53 = vrot.slane %v331_v33, 7 }
  0xcf   :  { %v11410_v38 = vpop.trf.xlu0  ;;  %19652 = vst [vmem:[#allocation12_spill] sm:$0xff] %v12200_v39  ;;  %v896_v52 = vpack.c.b16 %v12200_v39, %v12169_v11  ;;  %v12214_v59 = vpack.c.b16 %v12197_v35, %v12197_v35  ;;  %v12218_v60 = vpack.c.b16 %v12200_v39, %v12200_v39  ;;  %v12222_v0 = vpack.c.b16 %v449_v48, %v449_v48 }
  0xd0   :  { %v11414_v42 = vunpack.i.h.bf16 %v11410_v38  ;;  %v11411_v43 = vunpack.i.l.bf16 %v11410_v38  ;;  %912 = vrot.lane.b32.xlu2 %v900_v47, %s11961_s24  ;;  %v643_v63 = vshll.u32 %v12204_v46, 16  ;;  %v528_v1 = vor.u32 %v527_v56, %v524_v55 }
  0xd1   :  { %904 = vrot.lane.b32.xlu1 %v896_v52, %s11961_s24  ;;  %v280_v4 = vor.u32 %v278_v45, %v277_v49  ;;  %v620_v5 = vshrl.u32 %v12185_v23, 16  ;;  %v533_v9 = vrot.slane %v531_v54, 5  ;;  %v623_v12 = vshll.u32 %v12185_v23, 16 }
  0xd2   :  { %v248_v50 = vpack.c.bf16 %v11414_v42, %v11414_v42  ;;  %v240_v51 = vpack.c.bf16 %v11411_v43, %v11411_v43  ;;  %v529_v8 = vrot.slane %v528_v1, 4  ;;  %v545_v40 = vshll.u32 %v12222_v0, 16 }
  0xd3   :  { %v395_v18 = vsel %vm12130_vm2, 0, %v280_v4  ;;  %v622_v19 = vrot.slane %v620_v5, 4  ;;  %v625_v38 = vrot.slane %v623_v12, 5  ;;  %v336_v43 = vor.u32 %v334_v37, %v333_v53 }
  0xd4   :  { %v338_v57 = vshrl.u32 %v248_v50, 16  ;;  %v282_v58 = vshrl.u32 %v240_v51, 16  ;;  %v341_v61 = vshll.u32 %v248_v50, 16  ;;  %v285_v3 = vshll.u32 %v240_v51, 16 }
  0xd5   :  { %v534_v16 = vsel %vm12157_vm8, %v529_v8, %v533_v9  ;;  %v415_v29 = vsel %vm12134_vm5, %v395_v18, 0  ;;  %v631_v49 = vrot.slane %v629_v28, 5  ;;  %v626_v56 = vor.u32 %v625_v38, %v622_v19 }
  0xd6   :  { %v284_v2 = vrot.slane %v282_v58, 7  ;;  %v340_v6 = vrot.slane %v338_v57, 7  ;;  %v12230_v26 = vunpack.c.l.b16 %v534_v16  ;;  %v12236_v34 = vunpack.c.l.b16 %v415_v29 }
  0xd7   :  { %v11415_v7 = vpop.trf.xlu0  ;;  %v451_v36 = vunpack.c.h.b16 %v415_v29  ;;  %v403_v28 = vsel %vm12130_vm2, 0, %v336_v43  ;;  %v634_v4 = vshrl.u32 %v12214_v59, 16  ;;  %v627_v9 = vrot.slane %v626_v56, 4 }
  0xd8   :  { %v11419_v13 = vunpack.i.h.bf16 %v11415_v7  ;;  %v11416_v14 = vunpack.i.l.bf16 %v11415_v7  ;;  %v287_v17 = vor.u32 %v285_v3, %v284_v2  ;;  %19653 = vst [vmem:[#allocation13_spill] sm:$0xff] %v12230_v26  ;;  %v849_v47 = vpack.c.b16 %v12230_v26, %v12187_v25 }
  0xd9   :  { %19654 = vst [vmem:[#allocation14_spill] sm:$0xff] %v12236_v34  ;;  %v12250_v37 = vpack.c.b16 %v12236_v34, %v12236_v34  ;;  %v12252_v53 = vpack.c.b16 %v451_v36, %v451_v36  ;;  %v343_v57 = vor.u32 %v341_v61, %v340_v6 }
  0xda   :  { %v249_v20 = vpack.c.bf16 %v11419_v13, %v11419_v13  ;;  %v241_v21 = vpack.c.bf16 %v11416_v14, %v11416_v14  ;;  %v396_v33 = vsel %vm12130_vm2, 0, %v287_v17  ;;  %857 = vrot.lane.b32.xlu1 %v849_v47, %s11961_s24  ;;  %v423_v13 = vsel %vm12134_vm5, %v403_v28, 0 }
  0xdb   :  { %v416_v48 = vsel %vm12134_vm5, %v396_v33, 0  ;;  %v404_v12 = vsel %vm12130_vm2, 0, %v343_v57  ;;  %v12278_v18 = vunpack.c.l.b16 %v423_v13  ;;  %v465_v29 = vunpack.c.h.b16 %v423_v13 }
  0xdc   :  { %v345_v41 = vshrl.u32 %v249_v20, 16  ;;  %v289_v42 = vshrl.u32 %v241_v21, 16  ;;  %v348_v45 = vshll.u32 %v249_v20, 16  ;;  %v292_v52 = vshll.u32 %v241_v21, 16 }
  0xdd   :  { %v12245_v54 = vunpack.c.l.b16 %v416_v48  ;;  %v453_v1 = vunpack.c.h.b16 %v416_v48  ;;  %v424_v17 = vsel %vm12134_vm5, %v404_v12, 0  ;;  %19656 = vst [vmem:[#allocation16_spill] sm:$0xff] %v12278_v18  ;;  %v632_v21 = vsel %vm12157_vm8, %v627_v9, %v631_v49 }
  0xde   :  { %v347_v50 = vrot.slane %v345_v41, 7  ;;  %v291_v51 = vrot.slane %v289_v42, 7  ;;  %v12289_v38 = vunpack.c.l.b16 %v632_v21  ;;  %v12291_v41 = vunpack.c.l.b16 %v424_v17 }
  0xdf   :  { %19655 = vst [vmem:[#allocation15_spill] sm:$0xff] %v12245_v54  ;;  %v11420_v55 = vpop.trf.xlu0  ;;  %v12263_v8 = vpack.c.b16 %v12245_v54, %v12245_v54  ;;  %v897_v61 = vpack.c.b16 %v12245_v54, %v12236_v34  ;;  %v12273_v16 = vpack.c.b16 %v453_v1, %v453_v1  ;;  %v467_v47 = vunpack.c.h.b16 %v424_v17 }
  0xe0   :  { %v11424_v58 = vunpack.i.h.bf16 %v11420_v55  ;;  %v12256_v2 = vor.u32 %v348_v45, %v347_v50  ;;  %v11421_v3 = vunpack.i.l.bf16 %v11420_v55  ;;  %v12259_v5 = vor.u32 %v292_v52, %v291_v51  ;;  %19657 = vst [vmem:[#allocation17_spill] sm:$0xff] %v12289_v38 }
  0xe1   :  { %906 = vrot.lane.b32.xlu2 %v897_v61, %s11961_s24  ;;  %19658 = vst [vmem:[#allocation18_spill] sm:$0xff] %v12291_v41  ;;  %v12296_v48 = vpack.c.b16 %v12278_v18, %v12278_v18  ;;  %v853_v49 = vpack.c.b16 %v12289_v38, %v12187_v25  ;;  %v12300_v51 = vpack.c.b16 %v465_v29, %v465_v29  ;;  %v636_v1 = vrot.slane %v634_v4, 4 }
  0xe2   :  { %v250_v7 = vpack.c.bf16 %v11424_v58, %v11424_v58  ;;  %v12267_v6 = vpack.c.bf16 %v11421_v3, %v11421_v3  ;;  %v901_v58 = vpack.c.b16 %v12291_v41, %v12278_v18  ;;  %v637_v28 = vshll.u32 %v12214_v59, 16 }
  0xe3   :  { %865 = vrot.lane.b32.xlu1 %v853_v49, %s11961_s24  ;;  %v648_v61 = vshrl.u32 %v12296_v48, 16  ;;  %v651_v9 = vshll.u32 %v12296_v48, 16  ;;  %v12318_v13 = vpack.c.b16 %v467_v47, %v467_v47  ;;  %v657_v4 = vshll.u32 %v12300_v51, 16 }
  0xe4   :  { %v352_v14 = vshrl.u32 %v250_v7, 16  ;;  %v296_v20 = vshrl.u32 %v12267_v6, 16  ;;  %v355_v42 = vshll.u32 %v250_v7, 16  ;;  %v12314_v7 = vpack.c.b16 %v12291_v41, %v12291_v41 }
  0xe5   :  { %v650_v21 = vrot.slane %v648_v61, 4  ;;  %v653_v29 = vrot.slane %v651_v9, 5  ;;  %v536_v49 = vshrl.u32 %v12218_v60, 16  ;;  %v645_v47 = vrot.slane %v643_v63, 5 }
  0xe6   :  { %v354_v36 = vrot.slane %v352_v14, 7  ;;  %v12304_v55 = vrot.slane %v296_v20, 7  ;;  %v639_v14 = vrot.slane %v637_v28, 5  ;;  %v539_v28 = vshll.u32 %v12218_v60, 16 }
  0xe7   :  { %v11425_v45 = vpop.trf.xlu0 }
  0xe8   :  { %v11429_v50 = vunpack.i.h.bf16 %v11425_v45  ;;  %v12302_v52 = vor.u32 %v355_v42, %v354_v36  ;;  %v11426_v56 = vunpack.i.l.bf16 %v11425_v45  ;;  %v640_v45 = vor.u32 %v639_v14, %v636_v1 }
  0xe9   :  { %914 = vrot.lane.b32.xlu2 %v901_v58, %s11961_s24  ;;  %v541_v33 = vrot.slane %v539_v28, 5 }
  0xea   :  { %v251_v57 = vpack.c.bf16 %v11429_v50, %v11429_v50  ;;  %v12310_v3 = vpack.c.bf16 %v11426_v56, %v11426_v56  ;;  %v654_v50 = vor.u32 %v653_v29, %v650_v21  ;;  %v659_v56 = vrot.slane %v657_v4, 5 }
  0xeb   :  { %v641_v17 = vrot.slane %v640_v45, 4  ;;  %v550_v21 = vshrl.u32 %v12250_v37, 16 }
  0xec   :  { %v359_v12 = vshrl.u32 %v251_v57, 16  ;;  %v362_v20 = vshll.u32 %v251_v57, 16  ;;  %v303_v42 = vshrl.u32 %v12310_v3, 16  ;;  %v655_v61 = vrot.slane %v654_v50, 4 }
  0xed   :  { %v306_v1 = vshll.u32 %v12310_v3, 16  ;;  %v646_v14 = vsel %vm12157_vm8, %v641_v17, %v645_v47  ;;  %v553_v47 = vshll.u32 %v12250_v37, 16 }
  0xee   :  { %v361_v36 = vrot.slane %v359_v12, 7  ;;  %v538_v12 = vrot.slane %v536_v49, 4  ;;  %v305_v43 = vrot.slane %v303_v42, 7  ;;  %v660_v63 = vsel %vm12157_vm8, %v655_v61, %v659_v56 }
  0xef   :  { %v11430_v58 = vpop.trf.xlu0  ;;  %v12340_v29 = vunpack.c.l.b16 %v646_v14  ;;  %v552_v49 = vrot.slane %v550_v21, 4  ;;  %v555_v61 = vrot.slane %v553_v47, 5 }
  0xf0   :  { %v12330_v19 = vor.u32 %v362_v20, %v361_v36  ;;  %v11434_v57 = vunpack.i.h.bf16 %v11430_v58  ;;  %v11431_v9 = vunpack.i.l.bf16 %v11430_v58  ;;  %v547_v20 = vrot.slane %v545_v40, 5 }
  0xf1   :  { %19659 = vst [vmem:[#allocation19_spill] sm:$0xff] %v12340_v29  ;;  %v12342_v36 = vunpack.c.l.b16 %v660_v63  ;;  %v542_v3 = vor.u32 %v541_v33, %v538_v12  ;;  %v559_v58 = vshll.u32 %v12252_v53, 16  ;;  %v19661_v33 = vsel %vm12130_vm2, 0, %v12259_v5 }
  0xf2   :  { %v244_v4 = vpack.c.bf16 %v11431_v9, %v11431_v9  ;;  %v12344_v42 = vpack.c.bf16 %v11434_v57, %v11434_v57  ;;  %v417_v57 = vsel %vm12134_vm5, %v19661_v33, 0  ;;  %v564_v9 = vshrl.u32 %v12263_v8, 16 }
  0xf3   :  { %19660 = vst [vmem:[#allocation20_spill] sm:$0xff] %v12342_v36  ;;  %v854_v40 = vpack.c.b16 %v12342_v36, %v12340_v29  ;;  %v543_v56 = vrot.slane %v542_v3, 4  ;;  %v12364_v63 = vunpack.c.l.b16 %v417_v57  ;;  %v556_v21 = vor.u32 %v555_v61, %v552_v49 }
  0xf4   :  { %v310_v45 = vshrl.u32 %v244_v4, 16  ;;  %v313_v50 = vshll.u32 %v244_v4, 16  ;;  %v455_v4 = vunpack.c.h.b16 %v417_v57  ;;  %v561_v3 = vrot.slane %v559_v58, 5 }
  0xf5   :  { %867 = vrot.lane.b32.xlu1 %v854_v40, %s11961_s24  ;;  %v548_v14 = vsel %vm12157_vm8, %v543_v56, %v547_v20  ;;  %19662 = vst [vmem:[#allocation21_spill] sm:$0xff] %v12364_v63  ;;  %v567_v5 = vshll.u32 %v12263_v8, 16  ;;  %v12369_v47 = vpack.c.b16 %v12364_v63, %v12364_v63  ;;  %v573_v40 = vshll.u32 %v12273_v16, 16 }
  0xf6   :  { %v312_v28 = vrot.slane %v310_v45, 7  ;;  %v566_v45 = vrot.slane %v564_v9, 4  ;;  %v12371_v33 = vpack.c.b16 %v455_v4, %v455_v4  ;;  %v19663_v12 = vshll.u32 %v12267_v6, 16 }
  0xf7   :  { %v557_v56 = vrot.slane %v556_v21, 4  ;;  %v569_v17 = vrot.slane %v567_v5, 5  ;;  %v308_v57 = vor.u32 %v306_v1, %v305_v43  ;;  %v12377_v58 = vunpack.c.l.b16 %v548_v14 }
  0xf8   :  { %v301_v20 = vor.u32 %v19663_v12, %v12304_v55  ;;  %v315_v49 = vor.u32 %v313_v50, %v312_v28  ;;  %v575_v61 = vrot.slane %v573_v40, 5  ;;  %v578_v9 = vshrl.u32 %v12369_v47, 16 }
  0xf9   :  { %19664 = vst [vmem:[#allocation22_spill] sm:$0xff] %v12377_v58  ;;  %v581_v29 = vshll.u32 %v12369_v47, 16  ;;  %v562_v4 = vsel %vm12157_vm8, %v557_v56, %v561_v3  ;;  %v570_v38 = vor.u32 %v569_v17, %v566_v45  ;;  %v399_v6 = vsel %vm12130_vm2, 0, %v308_v57 }
  0xfa   :  { %v398_v41 = vsel %vm12130_vm2, 0, %v301_v20  ;;  %v12387_v55 = vunpack.c.l.b16 %v562_v4  ;;  %v580_v43 = vrot.slane %v578_v9, 4  ;;  %v587_v50 = vshll.u32 %v12371_v33, 16 }
  0xfb   :  { %v583_v1 = vrot.slane %v581_v29, 5  ;;  %v571_v28 = vrot.slane %v570_v38, 4  ;;  %v418_v12 = vsel %vm12134_vm5, %v398_v41, 0  ;;  %v400_v14 = vsel %vm12130_vm2, 0, %v315_v49 }
  0xfc   :  { %v419_v17 = vsel %vm12134_vm5, %v399_v6, 0  ;;  %v850_v21 = vpack.c.b16 %v12387_v55, %v12377_v58  ;;  %v12398_v45 = vunpack.c.l.b16 %v418_v12  ;;  %v457_v5 = vunpack.c.h.b16 %v418_v12 }
  0xfd   :  { %v584_v3 = vor.u32 %v583_v1, %v580_v43  ;;  %v576_v29 = vsel %vm12157_vm8, %v571_v28, %v575_v61  ;;  %v420_v38 = vsel %vm12134_vm5, %v400_v14, 0  ;;  %v12404_v41 = vunpack.c.l.b16 %v419_v17 }
  0xfe   :  { %v459_v40 = vunpack.c.h.b16 %v419_v17  ;;  %859 = vrot.lane.b32.xlu2 %v850_v21, %s11961_s24  ;;  %v589_v56 = vrot.slane %v587_v50, 5  ;;  %v12407_v57 = vunpack.c.l.b16 %v576_v29  ;;  %v12411_v49 = vpack.c.b16 %v12398_v45, %v12398_v45 }
  0xff   :  { %v585_v20 = vrot.slane %v584_v3, 4  ;;  %v12413_v9 = vpack.c.b16 %v457_v5, %v457_v5  ;;  %v898_v61 = vpack.c.b16 %v12398_v45, %v12364_v63  ;;  %v12419_v4 = vpack.c.b16 %v12404_v41, %v12404_v41 }
 0x100   :  { %v12421_v6 = vunpack.c.l.b16 %v420_v38  ;;  %v12425_v1 = vpack.c.b16 %v459_v40, %v459_v40  ;;  %v19666_v50 = vsel %vm12130_vm2, 0, %v12302_v52  ;;  %v19667_v12 = vsel %vm12130_vm2, 0, %v12330_v19 }
 0x101   :  { %v590_v43 = vsel %vm12157_vm8, %v585_v20, %v589_v56  ;;  %v426_v28 = vsel %vm12134_vm5, %v19666_v50, 0  ;;  %v427_v14 = vsel %vm12134_vm5, %v19667_v12, 0  ;;  %v783_v21 = vunpack.c.h.b16 %v420_v38 }
 0x102   :  { %19665 = vst [vmem:[#allocation23_spill] sm:$0xff] %v12421_v6  ;;  %v12439_v17 = vunpack.c.l.b16 %v590_v43  ;;  %v12443_v3 = vpack.c.b16 %v12421_v6, %v12421_v6  ;;  %v12445_v5 = vunpack.c.l.b16 %v426_v28  ;;  %v899_v52 = vpack.c.b16 %v12421_v6, %v12404_v41 }
 0x103   :  { %v471_v29 = vunpack.c.h.b16 %v426_v28  ;;  %v12449_v40 = vunpack.c.l.b16 %v427_v14  ;;  %v473_v20 = vunpack.c.h.b16 %v427_v14  ;;  %v592_v38 = vshrl.u32 %v12411_v49, 16 }
 0x104   :  { %19668 = vst [vmem:[#allocation24_spill] sm:$0xff] %v12439_v17  ;;  %v851_v19 = vpack.c.b16 %v12439_v17, %v12407_v57  ;;  %v12455_v56 = vpack.c.b16 %v12445_v5, %v12445_v5  ;;  %v595_v43 = vshll.u32 %v12411_v49, 16  ;;  %v601_v14 = vshll.u32 %v12413_v9, 16 }
 0x105   :  { %v12459_v50 = vpack.c.b16 %v471_v29, %v471_v29  ;;  %v12463_v12 = vpack.c.b16 %v12449_v40, %v12449_v40  ;;  %v12465_v28 = vpack.c.b16 %v473_v20, %v473_v20  ;;  %v594_v10 = vrot.slane %v592_v38, 4 }
 0x106   :  { %861 = vrot.lane.b32.xlu1 %v851_v19, %s11961_s24  ;;  %v690_v18 = vshrl.u32 %v12455_v56, 16  ;;  %v693_v35 = vshll.u32 %v12455_v56, 16  ;;  %v597_v6 = vrot.slane %v595_v43, 5  ;;  %908 = vrot.lane.b32.xlu2 %v898_v61, %s11961_s24  ;;  %v12472_v29 = vpack.c.b16 %v783_v21, %v783_v21 }
 0x107   :  { %19669 = vst [vmem:[#allocation25_spill] sm:$0xff] %v12465_v28  ;;  %v699_v58 = vshll.u32 %v12459_v50, 16  ;;  %v704_v26 = vshrl.u32 %v12463_v12, 16  ;;  %v707_v20 = vshll.u32 %v12463_v12, 16  ;;  %v713_v19 = vshll.u32 %v12465_v28, 16 }
 0x108   :  { %v692_v63 = vrot.slane %v690_v18, 4  ;;  %v695_v54 = vrot.slane %v693_v35, 5  ;;  %v598_v34 = vor.u32 %v597_v6, %v594_v10  ;;  %v603_v38 = vrot.slane %v601_v14, 5 }
 0x109   :  { %v701_v39 = vrot.slane %v699_v58, 5  ;;  %v706_v11 = vrot.slane %v704_v26, 4  ;;  %v709_v30 = vrot.slane %v707_v20, 5  ;;  %v606_v61 = vshrl.u32 %v12419_v4, 16 }
 0x10a   :  { %v696_v43 = vor.u32 %v695_v54, %v692_v63  ;;  %v599_v17 = vrot.slane %v598_v34, 4  ;;  %v609_v21 = vshll.u32 %v12419_v4, 16  ;;  %v615_v31 = vshll.u32 %v12425_v1, 16 }
 0x10b   :  { %v710_v44 = vor.u32 %v709_v30, %v706_v11  ;;  %v19670_v35 = vsel %vm12130_vm2, 0, %v12256_v2  ;;  %v662_v26 = vshrl.u32 %v12314_v7, 16  ;;  %v715_v58 = vrot.slane %v713_v19, 5 }
 0x10c   :  { %v425_v10 = vsel %vm12134_vm5, %v19670_v35, 0  ;;  %v697_v18 = vrot.slane %v696_v43, 4  ;;  %v608_v54 = vrot.slane %v606_v61, 4  ;;  %v611_v34 = vrot.slane %v609_v21, 5 }
 0x10d   :  { %v711_v63 = vrot.slane %v710_v44, 4  ;;  %v604_v6 = vsel %vm12157_vm8, %v599_v17, %v603_v38  ;;  %v617_v30 = vrot.slane %v615_v31, 5  ;;  %v12490_v11 = vunpack.c.l.b16 %v425_v10 }
 0x10e   :  { %v702_v14 = vsel %vm12157_vm8, %v697_v18, %v701_v39  ;;  %v612_v2 = vor.u32 %v611_v34, %v608_v54  ;;  %v469_v20 = vunpack.c.h.b16 %v425_v10  ;;  %v664_v28 = vrot.slane %v662_v26, 4  ;;  %910 = vrot.lane.b32.xlu2 %v899_v52, %s11961_s24 }
 0x10f   :  { %v716_v19 = vsel %vm12157_vm8, %v711_v63, %v715_v58  ;;  %v12497_v43 = vunpack.c.l.b16 %v702_v14  ;;  %v12501_v44 = vpack.c.b16 %v12490_v11, %v12490_v11  ;;  %v665_v31 = vshll.u32 %v12314_v7, 16 }
 0x110   :  { %v12504_v17 = vunpack.c.l.b16 %v716_v19  ;;  %v613_v38 = vrot.slane %v612_v2, 4  ;;  %v12506_v39 = vpack.c.b16 %v469_v20, %v469_v20  ;;  %v671_v61 = vshll.u32 %v12318_v13, 16 }
 0x111   :  { %19671 = vst [vmem:[#allocation26_spill] sm:$0xff] %v12497_v43  ;;  %v12509_v21 = vunpack.c.l.b16 %v604_v6  ;;  %v667_v52 = vrot.slane %v665_v31, 5  ;;  %v676_v35 = vshrl.u32 %v12501_v44, 16  ;;  %v679_v10 = vshll.u32 %v12501_v44, 16 }
 0x112   :  { %19672 = vst [vmem:[#allocation27_spill] sm:$0xff] %v12504_v17  ;;  %v856_v26 = vpack.c.b16 %v12504_v17, %v12497_v43  ;;  %v618_v18 = vsel %vm12157_vm8, %v613_v38, %v617_v30  ;;  %v685_v58 = vshll.u32 %v12506_v39, 16  ;;  %v673_v14 = vrot.slane %v671_v61, 5 }
 0x113   :  { %v12518_v54 = vunpack.c.l.b16 %v618_v18  ;;  %v668_v34 = vor.u32 %v667_v52, %v664_v28  ;;  %v678_v63 = vrot.slane %v676_v35, 4  ;;  %v681_v6 = vrot.slane %v679_v10, 5  ;;  %v11231_v35 = vld [vmem:[%s19677_s1 + $0x78] sm:$0xff] }
 0x114   :  { %871 = vrot.lane.b32.xlu0 %v856_v26, %s11961_s24  ;;  %v10318_v2 = vrot.slane %v12419_v4, 9  ;;  %v750_v20 = vrot.slane %v12425_v1, 5  ;;  %v19674_v38 = vmov 0  ;;  %v10326_v28 = vrot.slane %v12443_v3, 9  ;;  %v11223_v10 = vld [vmem:[%s19677_s1 + $0x38] sm:$0xff]  ;;  %1426 = vmatpush.bf16.msra.mxu1 %v11231_v35 }
 0x115   :  { %19673 = vst [vmem:[#allocation28_spill] sm:$0xff] %v12518_v54  ;;  %v852_v19 = vpack.c.b16 %v12518_v54, %v12509_v21  ;;  %v669_v30 = vrot.slane %v668_v34, 4  ;;  %v682_v31 = vor.u32 %v681_v6, %v678_v63  ;;  %v19675_v38 = vsel %vm12525_vm11, 4294967295, %v19674_v38  ;;  %v11247_v6 = vld [vmem:[%s19677_s1 + $0xf8] sm:$0xff]  ;;  %1377 = vmatpush.bf16.msra.mxu0 %v11223_v10 }
 0x116   :  { %19676 = vst [vmem:[#allocation29_spill] sm:$0xff] %v19675_v38  ;;  %v369_v52 = vshll.u32 %v12344_v42, 16  ;;  %v12533_v61 = vsel %vm12525_vm11, %v10318_v2, %v750_v20  ;;  %v820_v4 = vrot.slane %v12472_v29, 5  ;;  %v791_v1 = vshrl.u32 %v12443_v3, 16  ;;  %1524 = vmatpush.bf16.msra.mxu3 %v11247_v6 }
 0x117   :  { %863 = vrot.lane.b32.xlu1 %v852_v19, %s11961_s24  ;;  %v674_v26 = vsel %vm12157_vm8, %v669_v30, %v673_v14  ;;  %v683_v18 = vrot.slane %v682_v31, 4  ;;  %v687_v34 = vrot.slane %v685_v58, 5  ;;  %v794_v63 = vshll.u32 %v12443_v3, 16  ;;  %v11230_v58 = vld [vmem:[%s19677_s1 + $0x70] sm:$0xff] }
 0x118   :  { %v19678_v2 = vshrl.u32 %v12344_v42, 16  ;;  %v12554_v17 = vsel %vm12525_vm11, %v10326_v28, %v820_v4  ;;  %v793_v54 = vrot.slane %v791_v1, 4  ;;  %v800_v19 = vshll.u32 %v12472_v29, 16  ;;  %v11222_v3 = vld [vmem:[%s19677_s1 + $0x30] sm:$0xff]  ;;  %1427 = vmatpush.bf16.msra.mxu1 %v11230_v58  ;;  %v11228_v58 = vld [vmem:[%s19677_s1 + $0x60] sm:$0xff] }
 0x119   :  { %v688_v42 = vsel %vm12157_vm8, %v683_v18, %v687_v34  ;;  %v880_v14 = vunpack.c.l.b16 %v12533_v61  ;;  %v19337_v30 = vunpack.c.l.b16 %v12554_v17  ;;  %v796_v31 = vrot.slane %v794_v63, 5  ;;  %v11246_v29 = vld [vmem:[%s19677_s1 + $0xf0] sm:$0xff]  ;;  %v11229_v34 = vld [vmem:[%s19677_s1 + $0x68] sm:$0xff]  ;;  %1378 = vmatpush.bf16.msra.mxu0 %v11222_v3  ;;  %v11240_v61 = vld [vmem:[%s19677_s1 + $0xc0] sm:$0xff] }
 0x11a   :  { %v368_v20 = vrot.slane %v19678_v2, 7  ;;  %v12570_v28 = vunpack.c.l.b16 %v674_v26  ;;  %v12572_v4 = vunpack.c.l.b16 %v688_v42  ;;  %v802_v10 = vrot.slane %v800_v19, 5  ;;  %v11221_v26 = vld [vmem:[%s19677_s1 + $0x28] sm:$0xff]  ;;  %1525 = vmatpush.bf16.msra.mxu3 %v11246_v29 }
 0x11b   :  { %v935_v1 = vpack.c.b16 %v19337_v30, %v880_v14  ;;  %v797_v35 = vor.u32 %v796_v31, %v793_v54  ;;  %v11245_v54 = vld [vmem:[%s19677_s1 + $0xe8] sm:$0xff]  ;;  %v754_v3 = vrot.slane %v12171_v15, 5  ;;  %v11244_v31 = vld [vmem:[%s19677_s1 + $0xe0] sm:$0xff]  ;;  %v734_v29 = vrot.slane %v12252_v53, 5 }
 0x11c   :  { %19679 = vst [vmem:[#allocation30_spill] sm:$0xff] %v12570_v28  ;;  %v855_v18 = vpack.c.b16 %v12572_v4, %v12570_v28  ;;  %v371_v6 = vor.u32 %v369_v52, %v368_v20  ;;  %1428 = vmatpush.bf16.msra.mxu1 %v11229_v34  ;;  %v11220_v52 = vld [vmem:[%s19677_s1 + $0x20] sm:$0xff]  ;;  %v10314_v20 = vrot.slane %v12250_v37, 9  ;;  %v10316_v37 = vrot.slane %v12369_v47, 9 }
 0x11d   :  { %19680 = vst [vmem:[#allocation31_spill] sm:$0xff] %v12572_v4  ;;  %946 = vrot.lane.b32.xlu0 %v935_v1, %s11961_s24  ;;  %v798_v63 = vrot.slane %v797_v35, 4  ;;  %1379 = vmatpush.bf16.msra.mxu0 %v11221_v26  ;;  %v10315_v1 = vrot.slane %v12263_v8, 9  ;;  %v742_v15 = vrot.slane %v12371_v33, 5  ;;  %v726_v34 = vrot.slane %v12194_v32, 5 }
 0x11e   :  { %869 = vrot.lane.b32.xlu2 %v855_v18, %s11961_s24  ;;  %v408_v42 = vsel %vm12130_vm2, 0, %v371_v6  ;;  %1526 = vmatpush.bf16.msra.mxu3 %v11245_v54  ;;  %v758_v18 = vrot.slane %v12204_v46, 5  ;;  %v902_v26 = vpack.c.b16 %v12445_v5, %v12490_v11  ;;  %v12621_v53 = vsel %vm12525_vm11, %v10314_v20, %v734_v29 }
 0x11f   :  { %v803_v2 = vsel %vm12157_vm8, %v798_v63, %v802_v10  ;;  %v738_v10 = vrot.slane %v12273_v16, 5  ;;  %v12625_v8 = vsel %vm12134_vm5, %v408_v42, 0  ;;  %v11227_v16 = vld [vmem:[%s19677_s1 + $0x58] sm:$0xff]  ;;  %v12634_v46 = vsel %vm12525_vm11, %v10316_v37, %v742_v15 }
 0x120   :  { %v12593_v19 = vunpack.c.l.b16 %v803_v2  ;;  %1429 = vmatpush.bf16.msra.mxu1 %v11228_v58  ;;  %v10319_v47 = vrot.slane %v12185_v23, 9  ;;  %v730_v33 = vrot.slane %v12222_v0, 5  ;;  %v878_v6 = vunpack.c.l.b16 %v12634_v46 }
 0x121   :  { %1380 = vmatpush.bf16.msra.mxu0 %v11220_v52  ;;  %v739_v32 = vsel %vm12525_vm11, %v10315_v1, %v738_v10  ;;  %v10320_v54 = vrot.slane %v12214_v59, 9  ;;  %v10312_v2 = vrot.slane %v12181_v22, 9  ;;  %v10313_v58 = vrot.slane %v12218_v60, 9  ;;  %v11226_v60 = vld [vmem:[%s19677_s1 + $0x50] sm:$0xff] }
 0x122   :  { %v958_v35 = vpack.c.b16 %v12187_v25, %v12593_v19  ;;  %1527 = vmatpush.bf16.msra.mxu3 %v11244_v31  ;;  %v877_v63 = vunpack.c.l.b16 %v739_v32  ;;  %v10321_v52 = vrot.slane %v12296_v48, 9  ;;  %v762_v23 = vrot.slane %v12300_v51, 5 }
 0x123   :  { %v12647_v0 = vunpack.c.l.b16 %v12625_v8  ;;  %v12655_v59 = vsel %vm12525_vm11, %v10319_v47, %v754_v3  ;;  %v759_v22 = vsel %vm12525_vm11, %v10320_v54, %v758_v18  ;;  %v10317_v48 = vrot.slane %v12411_v49, 9 }
 0x124   :  { %v12651_v20 = vpack.c.b16 %v878_v6, %v877_v63  ;;  %1430 = vmatpush.bf16.msra.mxu1 %v11227_v16  ;;  %v746_v51 = vrot.slane %v12413_v9, 5  ;;  %v763_v42 = vsel %vm12525_vm11, %v10321_v52, %v762_v23  ;;  %v882_v31 = vunpack.c.l.b16 %v759_v22  ;;  %v11218_v22 = vld [vmem:[%s19677_s1 + $0x10] sm:$0xff] }
 0x125   :  { %960 = vrot.lane.b32.xlu0 %v958_v35, %s11961_s24  ;;  %19681 = vst [vmem:[#allocation32_spill] sm:$0xff] %v12647_v0  ;;  %v876_v29 = vunpack.c.l.b16 %v12621_v53  ;;  %v883_v3 = vunpack.c.l.b16 %v763_v42  ;;  %v10322_v1 = vrot.slane %v12314_v7, 9  ;;  %v766_v35 = vrot.slane %v12318_v13, 5  ;;  %v11219_v13 = vld [vmem:[%s19677_s1 + $0x18] sm:$0xff]  ;;  %v19695_v23 = vld [vmem:[#allocation12_spill] sm:$0xff] }
 0x126   :  { %916 = vrot.lane.b32.xlu2 %v902_v26, %s11961_s24  ;;  %v747_v10 = vsel %vm12525_vm11, %v10317_v48, %v746_v51  ;;  %v881_v37 = vunpack.c.l.b16 %v12655_v59  ;;  %v10323_v49 = vrot.slane %v12501_v44, 9  ;;  %v770_v9 = vrot.slane %v12506_v39, 5  ;;  %v11225_v44 = vld [vmem:[%s19677_s1 + $0x48] sm:$0xff]  ;;  %v11243_v39 = vld [vmem:[%s19677_s1 + $0xd8] sm:$0xff]  ;;  %1381 = vmatpush.bf16.msra.mxu0 %v11219_v13  ;;  %v158_v53 = vld [vmem:[%s19691_s25 + $0x10] sm:$0xff] }
 0x127   :  { %v903_v15 = vpack.c.b16 %v12647_v0, %v12449_v40  ;;  %v12676_v18 = vpack.c.b16 %v883_v3, %v882_v31  ;;  %v767_v26 = vsel %vm12525_vm11, %v10322_v1, %v766_v35  ;;  %v12682_v7 = vpack.c.b16 %v877_v63, %v876_v29  ;;  %1528 = vmatpush.bf16.msra.mxu3 %v11243_v39  ;;  %v19683_v39 = vld [vmem:[#allocation5_spill] sm:$0xff] }
 0x128   :  { %1431 = vmatpush.bf16.msra.mxu1 %v11226_v60  ;;  %v771_v16 = vsel %vm12525_vm11, %v10323_v49, %v770_v9  ;;  %v884_v32 = vunpack.c.l.b16 %v767_v26  ;;  %v12697_v47 = vpack.c.b16 %v882_v31, %v881_v37  ;;  %v12703_v54 = vsel %vm12525_vm11, %v10313_v58, %v730_v33  ;;  %v11242_v58 = vld [vmem:[%s19677_s1 + $0xd0] sm:$0xff]  ;;  %v11241_v9 = vld [vmem:[%s19677_s1 + $0xc8] sm:$0xff] }
 0x129   :  { %v885_v52 = vunpack.c.l.b16 %v771_v16  ;;  %v829_v60 = vpack.c.b16 %v12404_v41, %v12398_v45  ;;  %v727_v33 = vsel %vm12525_vm11, %v10312_v2, %v726_v34  ;;  %v10324_v42 = vrot.slane %v12455_v56, 9 }
 0x12a   :  { %v12713_v48 = vpack.c.b16 %v884_v32, %v883_v3  ;;  %v774_v31 = vrot.slane %v12459_v50, 5  ;;  %v875_v1 = vunpack.c.l.b16 %v12703_v54  ;;  %v11224_v3 = vld [vmem:[%s19677_s1 + $0x40] sm:$0xff]  ;;  %v879_v35 = vunpack.c.l.b16 %v747_v10  ;;  %1382 = vmatpush.bf16.msra.mxu0 %v11218_v22  ;;  %v11217_v50 = vld [vmem:[%s19677_s1 + $0x8] sm:$0xff] }
 0x12b   :  { %v12720_v51 = vpack.c.b16 %v885_v52, %v884_v32  ;;  %v874_v2 = vunpack.c.l.b16 %v727_v33  ;;  %1529 = vmatpush.bf16.msra.mxu3 %v11242_v58  ;;  %v833_v13 = vpack.c.b16 %v12449_v40, %v12445_v5  ;;  %v10311_v46 = vrot.slane %v19683_v39, 9  ;;  %v19685_v32 = vld [vmem:[#allocation25_spill] sm:$0xff]  ;;  %v19687_v58 = vld [vmem:[#allocation24_spill] sm:$0xff]  ;;  %v11236_v54 = vld [vmem:[%s19677_s1 + $0xa0] sm:$0xff] }
 0x12c   :  { %1432 = vmatpush.bf16.msra.mxu1 %v11225_v44  ;;  %v775_v34 = vsel %vm12525_vm11, %v10324_v42, %v774_v31  ;;  %v12740_v10 = vpack.c.b16 %v879_v35, %v878_v6  ;;  %v12746_v26 = vpack.c.b16 %v880_v14, %v879_v35  ;;  %v11216_v44 = vld [vmem:[%s19677_s1] sm:$0xff]  ;;  %v10325_v14 = vrot.slane %v12463_v12, 9 }
 0x12d   :  { %v886_v49 = vunpack.c.l.b16 %v775_v34  ;;  %v932_v56 = vpack.c.b16 %v875_v1, %v874_v2  ;;  %v19684_v6 = vld [vmem:[#allocation6_spill] sm:$0xff]  ;;  %v785_v34 = vunpack.c.h.b16 %v12625_v8 }
 0x12e   :  { %918 = vrot.lane.b32.xlu2 %v903_v15, %s11961_s24  ;;  %1383 = vmatpush.bf16.msra.mxu0 %v11217_v50  ;;  %v722_v16 = vrot.slane %v19684_v6, 5 }
 0x12f   :  { %v12742_v15 = vpack.c.b16 %v886_v49, %v885_v52  ;;  %1530 = vmatpush.bf16.msra.mxu3 %v11241_v9  ;;  %v778_v52 = vrot.slane %v19685_v32, 5  ;;  %v12787_v39 = vpack.c.b16 %v785_v34, %v785_v34  ;;  %v19696_v34 = vld [vmem:[#allocation14_spill] sm:$0xff] }
 0x130   :  { %1433 = vmatpush.bf16.msra.mxu1 %v11224_v3  ;;  %v12772_v3 = vpack.c.b16 %v12647_v0, %v12647_v0  ;;  %v723_v12 = vsel %vm12525_vm11, %v10311_v46, %v722_v16 }
 0x131   :  { %19682 = vst [vmem:[#allocation33_spill] sm:$0xff] %v12742_v15  ;;  %v12763_v22 = vsel %vm12525_vm11, %v10325_v14, %v778_v52  ;;  %v12783_v50 = vunpack.c.l.b16 %v723_v12 }
 0x132   :  { %19686 = vst [vmem:[#allocation5_spill] sm:$0xff] %v12763_v22  ;;  %1384 = vmatpush.bf16.msra.mxu0 %v11216_v44  ;;  %v19336_v33 = vunpack.c.l.b16 %v12763_v22  ;;  %v805_v9 = vshrl.u32 %v12772_v3, 16  ;;  %v808_v44 = vshll.u32 %v12772_v3, 16 }
 0x133   :  { %1531 = vmatpush.bf16.msra.mxu3 %v11240_v61  ;;  %19688 = vst [vmem:[#allocation6_spill] sm:$0xff] %v12783_v50  ;;  %v888_v46 = vpack.c.b16 %v874_v2, %v12783_v50  ;;  %v814_v61 = vshll.u32 %v12787_v39, 16  ;;  %v156_v2 = vld [vmem:[%s19691_s25] sm:$0xff] }
 0x134   :  { %v12778_v35 = vpack.c.b16 %v19336_v33, %v886_v49  ;;  %v807_v6 = vrot.slane %v805_v9, 4  ;;  %v810_v14 = vrot.slane %v808_v44, 5  ;;  %v19692_v9 = vld [vmem:[#allocation28_spill] sm:$0xff] }
 0x135   :  { %v12794_v12 = vrot.slane %v814_v61, 5  ;;  %v11238_v61 = vld [vmem:[%s19677_s1 + $0xb0] sm:$0xff] }
 0x136   :  { %940 = vrot.lane.b32.xlu2 %v932_v56, %s11961_s24  ;;  %v12781_v56 = vpop.permute.xlu2 %912  ;;  %v811_v49 = vor.u32 %v810_v14, %v807_v6  ;;  %v11239_v6 = vld [vmem:[%s19677_s1 + $0xb8] sm:$0xff]  ;;  %v19693_v14 = vld [vmem:[#allocation4_spill] sm:$0xff] }
 0x137   :  { %19690 = vst [vmem:[#allocation24_spill] sm:$0xff] %v12794_v12  ;;  %1475 = vmatpush.bf16.msra.mxu2 %v11239_v6 }
 0x138   :  { %v12792_v52 = vrot.slane %v811_v49, 4 }
 0x13a   :  { %19689 = vst [vmem:[#allocation25_spill] sm:$0xff] %v12792_v52  ;;  %v11255_v52 = vld [vmem:[%s19724_s6 + $0x18] sm:$0xff] }
 0x13b   :  { %1476 = vmatpush.bf16.msra.mxu2 %v11238_v61 }
 0x13e   :  { %v907_v32 = vpop.permute.xlu2 %906 }
 0x143   :  { %v905_v16 = vpop.permute.xlu1 %904 }
 0x144   :  { %v1001_v8 = vsel %vm966_vm12, %v888_v46, %v905_v16  ;;  %v19694_v46 = vld [vmem:[#allocation9_spill] sm:$0xff] }
 0x145   :  { %1434 = vmatmul.bf16.vlgmr.msra.gmra.mxu1 %v1001_v8  ;;  %v826_v16 = vpack.c.b16 %v19694_v46, %v19693_v14  ;;  %v12823_v46 = vpack.c.b16 %v876_v29, %v875_v1 }
 0x146   :  { %v12813_v8 = vpop.permute.xlu2 %914 }
 0x147   :  { %v1005_v6 = vsel %vm966_vm12, %v12823_v46, %v907_v32  ;;  %v159_v32 = vld [vmem:[%s19691_s25 + $0x18] sm:$0xff]  ;;  %v1021_v45 = vsel %vm966_vm12, %v12676_v18, %v12813_v8 }
 0x14c   :  { %164 = vxpose.xlu1.b32.start [1/8] (short) (narrow) %v156_v2, 64  ;;  %v858_v49 = vpop.permute.xlu1 %857  ;;  %v157_v2 = vld [vmem:[%s19691_s25 + $0x8] sm:$0xff] }
 0x14d   :  { %v969_v31 = vsel %vm966_vm12, %v826_v16, %v858_v49  ;;  %v827_v16 = vpack.c.b16 %v19696_v34, %v19695_v23  ;;  %v11235_v23 = vld [vmem:[%s19677_s1 + $0x98] sm:$0xff]  ;;  %v11234_v34 = vld [vmem:[%s19677_s1 + $0x90] sm:$0xff] }
 0x14e   :  { %1385 = vmatmul.bf16.vlgmr.msra.gmra.mxu0 %v969_v31  ;;  %v11237_v31 = vld [vmem:[%s19677_s1 + $0xa8] sm:$0xff] }
 0x14f   :  { %1477 = vmatpush.bf16.msra.mxu2 %v11237_v31  ;;  %v11232_v31 = vld [vmem:[%s19677_s1 + $0x80] sm:$0xff] }
 0x153   :  { %1478 = vmatpush.bf16.msra.mxu2 %v11236_v54 }
 0x154   :  { %165 = vxpose.xlu1.b32.cont [2/8] (short) (narrow) %v157_v2, 64 }
 0x155   :  { %1439 = vmatmul.bf16.gmra.mxu1 %v1005_v6  ;;  %v866_v2 = vpop.permute.xlu1 %865  ;;  %v11233_v6 = vld [vmem:[%s19677_s1 + $0x88] sm:$0xff] }
 0x157   :  { %1479 = vmatpush.bf16.msra.mxu2 %v11235_v23  ;;  %v19697_v23 = vld [vmem:[#allocation15_spill] sm:$0xff] }
 0x158   :  { %v860_v49 = vpop.permute.xlu2 %859 }
 0x159   :  { %v973_v29 = vsel %vm966_vm12, %v827_v16, %v860_v49  ;;  %v160_v16 = vld [vmem:[%s19691_s25 + $0x20] sm:$0xff] }
 0x15a   :  { %1532 = vmatmul.bf16.vlgmr.msra.gmra.mxu3 %v973_v29 }
 0x15b   :  { %1480 = vmatpush.bf16.msra.mxu2 %v11234_v34 }
 0x15c   :  { %166 = vxpose.xlu1.b32.cont [3/8] (short) (narrow) %v158_v53, 64 }
 0x15e   :  { %1390 = vmatmul.bf16.gmra.mxu0 %v973_v29  ;;  %v161_v29 = vld [vmem:[%s19691_s25 + $0x28] sm:$0xff] }
 0x15f   :  { %1481 = vmatpush.bf16.msra.mxu2 %v11233_v6 }
 0x160   :  { %v909_v1 = vpop.permute.xlu2 %908 }
 0x161   :  { %v1009_v61 = vsel %vm966_vm12, %v12651_v20, %v909_v1  ;;  %v19698_v1 = vld [vmem:[#allocation21_spill] sm:$0xff] }
 0x163   :  { %1482 = vmatpush.bf16.msra.mxu2 %v11232_v31 }
 0x164   :  { %167 = vxpose.xlu1.b32.cont [4/8] (short) (narrow) %v159_v32, 64  ;;  %v828_v32 = vpack.c.b16 %v19698_v1, %v19697_v23 }
 0x165   :  { %1444 = vmatmul.bf16.gmra.mxu1 %v1009_v61 }
 0x167   :  { %v868_v53 = vpop.permute.xlu1 %867 }
 0x168   :  { %v911_v49 = vpop.permute.xlu2 %910 }
 0x169   :  { %v1013_v54 = vsel %vm966_vm12, %v12746_v26, %v911_v49  ;;  %v163_v49 = vld [vmem:[%s19691_s25 + $0x38] sm:$0xff] }
 0x16c   :  { %168 = vxpose.xlu1.b32.cont [5/8] (short) (narrow) %v160_v16, 64  ;;  %v162_v16 = vld [vmem:[%s19691_s25 + $0x30] sm:$0xff] }
 0x174   :  { %169 = vxpose.xlu1.b32.cont [6/8] (short) (narrow) %v161_v29, 64  ;;  %v892_v29 = vpack.c.b16 %v881_v37, %v12783_v50 }
 0x175   :  { %1449 = vmatmul.bf16.gmra.mxu1 %v1013_v54 }
 0x176   :  { %v1017_v54 = vsel %vm966_vm12, %v892_v29, %v12781_v56  ;;  %v19701_v56 = vld [vmem:[#allocation23_spill] sm:$0xff] }
 0x177   :  { %v956_v29 = vpack.c.b16 %v19693_v14, %v19701_v56 }
 0x178   :  { %v870_v34 = vpop.permute.xlu2 %869  ;;  %v862_v61 = vpop.permute.xlu1 %861 }
 0x179   :  { %v977_v6 = vsel %vm966_vm12, %v828_v32, %v862_v61 }
 0x17a   :  { %1537 = vmatmul.bf16.gmra.mxu3 %v977_v6  ;;  %1395 = vmatmul.bf16.gmra.mxu0 %v977_v6  ;;  %v19699_v6 = vld [vmem:[#allocation13_spill] sm:$0xff] }
 0x17c   :  { %170 = vxpose.xlu1.b32.cont [7/8] (short) (narrow) %v162_v16, 64  ;;  %v19700_v16 = vld [vmem:[#allocation22_spill] sm:$0xff] }
 0x17d   :  { %v922_v33 = vpack.c.b16 %v19700_v16, %v19699_v6  ;;  %v19703_v6 = vld [vmem:[#allocation11_spill] sm:$0xff]  ;;  %v19704_v16 = vld [vmem:[#allocation16_spill] sm:$0xff] }
 0x180   :  { %v917_v31 = vpop.permute.xlu2 %916 }
 0x184   :  { %171 = vxpose.xlu1.b32.end [8/8] (short) (narrow) %v163_v49, 64 }
 0x185   :  { %1454 = vmatmul.bf16.gmra.mxu1 %v1017_v54  ;;  %v19702_v54 = vld [vmem:[#allocation8_spill] sm:$0xff] }
 0x186   :  { %v872_v23 = vpop.permute.xlu0 %871 }
 0x188   :  { %v919_v1 = vpop.permute.xlu2 %918 }
 0x189   :  { %v864_v32 = vpop.permute.xlu1 %863  ;;  %v1029_v56 = vsel %vm966_vm12, %v12778_v35, %v919_v1  ;;  %v997_v1 = vsel %vm966_vm12, %v833_v13, %v872_v23 }
 0x18a   :  { %v981_v61 = vsel %vm966_vm12, %v829_v60, %v864_v32  ;;  %v830_v32 = vpack.c.b16 %v19702_v54, %v19693_v14 }
 0x18b   :  { %1542 = vmatmul.bf16.gmra.mxu3 %v981_v61  ;;  %1400 = vmatmul.bf16.gmra.mxu0 %v981_v61 }
 0x18c   :  { %v985_v61 = vsel %vm966_vm12, %v830_v32, %v866_v2  ;;  %v11250_v2 = vld [vmem:[%s19677_s1 + $0x110] sm:$0xff] }
 0x18f   :  { %v12884_v59 = vpop.permute.xlu0 %946 }
 0x190   :  { %v941_v37 = vpop.permute.xlu2 %940 }
 0x191   :  { %v1033_v49 = vsel %vm966_vm12, %v922_v33, %v941_v37  ;;  %v1025_v33 = vsel %vm966_vm12, %v12720_v51, %v917_v31  ;;  %v831_v37 = vpack.c.b16 %v19704_v16, %v19703_v6  ;;  %v11249_v31 = vld [vmem:[%s19677_s1 + $0x108] sm:$0xff] }
 0x192   :  { %1483 = vmatmul.bf16.vlgmr.msra.gmra.mxu2 %v1033_v49  ;;  %v11251_v49 = vld [vmem:[%s19677_s1 + $0x118] sm:$0xff] }
 0x193   :  { %v989_v8 = vsel %vm966_vm12, %v831_v37, %v868_v53  ;;  %1577 = vmatpush.bf16.msrb.mxu0 %v11251_v49  ;;  %v11248_v53 = vld [vmem:[%s19677_s1 + $0x100] sm:$0xff] }
 0x195   :  { %1459 = vmatmul.bf16.gmra.mxu1 %v1021_v45 }
 0x197   :  { %v961_v41 = vpop.permute.xlu0 %960  ;;  %1578 = vmatpush.bf16.msrb.mxu0 %v11250_v2 }
 0x198   :  { %v1065_v60 = vsel %vm966_vm12, %v956_v29, %v961_v41  ;;  %v19705_v29 = vld [vmem:[#allocation18_spill] sm:$0xff] }
 0x199   :  { %v832_v45 = vpack.c.b16 %v12490_v11, %v19705_v29 }
 0x19b   :  { %1547 = vmatmul.bf16.gmra.mxu3 %v1065_v60  ;;  %1405 = vmatmul.bf16.gmra.mxu0 %v985_v61  ;;  %v993_v41 = vsel %vm966_vm12, %v832_v45, %v870_v34 }
 0x19c   :  { %1579 = vmatpush.bf16.msrb.mxu0 %v11249_v31 }
 0x1a0   :  { %1580 = vmatpush.bf16.msrb.mxu0 %v11248_v53 }
 0x1a5   :  { %1464 = vmatmul.bf16.gmra.mxu1 %v1025_v33 }
 0x1ab   :  { %1552 = vmatmul.bf16.gmra.mxu3 %v989_v8  ;;  %1410 = vmatmul.bf16.gmra.mxu0 %v989_v8 }
 0x1b5   :  { %1469 = vmatmul.bf16.gmra.mxu1 %v1029_v56 }
 0x1bb   :  { %1557 = vmatmul.bf16.gmra.mxu3 %v993_v41  ;;  %1415 = vmatmul.bf16.gmra.mxu0 %v993_v41 }
 0x1c2   :  { %v1435_v60 = vpop.f32.mrf.mxu1 }
 0x1ca   :  { %v12922_v54 = vpop.f32.mrf.mxu1 }
 0x1cb   :  { %19706 = vst [vmem:[#allocation28_spill] sm:$0xff] %v12922_v54  ;;  %1562 = vmatmul.bf16.gmra.mxu3 %v997_v1  ;;  %1420 = vmatmul.bf16.gmra.mxu0 %v997_v1  ;;  %v1386_v32 = vpop.f32.mrf.mxu0 }
 0x1cc   :  { %v12924_v61 = vadd.f32 %v1435_v60, %v1386_v32 }
 0x1d2   :  { %v1440_v33 = vpop.f32.mrf.mxu1 }
 0x1d3   :  { %v12926_v11 = vpop.f32.mrf.mxu0 }
 0x1d4   :  { %19707 = vst [vmem:[#allocation9_spill] sm:$0xff] %v12926_v11 }
 0x1da   :  { %v12928_v6 = vpop.f32.mrf.mxu1 }
 0x1db   :  { %19708 = vst [vmem:[#allocation12_spill] sm:$0xff] %v12928_v6  ;;  %10472 = vmatmul.msk.bf16.vlgmr.msrb.gmra.mxu0 %vm966_vm12, %v12823_v46  ;;  %v1391_v34 = vpop.f32.mrf.mxu0 }
 0x1dc   :  { %v12932_v16 = vadd.f32 %v1440_v33, %v1391_v34 }
 0x1e2   :  { %v1445_v5 = vpop.f32.mrf.mxu1 }
 0x1e3   :  { %v12936_v40 = vpop.f32.mrf.mxu0 }
 0x1e4   :  { %19709 = vst [vmem:[#allocation14_spill] sm:$0xff] %v12936_v40 }
 0x1ea   :  { %v12938_v13 = vpop.f32.mrf.mxu1 }
 0x1eb   :  { %10473 = vmatmul.msk.bf16.gmra.mxu0 %vm966_vm12, %v12651_v20  ;;  %19710 = vst [vmem:[#allocation15_spill] sm:$0xff] %v12938_v13 }
 0x1f0   :  { %v180_v23 = vpop.trf.xlu1 }
 0x1f1   :  { %v1678_v37 = vpack.c.bf16 %v180_v23, %v180_v23 }
 0x1f2   :  { %v1450_v53 = vpop.f32.mrf.mxu1 }
 0x1f3   :  { %v1695_v8 = vshrl.u32 %v1678_v37, 16  ;;  %v1698_v2 = vshll.u32 %v1678_v37, 16 }
 0x1f5   :  { %v1697_v49 = vrot.slane %v1695_v8, 7 }
 0x1f7   :  { %v1700_v31 = vor.u32 %v1698_v2, %v1697_v49  ;;  %v1396_v56 = vpop.f32.mrf.mxu0 }
 0x1f8   :  { %v181_v46 = vpop.trf.xlu1  ;;  %v12940_v29 = vadd.f32 %v1445_v5, %v1396_v56 }
 0x1f9   :  { %v1822_v45 = vsel %vm12130_vm2, 0, %v1700_v31  ;;  %v1679_v41 = vpack.c.bf16 %v181_v46, %v181_v46 }
 0x1fa   :  { %v1838_v20 = vsel %vm12134_vm5, %v1822_v45, 0  ;;  %v12962_v46 = vpop.f32.mrf.mxu1 }
 0x1fb   :  { %v12946_v60 = vunpack.c.l.b16 %v1838_v20  ;;  %v1869_v1 = vunpack.c.h.b16 %v1838_v20  ;;  %v1702_v32 = vshrl.u32 %v1679_v41, 16  ;;  %10474 = vmatmul.msk.bf16.gmra.mxu0 %vm966_vm12, %v12746_v26  ;;  %v1705_v5 = vshll.u32 %v1679_v41, 16  ;;  %19712 = vst [vmem:[#allocation13_spill] sm:$0xff] %v12962_v46 }
 0x1fd   :  { %v12952_v33 = vpack.c.b16 %v12946_v60, %v12946_v60  ;;  %v1704_v34 = vrot.slane %v1702_v32, 7  ;;  %v12954_v23 = vpack.c.b16 %v1869_v1, %v1869_v1 }
 0x1ff   :  { %v1707_v37 = vor.u32 %v1705_v5, %v1704_v34  ;;  %v12956_v8 = vpop.f32.mrf.mxu0  ;;  %v1925_v49 = vshrl.u32 %v12952_v33, 16  ;;  %v1928_v2 = vshll.u32 %v12952_v33, 16  ;;  %v1934_v1 = vshll.u32 %v12954_v23, 16 }
 0x200   :  { %19711 = vst [vmem:[#allocation21_spill] sm:$0xff] %v12956_v8  ;;  %v182_v31 = vpop.trf.xlu1 }
 0x201   :  { %v1823_v56 = vsel %vm12130_vm2, 0, %v1707_v37  ;;  %v1680_v26 = vpack.c.bf16 %v182_v31, %v182_v31  ;;  %v1927_v45 = vrot.slane %v1925_v49, 4  ;;  %v1930_v20 = vrot.slane %v1928_v2, 5 }
 0x202   :  { %v1839_v41 = vsel %vm12134_vm5, %v1823_v56, 0  ;;  %v1936_v63 = vrot.slane %v1934_v1, 5 }
 0x203   :  { %v12967_v32 = vunpack.c.l.b16 %v1839_v41  ;;  %v1709_v34 = vshrl.u32 %v1680_v26, 16  ;;  %v1931_v5 = vor.u32 %v1930_v20, %v1927_v45  ;;  %v1712_v37 = vshll.u32 %v1680_v26, 16 }
 0x204   :  { %v19713_v45 = vunpack.c.l.b16 %v12554_v17  ;;  %v1871_v8 = vunpack.c.h.b16 %v1839_v41 }
 0x205   :  { %v12971_v44 = vpack.c.b16 %v12967_v32, %v12967_v32  ;;  %v1711_v42 = vrot.slane %v1709_v34, 7  ;;  %v1932_v31 = vrot.slane %v1931_v5, 4 }
 0x206   :  { %v964_v20 = vpack.c.b16 %v12783_v50, %v19713_v45  ;;  %v12993_v45 = vpack.c.b16 %v1871_v8, %v1871_v8 }
 0x207   :  { %v1714_v30 = vor.u32 %v1712_v37, %v1711_v42  ;;  %v1939_v49 = vshrl.u32 %v12971_v44, 16  ;;  %v1942_v2 = vshll.u32 %v12971_v44, 16  ;;  %v1937_v13 = vsel %vm12157_vm8, %v1932_v31, %v1936_v63  ;;  %v1455_v63 = vpop.f32.mrf.mxu1 }
 0x208   :  { %v183_v56 = vpop.trf.xlu1  ;;  %v1401_v46 = vpop.f32.mrf.mxu0  ;;  %v12984_v42 = vunpack.c.l.b16 %v1937_v13 }
 0x209   :  { %v1824_v26 = vsel %vm12130_vm2, 0, %v1714_v30  ;;  %v12982_v34 = vadd.f32 %v1450_v53, %v1401_v46  ;;  %v1941_v17 = vrot.slane %v1939_v49, 4  ;;  %v1944_v31 = vrot.slane %v1942_v2, 5 }
 0x20a   :  { %19714 = vst [vmem:[#allocation22_spill] sm:$0xff] %v12984_v42  ;;  %v1840_v1 = vsel %vm12134_vm5, %v1824_v26, 0  ;;  %v2244_v41 = vpack.c.b16 %v12984_v42, %v12187_v25  ;;  %v1948_v26 = vshll.u32 %v12993_v45, 16  ;;  %v1681_v54 = vpack.c.bf16 %v183_v56, %v183_v56 }
 0x20b   :  { %v12988_v5 = vunpack.c.l.b16 %v1840_v1  ;;  %v1873_v37 = vunpack.c.h.b16 %v1840_v1  ;;  %10475 = vmatmul.msk.bf16.gmra.mxu0 %vm966_vm12, %v964_v20  ;;  %v1945_v53 = vor.u32 %v1944_v31, %v1941_v17 }
 0x20c   :  { %2252 = vrot.lane.b32.xlu2 %v2244_v41, %s11961_s24  ;;  %v1950_v17 = vrot.slane %v1948_v26, 5 }
 0x20d   :  { %v12997_v30 = vpack.c.b16 %v12988_v5, %v12988_v5  ;;  %v12999_v13 = vpack.c.b16 %v1873_v37, %v1873_v37  ;;  %v1946_v40 = vrot.slane %v1945_v53, 4 }
 0x20f   :  { %v1953_v46 = vshrl.u32 %v12997_v30, 16  ;;  %v1956_v20 = vshll.u32 %v12997_v30, 16  ;;  %v1962_v6 = vshll.u32 %v12999_v13, 16  ;;  %v13008_v41 = vpop.f32.mrf.mxu1 }
 0x210   :  { %v184_v49 = vpop.trf.xlu1  ;;  %v13004_v2 = vpop.f32.mrf.mxu0  ;;  %19716 = vst [vmem:[#allocation8_spill] sm:$0xff] %v13008_v41 }
 0x211   :  { %19715 = vst [vmem:[#allocation23_spill] sm:$0xff] %v13004_v2  ;;  %v1955_v8 = vrot.slane %v1953_v46, 4  ;;  %v1958_v1 = vrot.slane %v1956_v20, 5  ;;  %v1682_v11 = vpack.c.bf16 %v184_v49, %v184_v49  ;;  %v1964_v4 = vrot.slane %v1962_v6, 5 }
 0x212   :  { %v1951_v46 = vsel %vm12157_vm8, %v1946_v40, %v1950_v17  ;;  %v1716_v20 = vshrl.u32 %v1681_v54, 16  ;;  %v1719_v6 = vshll.u32 %v1681_v54, 16 }
 0x213   :  { %v1959_v37 = vor.u32 %v1958_v1, %v1955_v8  ;;  %v1723_v8 = vshrl.u32 %v1682_v11, 16 }
 0x214   :  { %942 = vrot.lane.b32.xlu2 %v12682_v7, %s11961_s24  ;;  %v1718_v17 = vrot.slane %v1716_v20, 7 }
 0x215   :  { %v1484_v0 = vpop.f32.mrf.mxu2  ;;  %v1960_v2 = vrot.slane %v1959_v37, 4  ;;  %v1725_v41 = vrot.slane %v1723_v8, 7 }
 0x216   :  { %v13011_v31 = vadd.f32 %v1484_v0, %v12924_v61  ;;  %v13023_v61 = vunpack.c.l.b16 %v1951_v46 }
 0x217   :  { %v1965_v49 = vsel %vm12157_vm8, %v1960_v2, %v1964_v4  ;;  %v1726_v4 = vshll.u32 %v1682_v11, 16 }
 0x218   :  { %v185_v53 = vpop.trf.xlu1  ;;  %v1406_v56 = vpop.f32.mrf.mxu0  ;;  %v13021_v0 = vunpack.c.l.b16 %v1965_v49  ;;  %19719 = vst [vmem:[#allocation18_spill] sm:$0xff] %v13023_v61  ;;  %v1721_v49 = vor.u32 %v1719_v6, %v1718_v17 }
 0x219   :  { %v1683_v1 = vpack.c.bf16 %v185_v53, %v185_v53  ;;  %v13019_v26 = vadd.f32 %v1455_v63, %v1406_v56  ;;  %v1460_v53 = vpop.f32.mrf.mxu1 }
 0x21a   :  { %19718 = vst [vmem:[#allocation16_spill] sm:$0xff] %v13021_v0  ;;  %v2245_v40 = vpack.c.b16 %v13021_v0, %v13023_v61 }
 0x21b   :  { %19717 = vst [vmem:[#allocation11_spill] sm:$0xff] %v13019_v26  ;;  %v1730_v7 = vshrl.u32 %v1683_v1, 16  ;;  %v1733_v37 = vshll.u32 %v1683_v1, 16  ;;  %10476 = vmatmul.msk.bf16.gmra.mxu0 %vm966_vm12, %v12676_v18  ;;  %v1728_v1 = vor.u32 %v1726_v4, %v1725_v41 }
 0x21c   :  { %2254 = vrot.lane.b32.xlu2 %v2245_v40, %s11961_s24 }
 0x21d   :  { %v1732_v2 = vrot.slane %v1730_v7, 7  ;;  %v1826_v40 = vsel %vm12130_vm2, 0, %v1728_v1 }
 0x21f   :  { %v1735_v63 = vor.u32 %v1733_v37, %v1732_v2  ;;  %v1825_v37 = vsel %vm12130_vm2, 0, %v1721_v49  ;;  %v1842_v49 = vsel %vm12134_vm5, %v1826_v40, 0 }
 0x220   :  { %v186_v56 = vpop.trf.xlu1  ;;  %v13030_v46 = vpop.f32.mrf.mxu0 }
 0x221   :  { %19720 = vst [vmem:[#allocation34_spill] sm:$0xff] %v13030_v46  ;;  %v1827_v18 = vsel %vm12130_vm2, 0, %v1735_v63  ;;  %v1684_v54 = vpack.c.bf16 %v186_v56, %v186_v56  ;;  %v1841_v56 = vsel %vm12134_vm5, %v1825_v37, 0 }
 0x222   :  { %v1843_v43 = vsel %vm12134_vm5, %v1827_v18, 0 }
 0x223   :  { %v13036_v20 = vunpack.c.l.b16 %v1843_v43  ;;  %v1879_v11 = vunpack.c.h.b16 %v1843_v43  ;;  %v1737_v8 = vshrl.u32 %v1684_v54, 16  ;;  %v1740_v7 = vshll.u32 %v1684_v54, 16  ;;  %v11259_v43 = vld [vmem:[%s19724_s6 + $0x38] sm:$0xff] }
 0x224   :  { %944 = vrot.lane.b32.xlu2 %v12740_v10, %s11961_s24  ;;  %2770 = vmatpush.bf16.msrb.mxu1 %v11259_v43  ;;  %v13072_v43 = vunpack.c.l.b16 %v1841_v56 }
 0x225   :  { %19721 = vst [vmem:[#allocation35_spill] sm:$0xff] %v13036_v20  ;;  %v13044_v41 = vpack.c.b16 %v13036_v20, %v13036_v20  ;;  %v1739_v6 = vrot.slane %v1737_v8, 7  ;;  %v13046_v17 = vpack.c.b16 %v1879_v11, %v1879_v11 }
 0x227   :  { %19722 = vst [vmem:[#allocation36_spill] sm:$0xff] %v13044_v41  ;;  %v1742_v4 = vor.u32 %v1740_v7, %v1739_v6  ;;  %v1995_v2 = vshrl.u32 %v13044_v41, 16  ;;  %v1998_v63 = vshll.u32 %v13044_v41, 16  ;;  %v13065_v7 = vpop.f32.mrf.mxu1  ;;  %v2004_v6 = vshll.u32 %v13046_v17, 16 }
 0x228   :  { %19723 = vst [vmem:[#allocation37_spill] sm:$0xff] %v13046_v17  ;;  %v1411_v1 = vpop.f32.mrf.mxu0 }
 0x229   :  { %v1828_v10 = vsel %vm12130_vm2, 0, %v1742_v4  ;;  %v13061_v18 = vadd.f32 %v1460_v53, %v1411_v1  ;;  %v1997_v54 = vrot.slane %v1995_v2, 4  ;;  %v2000_v11 = vrot.slane %v1998_v63, 5  ;;  %19726 = vst [vmem:[#allocation39_spill] sm:$0xff] %v13065_v7  ;;  %v11258_v4 = vld [vmem:[%s19724_s6 + $0x30] sm:$0xff] }
 0x22a   :  { %v1844_v8 = vsel %vm12134_vm5, %v1828_v10, 0  ;;  %v13074_v53 = vunpack.c.l.b16 %v1842_v49  ;;  %v10480_v2 = vrot.slane %v12952_v33, 9  ;;  %v2122_v63 = vrot.slane %v12954_v23, 5  ;;  %2771 = vmatpush.bf16.msrb.mxu1 %v11258_v4 }
 0x22b   :  { %19725 = vst [vmem:[#allocation38_spill] sm:$0xff] %v13061_v18  ;;  %v13068_v37 = vunpack.c.l.b16 %v1844_v8  ;;  %v1881_v46 = vunpack.c.h.b16 %v1844_v8  ;;  %10477 = vmatmul.msk.bf16.gmra.mxu0 %vm966_vm12, %v12720_v51  ;;  %v2001_v40 = vor.u32 %v2000_v11, %v1997_v54  ;;  %v1877_v1 = vunpack.c.h.b16 %v1842_v49  ;;  %v11257_v11 = vld [vmem:[%s19724_s6 + $0x28] sm:$0xff] }
 0x22c   :  { %v1875_v51 = vunpack.c.h.b16 %v1841_v56  ;;  %v2006_v54 = vrot.slane %v2004_v6, 5  ;;  %v13092_v7 = vsel %vm12525_vm11, %v10480_v2, %v2122_v63  ;;  %v13103_v56 = vpack.c.b16 %v13074_v53, %v13074_v53 }
 0x22d   :  { %19727 = vst [vmem:[#allocation40_spill] sm:$0xff] %v13068_v37  ;;  %v13083_v10 = vpack.c.b16 %v13068_v37, %v13068_v37  ;;  %v13085_v8 = vpack.c.b16 %v1881_v46, %v1881_v46  ;;  %v2002_v33 = vrot.slane %v2001_v40, 4  ;;  %v13099_v46 = vpack.c.b16 %v13072_v43, %v13072_v43 }
 0x22e   :  { %19730 = vst [vmem:[#allocation43_spill] sm:$0xff] %v13092_v7  ;;  %v13107_v4 = vpack.c.b16 %v1877_v1, %v1877_v1  ;;  %v13109_v63 = vpack.c.b16 %v1875_v51, %v1875_v51  ;;  %2772 = vmatpush.bf16.msrb.mxu1 %v11257_v11  ;;  %v11256_v51 = vld [vmem:[%s19724_s6 + $0x20] sm:$0xff] }
 0x22f   :  { %19728 = vst [vmem:[#allocation41_spill] sm:$0xff] %v13083_v10  ;;  %v2009_v23 = vshrl.u32 %v13083_v10, 16  ;;  %v2012_v49 = vshll.u32 %v13083_v10, 16  ;;  %v2018_v18 = vshll.u32 %v13085_v8, 16  ;;  %v2007_v28 = vsel %vm12157_vm8, %v2002_v33, %v2006_v54  ;;  %v1465_v41 = vpop.f32.mrf.mxu1 }
 0x230   :  { %19729 = vst [vmem:[#allocation42_spill] sm:$0xff] %v13085_v8  ;;  %v13105_v6 = vpop.f32.mrf.mxu0  ;;  %v1967_v12 = vshrl.u32 %v13099_v46, 16  ;;  %v1976_v1 = vshll.u32 %v13109_v63, 16  ;;  %v1990_v54 = vshll.u32 %v13107_v4, 16  ;;  %v13125_v33 = vunpack.c.l.b16 %v2007_v28 }
 0x231   :  { %19731 = vst [vmem:[#allocation44_spill] sm:$0xff] %v13103_v56  ;;  %v2011_v2 = vrot.slane %v2009_v23, 4  ;;  %v2014_v40 = vrot.slane %v2012_v49, 5  ;;  %v2020_v17 = vrot.slane %v2018_v18, 5  ;;  %v1981_v23 = vshrl.u32 %v13103_v56, 16 }
 0x232   :  { %19732 = vst [vmem:[#allocation45_spill] sm:$0xff] %v13105_v6  ;;  %v1970_v6 = vshll.u32 %v13099_v46, 16  ;;  %v1984_v49 = vshll.u32 %v13103_v56, 16  ;;  %v10481_v18 = vrot.slane %v12971_v44, 9  ;;  %2773 = vmatpush.bf16.msrb.mxu1 %v11256_v51  ;;  %v2126_v44 = vrot.slane %v12993_v45, 5 }
 0x233   :  { %19733 = vst [vmem:[#allocation46_spill] sm:$0xff] %v13107_v4  ;;  %v2015_v26 = vor.u32 %v2014_v40, %v2011_v2  ;;  %v1969_v2 = vrot.slane %v1967_v12, 4  ;;  %v1983_v36 = vrot.slane %v1981_v23, 4  ;;  %v19352_v23 = vunpack.c.l.b16 %v13092_v7 }
 0x234   :  { %19734 = vst [vmem:[#allocation47_spill] sm:$0xff] %v13125_v33  ;;  %v1972_v40 = vrot.slane %v1970_v6, 5  ;;  %v1986_v4 = vrot.slane %v1984_v49, 5  ;;  %v1978_v6 = vrot.slane %v1976_v1, 5  ;;  %v1992_v10 = vrot.slane %v1990_v54, 5  ;;  %v11254_v54 = vld [vmem:[%s19724_s6 + $0x10] sm:$0xff] }
 0x235   :  { %v2016_v11 = vrot.slane %v2015_v26, 4  ;;  %v11283_v26 = vld [vmem:[%s19724_s6 + $0xf8] sm:$0xff]  ;;  %v2127_v15 = vsel %vm12525_vm11, %v10481_v18, %v2126_v44  ;;  %v2223_v45 = vpack.c.b16 %v12988_v5, %v12967_v32  ;;  %v11282_v18 = vld [vmem:[%s19724_s6 + $0xf0] sm:$0xff] }
 0x236   :  { %v1973_v12 = vor.u32 %v1972_v40, %v1969_v2  ;;  %2917 = vmatpush.bf16.msra.mxu0 %v11283_v26  ;;  %v1987_v8 = vor.u32 %v1986_v4, %v1983_v36  ;;  %2774 = vmatpush.bf16.msrb.mxu1 %v11255_v52  ;;  %v10482_v4 = vrot.slane %v12997_v30, 9  ;;  %v10327_v40 = vrot.slane %v12772_v3, 9 }
 0x237   :  { %v2021_v56 = vsel %vm12157_vm8, %v2016_v11, %v2020_v17  ;;  %v13160_v49 = vpop.f32.mrf.mxu1 }
 0x238   :  { %v1416_v28 = vpop.f32.mrf.mxu0  ;;  %v13136_v22 = vunpack.c.l.b16 %v2021_v56  ;;  %v1974_v11 = vrot.slane %v1973_v12, 4  ;;  %v2269_v56 = vunpack.c.l.b16 %v2127_v15  ;;  %v1988_v1 = vrot.slane %v1987_v8, 4  ;;  %19737 = vst [vmem:[#allocation50_spill] sm:$0xff] %v13160_v49  ;;  %v11281_v12 = vld [vmem:[%s19724_s6 + $0xe8] sm:$0xff] }
 0x239   :  { %v13139_v51 = vadd.f32 %v1465_v41, %v1416_v28  ;;  %v2130_v15 = vrot.slane %v12999_v13, 5  ;;  %v11253_v28 = vld [vmem:[%s19724_s6 + $0x8] sm:$0xff] }
 0x23a   :  { %19735 = vst [vmem:[#allocation48_spill] sm:$0xff] %v13136_v22  ;;  %v2247_v17 = vpack.c.b16 %v13136_v22, %v13125_v33  ;;  %v1979_v36 = vsel %vm12157_vm8, %v1974_v11, %v1978_v6  ;;  %v13154_v41 = vpack.c.b16 %v2269_v56, %v19352_v23  ;;  %v1993_v52 = vsel %vm12157_vm8, %v1988_v1, %v1992_v10 }
 0x23b   :  { %19736 = vst [vmem:[#allocation49_spill] sm:$0xff] %v13139_v51  ;;  %10478 = vmatmul.msk.bf16.gmra.mxu0 %vm966_vm12, %v12778_v35  ;;  %v13162_v35 = vunpack.c.l.b16 %v1979_v36  ;;  %v13164_v8 = vunpack.c.l.b16 %v1993_v52  ;;  %v13174_v30 = vsel %vm12525_vm11, %v10482_v4, %v2130_v15  ;;  %v824_v10 = vrot.slane %v12787_v39, 5  ;;  %2775 = vmatpush.bf16.msrb.mxu1 %v11254_v54  ;;  %v11280_v52 = vld [vmem:[%s19724_s6 + $0xe0] sm:$0xff]  ;;  %v11279_v15 = vld [vmem:[%s19724_s6 + $0xd8] sm:$0xff] }
 0x23c   :  { %2258 = vrot.lane.b32.xlu0 %v2247_v17, %s11961_s24  ;;  %v19353_v44 = vunpack.c.l.b16 %v13174_v30  ;;  %2918 = vmatpush.bf16.msra.mxu0 %v11282_v18  ;;  %v10483_v6 = vrot.slane %v13099_v46, 9  ;;  %v2134_v17 = vrot.slane %v13109_v63, 5  ;;  %v11252_v63 = vld [vmem:[%s19724_s6] sm:$0xff] }
 0x23d   :  { %19738 = vst [vmem:[#allocation51_spill] sm:$0xff] %v13162_v35  ;;  %v2246_v26 = vpack.c.b16 %v13164_v8, %v13162_v35  ;;  %v13200_v39 = vsel %vm12525_vm11, %v10327_v40, %v824_v10  ;;  %v11278_v10 = vld [vmem:[%s19724_s6 + $0xd0] sm:$0xff]  ;;  %v10304_v40 = vld [vmem:[%s19691_s25 + $0x48] sm:$0xff] }
 0x23e   :  { %19739 = vst [vmem:[#allocation52_spill] sm:$0xff] %v13164_v8  ;;  %v13194_v3 = vpack.c.b16 %v19353_v44, %v2269_v56  ;;  %v13206_v11 = vsel %vm12525_vm11, %v10483_v6, %v2134_v17  ;;  %v19354_v56 = vunpack.c.l.b16 %v13200_v39  ;;  %v11276_v17 = vld [vmem:[%s19724_s6 + $0xc0] sm:$0xff] }
 0x23f   :  { %2256 = vrot.lane.b32.xlu1 %v2246_v26, %s11961_s24  ;;  %2776 = vmatpush.bf16.msrb.mxu1 %v11253_v28  ;;  %v1470_v1 = vpop.f32.mrf.mxu1  ;;  %v11277_v26 = vld [vmem:[%s19724_s6 + $0xc8] sm:$0xff]  ;;  %v1533_v28 = vpop.f32.mrf.mxu3 }
 0x240   :  { %v13179_v2 = vpop.f32.mrf.mxu0  ;;  %19741 = vst [vmem:[#allocation54_spill] sm:$0xff] %v13194_v3  ;;  %2919 = vmatpush.bf16.msra.mxu0 %v11281_v12  ;;  %v965_v46 = vpack.c.b16 %v12783_v50, %v19354_v56  ;;  %v1534_v12 = vadd.f32 %v1533_v28, %v13011_v31  ;;  %v2222_v31 = vpack.c.b16 %v12946_v60, %v19693_v14  ;;  %v19761_v50 = vld [vmem:[#allocation5_spill] sm:$0xff] }
 0x241   :  { %19740 = vst [vmem:[#allocation53_spill] sm:$0xff] %v13179_v2  ;;  %v19762_v14 = vunpack.c.l.b16 %v19761_v50 }
 0x243   :  { %2777 = vmatpush.bf16.msrb.mxu1 %v11252_v63 }
 0x244   :  { %948 = vrot.lane.b32.xlu0 %v12697_v47, %s11961_s24  ;;  %v10303_v47 = vld [vmem:[%s19691_s25 + $0x40] sm:$0xff]  ;;  %2920 = vmatpush.bf16.msra.mxu0 %v11280_v52 }
 0x245   :  { %v10307_v52 = vld [vmem:[%s19691_s25 + $0x60] sm:$0xff] }
 0x248   :  { %v1421_v36 = vpop.f32.mrf.mxu0  ;;  %2921 = vmatpush.bf16.msra.mxu0 %v11279_v15 }
 0x249   :  { %v13212_v4 = vadd.f32 %v1470_v1, %v1421_v36  ;;  %v10305_v1 = vld [vmem:[%s19691_s25 + $0x50] sm:$0xff] }
 0x24a   :  { %205 = vxpose.xlu2.b32.start [1/8] (short) (narrow) %v10303_v47, 64  ;;  %v10306_v47 = vld [vmem:[%s19691_s25 + $0x58] sm:$0xff] }
 0x24b   :  { %19742 = vst [vmem:[#allocation55_spill] sm:$0xff] %v13212_v4  ;;  %10479 = vmatmul.msk.bf16.gmra.mxu0 %vm966_vm12, %v965_v46 }
 0x24c   :  { %2922 = vmatpush.bf16.msra.mxu0 %v11278_v10  ;;  %v19745_v10 = vpack.c.b16 %v12407_v57, %v12387_v55  ;;  %v19746_v57 = vpack.c.b16 %v12509_v21, %v19687_v58  ;;  %v2224_v21 = vpack.c.b16 %v13074_v53, %v13072_v43 }
 0x250   :  { %v13229_v18 = vpop.f32.mrf.mxu0  ;;  %2923 = vmatpush.bf16.msra.mxu0 %v11277_v26  ;;  %v10308_v26 = vld [vmem:[%s19691_s25 + $0x68] sm:$0xff] }
 0x251   :  { %19743 = vst [vmem:[#allocation56_spill] sm:$0xff] %v13229_v18 }
 0x252   :  { %206 = vxpose.xlu2.b32.cont [2/8] (short) (narrow) %v10304_v40, 64 }
 0x254   :  { %2924 = vmatpush.bf16.msra.mxu0 %v11276_v17 }
 0x258   :  { %v1582_v6 = vpop.f32.mrf.mxu0 }
 0x259   :  { %v13247_v36 = vadd.f32 %v1582_v6, %v1534_v12  ;;  %v10309_v6 = vld [vmem:[%s19691_s25 + $0x70] sm:$0xff] }
 0x25a   :  { %207 = vxpose.xlu2.b32.cont [3/8] (short) (narrow) %v10305_v1, 64  ;;  %v10310_v1 = vld [vmem:[%s19691_s25 + $0x78] sm:$0xff] }
 0x25b   :  { %19744 = vst [vmem:[#allocation57_spill] sm:$0xff] %v13247_v36 }
 0x262   :  { %208 = vxpose.xlu2.b32.cont [4/8] (short) (narrow) %v10306_v47, 64 }
 0x266   :  { %v2253_v46 = vpop.permute.xlu2 %2252 }
 0x267   :  { %v2362_v63 = vsel %vm966_vm12, %v2222_v31, %v2253_v46  ;;  %v13284_v31 = vpop.trf.xlu1 }
 0x268   :  { %2778 = vmatmul.bf16.vlgmr.msrb.gmra.mxu1 %v2362_v63  ;;  %v19748_v63 = vld [vmem:[#allocation17_spill] sm:$0xff] }
 0x26a   :  { %209 = vxpose.xlu2.b32.cont [5/8] (short) (narrow) %v10307_v52, 64  ;;  %v19749_v52 = vld [vmem:[#allocation19_spill] sm:$0xff] }
 0x26e   :  { %v943_v15 = vpop.permute.xlu2 %942 }
 0x26f   :  { %v1037_v40 = vsel %vm966_vm12, %v19745_v10, %v943_v15  ;;  %v926_v15 = vpack.c.b16 %v19749_v52, %v19748_v63 }
 0x270   :  { %1488 = vmatmul.bf16.gmra.mxu2 %v1037_v40 }
 0x272   :  { %210 = vxpose.xlu2.b32.cont [6/8] (short) (narrow) %v10308_v26, 64 }
 0x276   :  { %v2255_v28 = vpop.permute.xlu2 %2254 }
 0x277   :  { %v2366_v12 = vsel %vm966_vm12, %v2223_v45, %v2255_v28  ;;  %v19747_v45 = vpack.c.b16 %v12593_v19, %v19692_v9  ;;  %v2225_v9 = vpack.c.b16 %v13068_v37, %v13036_v20 }
 0x278   :  { %2783 = vmatmul.bf16.gmra.mxu1 %v2366_v12  ;;  %2925 = vmatmul.bf16.vlgmr.msra.gmra.mxu0 %v2366_v12 }
 0x279   :  { %v1045_v47 = vsel %vm966_vm12, %v19747_v45, %v12884_v59 }
 0x27a   :  { %211 = vxpose.xlu2.b32.cont [7/8] (short) (narrow) %v10309_v6, 64 }
 0x27e   :  { %v945_v55 = vpop.permute.xlu2 %944 }
 0x27f   :  { %v1041_v17 = vsel %vm966_vm12, %v19746_v57, %v945_v55 }
 0x280   :  { %1493 = vmatmul.bf16.gmra.mxu2 %v1041_v17  ;;  %v13295_v17 = vpop.f32.mrf.mxu2 }
 0x281   :  { %19750 = vst [vmem:[#allocation17_spill] sm:$0xff] %v13295_v17 }
 0x282   :  { %212 = vxpose.xlu2.b32.end [8/8] (short) (narrow) %v10310_v1, 64 }
 0x288   :  { %v19812_v62 = vld [vmem:[#allocation17_spill] sm:$0xff] }
 0x290   :  { %1498 = vmatmul.bf16.gmra.mxu2 %v1045_v47 }
 0x2ae   :  { %v2259_v46 = vpop.permute.xlu0 %2258 }
 0x2af   :  { %v2374_v59 = vsel %vm966_vm12, %v2225_v9, %v2259_v46 }
 0x2b1   :  { %v2257_v58 = vpop.permute.xlu1 %2256 }
 0x2b2   :  { %v2370_v10 = vsel %vm966_vm12, %v2224_v21, %v2257_v58 }
 0x2b3   :  { %2788 = vmatmul.bf16.gmra.mxu1 %v2370_v10  ;;  %2930 = vmatmul.bf16.gmra.mxu0 %v2370_v10 }
 0x2b6   :  { %v949_v40 = vpop.permute.xlu0 %948 }
 0x2b7   :  { %v1049_v19 = vsel %vm966_vm12, %v926_v15, %v949_v40 }
 0x2b8   :  { %1503 = vmatmul.bf16.gmra.mxu2 %v1049_v19 }
 0x2c3   :  { %2793 = vmatmul.bf16.gmra.mxu1 %v2374_v59  ;;  %2935 = vmatmul.bf16.gmra.mxu0 %v2374_v59 }
 0x2e3   :  { %v221_v26 = vpop.trf.xlu2 }
 0x2e4   :  { %v1686_v28 = vpack.c.bf16 %v221_v26, %v221_v26 }
 0x2e6   :  { %v1751_v12 = vshrl.u32 %v1686_v28, 16  ;;  %v1754_v55 = vshll.u32 %v1686_v28, 16 }
 0x2e8   :  { %v1753_v6 = vrot.slane %v1751_v12, 7 }
 0x2ea   :  { %v1756_v57 = vor.u32 %v1754_v55, %v1753_v6 }
 0x2eb   :  { %950 = vrot.lane.b32.xlu2 %v12713_v48, %s11961_s24  ;;  %v222_v1 = vpop.trf.xlu2 }
 0x2ec   :  { %v1830_v45 = vsel %vm12130_vm2, 0, %v1756_v57  ;;  %v1687_v47 = vpack.c.bf16 %v222_v1, %v222_v1 }
 0x2ed   :  { %v1846_v46 = vsel %vm12134_vm5, %v1830_v45, 0 }
 0x2ee   :  { %v13303_v21 = vunpack.c.l.b16 %v1846_v46  ;;  %v1883_v58 = vunpack.c.h.b16 %v1846_v46  ;;  %v1758_v63 = vshrl.u32 %v1687_v47, 16  ;;  %v1761_v10 = vshll.u32 %v1687_v47, 16 }
 0x2f0   :  { %v13307_v52 = vpack.c.b16 %v13303_v21, %v13303_v21  ;;  %v1760_v15 = vrot.slane %v1758_v63, 7  ;;  %v13309_v40 = vpack.c.b16 %v1883_v58, %v1883_v58 }
 0x2f2   :  { %v1763_v48 = vor.u32 %v1761_v10, %v1760_v15  ;;  %v2023_v19 = vshrl.u32 %v13307_v52, 16  ;;  %v2026_v9 = vshll.u32 %v13307_v52, 16  ;;  %v2032_v45 = vshll.u32 %v13309_v40, 16 }
 0x2f3   :  { %v1489_v59 = vpop.f32.mrf.mxu2  ;;  %v223_v26 = vpop.trf.xlu2 }
 0x2f4   :  { %v1831_v28 = vsel %vm12130_vm2, 0, %v1763_v48  ;;  %v13316_v12 = vadd.f32 %v1489_v59, %v12932_v16  ;;  %v1688_v6 = vpack.c.bf16 %v223_v26, %v223_v26  ;;  %v2025_v55 = vrot.slane %v2023_v19, 4 }
 0x2f5   :  { %v1847_v57 = vsel %vm12134_vm5, %v1831_v28, 0  ;;  %v2028_v1 = vrot.slane %v2026_v9, 5  ;;  %v2034_v48 = vrot.slane %v2032_v45, 5 }
 0x2f6   :  { %19751 = vst [vmem:[#allocation19_spill] sm:$0xff] %v13316_v12  ;;  %v13321_v47 = vunpack.c.l.b16 %v1847_v57  ;;  %v1765_v46 = vshrl.u32 %v1688_v6, 16  ;;  %v1768_v10 = vshll.u32 %v1688_v6, 16  ;;  %v1885_v9 = vunpack.c.h.b16 %v1847_v57 }
 0x2f7   :  { %v2029_v58 = vor.u32 %v2028_v1, %v2025_v55 }
 0x2f8   :  { %v13325_v63 = vpack.c.b16 %v13321_v47, %v13321_v47  ;;  %v1767_v15 = vrot.slane %v1765_v46, 7 }
 0x2f9   :  { %v2030_v16 = vrot.slane %v2029_v58, 4 }
 0x2fa   :  { %v1770_v59 = vor.u32 %v1768_v10, %v1767_v15  ;;  %v2037_v19 = vshrl.u32 %v13325_v63, 16  ;;  %v2040_v26 = vshll.u32 %v13325_v63, 16  ;;  %v13341_v10 = vpack.c.b16 %v1885_v9, %v1885_v9 }
 0x2fb   :  { %v13329_v28 = vpop.f32.mrf.mxu2  ;;  %v224_v54 = vpop.trf.xlu2  ;;  %v2035_v55 = vsel %vm12157_vm8, %v2030_v16, %v2034_v48 }
 0x2fc   :  { %19752 = vst [vmem:[#allocation58_spill] sm:$0xff] %v13329_v28  ;;  %v1832_v1 = vsel %vm12130_vm2, 0, %v1770_v59  ;;  %v1689_v13 = vpack.c.bf16 %v224_v54, %v224_v54  ;;  %v13337_v45 = vunpack.c.l.b16 %v2035_v55  ;;  %v2039_v46 = vrot.slane %v2037_v19, 4 }
 0x2fd   :  { %v1848_v6 = vsel %vm12134_vm5, %v1832_v1, 0  ;;  %v2042_v58 = vrot.slane %v2040_v26, 5  ;;  %v2046_v56 = vshll.u32 %v13341_v10, 16 }
 0x2fe   :  { %v13339_v15 = vunpack.c.l.b16 %v1848_v6  ;;  %v1887_v57 = vunpack.c.h.b16 %v1848_v6  ;;  %v1772_v23 = vshrl.u32 %v1689_v13, 16  ;;  %v2248_v16 = vpack.c.b16 %v13337_v45, %v12187_v25 }
 0x2ff   :  { %v1775_v55 = vshll.u32 %v1689_v13, 16  ;;  %v2043_v19 = vor.u32 %v2042_v58, %v2039_v46  ;;  %v2048_v2 = vrot.slane %v2046_v56, 5 }
 0x300   :  { %v13347_v48 = vpack.c.b16 %v13339_v15, %v13339_v15  ;;  %v13349_v54 = vpack.c.b16 %v1887_v57, %v1887_v57  ;;  %v1774_v59 = vrot.slane %v1772_v23, 7  ;;  %2260 = vrot.lane.b32.xlu0 %v2248_v16, %s11961_s24 }
 0x301   :  { %v2044_v13 = vrot.slane %v2043_v19, 4 }
 0x302   :  { %v2051_v26 = vshrl.u32 %v13347_v48, 16  ;;  %v2054_v9 = vshll.u32 %v13347_v48, 16  ;;  %v1777_v1 = vor.u32 %v1775_v55, %v1774_v59  ;;  %v2060_v46 = vshll.u32 %v13349_v54, 16 }
 0x303   :  { %v1494_v6 = vpop.f32.mrf.mxu2  ;;  %v225_v44 = vpop.trf.xlu2  ;;  %v2049_v19 = vsel %vm12157_vm8, %v2044_v13, %v2048_v2 }
 0x304   :  { %v13356_v18 = vadd.f32 %v1494_v6, %v12940_v29  ;;  %v1690_v49 = vpack.c.bf16 %v225_v44, %v225_v44  ;;  %v2053_v57 = vrot.slane %v2051_v26, 4  ;;  %v1833_v23 = vsel %vm12130_vm2, 0, %v1777_v1 }
 0x305   :  { %v2056_v16 = vrot.slane %v2054_v9, 5  ;;  %v1849_v58 = vsel %vm12134_vm5, %v1833_v23, 0  ;;  %v2062_v9 = vrot.slane %v2060_v46, 5  ;;  %v13379_v28 = vunpack.c.l.b16 %v2049_v19 }
 0x306   :  { %19753 = vst [vmem:[#allocation59_spill] sm:$0xff] %v13356_v18  ;;  %v1779_v59 = vshrl.u32 %v1690_v49, 16  ;;  %v13363_v55 = vunpack.c.l.b16 %v1849_v58  ;;  %v1782_v29 = vshll.u32 %v1690_v49, 16  ;;  %v1889_v6 = vunpack.c.h.b16 %v1849_v58 }
 0x307   :  { %v2057_v4 = vor.u32 %v2056_v16, %v2053_v57 }
 0x308   :  { %v1781_v12 = vrot.slane %v1779_v59, 7  ;;  %v13367_v44 = vpack.c.b16 %v13363_v55, %v13363_v55 }
 0x309   :  { %v2058_v26 = vrot.slane %v2057_v4, 4 }
 0x30a   :  { %v1784_v1 = vor.u32 %v1782_v29, %v1781_v12  ;;  %v2065_v57 = vshrl.u32 %v13367_v44, 16  ;;  %v2068_v49 = vshll.u32 %v13367_v44, 16  ;;  %v13387_v29 = vpack.c.b16 %v1889_v6, %v1889_v6 }
 0x30b   :  { %v13371_v18 = vpop.f32.mrf.mxu2  ;;  %v226_v23 = vpop.trf.xlu2  ;;  %v2063_v56 = vsel %vm12157_vm8, %v2058_v26, %v2062_v9 }
 0x30c   :  { %19754 = vst [vmem:[#allocation60_spill] sm:$0xff] %v13371_v18  ;;  %v1834_v16 = vsel %vm12130_vm2, 0, %v1784_v1  ;;  %v1691_v59 = vpack.c.bf16 %v226_v23, %v226_v23  ;;  %v13383_v4 = vunpack.c.l.b16 %v2063_v56  ;;  %v2067_v12 = vrot.slane %v2065_v57, 4 }
 0x30d   :  { %v1850_v2 = vsel %vm12134_vm5, %v1834_v16, 0  ;;  %v2070_v13 = vrot.slane %v2068_v49, 5  ;;  %v2074_v18 = vshll.u32 %v13387_v29, 16 }
 0x30e   :  { %v13385_v46 = vunpack.c.l.b16 %v1850_v2  ;;  %v1891_v58 = vunpack.c.h.b16 %v1850_v2  ;;  %v1786_v26 = vshrl.u32 %v1691_v59, 16  ;;  %v1789_v9 = vshll.u32 %v1691_v59, 16 }
 0x30f   :  { %v2249_v1 = vpack.c.b16 %v13383_v4, %v13379_v28  ;;  %v2071_v57 = vor.u32 %v2070_v13, %v2067_v12  ;;  %v2076_v8 = vrot.slane %v2074_v18, 5  ;;  %v13423_v18 = vpack.c.bf16 %v13284_v31, %v13284_v31 }
 0x310   :  { %v13393_v19 = vpack.c.b16 %v13385_v46, %v13385_v46  ;;  %v13395_v23 = vpack.c.b16 %v1891_v58, %v1891_v58  ;;  %v1788_v56 = vrot.slane %v1786_v26, 7 }
 0x311   :  { %2262 = vrot.lane.b32.xlu0 %v2249_v1, %s11961_s24  ;;  %v2072_v26 = vrot.slane %v2071_v57, 4  ;;  %v19756_v57 = vld [vmem:[#allocation33_spill] sm:$0xff] }
 0x312   :  { %v2079_v49 = vshrl.u32 %v13393_v19, 16  ;;  %v2082_v6 = vshll.u32 %v13393_v19, 16  ;;  %v1791_v16 = vor.u32 %v1789_v9, %v1788_v56  ;;  %v2088_v12 = vshll.u32 %v13395_v23, 16 }
 0x313   :  { %v1499_v2 = vpop.f32.mrf.mxu2  ;;  %v227_v59 = vpop.trf.xlu2 }
 0x314   :  { %v13402_v51 = vadd.f32 %v1499_v2, %v12982_v34  ;;  %v1692_v36 = vpack.c.bf16 %v227_v59, %v227_v59  ;;  %v2081_v17 = vrot.slane %v2079_v49, 4  ;;  %v1835_v58 = vsel %vm12130_vm2, 0, %v1791_v16 }
 0x315   :  { %v2084_v1 = vrot.slane %v2082_v6, 5  ;;  %v1851_v13 = vsel %vm12134_vm5, %v1835_v58, 0  ;;  %v2077_v6 = vsel %vm12157_vm8, %v2072_v26, %v2076_v8  ;;  %v2090_v59 = vrot.slane %v2088_v12, 5 }
 0x316   :  { %19755 = vst [vmem:[#allocation61_spill] sm:$0xff] %v13402_v51  ;;  %v1793_v9 = vshrl.u32 %v1692_v36, 16  ;;  %v1796_v56 = vshll.u32 %v1692_v36, 16  ;;  %v13409_v22 = vunpack.c.l.b16 %v1851_v13  ;;  %v1893_v33 = vunpack.c.h.b16 %v1851_v13 }
 0x317   :  { %v2085_v34 = vor.u32 %v2084_v1, %v2081_v17  ;;  %v13431_v12 = vunpack.c.l.b16 %v2077_v6  ;;  %v1744_v6 = vshrl.u32 %v13423_v18, 16 }
 0x318   :  { %v1795_v2 = vrot.slane %v1793_v9, 7  ;;  %v13413_v49 = vpack.c.b16 %v13409_v22, %v13409_v22  ;;  %v13419_v58 = vpack.c.b16 %v1893_v33, %v1893_v33 }
 0x319   :  { %952 = vrot.lane.b32.xlu0 %v19756_v57, %s11961_s24  ;;  %v2086_v16 = vrot.slane %v2085_v34, 4 }
 0x31a   :  { %v1798_v36 = vor.u32 %v1796_v56, %v1795_v2  ;;  %v2093_v13 = vshrl.u32 %v13413_v49, 16  ;;  %v2096_v9 = vshll.u32 %v13413_v49, 16  ;;  %v2102_v33 = vshll.u32 %v13419_v58, 16 }
 0x31b   :  { %v228_v17 = vpop.trf.xlu2  ;;  %v2091_v1 = vsel %vm12157_vm8, %v2086_v16, %v2090_v59 }
 0x31c   :  { %v1836_v8 = vsel %vm12130_vm2, 0, %v1798_v36  ;;  %v1693_v26 = vpack.c.bf16 %v228_v17, %v228_v17  ;;  %v13436_v56 = vunpack.c.l.b16 %v2091_v1  ;;  %v2095_v34 = vrot.slane %v2093_v13, 4 }
 0x31d   :  { %v1852_v31 = vsel %vm12134_vm5, %v1836_v8, 0  ;;  %v2098_v2 = vrot.slane %v2096_v9, 5  ;;  %v19759_v8 = vld [vmem:[#allocation41_spill] sm:$0xff]  ;;  %v2104_v9 = vrot.slane %v2102_v33, 5  ;;  %v1746_v33 = vrot.slane %v1744_v6, 7 }
 0x31e   :  { %19757 = vst [vmem:[#allocation33_spill] sm:$0xff] %v13436_v56  ;;  %v13438_v57 = vunpack.c.l.b16 %v1852_v31  ;;  %v1895_v16 = vunpack.c.h.b16 %v1852_v31  ;;  %v1800_v59 = vshrl.u32 %v1693_v26, 16  ;;  %v1803_v51 = vshll.u32 %v1693_v26, 16  ;;  %v19760_v31 = vld [vmem:[#allocation42_spill] sm:$0xff] }
 0x31f   :  { %v2250_v36 = vpack.c.b16 %v13436_v56, %v13431_v12  ;;  %v2099_v17 = vor.u32 %v2098_v2, %v2095_v34  ;;  %v10486_v1 = vrot.slane %v19759_v8, 9  ;;  %v2146_v42 = vrot.slane %v19760_v31, 5  ;;  %v19765_v8 = vld [vmem:[#allocation24_spill] sm:$0xff] }
 0x320   :  { %19758 = vst [vmem:[#allocation62_spill] sm:$0xff] %v13438_v57  ;;  %v1922_v0 = vpack.c.b16 %v13438_v57, %v13438_v57  ;;  %v1923_v35 = vpack.c.b16 %v1895_v16, %v1895_v16  ;;  %v1802_v3 = vrot.slane %v1800_v59, 7  ;;  %v1747_v34 = vshll.u32 %v13423_v18, 16  ;;  %v19764_v59 = vld [vmem:[#allocation25_spill] sm:$0xff]  ;;  %v19767_v57 = vld [vmem:[#allocation36_spill] sm:$0xff] }
 0x321   :  { %2264 = vrot.lane.b32.xlu0 %v2250_v36, %s11961_s24  ;;  %v2100_v13 = vrot.slane %v2099_v17, 4  ;;  %v19763_v56 = vunpack.c.l.b16 %v13200_v39  ;;  %v19766_v36 = vsel %vm12157_vm8, %v19764_v59, %v19765_v8  ;;  %v10485_v20 = vrot.slane %v19767_v57, 9 }
 0x322   :  { %v2107_v26 = vshrl.u32 %v1922_v0, 16  ;;  %v2110_v61 = vshll.u32 %v1922_v0, 16  ;;  %v2116_v7 = vshll.u32 %v1923_v35, 16  ;;  %v1805_v2 = vor.u32 %v1803_v51, %v1802_v3  ;;  %v19768_v3 = vld [vmem:[#allocation37_spill] sm:$0xff] }
 0x323   :  { %v939_v16 = vpack.c.b16 %v19763_v56, %v19762_v14  ;;  %v13458_v17 = vunpack.c.l.b16 %v19766_v36  ;;  %v2105_v50 = vsel %vm12157_vm8, %v2100_v13, %v2104_v9  ;;  %v2142_v14 = vrot.slane %v19768_v3, 5 }
 0x324   :  { %v2109_v31 = vrot.slane %v2107_v26, 4  ;;  %v2112_v37 = vrot.slane %v2110_v61, 5  ;;  %v1837_v51 = vsel %vm12130_vm2, 0, %v1805_v2  ;;  %v13468_v39 = vsel %vm12525_vm11, %v10486_v1, %v2146_v42 }
 0x325   :  { %v1853_v18 = vsel %vm12134_vm5, %v1837_v51, 0  ;;  %v2118_v6 = vrot.slane %v2116_v7, 5  ;;  %v2294_v61 = vpack.c.b16 %v13321_v47, %v13303_v21  ;;  %v10493_v2 = vrot.slane %v1922_v0, 9 }
 0x326   :  { %v2113_v56 = vor.u32 %v2112_v37, %v2109_v31  ;;  %v13474_v57 = vunpack.c.l.b16 %v1853_v18  ;;  %v2181_v26 = vunpack.c.h.b16 %v1853_v18  ;;  %v2174_v59 = vrot.slane %v1923_v35, 5 }
 0x327   :  { %v10487_v9 = vrot.slane %v13307_v52, 9  ;;  %v2150_v8 = vrot.slane %v13309_v40, 5  ;;  %v10488_v42 = vrot.slane %v13325_v63, 9  ;;  %v13488_v37 = vsel %vm12525_vm11, %v10485_v20, %v2142_v14 }
 0x328   :  { %v2114_v13 = vrot.slane %v2113_v56, 4  ;;  %v13481_v1 = vpack.c.b16 %v13474_v57, %v13474_v57  ;;  %v13483_v7 = vpack.c.b16 %v2181_v26, %v2181_v26  ;;  %v2274_v0 = vunpack.c.l.b16 %v13468_v39 }
 0x329   :  { %954 = vrot.lane.b32.xlu0 %v939_v16, %s11961_s24  ;;  %v13493_v52 = vunpack.c.l.b16 %v2105_v50  ;;  %v13497_v40 = vsel %vm12525_vm11, %v10487_v9, %v2150_v8  ;;  %v2154_v63 = vrot.slane %v13341_v10, 5  ;;  %v13504_v16 = vsel %vm12525_vm11, %v10493_v2, %v2174_v59  ;;  %v13541_v8 = vpop.f32.mrf.mxu2 }
 0x32a   :  { %v2119_v35 = vsel %vm12157_vm8, %v2114_v13, %v2118_v6  ;;  %v10495_v20 = vrot.slane %v13481_v1, 9  ;;  %v2220_v31 = vrot.slane %v13483_v7, 5  ;;  %v1749_v51 = vor.u32 %v1747_v34, %v1746_v33 }
 0x32b   :  { %v13500_v36 = vunpack.c.l.b16 %v2119_v35  ;;  %v2273_v50 = vunpack.c.l.b16 %v13488_v37  ;;  %v2155_v3 = vsel %vm12525_vm11, %v10488_v42, %v2154_v63  ;;  %v2227_v14 = vpack.c.b16 %v13339_v15, %v13321_v47  ;;  %v11260_v47 = vld [vmem:[%s19724_s6 + $0x40] sm:$0xff] }
 0x32c   :  { %v13517_v18 = vsel %vm12525_vm11, %v10495_v20, %v2220_v31  ;;  %v19374_v56 = vunpack.c.l.b16 %v13497_v40  ;;  %v2276_v6 = vunpack.c.l.b16 %v2155_v3  ;;  %v2281_v34 = vunpack.c.l.b16 %v13504_v16 }
 0x32d   :  { %v2251_v10 = vpack.c.b16 %v13500_v36, %v13493_v52  ;;  %v19373_v33 = vunpack.c.l.b16 %v13517_v18  ;;  %v10489_v26 = vrot.slane %v13347_v48, 9  ;;  %v2158_v2 = vrot.slane %v13349_v54, 5 }
 0x32e   :  { %v959_v59 = vpack.c.b16 %v12187_v25, %v13458_v17  ;;  %v13529_v13 = vpack.c.b16 %v2276_v6, %v19374_v56  ;;  %v13533_v9 = vpack.c.b16 %v2274_v0, %v2273_v50  ;;  %v1829_v42 = vsel %vm12130_vm2, 0, %v1749_v51  ;;  %v19774_v56 = vld [vmem:[#allocation30_spill] sm:$0xff] }
 0x32f   :  { %2266 = vrot.lane.b32.xlu1 %v2251_v10, %s11961_s24  ;;  %v2333_v48 = vpack.c.b16 %v19373_v33, %v2281_v34  ;;  %v2159_v54 = vsel %vm12525_vm11, %v10489_v26, %v2158_v2  ;;  %v2295_v35 = vpack.c.b16 %v13363_v55, %v13339_v15  ;;  %v1845_v20 = vsel %vm12134_vm5, %v1829_v42, 0  ;;  %v11270_v15 = vld [vmem:[%s19724_s6 + $0x90] sm:$0xff] }
 0x330   :  { %v2277_v37 = vunpack.c.l.b16 %v2159_v54  ;;  %v10490_v31 = vrot.slane %v13367_v44, 9  ;;  %v2162_v3 = vrot.slane %v13387_v29, 5  ;;  %v13561_v26 = vunpack.c.l.b16 %v1845_v20 }
 0x331   :  { %962 = vrot.lane.b32.xlu0 %v959_v59, %s11961_s24  ;;  %2348 = vrot.lane.b32.xlu2 %v2333_v48, %s11961_s24  ;;  %v19769_v59 = vpack.c.b16 %v12967_v32, %v12946_v60  ;;  %v19375_v44 = vunpack.c.l.b16 %v13206_v11  ;;  %v2179_v29 = vunpack.c.h.b16 %v1845_v20  ;;  %v19773_v32 = vunpack.c.l.b16 %v13174_v30 }
 0x332   :  { %v13555_v10 = vpack.c.b16 %v2277_v37, %v2276_v6  ;;  %v2163_v51 = vsel %vm12525_vm11, %v10490_v31, %v2162_v3  ;;  %v19770_v6 = vld [vmem:[#allocation11_spill] sm:$0xff]  ;;  %v19771_v31 = vld [vmem:[#allocation44_spill] sm:$0xff]  ;;  %v2182_v60 = vpack.c.b16 %v13561_v26, %v13561_v26 }
 0x333   :  { %v2278_v2 = vunpack.c.l.b16 %v2163_v51  ;;  %v10484_v3 = vrot.slane %v19771_v31, 9  ;;  %v19772_v51 = vld [vmem:[#allocation46_spill] sm:$0xff]  ;;  %v2327_v20 = vpack.c.b16 %v19375_v44, %v19773_v32  ;;  %v19775_v44 = vld [vmem:[#allocation20_spill] sm:$0xff] }
 0x334   :  { %v2138_v33 = vrot.slane %v19772_v51, 5  ;;  %v2187_v30 = vshrl.u32 %v2182_v60, 16  ;;  %v2190_v63 = vshll.u32 %v2182_v60, 16 }
 0x335   :  { %v13571_v42 = vpack.c.b16 %v2278_v2, %v2277_v37  ;;  %v2166_v37 = vrot.slane %v13395_v23, 5  ;;  %v10494_v23 = vrot.slane %v2182_v60, 9  ;;  %v19776_v60 = vpack.c.b16 %v19774_v56, %v19775_v44 }
 0x336   :  { %v13592_v51 = vsel %vm12525_vm11, %v10484_v3, %v2138_v33  ;;  %v10492_v3 = vrot.slane %v13413_v49, 9 }
 0x337   :  { %2334 = vrot.lane.b32.xlu1 %v13154_v41, %s11961_s24  ;;  %v2228_v41 = vpack.c.b16 %v13385_v46, %v13363_v55 }
 0x339   :  { %2298 = vrot.lane.b32.xlu0 %v19769_v59, %s11961_s24  ;;  %v10491_v59 = vrot.slane %v13393_v19, 9  ;;  %v2296_v19 = vpack.c.b16 %v13409_v22, %v13385_v46 }
 0x33b   :  { %v1504_v48 = vpop.f32.mrf.mxu2  ;;  %v2167_v31 = vsel %vm12525_vm11, %v10491_v59, %v2166_v37  ;;  %v19777_v59 = vld [vmem:[#allocation35_spill] sm:$0xff] }
 0x33c   :  { %v13569_v54 = vadd.f32 %v1504_v48, %v19770_v6  ;;  %v2183_v48 = vpack.c.b16 %v2179_v29, %v2179_v29  ;;  %v2291_v6 = vpack.c.b16 %v13072_v43, %v12988_v5  ;;  %v2279_v32 = vunpack.c.l.b16 %v2167_v31 }
 0x33d   :  { %v2189_v5 = vrot.slane %v2187_v30, 4  ;;  %v2192_v43 = vrot.slane %v2190_v63, 5 }
 0x33e   :  { %v2216_v29 = vrot.slane %v2183_v48, 5  ;;  %v13612_v63 = vpack.c.b16 %v2279_v32, %v2278_v2  ;;  %v19778_v2 = vld [vmem:[#allocation62_spill] sm:$0xff] }
 0x33f   :  { %2336 = vrot.lane.b32.xlu1 %v2327_v20, %s11961_s24  ;;  %v19376_v20 = vunpack.c.l.b16 %v13592_v51  ;;  %v2297_v16 = vpack.c.b16 %v13474_v57, %v19778_v2 }
 0x340   :  { %v13610_v30 = vsel %vm12525_vm11, %v10494_v23, %v2216_v29  ;;  %v2229_v29 = vpack.c.b16 %v19778_v2, %v13409_v22 }
 0x341   :  { %2300 = vrot.lane.b32.xlu0 %v2291_v6, %s11961_s24  ;;  %v2328_v33 = vpack.c.b16 %v2273_v50, %v19376_v20  ;;  %v2170_v6 = vrot.slane %v13419_v58, 5  ;;  %v2292_v50 = vpack.c.b16 %v19777_v59, %v13074_v53  ;;  %v2193_v58 = vor.u32 %v2192_v43, %v2189_v5  ;;  %v19779_v59 = vld [vmem:[#allocation40_spill] sm:$0xff]  ;;  %v19780_v43 = vld [vmem:[#allocation33_spill] sm:$0xff] }
 0x342   :  { %v2196_v20 = vshll.u32 %v2183_v48, 16  ;;  %v19377_v44 = vunpack.c.l.b16 %v13610_v30  ;;  %v2293_v5 = vpack.c.b16 %v13561_v26, %v19779_v59  ;;  %v11275_v59 = vld [vmem:[%s19724_s6 + $0xb8] sm:$0xff] }
 0x343   :  { %v2171_v49 = vsel %vm12525_vm11, %v10492_v3, %v2170_v6  ;;  %v2204_v3 = vshll.u32 %v13481_v1, 16  ;;  %v2210_v6 = vshll.u32 %v13483_v7, 16  ;;  %2868 = vmatpush.bf16.msrb.mxu3 %v11275_v59 }
 0x344   :  { %v2280_v56 = vunpack.c.l.b16 %v2171_v49  ;;  %v2329_v53 = vpack.c.b16 %v19377_v44, %v2274_v0  ;;  %v2201_v0 = vshrl.u32 %v13481_v1, 16  ;;  %v19801_v44 = vld [vmem:[#allocation47_spill] sm:$0xff] }
 0x345   :  { %v951_v37 = vpop.permute.xlu2 %950 }
 0x346   :  { %v1053_v31 = vsel %vm966_vm12, %v19776_v60, %v951_v37  ;;  %v2332_v23 = vpack.c.b16 %v2280_v56, %v2279_v32  ;;  %v2194_v37 = vrot.slane %v2193_v58, 4  ;;  %v13644_v60 = vpack.c.b16 %v2281_v34, %v2280_v56  ;;  %v11267_v34 = vld [vmem:[%s19724_s6 + $0x78] sm:$0xff] }
 0x347   :  { %2338 = vrot.lane.b32.xlu1 %v2328_v33, %s11961_s24  ;;  %1508 = vmatmul.bf16.gmra.mxu2 %v1053_v31  ;;  %v2198_v33 = vrot.slane %v2196_v20, 5  ;;  %v2203_v31 = vrot.slane %v2201_v0, 4  ;;  %v2212_v58 = vrot.slane %v2210_v6, 5  ;;  %v11287_v0 = vld [vmem:[%s19724_s6 + $0x118] sm:$0xff]  ;;  %v11272_v6 = vld [vmem:[%s19724_s6 + $0xa0] sm:$0xff] }
 0x348   :  { %2819 = vmatpush.bf16.msrb.mxu2 %v11267_v34  ;;  %2970 = vmatpush.bf16.msra.mxu1 %v11287_v0  ;;  %v19783_v34 = vld [vmem:[#allocation31_spill] sm:$0xff]  ;;  %v19799_v20 = vld [vmem:[#allocation38_spill] sm:$0xff] }
 0x349   :  { %2302 = vrot.lane.b32.xlu0 %v2292_v50, %s11961_s24  ;;  %v2199_v48 = vsel %vm12157_vm8, %v2194_v37, %v2198_v33  ;;  %v2206_v50 = vrot.slane %v2204_v3, 5  ;;  %v11262_v3 = vld [vmem:[%s19724_s6 + $0x50] sm:$0xff] }
 0x34a   :  { %v13633_v32 = vunpack.c.l.b16 %v2199_v48  ;;  %v11263_v48 = vld [vmem:[%s19724_s6 + $0x58] sm:$0xff] }
 0x34b   :  { %v2207_v49 = vor.u32 %v2206_v50, %v2203_v31 }
 0x34c   :  { %v2352_v39 = vpack.c.b16 %v12187_v25, %v13633_v32 }
 0x34d   :  { %v2208_v37 = vrot.slane %v2207_v49, 4  ;;  %v11261_v49 = vld [vmem:[%s19724_s6 + $0x48] sm:$0xff] }
 0x34f   :  { %2340 = vrot.lane.b32.xlu1 %v2329_v53, %s11961_s24  ;;  %v2213_v1 = vsel %vm12157_vm8, %v2208_v37, %v2212_v58  ;;  %v11265_v53 = vld [vmem:[%s19724_s6 + $0x68] sm:$0xff]  ;;  %v11271_v58 = vld [vmem:[%s19724_s6 + $0x98] sm:$0xff] }
 0x350   :  { %v13657_v7 = vunpack.c.l.b16 %v2213_v1  ;;  %v11286_v1 = vld [vmem:[%s19724_s6 + $0x110] sm:$0xff] }
 0x351   :  { %2304 = vrot.lane.b32.xlu0 %v2293_v5, %s11961_s24  ;;  %v13694_v5 = vpop.f32.mrf.mxu0  ;;  %2971 = vmatpush.bf16.msra.mxu1 %v11286_v1 }
 0x352   :  { %v2353_v33 = vpack.c.b16 %v12187_v25, %v13657_v7 }
 0x357   :  { %2306 = vrot.lane.b32.xlu1 %v2294_v61, %s11961_s24 }
 0x359   :  { %2354 = vrot.lane.b32.xlu0 %v2352_v39, %s11961_s24  ;;  %v11273_v39 = vld [vmem:[%s19724_s6 + $0xa8] sm:$0xff]  ;;  %v13724_v37 = vpop.f32.mrf.mxu0 }
 0x35f   :  { %2308 = vrot.lane.b32.xlu1 %v2295_v35, %s11961_s24  ;;  %v19781_v35 = vld [vmem:[#allocation4_spill] sm:$0xff] }
 0x361   :  { %2342 = vrot.lane.b32.xlu0 %v13529_v13, %s11961_s24  ;;  %v11266_v13 = vld [vmem:[%s19724_s6 + $0x70] sm:$0xff]  ;;  %v13751_v59 = vpop.f32.mrf.mxu0 }
 0x362   :  { %2820 = vmatpush.bf16.msrb.mxu2 %v11266_v13 }
 0x366   :  { %2821 = vmatpush.bf16.msrb.mxu2 %v11265_v53  ;;  %v11284_v53 = vld [vmem:[%s19724_s6 + $0x100] sm:$0xff] }
 0x367   :  { %2310 = vrot.lane.b32.xlu1 %v2296_v19, %s11961_s24  ;;  %v2226_v19 = vpack.c.b16 %v13303_v21, %v19781_v35  ;;  %v11264_v21 = vld [vmem:[%s19724_s6 + $0x60] sm:$0xff] }
 0x369   :  { %2344 = vrot.lane.b32.xlu0 %v13571_v42, %s11961_s24 }
 0x36a   :  { %2822 = vmatpush.bf16.msrb.mxu2 %v11264_v21 }
 0x36e   :  { %2823 = vmatpush.bf16.msrb.mxu2 %v11263_v48  ;;  %v13760_v48 = vpop.f32.mrf.mxu0 }
 0x36f   :  { %2312 = vrot.lane.b32.xlu1 %v2297_v16, %s11961_s24  ;;  %v19782_v16 = vld [vmem:[#allocation26_spill] sm:$0xff] }
 0x370   :  { %v19784_v13 = vpack.c.b16 %v19782_v16, %v19783_v34  ;;  %v19788_v16 = vld [vmem:[#allocation43_spill] sm:$0xff] }
 0x371   :  { %2346 = vrot.lane.b32.xlu0 %v2332_v23, %s11961_s24  ;;  %v11274_v23 = vld [vmem:[%s19724_s6 + $0xb0] sm:$0xff]  ;;  %v19789_v34 = vunpack.c.l.b16 %v19788_v16 }
 0x372   :  { %v2261_v42 = vpop.permute.xlu0 %2260  ;;  %2869 = vmatpush.bf16.msrb.mxu3 %v11274_v23  ;;  %2824 = vmatpush.bf16.msrb.mxu2 %v11262_v3 }
 0x373   :  { %v2378_v56 = vsel %vm966_vm12, %v2226_v19, %v2261_v42  ;;  %v11269_v42 = vld [vmem:[%s19724_s6 + $0x88] sm:$0xff] }
 0x374   :  { %2798 = vmatmul.bf16.gmra.mxu1 %v2378_v56  ;;  %v11285_v56 = vld [vmem:[%s19724_s6 + $0x108] sm:$0xff] }
 0x375   :  { %2972 = vmatpush.bf16.msra.mxu1 %v11285_v56 }
 0x376   :  { %2870 = vmatpush.bf16.msrb.mxu3 %v11273_v39  ;;  %2825 = vmatpush.bf16.msrb.mxu2 %v11261_v49  ;;  %v19785_v39 = vld [vmem:[#allocation27_spill] sm:$0xff]  ;;  %v13775_v1 = vpop.f32.mrf.mxu0 }
 0x377   :  { %v929_v0 = vpack.c.b16 %v13458_v17, %v19785_v39 }
 0x379   :  { %2356 = vrot.lane.b32.xlu0 %v2353_v33, %s11961_s24  ;;  %v11268_v33 = vld [vmem:[%s19724_s6 + $0x80] sm:$0xff]  ;;  %2973 = vmatpush.bf16.msra.mxu1 %v11284_v53  ;;  %s19818_s6 = sld [smem:[#allocation112_spill]] }
 0x37a   :  { %2871 = vmatpush.bf16.msrb.mxu3 %v11272_v6  ;;  %2826 = vmatpush.bf16.msrb.mxu2 %v11260_v47  ;;  %v19790_v53 = vld [vmem:[#allocation18_spill] sm:$0xff] }
 0x37e   :  { %2872 = vmatpush.bf16.msrb.mxu3 %v11271_v58  ;;  %v19786_v58 = vld [vmem:[#allocation32_spill] sm:$0xff] }
 0x37f   :  { %v957_v55 = vpack.c.b16 %v19781_v35, %v19786_v58 }
 0x382   :  { %2873 = vmatpush.bf16.msrb.mxu3 %v11270_v15  ;;  %v13781_v15 = vpop.f32.mrf.mxu3 }
 0x383   :  { %v2263_v31 = vpop.permute.xlu0 %2262 }
 0x384   :  { %v13715_v50 = vsel %vm966_vm12, %v2227_v14, %v2263_v31  ;;  %v13765_v31 = vpop.f32.mrf.mxu1 }
 0x385   :  { %2803 = vmatmul.bf16.gmra.mxu1 %v13715_v50 }
 0x386   :  { %2874 = vmatpush.bf16.msrb.mxu3 %v11269_v42 }
 0x38a   :  { %2875 = vmatpush.bf16.msrb.mxu3 %v11268_v33  ;;  %v13791_v56 = vpop.f32.mrf.mxu3 }
 0x38b   :  { %v953_v14 = vpop.permute.xlu0 %952 }
 0x38c   :  { %v1057_v19 = vsel %vm966_vm12, %v19784_v13, %v953_v14  ;;  %v13779_v47 = vpop.f32.mrf.mxu1  ;;  %v19787_v14 = vld [vmem:[#allocation6_spill] sm:$0xff] }
 0x38d   :  { %1513 = vmatmul.bf16.gmra.mxu2 %v1057_v19  ;;  %v2282_v13 = vpack.c.b16 %v19789_v34, %v19787_v14  ;;  %v13809_v34 = vpop.f32.mrf.mxu2 }
 0x393   :  { %v2265_v21 = vpop.permute.xlu0 %2264 }
 0x394   :  { %v13757_v23 = vsel %vm966_vm12, %v2228_v41, %v2265_v21  ;;  %v13789_v19 = vpop.f32.mrf.mxu1  ;;  %v19791_v21 = vld [vmem:[#allocation22_spill] sm:$0xff] }
 0x395   :  { %2808 = vmatmul.bf16.gmra.mxu1 %v13757_v23  ;;  %v19792_v39 = vpack.c.b16 %v19790_v53, %v19791_v21  ;;  %v19796_v21 = vld [vmem:[#allocation51_spill] sm:$0xff] }
 0x39b   :  { %v955_v3 = vpop.permute.xlu0 %954 }
 0x39c   :  { %v1061_v6 = vsel %vm966_vm12, %v929_v0, %v955_v3  ;;  %v19793_v3 = vld [vmem:[#allocation54_spill] sm:$0xff] }
 0x39d   :  { %1518 = vmatmul.bf16.gmra.mxu2 %v1061_v6 }
 0x3a1   :  { %v2267_v49 = vpop.permute.xlu1 %2266 }
 0x3a2   :  { %v13773_v46 = vsel %vm966_vm12, %v2229_v29, %v2267_v49  ;;  %v13787_v29 = vpop.f32.mrf.mxu0  ;;  %v13801_v49 = vpop.f32.mrf.mxu1 }
 0x3a3   :  { %v963_v41 = vpop.permute.xlu0 %962 }
 0x3a4   :  { %v1069_v17 = vsel %vm966_vm12, %v957_v55, %v963_v41  ;;  %v13803_v55 = vpop.f32.mrf.mxu3 }
 0x3a5   :  { %1567 = vmatmul.bf16.gmra.mxu3 %v1069_v17  ;;  %2813 = vmatmul.bf16.gmra.mxu1 %v13773_v46 }
 0x3a9   :  { %v2335_v42 = vpop.permute.xlu1 %2334 }
 0x3aa   :  { %v2426_v0 = vsel %vm966_vm12, %v19792_v39, %v2335_v42  ;;  %v13799_v6 = vpop.f32.mrf.mxu0  ;;  %v13815_v53 = vpop.f32.mrf.mxu1  ;;  %v19797_v39 = vld [vmem:[#allocation16_spill] sm:$0xff] }
 0x3ab   :  { %v2299_v22 = vpop.permute.xlu0 %2298 }
 0x3ac   :  { %v2394_v2 = vsel %vm966_vm12, %v2282_v13, %v2299_v22  ;;  %v19794_v22 = vunpack.c.l.b16 %v13206_v11 }
 0x3ad   :  { %2827 = vmatmul.bf16.vlgmr.msrb.gmra.mxu2 %v2394_v2  ;;  %v19795_v2 = vunpack.c.l.b16 %v13592_v51 }
 0x3af   :  { %v2284_v42 = vpack.c.b16 %v19795_v2, %v19794_v22 }
 0x3b1   :  { %v2337_v17 = vpop.permute.xlu1 %2336 }
 0x3b2   :  { %v13807_v16 = vpop.f32.mrf.mxu0  ;;  %v13831_v2 = vpop.f32.mrf.mxu1 }
 0x3b3   :  { %v2301_v33 = vpop.permute.xlu0 %2300 }
 0x3b4   :  { %v2398_v41 = vsel %vm966_vm12, %v19793_v3, %v2301_v33  ;;  %v13822_v33 = vpop.f32.mrf.mxu3 }
 0x3b5   :  { %2876 = vmatmul.bf16.vlgmr.msrb.gmra.mxu3 %v2426_v0  ;;  %10640 = vmatmul.msk.bf16.vlgmr.msra.gmra.mxu1 %vm966_vm12, %v19793_v3  ;;  %v19798_v0 = vpack.c.b16 %v19796_v21, %v19797_v39 }
 0x3b7   :  { %v2430_v61 = vsel %vm966_vm12, %v19798_v0, %v2337_v17  ;;  %v19800_v0 = vld [vmem:[#allocation52_spill] sm:$0xff] }
 0x3b9   :  { %v2339_v39 = vpop.permute.xlu1 %2338 }
 0x3ba   :  { %v13829_v22 = vpop.f32.mrf.mxu0 }
 0x3bb   :  { %v2303_v58 = vpop.permute.xlu0 %2302 }
 0x3bc   :  { %v2402_v21 = vsel %vm966_vm12, %v2284_v42, %v2303_v58  ;;  %v13835_v17 = vpop.f32.mrf.mxu3 }
 0x3bd   :  { %2832 = vmatmul.bf16.gmra.mxu2 %v2398_v41  ;;  %v2350_v41 = vpack.c.b16 %v19781_v35, %v13561_v26  ;;  %v2318_v26 = vpack.c.b16 %v19801_v44, %v19800_v0 }
 0x3bf   :  { %v2434_v38 = vsel %vm966_vm12, %v2318_v26, %v2339_v39 }
 0x3c3   :  { %v2305_v13 = vpop.permute.xlu0 %2304 }
 0x3c4   :  { %v13846_v58 = vpop.f32.mrf.mxu3 }
 0x3c5   :  { %2881 = vmatmul.bf16.gmra.mxu3 %v2430_v61  ;;  %10641 = vmatmul.msk.bf16.gmra.mxu1 %vm966_vm12, %v2284_v42  ;;  %v2406_v42 = vsel %vm966_vm12, %v13533_v9, %v2305_v13 }
 0x3ca   :  { %v1509_v3 = vpop.f32.mrf.mxu2 }
 0x3cb   :  { %v2355_v11 = vpop.permute.xlu0 %2354  ;;  %v13827_v51 = vadd.f32 %v1509_v3, %v19799_v20  ;;  %v13842_v20 = vpop.f32.mrf.mxu0 }
 0x3cc   :  { %v2458_v61 = vsel %vm966_vm12, %v2350_v41, %v2355_v11  ;;  %v13844_v3 = vpop.f32.mrf.mxu1  ;;  %v2341_v41 = vpop.permute.xlu1 %2340 }
 0x3cd   :  { %2837 = vmatmul.bf16.gmra.mxu2 %v2402_v21  ;;  %2940 = vmatmul.bf16.gmra.mxu0 %v2458_v61  ;;  %v19803_v61 = vunpack.c.l.b16 %v13610_v30  ;;  %v13860_v0 = vpop.f32.mrf.mxu3 }
 0x3cf   :  { %v2358_v39 = vpack.c.b16 %v19787_v14, %v19803_v61 }
 0x3d3   :  { %v13851_v44 = vpop.f32.mrf.mxu0 }
 0x3d4   :  { %v13853_v11 = vpop.f32.mrf.mxu1 }
 0x3d5   :  { %2886 = vmatmul.bf16.gmra.mxu3 %v2434_v38  ;;  %10642 = vmatmul.msk.bf16.gmra.mxu1 %vm966_vm12, %v13533_v9  ;;  %v19802_v38 = vld [vmem:[#allocation48_spill] sm:$0xff]  ;;  %v2307_v9 = vpop.permute.xlu1 %2306 }
 0x3d6   :  { %v2319_v21 = vpack.c.b16 %v13633_v32, %v19802_v38  ;;  %v2343_v38 = vpop.permute.xlu0 %2342 }
 0x3d8   :  { %v2438_v26 = vsel %vm966_vm12, %v2319_v21, %v2341_v41  ;;  %v11299_v41 = vld [vmem:[%s19292_s12 + $0x18] sm:$0xff]  ;;  %v13876_v21 = vpop.f32.mrf.mxu3 }
 0x3d9   :  { %3345 = vmatpush.bf16.msrb.mxu0 %v11299_v41 }
 0x3dc   :  { %v13866_v13 = vpop.f32.mrf.mxu1 }
 0x3dd   :  { %2842 = vmatmul.bf16.gmra.mxu2 %v2406_v42  ;;  %2945 = vmatmul.bf16.gmra.mxu0 %v13715_v50  ;;  %v13864_v50 = vpop.f32.mrf.mxu0  ;;  %v19804_v42 = vunpack.c.l.b16 %v13497_v40  ;;  %v19805_v40 = vpack.c.b16 %v13379_v28, %v13337_v45  ;;  %v11297_v45 = vld [vmem:[%s19292_s12 + $0x8] sm:$0xff] }
 0x3df   :  { %v2286_v32 = vpack.c.b16 %v19804_v42, %v19787_v14  ;;  %v2309_v42 = vpop.permute.xlu1 %2308 }
 0x3e0   :  { %v2414_v41 = vsel %vm966_vm12, %v13555_v10, %v2309_v42  ;;  %v19809_v42 = vld [vmem:[#allocation9_spill] sm:$0xff] }
 0x3e1   :  { %v2410_v30 = vsel %vm966_vm12, %v2286_v32, %v2307_v9  ;;  %v2345_v9 = vpop.permute.xlu0 %2344 }
 0x3e5   :  { %2891 = vmatmul.bf16.gmra.mxu3 %v2438_v26  ;;  %10643 = vmatmul.msk.bf16.gmra.mxu1 %vm966_vm12, %v2358_v39  ;;  %v13880_v39 = vpop.f32.mrf.mxu0  ;;  %v2442_v26 = vsel %vm966_vm12, %v19805_v40, %v2343_v38 }
 0x3e9   :  { %v2347_v38 = vpop.permute.xlu0 %2346 }
 0x3ed   :  { %2847 = vmatmul.bf16.gmra.mxu2 %v2410_v30  ;;  %2950 = vmatmul.bf16.gmra.mxu0 %v13757_v23  ;;  %v13888_v23 = vpop.f32.mrf.mxu3  ;;  %v11298_v30 = vld [vmem:[%s19292_s12 + $0x10] sm:$0xff]  ;;  %v13898_v28 = vpop.f32.mrf.mxu0 }
 0x3ee   :  { %19807 = vst [vmem:[#allocation42_spill] sm:$0xff] %v13898_v28  ;;  %3346 = vmatpush.bf16.msrb.mxu0 %v11298_v30  ;;  %v19811_v30 = vpack.c.b16 %v13431_v12, %v13383_v4  ;;  %v2311_v12 = vpop.permute.xlu1 %2310 }
 0x3f0   :  { %v2446_v25 = vsel %vm966_vm12, %v19811_v30, %v2345_v9 }
 0x3f1   :  { %v13878_v61 = vpop.f32.mrf.mxu1  ;;  %v2357_v9 = vpop.permute.xlu0 %2356 }
 0x3f2   :  { %3347 = vmatpush.bf16.msrb.mxu0 %v11297_v45  ;;  %v11295_v45 = vld [vmem:[%s19293_s10 + $0x18] sm:$0xff] }
 0x3f3   :  { %3260 = vmatpush.bf16.msra.mxu3 %v11295_v45 }
 0x3f5   :  { %2896 = vmatmul.bf16.gmra.mxu3 %v2442_v26  ;;  %10644 = vmatmul.msk.bf16.gmra.mxu1 %vm966_vm12, %v13555_v10  ;;  %v13903_v40 = vpop.f32.mrf.mxu3  ;;  %v11296_v10 = vld [vmem:[%s19292_s12] sm:$0xff]  ;;  %v13922_v24 = vpop.f32.mrf.mxu0 }
 0x3f6   :  { %3348 = vmatpush.bf16.msrb.mxu0 %v11296_v10  ;;  %v2418_v10 = vsel %vm966_vm12, %v13612_v63, %v2311_v12 }
 0x3f9   :  { %v13890_v32 = vpop.f32.mrf.mxu1 }
 0x3fa   :  { %19806 = vst [vmem:[#allocation41_spill] sm:$0xff] %v13890_v32 }
 0x3fd   :  { %2852 = vmatmul.bf16.gmra.mxu2 %v2414_v41  ;;  %2955 = vmatmul.bf16.gmra.mxu0 %v13773_v46  ;;  %v19810_v41 = vld [vmem:[#allocation28_spill] sm:$0xff]  ;;  %v13952_v12 = vpop.f32.mrf.mxu0 }
 0x3fe   :  { %v1438_v46 = vadd.f32 %v19810_v41, %v19809_v42  ;;  %v13924_v42 = vpop.f32.mrf.mxu2 }
 0x400   :  { %v1487_v27 = vadd.f32 %v19812_v62, %v1438_v46  ;;  %v2351_v62 = vpack.c.b16 %v19781_v35, %v13474_v57  ;;  %v13932_v46 = vpop.f32.mrf.mxu3  ;;  %v19815_v57 = vld [vmem:[#allocation14_spill] sm:$0xff]  ;;  %v19816_v35 = vld [vmem:[#allocation12_spill] sm:$0xff] }
 0x402   :  { %v13905_v26 = vpop.f32.mrf.mxu1  ;;  %v1536_v4 = vadd.f32 %v13781_v15, %v1487_v27  ;;  %v2462_v30 = vsel %vm966_vm12, %v2351_v62, %v2357_v9  ;;  %v13940_v27 = vld [vmem:[%s19814_s5] ss:$0 sm:$0xff]  ;;  %v19819_v9 = vld [vmem:[#allocation49_spill] sm:$0xff] }
 0x403   :  { %19808 = vst [vmem:[#allocation5_spill] sm:$0xff] %v13905_v26 }
 0x405   :  { %2901 = vmatmul.bf16.gmra.mxu3 %v2446_v25  ;;  %10645 = vmatmul.msk.bf16.gmra.mxu1 %vm966_vm12, %v13612_v63  ;;  %v1585_v25 = vadd.f32 %v13694_v5, %v1536_v4  ;;  %v1443_v5 = vadd.f32 %v19816_v35, %v19815_v57  ;;  %v19817_v4 = vld [vmem:[#allocation57_spill] sm:$0xff]  ;;  %v13950_v63 = vld [vmem:[%s19818_s6] ss:$0 sm:$0xff]  ;;  %s19842_s6 = sld [smem:[#allocation114_spill]] }
 0x407   :  { %v1627_v15 = vmul.f32 %v13940_v27, %v1585_v25  ;;  %v11294_v25 = vld [vmem:[%s19293_s10 + $0x10] sm:$0xff] }
 0x408   :  { %3261 = vmatpush.bf16.msra.mxu3 %v11294_v25 }
 0x409   :  { %v13963_v35 = vadd.f32 %v13950_v63, %v1627_v15  ;;  %v13978_v15 = vpop.f32.mrf.mxu3 }
 0x40a   :  { %v13927_v41 = vpop.f32.mrf.mxu1 }
 0x40b   :  { %19813 = vst [vmem:[#allocation25_spill] sm:$0xff] %v13927_v41  ;;  %v1626_v41 = vmul.f32 %v13940_v27, %v19817_v4  ;;  %v11293_v4 = vld [vmem:[%s19293_s10 + $0x8] sm:$0xff] }
 0x40c   :  { %19821 = vst [vmem:[#allocation36_spill] sm:$0xff] %v13963_v35  ;;  %3262 = vmatpush.bf16.msra.mxu3 %v11293_v4 }
 0x40d   :  { %2857 = vmatmul.bf16.gmra.mxu2 %v2418_v10  ;;  %2960 = vmatmul.bf16.gmra.mxu0 %v2462_v30  ;;  %v19822_v30 = vld [vmem:[#allocation58_spill] sm:$0xff]  ;;  %v13974_v26 = vadd.f32 %v13950_v63, %v1626_v41  ;;  %v2313_v41 = vpop.permute.xlu1 %2312 }
 0x40e   :  { %v1492_v57 = vadd.f32 %v19822_v30, %v1443_v5 }
 0x40f   :  { %19824 = vst [vmem:[#allocation37_spill] sm:$0xff] %v13974_v26 }
 0x410   :  { %v1514_v45 = vpop.f32.mrf.mxu2  ;;  %v1541_v25 = vadd.f32 %v13803_v55, %v1492_v57  ;;  %v19827_v55 = vmax.f32 %v13963_v35, 0.0 }
 0x411   :  { %v13955_v62 = vadd.f32 %v1514_v45, %v19819_v9  ;;  %v19823_v45 = vpack.c.b16 %v13493_v52, %v19780_v43  ;;  %v19391_v52 = vmax.f32 %v13974_v26, 0.0  ;;  %v19825_v43 = vld [vmem:[#allocation19_spill] sm:$0xff]  ;;  %v14007_v26 = vpop.f32.mrf.mxu3 }
 0x412   :  { %v13960_v10 = vpop.f32.mrf.mxu1  ;;  %v1590_v4 = vadd.f32 %v13751_v59, %v1541_v25 }
 0x413   :  { %19820 = vst [vmem:[#allocation24_spill] sm:$0xff] %v13960_v10  ;;  %v2450_v9 = vsel %vm966_vm12, %v19823_v45, %v2347_v38  ;;  %v1539_v38 = vadd.f32 %v13791_v56, %v19825_v43  ;;  %v11291_v45 = vld [vmem:[%s19294_s8 + $0x18] sm:$0xff]  ;;  %v3071_v57 = vpack.c.bf16 %v19827_v55, %v19391_v52  ;;  %v14000_v10 = vpop.f32.mrf.mxu0  ;;  %v2422_v56 = vsel %vm966_vm12, %v13644_v60, %v2313_v41  ;;  %v19829_v52 = vld [vmem:[#allocation15_spill] sm:$0xff] }
 0x414   :  { %3151 = vmatpush.bf16.msra.mxu2 %v11291_v45  ;;  %v19828_v55 = vld [vmem:[#allocation21_spill] sm:$0xff]  ;;  %v2349_v45 = vpop.permute.xlu2 %2348 }
 0x415   :  { %2906 = vmatmul.bf16.gmra.mxu3 %v2450_v9  ;;  %10646 = vmatmul.msk.bf16.gmra.mxu1 %vm966_vm12, %v13644_v60  ;;  %v11292_v9 = vld [vmem:[%s19293_s10] sm:$0xff]  ;;  %v1588_v43 = vadd.f32 %v13724_v37, %v1539_v38  ;;  %v1448_v59 = vadd.f32 %v19829_v52, %v19828_v55  ;;  %v19832_v37 = vld [vmem:[#allocation60_spill] sm:$0xff]  ;;  %v19834_v52 = vpack.c.b16 %v13657_v7, %v13500_v36 }
 0x416   :  { %3263 = vmatpush.bf16.msra.mxu3 %v11292_v9  ;;  %v19830_v9 = vld [vmem:[#allocation55_spill] sm:$0xff] }
 0x417   :  { %v1628_v25 = vmul.f32 %v13940_v27, %v1588_v43  ;;  %v1497_v38 = vadd.f32 %v19832_v37, %v1448_v59  ;;  %v2454_v43 = vsel %vm966_vm12, %v19834_v52, %v2349_v45  ;;  %v19836_v37 = vld [vmem:[#allocation59_spill] sm:$0xff] }
 0x418   :  { %v13982_v30 = vpop.f32.mrf.mxu2  ;;  %v1544_v36 = vadd.f32 %v13822_v33, %v19836_v37  ;;  %v11290_v33 = vld [vmem:[%s19294_s8 + $0x10] sm:$0xff]  ;;  %v19837_v52 = vld [vmem:[#allocation23_spill] sm:$0xff] }
 0x419   :  { %3152 = vmatpush.bf16.msra.mxu2 %v11290_v33 }
 0x41a   :  { %v13993_v5 = vpop.f32.mrf.mxu1 }
 0x41b   :  { %19826 = vst [vmem:[#allocation11_spill] sm:$0xff] %v13993_v5  ;;  %v1629_v5 = vmul.f32 %v13940_v27, %v1590_v4  ;;  %v14019_v41 = vpop.f32.mrf.mxu0  ;;  %v19833_v4 = vunpack.c.l.b16 %v13517_v18 }
 0x41d   :  { %2862 = vmatmul.bf16.gmra.mxu2 %v2422_v56  ;;  %10712 = vmatmul.msk.bf16.vlgmr.msrb.gmra.mxu0 %vm966_vm12, %v3071_v57  ;;  %v14016_v60 = vadd.f32 %v13950_v63, %v1629_v5  ;;  %v2359_v56 = vpack.c.b16 %v19787_v14, %v19833_v4  ;;  %v1546_v5 = vadd.f32 %v13835_v17, %v1497_v38 }
 0x41e   :  { %v1593_v38 = vadd.f32 %v13760_v48, %v1544_v36 }
 0x41f   :  { %19831 = vst [vmem:[#allocation44_spill] sm:$0xff] %v14016_v60  ;;  %v19392_v55 = vmax.f32 %v14016_v60, 0.0 }
 0x420   :  { %v1519_v35 = vpop.f32.mrf.mxu2 }
 0x421   :  { %v1520_v32 = vadd.f32 %v1519_v35, %v19830_v9  ;;  %v14029_v35 = vadd.f32 %v13950_v63, %v1628_v25  ;;  %v1595_v25 = vadd.f32 %v13775_v1, %v1546_v5 }
 0x422   :  { %v14013_v28 = vpop.f32.mrf.mxu1 }
 0x423   :  { %19835 = vst [vmem:[#allocation46_spill] sm:$0xff] %v14029_v35  ;;  %v19393_v9 = vmax.f32 %v14029_v35, 0.0  ;;  %v14049_v4 = vpop.f32.mrf.mxu0 }
 0x425   :  { %2911 = vmatmul.bf16.gmra.mxu3 %v2454_v43  ;;  %10647 = vmatmul.msk.bf16.gmra.mxu1 %vm966_vm12, %v2359_v56  ;;  %v3072_v17 = vpack.c.bf16 %v19392_v55, %v19393_v9  ;;  %v19838_v43 = vld [vmem:[#allocation13_spill] sm:$0xff]  ;;  %v11289_v55 = vld [vmem:[%s19294_s8 + $0x8] sm:$0xff] }
 0x426   :  { %v1453_v5 = vadd.f32 %v19838_v43, %v19837_v52  ;;  %3153 = vmatpush.bf16.msra.mxu2 %v11289_v55  ;;  %v19841_v9 = vld [vmem:[#allocation61_spill] sm:$0xff] }
 0x428   :  { %v14034_v59 = vpop.f32.mrf.mxu2  ;;  %v1568_v18 = vpop.f32.mrf.mxu3  ;;  %v1502_v36 = vadd.f32 %v13541_v8, %v1453_v5 }
 0x429   :  { %v14039_v7 = vadd.f32 %v1568_v18, %v1520_v32  ;;  %v1631_v32 = vmul.f32 %v13940_v27, %v1595_v25  ;;  %v1630_v18 = vmul.f32 %v13940_v27, %v1593_v38  ;;  %v11288_v38 = vld [vmem:[%s19294_s8] sm:$0xff] }
 0x42a   :  { %v14041_v45 = vpop.f32.mrf.mxu1  ;;  %v1551_v33 = vadd.f32 %v13860_v0, %v1502_v36  ;;  %3154 = vmatpush.bf16.msra.mxu2 %v11288_v38  ;;  %v19844_v38 = vld [vmem:[#allocation8_spill] sm:$0xff] }
 0x42b   :  { %v14062_v37 = vadd.f32 %v13950_v63, %v1631_v32  ;;  %v14069_v25 = vadd.f32 %v13950_v63, %v1630_v18  ;;  %v14076_v32 = vpop.f32.mrf.mxu0 }
 0x42c   :  { %v1600_v60 = vadd.f32 %v13799_v6, %v1551_v33  ;;  %v14096_v6 = vld [vmem:[%s19842_s6] ss:$0 sm:$0xff] }
 0x42d   :  { %10713 = vmatmul.msk.bf16.gmra.mxu0 %vm966_vm12, %v3072_v17  ;;  %19839 = vst [vmem:[#allocation30_spill] sm:$0xff] %v14062_v37  ;;  %v19396_v52 = vmax.f32 %v14062_v37, 0.0  ;;  %v19407_v18 = vmax.f32 %v14069_v25, 0.0 }
 0x42e   :  { %19840 = vst [vmem:[#allocation20_spill] sm:$0xff] %v14069_v25  ;;  %v1633_v36 = vmul.f32 %v13940_v27, %v1600_v60 }
 0x430   :  { %v14056_v56 = vpop.f32.mrf.mxu3  ;;  %v2828_v1 = vpop.f32.mrf.mxu2 }
 0x431   :  { %v2829_v8 = vadd.f32 %v2828_v1, %v13779_v47  ;;  %v3073_v47 = vpack.c.bf16 %v19396_v52, %v19407_v18 }
 0x432   :  { %v2975_v48 = vpop.f32.mrf.mxu1 }
 0x433   :  { %v14102_v52 = vpop.f32.mrf.mxu0 }
 0x435   :  { %10688 = vmatmul.msk.bf16.vlgmr.msra.gmra.mxu3 %vm966_vm12, %v3071_v57  ;;  %v1549_v57 = vadd.f32 %v13846_v58, %v19841_v9 }
 0x437   :  { %v1598_v1 = vadd.f32 %v13787_v29, %v1549_v57 }
 0x438   :  { %v2830_v43 = vpop.f32.mrf.mxu2  ;;  %v2877_v5 = vpop.f32.mrf.mxu3 }
 0x439   :  { %v2878_v55 = vadd.f32 %v2877_v5, %v2829_v8  ;;  %v2831_v58 = vadd.f32 %v2830_v43, %v13789_v19  ;;  %v14105_v19 = vadd.f32 %v13950_v63, %v1633_v36  ;;  %v14111_v43 = vld [vmem:[%s19846_s27] ss:$0 sm:$0xff] }
 0x43a   :  { %v2977_v14 = vpop.f32.mrf.mxu1 }
 0x43b   :  { %v2927_v0 = vadd.f32 %v13952_v12, %v2878_v55  ;;  %v19843_v12 = vld [vmem:[#allocation34_spill] sm:$0xff]  ;;  %v1632_v55 = vmul.f32 %v13940_v27, %v1598_v1  ;;  %19845 = vst [vmem:[#allocation35_spill] sm:$0xff] %v14105_v19 }
 0x43c   :  { %v1458_v33 = vadd.f32 %v19844_v38, %v19843_v12  ;;  %v19401_v38 = vmax.f32 %v14105_v19, 0.0 }
 0x43d   :  { %10714 = vmatmul.msk.bf16.gmra.mxu0 %vm966_vm12, %v3073_v47  ;;  %v2976_v9 = vadd.f32 %v2975_v48, %v2927_v0  ;;  %v14115_v1 = vadd.f32 %v13950_v63, %v1632_v55  ;;  %v1554_v55 = vadd.f32 %v13876_v21, %v13569_v54 }
 0x43e   :  { %v1507_v57 = vadd.f32 %v13809_v34, %v1458_v33 }
 0x43f   :  { %v3019_v48 = vmul.f32 %v14096_v6, %v2976_v9  ;;  %19847 = vst [vmem:[#allocation62_spill] sm:$0xff] %v14115_v1 }
 0x440   :  { %v2833_v8 = vpop.f32.mrf.mxu2  ;;  %v2879_v5 = vpop.f32.mrf.mxu3  ;;  %v1556_v34 = vadd.f32 %v13888_v23, %v1507_v57 }
 0x441   :  { %v2880_v29 = vadd.f32 %v2879_v5, %v2831_v58  ;;  %v3039_v36 = vadd.f32 %v14111_v43, %v3019_v48  ;;  %v2834_v12 = vadd.f32 %v2833_v8, %v13801_v49 }
 0x442   :  { %v2980_v60 = vpop.f32.mrf.mxu1  ;;  %v1605_v23 = vadd.f32 %v13829_v22, %v1556_v34 }
 0x443   :  { %v2929_v0 = vadd.f32 %v14000_v10, %v2880_v29  ;;  %v19406_v10 = vmax.f32 %v14115_v1, 0.0  ;;  %v3055_v49 = vmax.f32 %v3039_v36, 0.0  ;;  %v19848_v36 = vld [vmem:[#allocation45_spill] sm:$0xff] }
 0x444   :  { %v1635_v21 = vmul.f32 %v13940_v27, %v1605_v23 }
 0x445   :  { %v2978_v58 = vadd.f32 %v2977_v14, %v2929_v0  ;;  %10689 = vmatmul.msk.bf16.gmra.mxu3 %vm966_vm12, %v3072_v17  ;;  %v3074_v0 = vpack.c.bf16 %v19401_v38, %v19406_v10 }
 0x446   :  { %v14147_v23 = vadd.f32 %v13950_v63, %v1635_v21 }
 0x447   :  { %v3020_v9 = vmul.f32 %v14096_v6, %v2978_v58  ;;  %v1603_v58 = vadd.f32 %v13807_v16, %v1554_v55 }
 0x448   :  { %v2835_v33 = vpop.f32.mrf.mxu2  ;;  %v2882_v5 = vpop.f32.mrf.mxu3  ;;  %19850 = vst [vmem:[#allocation40_spill] sm:$0xff] %v14147_v23  ;;  %v19404_v21 = vmax.f32 %v14147_v23, 0.0 }
 0x449   :  { %v3040_v14 = vadd.f32 %v14111_v43, %v3020_v9  ;;  %v2883_v17 = vadd.f32 %v2882_v5, %v2834_v12  ;;  %v2836_v22 = vadd.f32 %v2835_v33, %v13815_v53  ;;  %v19849_v12 = vld [vmem:[#allocation39_spill] sm:$0xff] }
 0x44a   :  { %v14128_v29 = vpop.f32.mrf.mxu0  ;;  %v2982_v57 = vpop.f32.mrf.mxu1 }
 0x44b   :  { %v3056_v8 = vmax.f32 %v3040_v14, 0.0  ;;  %v2932_v48 = vadd.f32 %v14019_v41, %v2883_v17  ;;  %v1463_v41 = vadd.f32 %v19849_v12, %v19848_v36  ;;  %v1634_v14 = vmul.f32 %v13940_v27, %v1603_v58 }
 0x44d   :  { %v3079_v54 = vpack.c.bf16 %v3056_v8, %v3055_v49  ;;  %10715 = vmatmul.msk.bf16.gmra.mxu0 %vm966_vm12, %v3074_v0  ;;  %v2981_v34 = vadd.f32 %v2980_v60, %v2932_v48  ;;  %v1512_v16 = vadd.f32 %v13924_v42, %v1463_v41  ;;  %v14152_v33 = vadd.f32 %v13950_v63, %v1634_v14 }
 0x44f   :  { %10664 = vmatmul.msk.bf16.vlgmr.msra.gmra.mxu2 %vm966_vm12, %v3079_v54  ;;  %v3021_v53 = vmul.f32 %v14096_v6, %v2981_v34  ;;  %19851 = vst [vmem:[#allocation33_spill] sm:$0xff] %v14152_v33  ;;  %v1561_v48 = vadd.f32 %v13932_v46, %v1512_v16  ;;  %v19405_v36 = vmax.f32 %v14152_v33, 0.0 }
 0x450   :  { %v2838_v9 = vpop.f32.mrf.mxu2  ;;  %v2884_v5 = vpop.f32.mrf.mxu3 }
 0x451   :  { %v2885_v17 = vadd.f32 %v2884_v5, %v2836_v22  ;;  %v3041_v42 = vadd.f32 %v14111_v43, %v3021_v53  ;;  %v2839_v58 = vadd.f32 %v2838_v9, %v13831_v2  ;;  %v1559_v22 = vadd.f32 %v13903_v40, %v13827_v51 }
 0x452   :  { %v14144_v55 = vpop.f32.mrf.mxu0  ;;  %v2985_v49 = vpop.f32.mrf.mxu1  ;;  %v1610_v46 = vadd.f32 %v13851_v44, %v1561_v48  ;;  %v3075_v51 = vpack.c.bf16 %v19404_v21, %v19405_v36  ;;  %v19853_v48 = vld [vmem:[#allocation50_spill] sm:$0xff] }
 0x453   :  { %v2934_v60 = vadd.f32 %v14049_v4, %v2885_v17  ;;  %v3057_v2 = vmax.f32 %v3041_v42, 0.0  ;;  %v1608_v5 = vadd.f32 %v13842_v20, %v1559_v22 }
 0x454   :  { %v1637_v17 = vmul.f32 %v13940_v27, %v1610_v46 }
 0x455   :  { %v2983_v8 = vadd.f32 %v2982_v57, %v2934_v60  ;;  %10690 = vmatmul.msk.bf16.gmra.mxu3 %vm966_vm12, %v3073_v47 }
 0x456   :  { %v14181_v20 = vadd.f32 %v13950_v63, %v1637_v17 }
 0x457   :  { %v3022_v54 = vmul.f32 %v14096_v6, %v2983_v8  ;;  %v19852_v8 = vld [vmem:[#allocation53_spill] sm:$0xff] }
 0x458   :  { %v2840_v4 = vpop.f32.mrf.mxu2  ;;  %v2887_v34 = vpop.f32.mrf.mxu3  ;;  %v1468_v42 = vadd.f32 %v19853_v48, %v19852_v8  ;;  %19854 = vst [vmem:[#allocation26_spill] sm:$0xff] %v14181_v20 }
 0x459   :  { %v3042_v57 = vadd.f32 %v14111_v43, %v3022_v54  ;;  %v2888_v47 = vadd.f32 %v2887_v34, %v2839_v58  ;;  %v2841_v44 = vadd.f32 %v2840_v4, %v13844_v3 }
 0x45a   :  { %v14165_v12 = vpop.f32.mrf.mxu0  ;;  %v2987_v41 = vpop.f32.mrf.mxu1  ;;  %v1517_v34 = vadd.f32 %v13982_v30, %v1468_v42 }
 0x45b   :  { %v2937_v9 = vadd.f32 %v14076_v32, %v2888_v47  ;;  %v3058_v40 = vmax.f32 %v3042_v57, 0.0  ;;  %v1636_v32 = vmul.f32 %v13940_v27, %v1608_v5  ;;  %v19402_v47 = vmax.f32 %v14181_v20, 0.0 }
 0x45c   :  { %v1566_v46 = vadd.f32 %v14007_v26, %v1517_v34 }
 0x45d   :  { %10716 = vmatmul.msk.bf16.gmra.mxu0 %vm966_vm12, %v3075_v51  ;;  %v3080_v14 = vpack.c.bf16 %v3058_v40, %v3057_v2  ;;  %v2986_v16 = vadd.f32 %v2985_v49, %v2937_v9  ;;  %v14189_v4 = vadd.f32 %v13950_v63, %v1636_v32 }
 0x45e   :  { %v1615_v26 = vadd.f32 %v13880_v39, %v1566_v46 }
 0x45f   :  { %10665 = vmatmul.msk.bf16.gmra.mxu2 %vm966_vm12, %v3080_v14  ;;  %v3023_v3 = vmul.f32 %v14096_v6, %v2986_v16  ;;  %19855 = vst [vmem:[#allocation31_spill] sm:$0xff] %v14189_v4  ;;  %v19403_v40 = vmax.f32 %v14189_v4, 0.0  ;;  %v1564_v14 = vadd.f32 %v13978_v15, %v13955_v62 }
 0x460   :  { %v2843_v53 = vpop.f32.mrf.mxu2  ;;  %v2889_v60 = vpop.f32.mrf.mxu3  ;;  %v1639_v15 = vmul.f32 %v13940_v27, %v1615_v26 }
 0x461   :  { %v2890_v58 = vadd.f32 %v2889_v60, %v2841_v44  ;;  %v3043_v2 = vadd.f32 %v14111_v43, %v3023_v3  ;;  %v2844_v9 = vadd.f32 %v2843_v53, %v13853_v11  ;;  %v3076_v11 = vpack.c.bf16 %v19402_v47, %v19403_v40  ;;  %v19856_v3 = vld [vmem:[#allocation56_spill] sm:$0xff] }
 0x462   :  { %v14183_v54 = vpop.f32.mrf.mxu0  ;;  %v2990_v22 = vpop.f32.mrf.mxu1  ;;  %v1613_v60 = vadd.f32 %v13864_v50, %v1564_v14 }
 0x463   :  { %v2939_v49 = vadd.f32 %v14102_v52, %v2890_v58  ;;  %v3059_v16 = vmax.f32 %v3043_v2, 0.0 }
 0x464   :  { %v1638_v39 = vmul.f32 %v13940_v27, %v1613_v60  ;;  %v19859_v60 = vld [vmem:[#allocation42_spill] sm:$0xff] }
 0x465   :  { %v2988_v57 = vadd.f32 %v2987_v41, %v2939_v49  ;;  %10691 = vmatmul.msk.bf16.gmra.mxu3 %vm966_vm12, %v3074_v0 }
 0x466   :  { %v14226_v2 = vadd.f32 %v13950_v63, %v1638_v39 }
 0x467   :  { %v3024_v30 = vmul.f32 %v14096_v6, %v2988_v57  ;;  %v14220_v57 = vadd.f32 %v13950_v63, %v1639_v15 }
 0x468   :  { %v2845_v5 = vpop.f32.mrf.mxu2  ;;  %v2892_v52 = vpop.f32.mrf.mxu3  ;;  %19858 = vst [vmem:[#allocation32_spill] sm:$0xff] %v14226_v2 }
 0x469   :  { %v3044_v41 = vadd.f32 %v14111_v43, %v3024_v30  ;;  %v2893_v0 = vadd.f32 %v2892_v52, %v2844_v9  ;;  %v2846_v8 = vadd.f32 %v2845_v5, %v13866_v13  ;;  %19857 = vst [vmem:[#allocation27_spill] sm:$0xff] %v14220_v57  ;;  %v19399_v14 = vmax.f32 %v14220_v57, 0.0 }
 0x46a   :  { %v14201_v17 = vpop.f32.mrf.mxu0  ;;  %v2992_v44 = vpop.f32.mrf.mxu1 }
 0x46b   :  { %v2942_v32 = vadd.f32 %v14128_v29, %v2893_v0  ;;  %v3060_v53 = vmax.f32 %v3044_v41, 0.0  ;;  %v1473_v29 = vadd.f32 %v13765_v31, %v19856_v3 }
 0x46d   :  { %10717 = vmatmul.msk.bf16.gmra.mxu0 %vm966_vm12, %v3076_v11  ;;  %v3081_v62 = vpack.c.bf16 %v3060_v53, %v3059_v16  ;;  %v2991_v48 = vadd.f32 %v2990_v22, %v2942_v32  ;;  %v1522_v22 = vadd.f32 %v14034_v59, %v1473_v29  ;;  %v19400_v59 = vmax.f32 %v14226_v2, 0.0 }
 0x46f   :  { %10666 = vmatmul.msk.bf16.gmra.mxu2 %vm966_vm12, %v3081_v62  ;;  %v3025_v46 = vmul.f32 %v14096_v6, %v2991_v48  ;;  %v1571_v31 = vadd.f32 %v14056_v56, %v1522_v22  ;;  %v1618_v62 = vadd.f32 %v19859_v60, %v14039_v7 }
 0x470   :  { %v2848_v42 = vpop.f32.mrf.mxu2  ;;  %v2894_v58 = vpop.f32.mrf.mxu3 }
 0x471   :  { %v2895_v34 = vadd.f32 %v2894_v58, %v2846_v8  ;;  %v3045_v30 = vadd.f32 %v14111_v43, %v3025_v46  ;;  %v2849_v5 = vadd.f32 %v2848_v42, %v13878_v61  ;;  %v3077_v61 = vpack.c.bf16 %v19399_v14, %v19400_v59  ;;  %v19860_v8 = vld [vmem:[#allocation41_spill] sm:$0xff] }
 0x472   :  { %v14217_v49 = vpop.f32.mrf.mxu0  ;;  %v2995_v50 = vpop.f32.mrf.mxu1  ;;  %v1640_v39 = vmul.f32 %v13940_v27, %v1618_v62 }
 0x473   :  { %v2944_v13 = vadd.f32 %v14144_v55, %v2895_v34  ;;  %v3061_v16 = vmax.f32 %v3045_v30, 0.0 }
 0x474   :  { %v14257_v22 = vadd.f32 %v13950_v63, %v1640_v39 }
 0x475   :  { %v2993_v9 = vadd.f32 %v2992_v44, %v2944_v13  ;;  %10692 = vmatmul.msk.bf16.gmra.mxu3 %vm966_vm12, %v3075_v51  ;;  %v1620_v44 = vadd.f32 %v13922_v24, %v1571_v31  ;;  %v19863_v31 = vld [vmem:[#allocation5_spill] sm:$0xff] }
 0x476   :  { %19862 = vst [vmem:[#allocation18_spill] sm:$0xff] %v14257_v22 }
 0x477   :  { %v3026_v52 = vmul.f32 %v14096_v6, %v2993_v9  ;;  %v1641_v24 = vmul.f32 %v13940_v27, %v1620_v44 }
 0x478   :  { %v2850_v41 = vpop.f32.mrf.mxu2  ;;  %v2897_v55 = vpop.f32.mrf.mxu3 }
 0x479   :  { %v3046_v0 = vadd.f32 %v14111_v43, %v3026_v52  ;;  %v2898_v26 = vadd.f32 %v2897_v55, %v2849_v5  ;;  %v2851_v48 = vadd.f32 %v2850_v41, %v19860_v8  ;;  %v14252_v46 = vadd.f32 %v13950_v63, %v1641_v24 }
 0x47a   :  { %v14237_v51 = vpop.f32.mrf.mxu0  ;;  %v2997_v56 = vpop.f32.mrf.mxu1  ;;  %v19398_v55 = vmax.f32 %v14257_v22, 0.0 }
 0x47b   :  { %v2947_v32 = vadd.f32 %v14165_v12, %v2898_v26  ;;  %v3062_v53 = vmax.f32 %v3046_v0, 0.0  ;;  %19861 = vst [vmem:[#allocation43_spill] sm:$0xff] %v14252_v46  ;;  %v19397_v9 = vmax.f32 %v14252_v46, 0.0 }
 0x47d   :  { %10718 = vmatmul.msk.bf16.gmra.mxu0 %vm966_vm12, %v3077_v61  ;;  %v3082_v15 = vpack.c.bf16 %v3062_v53, %v3061_v16  ;;  %v2996_v42 = vadd.f32 %v2995_v50, %v2947_v32  ;;  %v19864_v53 = vld [vmem:[#allocation25_spill] sm:$0xff] }
 0x47f   :  { %10667 = vmatmul.msk.bf16.gmra.mxu2 %vm966_vm12, %v3082_v15  ;;  %v3027_v7 = vmul.f32 %v14096_v6, %v2996_v42 }
 0x480   :  { %v2853_v12 = vpop.f32.mrf.mxu2  ;;  %v2899_v58 = vpop.f32.mrf.mxu3 }
 0x481   :  { %v2900_v34 = vadd.f32 %v2899_v58, %v2851_v48  ;;  %v3047_v27 = vadd.f32 %v14111_v43, %v3027_v7  ;;  %v2854_v30 = vadd.f32 %v2853_v12, %v19863_v31 }
 0x482   :  { %v2958_v3 = vpop.f32.mrf.mxu0  ;;  %v3000_v29 = vpop.f32.mrf.mxu1 }
 0x483   :  { %v2949_v13 = vadd.f32 %v14183_v54, %v2900_v34  ;;  %v3063_v26 = vmax.f32 %v3047_v27, 0.0  ;;  %v19865_v34 = vld [vmem:[#allocation24_spill] sm:$0xff] }
 0x485   :  { %v2998_v50 = vadd.f32 %v2997_v56, %v2949_v13  ;;  %10693 = vmatmul.msk.bf16.gmra.mxu3 %vm966_vm12, %v3076_v11  ;;  %v3078_v11 = vpack.c.bf16 %v19397_v9, %v19398_v55 }
 0x487   :  { %v3028_v5 = vmul.f32 %v14096_v6, %v2998_v50 }
 0x488   :  { %v2855_v52 = vpop.f32.mrf.mxu2  ;;  %v2902_v41 = vpop.f32.mrf.mxu3 }
 0x489   :  { %v3048_v54 = vadd.f32 %v14111_v43, %v3028_v5  ;;  %v2903_v0 = vadd.f32 %v2902_v41, %v2854_v30  ;;  %v2856_v60 = vadd.f32 %v2855_v52, %v19864_v53 }
 0x48a   :  { %v2961_v63 = vpop.f32.mrf.mxu0  ;;  %v3002_v16 = vpop.f32.mrf.mxu1 }
 0x48b   :  { %v2952_v44 = vadd.f32 %v14201_v17, %v2903_v0  ;;  %v3064_v56 = vmax.f32 %v3048_v54, 0.0 }
 0x48d   :  { %10719 = vmatmul.msk.bf16.gmra.mxu0 %vm966_vm12, %v3078_v11  ;;  %v3083_v32 = vpack.c.bf16 %v3064_v56, %v3063_v26  ;;  %v3001_v62 = vadd.f32 %v3000_v29, %v2952_v44 }
 0x48f   :  { %10668 = vmatmul.msk.bf16.gmra.mxu2 %vm966_vm12, %v3083_v32  ;;  %v3029_v17 = vmul.f32 %v14096_v6, %v3001_v62 }
 0x490   :  { %v2858_v15 = vpop.f32.mrf.mxu2  ;;  %v2904_v24 = vpop.f32.mrf.mxu3 }
 0x491   :  { %v2905_v8 = vadd.f32 %v2904_v24, %v2856_v60  ;;  %v3049_v39 = vadd.f32 %v14111_v43, %v3029_v17  ;;  %v2859_v7 = vadd.f32 %v2858_v15, %v19865_v34 }
 0x492   :  { %v2963_v48 = vpop.f32.mrf.mxu0  ;;  %v3005_v58 = vpop.f32.mrf.mxu1 }
 0x493   :  { %v2954_v42 = vadd.f32 %v14217_v49, %v2905_v8  ;;  %v3065_v5 = vmax.f32 %v3049_v39, 0.0 }
 0x495   :  { %v3003_v12 = vadd.f32 %v3002_v16, %v2954_v42  ;;  %10694 = vmatmul.msk.bf16.gmra.mxu3 %vm966_vm12, %v3077_v61  ;;  %v19866_v61 = vld [vmem:[#allocation11_spill] sm:$0xff] }
 0x497   :  { %v3030_v29 = vmul.f32 %v14096_v6, %v3003_v12 }
 0x498   :  { %v2860_v13 = vpop.f32.mrf.mxu2  ;;  %v2907_v50 = vpop.f32.mrf.mxu3 }
 0x499   :  { %v3050_v27 = vadd.f32 %v14111_v43, %v3030_v29  ;;  %v2908_v31 = vadd.f32 %v2907_v50, %v2859_v7  ;;  %v2861_v54 = vadd.f32 %v2860_v13, %v19866_v61 }
 0x49a   :  { %v14281_v30 = vpop.f32.mrf.mxu0  ;;  %v3007_v26 = vpop.f32.mrf.mxu1 }
 0x49b   :  { %v2957_v49 = vadd.f32 %v14237_v51, %v2908_v31  ;;  %v3066_v52 = vmax.f32 %v3050_v27, 0.0 }
 0x49d   :  { %v3084_v41 = vpack.c.bf16 %v3066_v52, %v3065_v5  ;;  %v3006_v0 = vadd.f32 %v3005_v58, %v2957_v49 }
 0x49f   :  { %10669 = vmatmul.msk.bf16.gmra.mxu2 %vm966_vm12, %v3084_v41  ;;  %v3031_v53 = vmul.f32 %v14096_v6, %v3006_v0 }
 0x4a0   :  { %v2909_v44 = vpop.f32.mrf.mxu3  ;;  %v2863_v16 = vpop.f32.mrf.mxu2 }
 0x4a1   :  { %v2910_v56 = vadd.f32 %v2909_v44, %v2861_v54  ;;  %v3051_v51 = vadd.f32 %v14111_v43, %v3031_v53  ;;  %v2864_v15 = vadd.f32 %v2863_v16, %v14013_v28 }
 0x4a2   :  { %v3352_v32 = vpop.f32.mrf.mxu0  ;;  %v3010_v12 = vpop.f32.mrf.mxu1 }
 0x4a3   :  { %v2959_v60 = vadd.f32 %v2958_v3, %v2910_v56  ;;  %v3067_v39 = vmax.f32 %v3051_v51, 0.0 }
 0x4a5   :  { %v3008_v62 = vadd.f32 %v3007_v26, %v2959_v60  ;;  %10695 = vmatmul.msk.bf16.gmra.mxu3 %vm966_vm12, %v3078_v11 }
 0x4a7   :  { %v3032_v24 = vmul.f32 %v14096_v6, %v3008_v62 }
 0x4a8   :  { %v2912_v8 = vpop.f32.mrf.mxu3  ;;  %v2865_v29 = vpop.f32.mrf.mxu2 }
 0x4a9   :  { %v3052_v17 = vadd.f32 %v14111_v43, %v3032_v24  ;;  %v2913_v42 = vadd.f32 %v2912_v8, %v2864_v15  ;;  %v2866_v13 = vadd.f32 %v2865_v29, %v14041_v45 }
 0x4aa   :  { %v3355_v58 = vpop.f32.mrf.mxu0  ;;  %v3012_v49 = vpop.f32.mrf.mxu1 }
 0x4ab   :  { %v2962_v34 = vadd.f32 %v2961_v63, %v2913_v42  ;;  %v3068_v7 = vmax.f32 %v3052_v17, 0.0 }
 0x4ad   :  { %v3085_v3 = vpack.c.bf16 %v3068_v7, %v3067_v39  ;;  %v3011_v11 = vadd.f32 %v3010_v12, %v2962_v34 }
 0x4af   :  { %10670 = vmatmul.msk.bf16.gmra.mxu2 %vm966_vm12, %v3085_v3  ;;  %v3033_v31 = vmul.f32 %v14096_v6, %v3011_v11 }
 0x4b0   :  { %v2914_v50 = vpop.f32.mrf.mxu3 }
 0x4b1   :  { %v2915_v28 = vadd.f32 %v2914_v50, %v2866_v13  ;;  %v3053_v41 = vadd.f32 %v14111_v43, %v3033_v31 }
 0x4b2   :  { %v3357_v27 = vpop.f32.mrf.mxu0 }
 0x4b3   :  { %v2964_v5 = vadd.f32 %v2963_v48, %v2915_v28  ;;  %v3069_v45 = vmax.f32 %v3053_v41, 0.0  ;;  %v14304_v48 = vld [vmem:[%s19295_s13] ss:$0 sm:$0xff] }
 0x4b4   :  { %v3358_v17 = vadd.f32 %v14304_v48, %v3357_v27  ;;  %v3356_v34 = vadd.f32 %v14304_v48, %v3355_v58  ;;  %v3353_v13 = vadd.f32 %v14304_v48, %v3352_v32 }
 0x4b5   :  { %v3013_v52 = vadd.f32 %v3012_v49, %v2964_v5  ;;  %v3351_v49 = vadd.f32 %v14304_v48, %v14281_v30  ;;  %v14322_v30 = vld [vmem:[%s19296_s11] ss:$0 sm:$0xff] }
 0x4b6   :  { %v3409_v11 = vpack.c.bf16 %v3358_v17, %v3358_v17  ;;  %v3408_v27 = vpack.c.bf16 %v3356_v34, %v3356_v34  ;;  %v3407_v41 = vpack.c.bf16 %v3353_v13, %v3353_v13 }
 0x4b7   :  { %v3034_v63 = vmul.f32 %v14096_v6, %v3013_v52  ;;  %v3406_v58 = vpack.c.bf16 %v3351_v49, %v3351_v49 }
 0x4b8   :  { %v3265_v61 = vpop.f32.mrf.mxu3  ;;  %v6306_v32 = vunpack.c.l.b16 %v3407_v41 }
 0x4b9   :  { %v3054_v54 = vadd.f32 %v14111_v43, %v3034_v63  ;;  %v6308_v63 = vunpack.c.l.b16 %v3409_v11 }
 0x4ba   :  { %v3360_v0 = vpop.f32.mrf.mxu0 }
 0x4bb   :  { %v3070_v26 = vmax.f32 %v3054_v54, 0.0  ;;  %v3361_v15 = vadd.f32 %v14304_v48, %v3360_v0  ;;  %v6307_v0 = vunpack.c.l.b16 %v3408_v27 }
 0x4bd   :  { %v3086_v44 = vpack.c.bf16 %v3070_v26, %v3069_v45  ;;  %v3410_v7 = vpack.c.bf16 %v3361_v15, %v3361_v15  ;;  %v6314_v26 = vpack.c.b16 %v6308_v63, %v6307_v0  ;;  %v14335_v15 = vadd.f32 %v14322_v30, %v3265_v61 }
 0x4bf   :  { %10671 = vmatmul.msk.bf16.gmra.mxu2 %vm966_vm12, %v3086_v44  ;;  %v6309_v52 = vunpack.c.l.b16 %v3410_v7 }
 0x4c0   :  { %v3267_v56 = vpop.f32.mrf.mxu3 }
 0x4c2   :  { %v3362_v16 = vpop.f32.mrf.mxu0 }
 0x4c3   :  { %v3363_v43 = vadd.f32 %v14304_v48, %v3362_v16 }
 0x4c5   :  { %v3411_v42 = vpack.c.bf16 %v3363_v43, %v3363_v43  ;;  %v14327_v43 = vld [vmem:[%s19298_s16] sm:$0xff] }
 0x4c6   :  { %v14344_v17 = vperm.slane %v14327_v43, 3  ;;  %v14352_v34 = vperm.slane %v14327_v43, 5 }
 0x4c7   :  { %v6310_v50 = vunpack.c.l.b16 %v3411_v42 }
 0x4c8   :  { %v14299_v60 = vpop.f32.mrf.mxu3  ;;  %19869 = vst [vmem:[#allocation51_spill] sm:$0xff] %v14344_v17  ;;  %v3509_v49 = vmul.f32 %v14352_v34, %v14335_v15 }
 0x4c9   :  { %v6315_v54 = vpack.c.b16 %v6310_v50, %v6309_v52  ;;  %19871 = vst [vmem:[#allocation38_spill] sm:$0xff] %v14352_v34  ;;  %v14363_v50 = vadd.f32 %v14322_v30, %v3267_v56 }
 0x4ca   :  { %v3365_v53 = vpop.f32.mrf.mxu0 }
 0x4cb   :  { %v3366_v6 = vadd.f32 %v14304_v48, %v3365_v53  ;;  %v6305_v53 = vunpack.c.l.b16 %v3406_v58 }
 0x4cd   :  { %v3412_v24 = vpack.c.bf16 %v3366_v6, %v3366_v6  ;;  %v6313_v6 = vpack.c.b16 %v6306_v32, %v6305_v53 }
 0x4cf   :  { %v6311_v29 = vunpack.c.l.b16 %v3412_v24  ;;  %v14338_v24 = vperm.slane %v14327_v43, 1 }
 0x4d0   :  { %v14311_v12 = vpop.f32.mrf.mxu3 }
 0x4d1   :  { %19867 = vst [vmem:[#allocation22_spill] sm:$0xff] %v14338_v24  ;;  %v3441_v13 = vmul.f32 %v14338_v24, %v14335_v15  ;;  %v3442_v32 = vmul.f32 %v14338_v24, %v14363_v50 }
 0x4d2   :  { %v3156_v62 = vpop.f32.mrf.mxu2  ;;  %v3367_v51 = vpop.f32.mrf.mxu0 }
 0x4d3   :  { %v3368_v8 = vadd.f32 %v14304_v48, %v3367_v51  ;;  %v14332_v51 = vld [vmem:[%s19297_s9] ss:$0 sm:$0xff]  ;;  %v3567_v58 = vpack.c.bf16 %v3441_v13, %v3441_v13  ;;  %v3568_v9 = vpack.c.bf16 %v3442_v32, %v3442_v32 }
 0x4d4   :  { %v3157_v61 = vadd.f32 %v14332_v51, %v3156_v62 }
 0x4d5   :  { %v3413_v39 = vpack.c.bf16 %v3368_v8, %v3368_v8  ;;  %v14341_v8 = vperm.slane %v14327_v43, 2  ;;  %v14388_v38 = vunpack.c.l.b16 %v3567_v58  ;;  %v14392_v21 = vunpack.c.l.b16 %v3568_v9 }
 0x4d6   :  { %v3390_v27 = vpack.c.bf16 %v3157_v61, %v3157_v61 }
 0x4d7   :  { %v6312_v3 = vunpack.c.l.b16 %v3413_v39  ;;  %19868 = vst [vmem:[#allocation54_spill] sm:$0xff] %v14341_v8  ;;  %v14349_v39 = vperm.slane %v14327_v43, 4  ;;  %v3458_v11 = vmul.f32 %v14341_v8, %v14335_v15 }
 0x4d8   :  { %v14317_v45 = vpop.f32.mrf.mxu3  ;;  %v14427_v10 = vunpack.c.l.b16 %v3390_v27 }
 0x4d9   :  { %v6316_v28 = vpack.c.b16 %v6312_v3, %v6311_v29  ;;  %19870 = vst [vmem:[#allocation16_spill] sm:$0xff] %v14349_v39  ;;  %v14356_v3 = vperm.slane %v14327_v43, 0  ;;  %v3492_v62 = vmul.f32 %v14349_v39, %v14335_v15  ;;  %v3575_v0 = vpack.c.bf16 %v3458_v11, %v3458_v11 }
 0x4da   :  { %v3158_v31 = vpop.f32.mrf.mxu2  ;;  %v3370_v5 = vpop.f32.mrf.mxu0 }
 0x4db   :  { %6421 = vmatpush.bf16.msrb.mxu3 %v6316_v28  ;;  %19872 = vst [vmem:[#allocation52_spill] sm:$0xff] %v14356_v3  ;;  %v3475_v28 = vmul.f32 %v14344_v17, %v14335_v15  ;;  %v3159_v52 = vadd.f32 %v14332_v51, %v3158_v31  ;;  %v3371_v41 = vadd.f32 %v14304_v48, %v3370_v5  ;;  %v14390_v47 = vunpack.c.l.b16 %v3575_v0 }
 0x4dc   :  { %v3424_v56 = vmul.f32 %v14356_v3, %v14335_v15  ;;  %v3476_v31 = vmul.f32 %v14344_v17, %v14363_v50  ;;  %v3493_v5 = vmul.f32 %v14349_v39, %v14363_v50 }
 0x4dd   :  { %v3583_v53 = vpack.c.bf16 %v3475_v28, %v3475_v28  ;;  %19873 = vst [vmem:[#allocation47_spill] sm:$0xff] %v14390_v47 }
 0x4de   :  { %v3584_v14 = vpack.c.bf16 %v3476_v31, %v3476_v31  ;;  %v3592_v28 = vpack.c.bf16 %v3493_v5, %v3493_v5  ;;  %v14417_v31 = vadd.f32 %v14322_v30, %v14299_v60  ;;  %v3414_v5 = vpack.c.bf16 %v3371_v41, %v3371_v41 }
 0x4df   :  { %6422 = vmatpush.bf16.msrb.mxu3 %v6315_v54  ;;  %v14396_v36 = vunpack.c.l.b16 %v3583_v53  ;;  %v14432_v53 = vperm.slane %v14327_v43, 6 }
 0x4e0   :  { %v14346_v42 = vpop.f32.mrf.mxu3  ;;  %v14402_v32 = vunpack.c.l.b16 %v3592_v28  ;;  %v3559_v28 = vpack.c.bf16 %v3424_v56, %v3424_v56  ;;  %v3460_v41 = vmul.f32 %v14341_v8, %v14417_v31  ;;  %v3477_v27 = vmul.f32 %v14344_v17, %v14417_v31 }
 0x4e1   :  { %19875 = vst [vmem:[#allocation9_spill] sm:$0xff] %v14396_v36  ;;  %v14448_v56 = vunpack.c.l.b16 %v3414_v5  ;;  %v3494_v5 = vmul.f32 %v14349_v39, %v14417_v31 }
 0x4e2   :  { %v3161_v44 = vpop.f32.mrf.mxu2  ;;  %v3372_v16 = vpop.f32.mrf.mxu0  ;;  %19878 = vst [vmem:[#allocation14_spill] sm:$0xff] %v14402_v32  ;;  %v14461_v22 = vunpack.c.l.b16 %v3559_v28  ;;  %v3577_v57 = vpack.c.bf16 %v3460_v41, %v3460_v41  ;;  %v3585_v2 = vpack.c.bf16 %v3477_v27, %v3477_v27 }
 0x4e3   :  { %6423 = vmatpush.bf16.msrb.mxu3 %v6314_v26  ;;  %v3162_v63 = vadd.f32 %v14332_v51, %v3161_v44  ;;  %v3373_v54 = vadd.f32 %v14304_v48, %v3372_v16  ;;  %v3459_v26 = vmul.f32 %v14341_v8, %v14363_v50  ;;  %v3591_v44 = vpack.c.bf16 %v3492_v62, %v3492_v62 }
 0x4e4   :  { %v3510_v16 = vmul.f32 %v14352_v34, %v14363_v50  ;;  %19881 = vst [vmem:[#allocation49_spill] sm:$0xff] %v14432_v53  ;;  %v3593_v33 = vpack.c.bf16 %v3494_v5, %v3494_v5  ;;  %v14488_v37 = vunpack.c.l.b16 %v3577_v57  ;;  %v14490_v25 = vunpack.c.l.b16 %v3585_v2 }
 0x4e5   :  { %v3576_v55 = vpack.c.bf16 %v3459_v26, %v3459_v26 }
 0x4e6   :  { %v3600_v40 = vpack.c.bf16 %v3510_v16, %v3510_v16  ;;  %v3392_v16 = vpack.c.bf16 %v3162_v63, %v3162_v63  ;;  %v14444_v63 = vadd.f32 %v14322_v30, %v14317_v45  ;;  %19883 = vst [vmem:[#allocation19_spill] sm:$0xff] %v14488_v37 }
 0x4e7   :  { %6424 = vmatpush.bf16.msrb.mxu3 %v6313_v6  ;;  %v3599_v6 = vpack.c.bf16 %v3509_v49, %v3509_v49  ;;  %v14394_v62 = vunpack.c.l.b16 %v3576_v55  ;;  %v14398_v49 = vunpack.c.l.b16 %v3584_v14  ;;  %19884 = vst [vmem:[#allocation21_spill] sm:$0xff] %v14490_v25 }
 0x4e8   :  { %v3280_v59 = vpop.f32.mrf.mxu3  ;;  %v14406_v58 = vunpack.c.l.b16 %v3600_v40 }
 0x4e9   :  { %19874 = vst [vmem:[#allocation48_spill] sm:$0xff] %v14394_v62  ;;  %v14404_v26 = vunpack.c.l.b16 %v3599_v6  ;;  %v3415_v6 = vpack.c.bf16 %v3373_v54, %v3373_v54  ;;  %v14459_v9 = vadd.f32 %v14322_v30, %v3280_v59 }
 0x4ea   :  { %v3163_v7 = vpop.f32.mrf.mxu2  ;;  %v3375_v29 = vpop.f32.mrf.mxu0  ;;  %19876 = vst [vmem:[#allocation28_spill] sm:$0xff] %v14398_v49 }
 0x4eb   :  { %v3164_v61 = vadd.f32 %v14332_v51, %v3163_v7  ;;  %v14400_v7 = vunpack.c.l.b16 %v3591_v44  ;;  %19879 = vst [vmem:[#allocation12_spill] sm:$0xff] %v14404_v26  ;;  %v3376_v0 = vadd.f32 %v14304_v48, %v3375_v29  ;;  %v3391_v29 = vpack.c.bf16 %v3159_v52, %v3159_v52 }
 0x4ec   :  { %19880 = vst [vmem:[#allocation57_spill] sm:$0xff] %v14406_v58  ;;  %v14425_v44 = vadd.f32 %v14322_v30, %v14311_v12  ;;  %v3425_v52 = vmul.f32 %v14356_v3, %v14363_v50  ;;  %v3443_v12 = vmul.f32 %v14338_v24, %v14417_v31  ;;  %v14456_v40 = vunpack.c.l.b16 %v3415_v6 }
 0x4ed   :  { %19877 = vst [vmem:[#allocation17_spill] sm:$0xff] %v14400_v7  ;;  %v3393_v18 = vpack.c.bf16 %v3164_v61, %v3164_v61  ;;  %v3416_v60 = vpack.c.bf16 %v3376_v0, %v3376_v0  ;;  %v14446_v54 = vunpack.c.l.b16 %v3391_v29  ;;  %v14452_v61 = vadd.f32 %v14322_v30, %v14346_v42 }
 0x4ee   :  { %v14454_v0 = vunpack.c.l.b16 %v3392_v16  ;;  %v14471_v42 = vmul.f32 %v14432_v53, %v14335_v15  ;;  %v3560_v16 = vpack.c.bf16 %v3425_v52, %v3425_v52  ;;  %v3569_v6 = vpack.c.bf16 %v3443_v12, %v3443_v12 }
 0x4ef   :  { %v14463_v45 = vunpack.c.l.b16 %v3393_v18  ;;  %v14465_v29 = vunpack.c.l.b16 %v3416_v60  ;;  %v3444_v28 = vmul.f32 %v14338_v24, %v14425_v44  ;;  %v3461_v18 = vmul.f32 %v14341_v8, %v14425_v44 }
 0x4f0   :  { %v3282_v46 = vpop.f32.mrf.mxu3  ;;  %v3478_v60 = vmul.f32 %v14344_v17, %v14425_v44  ;;  %v3495_v52 = vmul.f32 %v14349_v39, %v14425_v44  ;;  %v3511_v12 = vmul.f32 %v14352_v34, %v14417_v31  ;;  %v14486_v1 = vunpack.c.l.b16 %v3569_v6 }
 0x4f1   :  { %v3570_v27 = vpack.c.bf16 %v3444_v28, %v3444_v28  ;;  %v3578_v4 = vpack.c.bf16 %v3461_v18, %v3461_v18  ;;  %v3512_v58 = vmul.f32 %v14352_v34, %v14425_v44  ;;  %v14500_v5 = vunpack.c.l.b16 %v3560_v16 }
 0x4f2   :  { %v3166_v13 = vpop.f32.mrf.mxu2  ;;  %v3377_v11 = vpop.f32.mrf.mxu0  ;;  %v3586_v23 = vpack.c.bf16 %v3478_v60, %v3478_v60  ;;  %19882 = vst [vmem:[#allocation58_spill] sm:$0xff] %v14486_v1  ;;  %v14519_v16 = vperm.slane %v14327_v43, 7 }
 0x4f3   :  { %v3167_v59 = vadd.f32 %v14332_v51, %v3166_v13  ;;  %v3378_v19 = vadd.f32 %v14304_v48, %v3377_v11  ;;  %v3594_v11 = vpack.c.bf16 %v3495_v52, %v3495_v52  ;;  %v14494_v35 = vunpack.c.l.b16 %v3578_v4 }
 0x4f4   :  { %v14496_v26 = vunpack.c.l.b16 %v3586_v23  ;;  %v14511_v23 = vadd.f32 %v14322_v30, %v3282_v46  ;;  %19889 = vst [vmem:[#allocation23_spill] sm:$0xff] %v14519_v16  ;;  %v3602_v4 = vpack.c.bf16 %v3512_v58, %v3512_v58  ;;  %v14542_v58 = vmul.f32 %v14356_v3, %v14417_v31 }
 0x4f5   :  { %19886 = vst [vmem:[#allocation55_spill] sm:$0xff] %v14494_v35  ;;  %v3394_v28 = vpack.c.bf16 %v3167_v59, %v3167_v59  ;;  %v3417_v18 = vpack.c.bf16 %v3378_v19, %v3378_v19  ;;  %v14508_v6 = vunpack.c.l.b16 %v3594_v11  ;;  %v3445_v59 = vmul.f32 %v14338_v24, %v14444_v63 }
 0x4f6   :  { %19887 = vst [vmem:[#allocation60_spill] sm:$0xff] %v14496_v26  ;;  %v3601_v11 = vpack.c.bf16 %v3511_v12, %v3511_v12  ;;  %v14554_v26 = vunpack.c.l.b16 %v3602_v4 }
 0x4f7   :  { %19888 = vst [vmem:[#allocation59_spill] sm:$0xff] %v14508_v6  ;;  %v14525_v2 = vunpack.c.l.b16 %v3394_v28  ;;  %v14527_v46 = vunpack.c.l.b16 %v3417_v18  ;;  %v3571_v57 = vpack.c.bf16 %v3445_v59, %v3445_v59  ;;  %v3496_v59 = vmul.f32 %v14349_v39, %v14444_v63 }
 0x4f8   :  { %v3285_v52 = vpop.f32.mrf.mxu3  ;;  %v14552_v25 = vunpack.c.l.b16 %v3601_v11  ;;  %19892 = vst [vmem:[#allocation34_spill] sm:$0xff] %v14554_v26  ;;  %v3513_v26 = vmul.f32 %v14352_v34, %v14444_v63 }
 0x4f9   :  { %v14536_v43 = vadd.f32 %v14322_v30, %v3285_v52  ;;  %v3462_v52 = vmul.f32 %v14341_v8, %v14444_v63 }
 0x4fa   :  { %v3168_v14 = vpop.f32.mrf.mxu2  ;;  %v14429_v55 = vpop.f32.mrf.mxu0  ;;  %19891 = vst [vmem:[#allocation61_spill] sm:$0xff] %v14552_v25  ;;  %v3595_v25 = vpack.c.bf16 %v3496_v59, %v3496_v59 }
 0x4fb   :  { %v3169_v20 = vadd.f32 %v14332_v51, %v3168_v14  ;;  %v14492_v14 = vunpack.c.l.b16 %v3570_v27  ;;  %v14523_v27 = vunpack.c.l.b16 %v3593_v33  ;;  %v3579_v6 = vpack.c.bf16 %v3462_v52, %v3462_v52 }
 0x4fd   :  { %19885 = vst [vmem:[#allocation15_spill] sm:$0xff] %v14492_v14  ;;  %v3395_v60 = vpack.c.bf16 %v3169_v20, %v3169_v20  ;;  %v14516_v20 = vmul.f32 %v14432_v53, %v14363_v50  ;;  %v14591_v47 = vunpack.c.l.b16 %v3579_v6 }
 0x4fe   :  { %19890 = vst [vmem:[#allocation13_spill] sm:$0xff] %v14523_v27 }
 0x4ff   :  { %v14538_v7 = vunpack.c.l.b16 %v3395_v60  ;;  %v3479_v60 = vmul.f32 %v14344_v17, %v14444_v63  ;;  %v3608_v4 = vpack.c.bf16 %v14516_v20, %v14516_v20  ;;  %v3480_v20 = vmul.f32 %v14344_v17, %v14452_v61  ;;  %19893 = vst [vmem:[#allocation8_spill] sm:$0xff] %v14591_v47 }
 0x500   :  { %v14575_v49 = vpop.f32.mrf.mxu3 }
 0x502   :  { %v3171_v13 = vpop.f32.mrf.mxu2  ;;  %v3382_v41 = vpop.f32.mrf.mxu0 }
 0x503   :  { %v3172_v19 = vadd.f32 %v14332_v51, %v3171_v13  ;;  %v14531_v13 = vadd.f32 %v14304_v48, %v14429_v55  ;;  %v3383_v55 = vadd.f32 %v14304_v48, %v3382_v41  ;;  %v3607_v41 = vpack.c.bf16 %v14471_v42, %v14471_v42 }
 0x504   :  { %v14571_v42 = vunpack.c.l.b16 %v3571_v57 }
 0x505   :  { %v3396_v28 = vpack.c.bf16 %v3172_v19, %v3172_v19  ;;  %v3418_v36 = vpack.c.bf16 %v14531_v13, %v14531_v13  ;;  %v3419_v13 = vpack.c.bf16 %v3383_v55, %v3383_v55 }
 0x507   :  { %v3861_v27 = vunpack.c.l.b16 %v3396_v28 }
 0x50a   :  { %v3173_v33 = vpop.f32.mrf.mxu2  ;;  %v3385_v32 = vpop.f32.mrf.mxu0 }
 0x50b   :  { %v3174_v18 = vadd.f32 %v14332_v51, %v3173_v33  ;;  %v3386_v19 = vadd.f32 %v14304_v48, %v3385_v32  ;;  %v3865_v33 = vpack.c.b16 %v14538_v7, %v14525_v2  ;;  %v3446_v32 = vmul.f32 %v14338_v24, %v14452_v61 }
 0x50c   :  { %v3463_v7 = vmul.f32 %v14341_v8, %v14452_v61  ;;  %v3587_v2 = vpack.c.bf16 %v3479_v60, %v3479_v60 }
 0x50d   :  { %v3397_v12 = vpack.c.bf16 %v3174_v18, %v3174_v18  ;;  %v3420_v11 = vpack.c.bf16 %v3386_v19, %v3386_v19  ;;  %v3572_v52 = vpack.c.bf16 %v3446_v32, %v3446_v32  ;;  %v3588_v19 = vpack.c.bf16 %v3480_v20, %v3480_v20 }
 0x50e   :  { %v3580_v57 = vpack.c.bf16 %v3463_v7, %v3463_v7  ;;  %v14595_v1 = vunpack.c.l.b16 %v3587_v2  ;;  %v14603_v20 = vunpack.c.l.b16 %v3595_v25  ;;  %v14611_v2 = vmul.f32 %v14356_v3, %v14425_v44 }
 0x50f   :  { %v3862_v18 = vunpack.c.l.b16 %v3397_v12  ;;  %v3497_v12 = vmul.f32 %v14349_v39, %v14452_v61  ;;  %v14589_v35 = vunpack.c.l.b16 %v3572_v52  ;;  %v6760_v59 = vunpack.c.l.b16 %v3420_v11 }
 0x510   :  { %v14593_v62 = vunpack.c.l.b16 %v3580_v57  ;;  %19894 = vst [vmem:[#allocation45_spill] sm:$0xff] %v14595_v1  ;;  %v14597_v14 = vunpack.c.l.b16 %v3588_v19  ;;  %v3603_v11 = vpack.c.bf16 %v3513_v26, %v3513_v26  ;;  %v14617_v25 = vunpack.c.l.b16 %v3607_v41 }
 0x511   :  { %v3866_v37 = vpack.c.b16 %v3862_v18, %v3861_v27  ;;  %v3514_v18 = vmul.f32 %v14352_v34, %v14452_v61  ;;  %v3596_v32 = vpack.c.bf16 %v3497_v12, %v3497_v12  ;;  %19896 = vst [vmem:[#allocation53_spill] sm:$0xff] %v14603_v20  ;;  %v3864_v12 = vpack.c.b16 %v14463_v45, %v14454_v0 }
 0x512   :  { %v14581_v28 = vpop.f32.mrf.mxu2  ;;  %v3387_v55 = vpop.f32.mrf.mxu0  ;;  %19895 = vst [vmem:[#allocation39_spill] sm:$0xff] %v14597_v14  ;;  %v3970_v41 = vsel %vm966_vm12, %v3865_v33, 0  ;;  %v6763_v0 = vpack.c.b16 %v14527_v46, %v14465_v29  ;;  %v6762_v45 = vpack.c.b16 %v14456_v40, %v14448_v56  ;;  %v3863_v29 = vpack.c.b16 %v14446_v54, %v14427_v10 }
 0x513   :  { %v3388_v60 = vadd.f32 %v14304_v48, %v3387_v55  ;;  %v3973_v27 = vsel %vm966_vm12, %v3866_v37, 0  ;;  %v14605_v55 = vunpack.c.l.b16 %v3596_v32  ;;  %v3604_v52 = vpack.c.bf16 %v3514_v18, %v3514_v18  ;;  %19898 = vst [vmem:[#allocation56_spill] sm:$0xff] %v14617_v25 }
 0x514   :  { %3979 = vmatpush.bf16.xpose.msrb.mxu1 %v3973_v27  ;;  %v6759_v27 = vunpack.c.l.b16 %v3419_v13  ;;  %v3464_v32 = vmul.f32 %v14341_v8, %v14459_v9  ;;  %v6758_v18 = vunpack.c.l.b16 %v3418_v36  ;;  %v3481_v48 = vmul.f32 %v14344_v17, %v14459_v9  ;;  %v14638_v36 = vpop.f32.mrf.mxu3 }
 0x515   :  { %v3421_v7 = vpack.c.bf16 %v3388_v60, %v3388_v60  ;;  %19897 = vst [vmem:[#allocation50_spill] sm:$0xff] %v14605_v55  ;;  %v3447_v60 = vmul.f32 %v14338_v24, %v14459_v9  ;;  %v14629_v37 = vunpack.c.l.b16 %v3608_v4  ;;  %v3498_v13 = vmul.f32 %v14349_v39, %v14459_v9 }
 0x516   :  { %v3562_v4 = vpack.c.bf16 %v14611_v2, %v14611_v2  ;;  %v3581_v26 = vpack.c.bf16 %v3464_v32, %v3464_v32  ;;  %v3589_v46 = vpack.c.bf16 %v3481_v48, %v3481_v48  ;;  %v3429_v56 = vmul.f32 %v14356_v3, %v14452_v61 }
 0x517   :  { %v6761_v6 = vunpack.c.l.b16 %v3421_v7  ;;  %19899 = vst [vmem:[#allocation42_spill] sm:$0xff] %v14629_v37  ;;  %v3573_v33 = vpack.c.bf16 %v3447_v60, %v3447_v60  ;;  %v3597_v2 = vpack.c.bf16 %v3498_v13, %v3498_v13  ;;  %v3528_v60 = vmul.f32 %v14432_v53, %v14417_v31 }
 0x518   :  { %v3465_v10 = vmul.f32 %v14341_v8, %v14511_v23  ;;  %v3482_v54 = vmul.f32 %v14344_v17, %v14511_v23  ;;  %v14669_v48 = vunpack.c.l.b16 %v3581_v26  ;;  %v3516_v13 = vmul.f32 %v14352_v34, %v14511_v23 }
 0x519   :  { %v6765_v19 = vpack.c.b16 %v6761_v6, %v6760_v59  ;;  %v14634_v59 = vunpack.c.l.b16 %v3603_v11  ;;  %v14636_v6 = vunpack.c.l.b16 %v3604_v52  ;;  %v3515_v52 = vmul.f32 %v14352_v34, %v14459_v9 }
 0x51a   :  { %v14623_v7 = vpop.f32.mrf.mxu2  ;;  %v14663_v32 = vunpack.c.l.b16 %v3573_v33  ;;  %19902 = vst [vmem:[#allocation25_spill] sm:$0xff] %v14669_v48  ;;  %v3582_v33 = vpack.c.bf16 %v3465_v10, %v3465_v10  ;;  %v3590_v57 = vpack.c.bf16 %v3482_v54, %v3482_v54  ;;  %v14677_v25 = vunpack.c.l.b16 %v3589_v46 }
 0x51b   :  { %6870 = vmatpush.bf16.msra.mxu0 %v6765_v19  ;;  %19900 = vst [vmem:[#allocation41_spill] sm:$0xff] %v14634_v59  ;;  %v6764_v19 = vpack.c.b16 %v6759_v27, %v6758_v18  ;;  %v3529_v27 = vmul.f32 %v14432_v53, %v14425_v44  ;;  %v3499_v18 = vmul.f32 %v14349_v39, %v14511_v23 }
 0x51c   :  { %19901 = vst [vmem:[#allocation5_spill] sm:$0xff] %v14636_v6  ;;  %3980 = vmatpush.bf16.xpose.msrb.mxu1 %v3970_v41  ;;  %v3967_v41 = vsel %vm966_vm12, %v3864_v12, 0  ;;  %v3448_v12 = vmul.f32 %v14338_v24, %v14511_v23  ;;  %v3606_v59 = vpack.c.bf16 %v3516_v13, %v3516_v13  ;;  %v3609_v6 = vpack.c.bf16 %v3528_v60, %v3528_v60  ;;  %v14695_v60 = vpop.f32.mrf.mxu3 }
 0x51d   :  { %19903 = vst [vmem:[#allocation24_spill] sm:$0xff] %v14677_v25  ;;  %v3598_v37 = vpack.c.bf16 %v3499_v18, %v3499_v18  ;;  %v3610_v26 = vpack.c.bf16 %v3529_v27, %v3529_v27  ;;  %v14681_v55 = vunpack.c.l.b16 %v3582_v33  ;;  %v14683_v1 = vunpack.c.l.b16 %v3590_v57 }
 0x51e   :  { %v3574_v11 = vpack.c.bf16 %v3448_v12, %v3448_v12  ;;  %v14691_v46 = vunpack.c.l.b16 %v3606_v59  ;;  %v14709_v27 = vunpack.c.l.b16 %v3609_v6  ;;  %v14715_v54 = vadd.f32 %v14332_v51, %v14581_v28 }
 0x51f   :  { %6871 = vmatpush.bf16.msra.mxu0 %v6764_v19  ;;  %v3605_v19 = vpack.c.bf16 %v3515_v52, %v3515_v52  ;;  %19904 = vst [vmem:[#allocation11_spill] sm:$0xff] %v14681_v55  ;;  %v14685_v52 = vunpack.c.l.b16 %v3597_v2  ;;  %v14687_v14 = vunpack.c.l.b16 %v3598_v37  ;;  %v3531_v37 = vmul.f32 %v14432_v53, %v14452_v61 }
 0x520   :  { %v14679_v20 = vunpack.c.l.b16 %v3574_v11  ;;  %19905 = vst [vmem:[#allocation63_spill] sm:$0xff] %v14683_v1  ;;  %v14711_v10 = vunpack.c.l.b16 %v3610_v26  ;;  %v19912_v18 = vpack.c.bf16 %v14542_v58, %v14542_v58  ;;  %v3449_v6 = vmul.f32 %v14338_v24, %v14536_v43 }
 0x521   :  { %19906 = vst [vmem:[#allocation64_spill] sm:$0xff] %v14685_v52  ;;  %v14689_v12 = vunpack.c.l.b16 %v3605_v19  ;;  %v3564_v19 = vpack.c.bf16 %v3429_v56, %v3429_v56  ;;  %v3543_v28 = vmul.f32 %v14519_v16, %v14335_v15  ;;  %v14734_v58 = vadd.f32 %v14322_v30, %v14575_v49 }
 0x522   :  { %v14675_v40 = vpop.f32.mrf.mxu2  ;;  %19907 = vst [vmem:[#allocation65_spill] sm:$0xff] %v14687_v14  ;;  %v14720_v13 = vunpack.c.l.b16 %v19912_v18  ;;  %v14738_v2 = vunpack.c.l.b16 %v3562_v4  ;;  %v3466_v56 = vmul.f32 %v14341_v8, %v14536_v43  ;;  %v3544_v59 = vmul.f32 %v14519_v16, %v14363_v50 }
 0x523   :  { %6872 = vmatpush.bf16.msra.mxu0 %v6763_v0  ;;  %19908 = vst [vmem:[#allocation66_spill] sm:$0xff] %v14689_v12  ;;  %v3530_v0 = vmul.f32 %v14432_v53, %v14444_v63  ;;  %v3964_v33 = vsel %vm966_vm12, %v3863_v29, 0  ;;  %v3500_v15 = vmul.f32 %v14349_v39, %v14536_v43  ;;  %v3612_v49 = vpack.c.bf16 %v3531_v37, %v3531_v37 }
 0x524   :  { %3981 = vmatpush.bf16.xpose.msrb.mxu1 %v3967_v41  ;;  %19909 = vst [vmem:[#allocation67_spill] sm:$0xff] %v14691_v46  ;;  %v14751_v41 = vadd.f32 %v14322_v30, %v14638_v36  ;;  %v3398_v4 = vpack.c.bf16 %v14715_v54, %v14715_v54  ;;  %v14757_v57 = vunpack.c.l.b16 %v3564_v19  ;;  %v3631_v29 = vpack.c.bf16 %v3449_v6, %v3449_v6 }
 0x525   :  { %19910 = vst [vmem:[#allocation68_spill] sm:$0xff] %v14709_v27  ;;  %v3611_v26 = vpack.c.bf16 %v3530_v0, %v3530_v0  ;;  %v3483_v0 = vmul.f32 %v14344_v17, %v14536_v43  ;;  %v14761_v27 = vunpack.c.l.b16 %v3612_v49  ;;  %v3532_v37 = vmul.f32 %v14432_v53, %v14459_v9  ;;  %v3295_v49 = vpop.f32.mrf.mxu3 }
 0x526   :  { %19911 = vst [vmem:[#allocation69_spill] sm:$0xff] %v14711_v10  ;;  %v3179_v36 = vadd.f32 %v14332_v51, %v14623_v7  ;;  %v3430_v54 = vmul.f32 %v14356_v3, %v14459_v9  ;;  %v3655_v10 = vpack.c.bf16 %v3500_v15, %v3500_v15  ;;  %v3431_v12 = vmul.f32 %v14356_v3, %v14511_v23 }
 0x527   :  { %6873 = vmatpush.bf16.msra.mxu0 %v6762_v45  ;;  %v14724_v45 = vmul.f32 %v14356_v3, %v14444_v63  ;;  %v14759_v11 = vunpack.c.l.b16 %v3611_v26  ;;  %19914 = vst [vmem:[#allocation71_spill] sm:$0xff] %v14761_v27  ;;  %v3647_v19 = vpack.c.bf16 %v3483_v0, %v3483_v0  ;;  %v3615_v26 = vpack.c.bf16 %v3543_v28, %v3543_v28 }
 0x528   :  { %v3450_v7 = vmul.f32 %v14338_v24, %v14734_v58  ;;  %v3467_v46 = vmul.f32 %v14341_v8, %v14734_v58  ;;  %v14781_v52 = vunpack.c.l.b16 %v3631_v29  ;;  %v3501_v0 = vmul.f32 %v14349_v39, %v14734_v58 }
 0x529   :  { %v3563_v50 = vpack.c.bf16 %v14724_v45, %v14724_v45  ;;  %19913 = vst [vmem:[#allocation70_spill] sm:$0xff] %v14759_v11  ;;  %v3533_v45 = vmul.f32 %v14432_v53, %v14511_v23  ;;  %v3613_v15 = vpack.c.bf16 %v3532_v37, %v3532_v37  ;;  %v19916_v1 = vpack.c.b16 %v14500_v5, %v14461_v22 }
 0x52a   :  { %v14736_v18 = vpop.f32.mrf.mxu2  ;;  %v3632_v11 = vpack.c.bf16 %v3450_v7, %v3450_v7  ;;  %v3640_v27 = vpack.c.bf16 %v3467_v46, %v3467_v46  ;;  %v14793_v48 = vunpack.c.l.b16 %v3647_v19  ;;  %v3656_v29 = vpack.c.bf16 %v3501_v0, %v3501_v0 }
 0x52b   :  { %v3614_v28 = vpack.c.bf16 %v3533_v45, %v3533_v45  ;;  %v14795_v55 = vunpack.c.l.b16 %v3655_v10  ;;  %v3616_v47 = vpack.c.bf16 %v3544_v59, %v3544_v59  ;;  %v14803_v46 = vunpack.c.l.b16 %v3615_v26 }
 0x52c   :  { %3982 = vmatpush.bf16.xpose.msrb.mxu1 %v3964_v33  ;;  %v3639_v33 = vpack.c.bf16 %v3466_v56, %v3466_v56  ;;  %v3484_v56 = vmul.f32 %v14344_v17, %v14734_v58  ;;  %19917 = vst [vmem:[#allocation73_spill] sm:$0xff] %v14793_v48  ;;  %v14797_v37 = vunpack.c.l.b16 %v3632_v11  ;;  %v14799_v45 = vunpack.c.l.b16 %v3640_v27 }
 0x52d   :  { %19918 = vst [vmem:[#allocation74_spill] sm:$0xff] %v14795_v55  ;;  %v3517_v22 = vmul.f32 %v14352_v34, %v14536_v43  ;;  %v14811_v5 = vunpack.c.l.b16 %v3614_v28  ;;  %v3545_v27 = vmul.f32 %v14519_v16, %v14417_v31  ;;  %v14825_v26 = vunpack.c.l.b16 %v3616_v47 }
 0x52e   :  { %v14787_v14 = vunpack.c.l.b16 %v3639_v33  ;;  %v3648_v25 = vpack.c.bf16 %v3484_v56, %v3484_v56  ;;  %19919 = vst [vmem:[#allocation75_spill] sm:$0xff] %v14799_v45  ;;  %v14805_v33 = vunpack.c.l.b16 %v3656_v29  ;;  %v3546_v56 = vmul.f32 %v14519_v16, %v14425_v44  ;;  %v3297_v44 = vpop.f32.mrf.mxu3 }
 0x52f   :  { %19921 = vst [vmem:[#allocation77_spill] sm:$0xff] %v14803_v46  ;;  %v3399_v0 = vpack.c.bf16 %v3179_v36, %v3179_v36  ;;  %v14831_v28 = vunpack.c.l.b16 %v3563_v50  ;;  %v3565_v29 = vpack.c.bf16 %v3430_v54, %v3430_v54  ;;  %v14835_v31 = vadd.f32 %v14322_v30, %v14695_v60 }
 0x530   :  { %19915 = vst [vmem:[#allocation72_spill] sm:$0xff] %v14787_v14  ;;  %v14801_v7 = vunpack.c.l.b16 %v3648_v25  ;;  %v3518_v10 = vmul.f32 %v14352_v34, %v14734_v58  ;;  %v3663_v19 = vpack.c.bf16 %v3517_v22, %v3517_v22  ;;  %v14841_v25 = vunpack.c.l.b16 %v3398_v4 }
 0x531   :  { %19922 = vst [vmem:[#allocation78_spill] sm:$0xff] %v14805_v33  ;;  %v3451_v50 = vmul.f32 %v14338_v24, %v14751_v41  ;;  %v3468_v60 = vmul.f32 %v14341_v8, %v14751_v41  ;;  %v3617_v11 = vpack.c.bf16 %v3545_v27, %v3545_v27  ;;  %v3618_v22 = vpack.c.bf16 %v3546_v56, %v3546_v56 }
 0x532   :  { %v14785_v6 = vpop.f32.mrf.mxu2  ;;  %19920 = vst [vmem:[#allocation76_spill] sm:$0xff] %v14801_v7  ;;  %v3664_v54 = vpack.c.bf16 %v3518_v10, %v3518_v10  ;;  %v14850_v59 = vadd.f32 %v14322_v30, %v3295_v49  ;;  %v14852_v4 = vunpack.c.l.b16 %v3399_v0  ;;  %v14854_v47 = vunpack.c.l.b16 %v3565_v29 }
 0x533   :  { %10720 = vmatmul.msk.bf16.vlgmr.msrb.gmra.mxu1 %vm966_vm12, %v19916_v1  ;;  %v14809_v1 = vunpack.c.l.b16 %v3613_v15  ;;  %19924 = vst [vmem:[#allocation80_spill] sm:$0xff] %v14811_v5  ;;  %v3816_v15 = vpack.c.b16 %v14738_v2, %v14720_v13  ;;  %v3566_v13 = vpack.c.bf16 %v3431_v12, %v3431_v12  ;;  %v3485_v2 = vmul.f32 %v14344_v17, %v14751_v41 }
 0x534   :  { %19925 = vst [vmem:[#allocation81_spill] sm:$0xff] %v14825_v26  ;;  %v3182_v12 = vadd.f32 %v14332_v51, %v14675_v40  ;;  %v3502_v46 = vmul.f32 %v14349_v39, %v14751_v41  ;;  %v14862_v26 = vunpack.c.l.b16 %v3663_v19  ;;  %v14864_v27 = vunpack.c.l.b16 %v3664_v54 }
 0x535   :  { %19923 = vst [vmem:[#allocation79_spill] sm:$0xff] %v14809_v1  ;;  %v14867_v49 = vadd.f32 %v14322_v30, %v3297_v44  ;;  %v3184_v10 = vadd.f32 %v14332_v51, %v14736_v18  ;;  %v14871_v56 = vunpack.c.l.b16 %v3566_v13  ;;  %v14873_v0 = vunpack.c.l.b16 %v3618_v22 }
 0x536   :  { %19926 = vst [vmem:[#allocation82_spill] sm:$0xff] %v14862_v26  ;;  %v3633_v29 = vpack.c.bf16 %v3451_v50, %v3451_v50  ;;  %v3641_v1 = vpack.c.bf16 %v3468_v60, %v3468_v60  ;;  %v14877_v5 = vunpack.c.l.b16 %v3617_v11  ;;  %v3452_v19 = vmul.f32 %v14338_v24, %v14835_v31  ;;  %v3300_v7 = vpop.f32.mrf.mxu3 }
 0x537   :  { %19927 = vst [vmem:[#allocation83_spill] sm:$0xff] %v14864_v27  ;;  %v3469_v44 = vmul.f32 %v14341_v8, %v14835_v31  ;;  %v3486_v18 = vmul.f32 %v14344_v17, %v14835_v31  ;;  %v3649_v13 = vpack.c.bf16 %v3485_v2, %v3485_v2  ;;  %v3400_v54 = vpack.c.bf16 %v3182_v12, %v3182_v12 }
 0x538   :  { %19928 = vst [vmem:[#allocation84_spill] sm:$0xff] %v14873_v0  ;;  %v3503_v50 = vmul.f32 %v14349_v39, %v14835_v31  ;;  %v3657_v60 = vpack.c.bf16 %v3502_v46, %v3502_v46  ;;  %v3401_v11 = vpack.c.bf16 %v3184_v10, %v3184_v10  ;;  %v3634_v26 = vpack.c.bf16 %v3452_v19, %v3452_v19 }
 0x539   :  { %19929 = vst [vmem:[#allocation85_spill] sm:$0xff] %v14877_v5  ;;  %v3642_v27 = vpack.c.bf16 %v3469_v44, %v3469_v44  ;;  %v3650_v55 = vpack.c.bf16 %v3486_v18, %v3486_v18  ;;  %v3187_v33 = vadd.f32 %v14332_v51, %v14785_v6  ;;  %v14893_v2 = vunpack.c.l.b16 %v3633_v29 }
 0x53a   :  { %v3188_v36 = vpop.f32.mrf.mxu2  ;;  %v3658_v12 = vpack.c.bf16 %v3503_v50, %v3503_v50  ;;  %v14895_v46 = vunpack.c.l.b16 %v3634_v26  ;;  %v14897_v14 = vunpack.c.l.b16 %v3641_v1  ;;  %v14901_v19 = vunpack.c.l.b16 %v3649_v13 }
 0x53b   :  { %v3189_v48 = vadd.f32 %v14332_v51, %v3188_v36  ;;  %v14899_v10 = vunpack.c.l.b16 %v3642_v27  ;;  %v14903_v44 = vunpack.c.l.b16 %v3650_v55  ;;  %v14905_v18 = vunpack.c.l.b16 %v3657_v60 }
 0x53c   :  { %19930 = vst [vmem:[#allocation86_spill] sm:$0xff] %v14897_v14  ;;  %v14907_v6 = vunpack.c.l.b16 %v3658_v12  ;;  %v14911_v36 = vunpack.c.l.b16 %v3400_v54  ;;  %v14919_v55 = vadd.f32 %v14322_v30, %v3300_v7  ;;  %v3402_v29 = vpack.c.bf16 %v3187_v33, %v3187_v33 }
 0x53d   :  { %19931 = vst [vmem:[#allocation87_spill] sm:$0xff] %v14899_v10  ;;  %v3403_v54 = vpack.c.bf16 %v3189_v48, %v3189_v48  ;;  %v3470_v60 = vmul.f32 %v14341_v8, %v14850_v59  ;;  %v3487_v12 = vmul.f32 %v14344_v17, %v14850_v59  ;;  %v14931_v22 = vunpack.c.l.b16 %v3401_v11 }
 0x53e   :  { %19932 = vst [vmem:[#allocation88_spill] sm:$0xff] %v14901_v19  ;;  %v3520_v7 = vmul.f32 %v14352_v34, %v14835_v31  ;;  %v3547_v13 = vmul.f32 %v14519_v16, %v14444_v63  ;;  %v3504_v1 = vmul.f32 %v14349_v39, %v14850_v59  ;;  %v3548_v5 = vmul.f32 %v14519_v16, %v14452_v61 }
 0x53f   :  { %19933 = vst [vmem:[#allocation89_spill] sm:$0xff] %v14903_v44  ;;  %v3643_v11 = vpack.c.bf16 %v3470_v60, %v3470_v60  ;;  %v4316_v19 = vunpack.c.l.b16 %v3402_v29  ;;  %v4317_v44 = vunpack.c.l.b16 %v3403_v54  ;;  %v3549_v63 = vmul.f32 %v14519_v16, %v14459_v9 }
 0x540   :  { %19934 = vst [vmem:[#allocation90_spill] sm:$0xff] %v14905_v18  ;;  %v3651_v18 = vpack.c.bf16 %v3487_v12, %v3487_v12  ;;  %v3619_v10 = vpack.c.bf16 %v3547_v13, %v3547_v13  ;;  %v3620_v60 = vpack.c.bf16 %v3548_v5, %v3548_v5  ;;  %v3454_v9 = vmul.f32 %v14338_v24, %v14867_v49 }
 0x541   :  { %19935 = vst [vmem:[#allocation91_spill] sm:$0xff] %v14907_v6  ;;  %v3666_v6 = vpack.c.bf16 %v3520_v7, %v3520_v7  ;;  %v14952_v29 = vunpack.c.l.b16 %v3643_v11  ;;  %v3505_v5 = vmul.f32 %v14349_v39, %v14867_v49  ;;  %v3550_v11 = vmul.f32 %v14519_v16, %v14511_v23 }
 0x542   :  { %v3191_v40 = vpop.f32.mrf.mxu2  ;;  %v14954_v54 = vunpack.c.l.b16 %v3651_v18  ;;  %v14966_v13 = vunpack.c.l.b16 %v3619_v10  ;;  %v14968_v18 = vunpack.c.l.b16 %v3620_v60  ;;  %v3535_v10 = vmul.f32 %v14432_v53, %v14734_v58 }
 0x543   :  { %10721 = vmatmul.msk.bf16.gmra.mxu1 %vm966_vm12, %v3816_v15  ;;  %v3519_v15 = vmul.f32 %v14352_v34, %v14751_v41  ;;  %v3192_v26 = vadd.f32 %v14332_v51, %v3191_v40  ;;  %v3453_v40 = vmul.f32 %v14338_v24, %v14850_v59  ;;  %v14948_v14 = vunpack.c.l.b16 %v3666_v6 }
 0x544   :  { %v3488_v6 = vmul.f32 %v14344_v17, %v14867_v49  ;;  %19936 = vst [vmem:[#allocation92_spill] sm:$0xff] %v14966_v13  ;;  %v3521_v23 = vmul.f32 %v14352_v34, %v14850_v59  ;;  %v3489_v7 = vmul.f32 %v14344_v17, %v14919_v55 }
 0x545   :  { %v3665_v33 = vpack.c.bf16 %v3519_v15, %v3519_v15  ;;  %v3404_v50 = vpack.c.bf16 %v3192_v26, %v3192_v26  ;;  %v3635_v27 = vpack.c.bf16 %v3453_v40, %v3453_v40  ;;  %v3534_v15 = vmul.f32 %v14432_v53, %v14536_v43  ;;  %19937 = vst [vmem:[#allocation93_spill] sm:$0xff] %v14968_v18  ;;  %v20020_v18 = vld [vmem:[#allocation12_spill] sm:$0xff] }
 0x547   :  { %v14946_v40 = vunpack.c.l.b16 %v3665_v33  ;;  %v4318_v61 = vunpack.c.l.b16 %v3404_v50  ;;  %v14950_v45 = vunpack.c.l.b16 %v3635_v27  ;;  %v3671_v27 = vpack.c.bf16 %v3534_v15, %v3534_v15 }
 0x548   :  { %v3636_v50 = vpack.c.bf16 %v3454_v9, %v3454_v9 }
 0x54a   :  { %v3193_v48 = vpop.f32.mrf.mxu2  ;;  %v14979_v60 = vunpack.c.l.b16 %v3636_v50 }
 0x54b   :  { %v3194_v0 = vadd.f32 %v14332_v51, %v3193_v48  ;;  %v3659_v51 = vpack.c.bf16 %v3504_v1, %v3504_v1  ;;  %v3652_v48 = vpack.c.bf16 %v3488_v6, %v3488_v6  ;;  %v3672_v6 = vpack.c.bf16 %v3535_v10, %v3535_v10 }
 0x54d   :  { %v3405_v26 = vpack.c.bf16 %v3194_v0, %v3194_v0  ;;  %v3471_v0 = vmul.f32 %v14341_v8, %v14867_v49 }
 0x54f   :  { %v4319_v12 = vunpack.c.l.b16 %v3405_v26  ;;  %v3644_v33 = vpack.c.bf16 %v3471_v0, %v3471_v0  ;;  %v19938_v26 = vpack.c.b16 %v14757_v57, %v14831_v28  ;;  %v14983_v0 = vunpack.c.l.b16 %v3652_v48 }
 0x550   :  { %v14987_v57 = vunpack.c.l.b16 %v3659_v51  ;;  %v15001_v48 = vunpack.c.l.b16 %v3671_v27  ;;  %v3522_v27 = vmul.f32 %v14352_v34, %v14867_v49 }
 0x551   :  { %v4323_v1 = vpack.c.b16 %v4319_v12, %v4318_v61  ;;  %v3660_v61 = vpack.c.bf16 %v3505_v5, %v3505_v5  ;;  %v3621_v12 = vpack.c.bf16 %v3549_v63, %v3549_v63  ;;  %v14981_v9 = vunpack.c.l.b16 %v3644_v33 }
 0x552   :  { %v4322_v5 = vpack.c.b16 %v4317_v44, %v4316_v19  ;;  %v3455_v19 = vmul.f32 %v14338_v24, %v14919_v55  ;;  %v3472_v44 = vmul.f32 %v14341_v8, %v14919_v55  ;;  %v3818_v33 = vpack.c.b16 %v14871_v56, %v14854_v47 }
 0x553   :  { %10722 = vmatmul.msk.bf16.gmra.mxu1 %vm966_vm12, %v19938_v26  ;;  %v4430_v15 = vsel %vm966_vm12, %v4323_v1, 0  ;;  %v14989_v28 = vunpack.c.l.b16 %v3660_v61  ;;  %v15003_v26 = vunpack.c.l.b16 %v3672_v6  ;;  %v3667_v61 = vpack.c.bf16 %v3521_v23, %v3521_v23  ;;  %v3302_v1 = vpop.f32.mrf.mxu3 }
 0x554   :  { %4436 = vmatpush.bf16.xpose.msrb.mxu2 %v4430_v15  ;;  %v3622_v15 = vpack.c.bf16 %v3550_v11, %v3550_v11  ;;  %v15009_v10 = vunpack.c.l.b16 %v3621_v12  ;;  %v4427_v51 = vsel %vm966_vm12, %v4322_v5, 0  ;;  %v4321_v12 = vpack.c.b16 %v14931_v22, %v14911_v36 }
 0x555   :  { %v3551_v23 = vmul.f32 %v14519_v16, %v14536_v43  ;;  %v3637_v50 = vpack.c.bf16 %v3455_v19, %v3455_v19  ;;  %v3506_v63 = vmul.f32 %v14349_v39, %v14919_v55  ;;  %v3668_v13 = vpack.c.bf16 %v3522_v27, %v3522_v27 }
 0x556   :  { %19939 = vst [vmem:[#allocation94_spill] sm:$0xff] %v15009_v10  ;;  %v15017_v11 = vunpack.c.l.b16 %v3622_v15  ;;  %v15031_v6 = vadd.f32 %v14322_v30, %v3302_v1  ;;  %v15035_v47 = vmul.f32 %v14356_v3, %v14536_v43  ;;  %v3433_v56 = vmul.f32 %v14356_v3, %v14734_v58 }
 0x557   :  { %v3645_v22 = vpack.c.bf16 %v3472_v44, %v3472_v44  ;;  %v3653_v36 = vpack.c.bf16 %v3489_v7, %v3489_v7  ;;  %v15039_v5 = vunpack.c.l.b16 %v3667_v61  ;;  %v15041_v19 = vunpack.c.l.b16 %v3668_v13 }
 0x558   :  { %19940 = vst [vmem:[#allocation95_spill] sm:$0xff] %v15017_v11  ;;  %v3552_v27 = vmul.f32 %v14519_v16, %v14734_v58  ;;  %v4424_v30 = vsel %vm966_vm12, %v4321_v12, 0  ;;  %v4320_v1 = vpack.c.b16 %v14852_v4, %v14841_v25  ;;  %v3536_v43 = vmul.f32 %v14432_v53, %v14751_v41 }
 0x559   :  { %v15050_v15 = vunpack.c.l.b16 %v3637_v50  ;;  %v3661_v44 = vpack.c.bf16 %v3506_v63, %v3506_v63  ;;  %v3456_v61 = vmul.f32 %v14338_v24, %v15031_v6  ;;  %v3473_v58 = vmul.f32 %v14341_v8, %v15031_v6 }
 0x55a   :  { %v3680_v13 = vpack.c.bf16 %v3552_v27, %v3552_v27  ;;  %v15058_v12 = vunpack.c.l.b16 %v3645_v22  ;;  %v3490_v25 = vmul.f32 %v14344_v17, %v15031_v6  ;;  %v15062_v4 = vunpack.c.l.b16 %v3653_v36 }
 0x55b   :  { %v3507_v63 = vmul.f32 %v14349_v39, %v15031_v6  ;;  %v3638_v27 = vpack.c.bf16 %v3456_v61, %v3456_v61  ;;  %v3646_v7 = vpack.c.bf16 %v3473_v58, %v3473_v58  ;;  %v3673_v10 = vpack.c.bf16 %v3536_v43, %v3536_v43 }
 0x55c   :  { %4437 = vmatpush.bf16.xpose.msrb.mxu2 %v4427_v51  ;;  %v3679_v51 = vpack.c.bf16 %v3551_v23, %v3551_v23  ;;  %v15068_v23 = vunpack.c.l.b16 %v3680_v13  ;;  %v3654_v24 = vpack.c.bf16 %v3490_v25, %v3490_v25  ;;  %v3537_v8 = vmul.f32 %v14432_v53, %v14835_v31 }
 0x55d   :  { %v3662_v22 = vpack.c.bf16 %v3507_v63, %v3507_v63  ;;  %v3553_v39 = vmul.f32 %v14519_v16, %v14751_v41  ;;  %v15079_v13 = vunpack.c.l.b16 %v3646_v7  ;;  %v15085_v43 = vunpack.c.l.b16 %v3661_v44 }
 0x55e   :  { %v15066_v50 = vunpack.c.l.b16 %v3679_v51  ;;  %19942 = vst [vmem:[#allocation97_spill] sm:$0xff] %v15068_v23  ;;  %v15077_v51 = vunpack.c.l.b16 %v3638_v27  ;;  %v15081_v61 = vunpack.c.l.b16 %v3654_v24  ;;  %v3674_v25 = vpack.c.bf16 %v3537_v8, %v3537_v8 }
 0x55f   :  { %v15087_v58 = vunpack.c.l.b16 %v3662_v22  ;;  %v3554_v63 = vmul.f32 %v14519_v16, %v14835_v31  ;;  %v15097_v27 = vunpack.c.l.b16 %v3673_v10  ;;  %v3681_v8 = vpack.c.bf16 %v3553_v39, %v3553_v39 }
 0x560   :  { %19941 = vst [vmem:[#allocation96_spill] sm:$0xff] %v15066_v50  ;;  %v15101_v22 = vunpack.c.l.b16 %v3674_v25  ;;  %v3624_v17 = vpack.c.bf16 %v3433_v56, %v3433_v56  ;;  %v4421_v10 = vsel %vm966_vm12, %v4320_v1, 0  ;;  %v3623_v25 = vpack.c.bf16 %v15035_v47, %v15035_v47 }
 0x561   :  { %19943 = vst [vmem:[#allocation98_spill] sm:$0xff] %v15097_v27  ;;  %v3682_v36 = vpack.c.bf16 %v3554_v63, %v3554_v63  ;;  %v15107_v23 = vunpack.c.l.b16 %v3681_v8  ;;  %v3538_v8 = vmul.f32 %v14432_v53, %v14850_v59  ;;  %v3555_v47 = vmul.f32 %v14519_v16, %v14850_v59  ;;  %v20022_v27 = vld [vmem:[#allocation78_spill] sm:$0xff] }
 0x562   :  { %19944 = vst [vmem:[#allocation99_spill] sm:$0xff] %v15101_v22  ;;  %v4209_v56 = vunpack.c.l.b16 %v3624_v17  ;;  %v3539_v17 = vmul.f32 %v14432_v53, %v14867_v49  ;;  %v20023_v22 = vld [vmem:[#allocation74_spill] sm:$0xff] }
 0x563   :  { %10723 = vmatmul.msk.bf16.gmra.mxu1 %vm966_vm12, %v3818_v33  ;;  %v3523_v33 = vmul.f32 %v14352_v34, %v14919_v55  ;;  %19945 = vst [vmem:[#allocation100_spill] sm:$0xff] %v15107_v23  ;;  %v15109_v24 = vunpack.c.l.b16 %v3682_v36  ;;  %v4208_v36 = vunpack.c.l.b16 %v3623_v25  ;;  %v3675_v7 = vpack.c.bf16 %v3538_v8, %v3538_v8 }
 0x564   :  { %4438 = vmatpush.bf16.xpose.msrb.mxu2 %v4424_v30  ;;  %v3524_v30 = vmul.f32 %v14352_v34, %v15031_v6  ;;  %v3435_v25 = vmul.f32 %v14356_v3, %v14835_v31  ;;  %v3676_v39 = vpack.c.bf16 %v3539_v17, %v3539_v17  ;;  %v3434_v8 = vmul.f32 %v14356_v3, %v14751_v41  ;;  %v19953_v34 = vld [vmem:[#allocation58_spill] sm:$0xff] }
 0x565   :  { %v3669_v50 = vpack.c.bf16 %v3523_v33, %v3523_v33  ;;  %19946 = vst [vmem:[#allocation101_spill] sm:$0xff] %v15109_v24  ;;  %v3540_v41 = vmul.f32 %v14432_v53, %v14919_v55 }
 0x566   :  { %v3670_v44 = vpack.c.bf16 %v3524_v30, %v3524_v30  ;;  %v4272_v30 = vpack.c.b16 %v4209_v56, %v4208_v36  ;;  %v3625_v17 = vpack.c.bf16 %v3434_v8, %v3434_v8  ;;  %v3541_v8 = vmul.f32 %v14432_v53, %v15031_v6 }
 0x567   :  { %v15116_v33 = vunpack.c.l.b16 %v3669_v50  ;;  %v3556_v50 = vmul.f32 %v14519_v16, %v14867_v49  ;;  %v3677_v1 = vpack.c.bf16 %v3540_v41, %v3540_v41  ;;  %v3436_v41 = vmul.f32 %v14356_v3, %v14850_v59 }
 0x568   :  { %v15118_v63 = vunpack.c.l.b16 %v3670_v44  ;;  %v3683_v44 = vpack.c.bf16 %v3555_v47, %v3555_v47  ;;  %v3678_v47 = vpack.c.bf16 %v3541_v8, %v3541_v8  ;;  %v19959_v59 = vpack.c.b16 %v14589_v35, %v14571_v42  ;;  %v19961_v42 = vld [vmem:[#allocation48_spill] sm:$0xff] }
 0x569   :  { %v3684_v56 = vpack.c.bf16 %v3556_v50, %v3556_v50  ;;  %v3627_v8 = vpack.c.bf16 %v3436_v41, %v3436_v41 }
 0x56a   :  { %v15143_v36 = vunpack.c.l.b16 %v3683_v44 }
 0x56c   :  { %4439 = vmatpush.bf16.xpose.msrb.mxu2 %v4421_v10  ;;  %v19947_v10 = vpack.c.b16 %v14392_v21, %v14388_v38  ;;  %v15139_v38 = vunpack.c.l.b16 %v3675_v7  ;;  %v15141_v21 = vunpack.c.l.b16 %v3676_v39  ;;  %19950 = vst [vmem:[#allocation104_spill] sm:$0xff] %v15143_v36  ;;  %v4210_v7 = vunpack.c.l.b16 %v3625_v17 }
 0x56d   :  { %v3557_v39 = vmul.f32 %v14519_v16, %v14919_v55  ;;  %v3437_v17 = vmul.f32 %v14356_v3, %v14867_v49 }
 0x56e   :  { %19948 = vst [vmem:[#allocation102_spill] sm:$0xff] %v15139_v38 }
 0x56f   :  { %19949 = vst [vmem:[#allocation103_spill] sm:$0xff] %v15141_v21  ;;  %v3685_v31 = vpack.c.bf16 %v3557_v39, %v3557_v39  ;;  %v20016_v21 = vpack.c.b16 %v15081_v61, %v15062_v4 }
 0x573   :  { %10724 = vmatmul.msk.bf16.gmra.mxu1 %vm966_vm12, %v19947_v10  ;;  %10752 = vmatmul.msk.bf16.vlgmr.msrb.gmra.mxu2 %vm966_vm12, %v4272_v30  ;;  %v15145_v30 = vunpack.c.l.b16 %v3684_v56  ;;  %v3626_v10 = vpack.c.bf16 %v3435_v25, %v3435_v25  ;;  %v19952_v56 = vld [vmem:[#allocation15_spill] sm:$0xff] }
 0x574   :  { %v19954_v25 = vpack.c.b16 %v19952_v56, %v19953_v34  ;;  %v15168_v34 = vunpack.c.l.b16 %v3677_v1  ;;  %v3439_v1 = vmul.f32 %v14356_v3, %v15031_v6 }
 0x575   :  { %19951 = vst [vmem:[#allocation105_spill] sm:$0xff] %v15145_v30  ;;  %v4211_v50 = vunpack.c.l.b16 %v3626_v10  ;;  %v3558_v10 = vmul.f32 %v14519_v16, %v15031_v6  ;;  %v4212_v16 = vunpack.c.l.b16 %v3627_v8  ;;  %v19964_v8 = vpack.c.b16 %v14797_v37, %v14781_v52 }
 0x576   :  { %19955 = vst [vmem:[#allocation15_spill] sm:$0xff] %v15168_v34  ;;  %v19968_v52 = vpack.c.b16 %v14895_v46, %v14893_v2  ;;  %v19971_v2 = vpack.c.b16 %v14979_v60, %v14950_v45  ;;  %v19975_v45 = vpack.c.b16 %v15077_v51, %v15050_v15  ;;  %v19979_v15 = vld [vmem:[#allocation75_spill] sm:$0xff]  ;;  %v19980_v51 = vld [vmem:[#allocation72_spill] sm:$0xff] }
 0x577   :  { %v4273_v44 = vpack.c.b16 %v4211_v50, %v4210_v7  ;;  %v3686_v50 = vpack.c.bf16 %v3558_v10, %v3558_v10  ;;  %v15170_v7 = vunpack.c.l.b16 %v3678_v47  ;;  %v3438_v47 = vmul.f32 %v14356_v3, %v14919_v55  ;;  %v19962_v55 = vld [vmem:[#allocation47_spill] sm:$0xff] }
 0x578   :  { %v19963_v6 = vpack.c.b16 %v19961_v42, %v19962_v55 }
 0x579   :  { %19956 = vst [vmem:[#allocation58_spill] sm:$0xff] %v15170_v7  ;;  %v15174_v56 = vunpack.c.l.b16 %v3686_v50  ;;  %v20009_v7 = vld [vmem:[#allocation53_spill] sm:$0xff] }
 0x57b   :  { %19958 = vst [vmem:[#allocation107_spill] sm:$0xff] %v15174_v56 }
 0x583   :  { %10725 = vmatmul.msk.bf16.gmra.mxu1 %vm966_vm12, %v19954_v25  ;;  %10753 = vmatmul.msk.bf16.gmra.mxu2 %vm966_vm12, %v4273_v44  ;;  %v15172_v44 = vunpack.c.l.b16 %v3685_v31  ;;  %v3628_v25 = vpack.c.bf16 %v3437_v17, %v3437_v17  ;;  %v3630_v31 = vpack.c.bf16 %v3439_v1, %v3439_v1  ;;  %v3629_v17 = vpack.c.bf16 %v3438_v47, %v3438_v47  ;;  %v19965_v1 = vld [vmem:[#allocation55_spill] sm:$0xff] }
 0x584   :  { %v19966_v47 = vld [vmem:[#allocation19_spill] sm:$0xff] }
 0x585   :  { %19957 = vst [vmem:[#allocation106_spill] sm:$0xff] %v15172_v44  ;;  %v4213_v10 = vunpack.c.l.b16 %v3628_v25  ;;  %v4215_v50 = vunpack.c.l.b16 %v3630_v31  ;;  %v4214_v41 = vunpack.c.l.b16 %v3629_v17  ;;  %v19967_v31 = vpack.c.b16 %v19965_v1, %v19966_v47  ;;  %v19976_v47 = vld [vmem:[#allocation28_spill] sm:$0xff] }
 0x587   :  { %v4274_v53 = vpack.c.b16 %v4213_v10, %v4212_v16  ;;  %v4275_v25 = vpack.c.b16 %v4215_v50, %v4214_v41  ;;  %v19960_v16 = vpack.c.b16 %v14679_v20, %v14663_v32 }
 0x593   :  { %10726 = vmatmul.msk.bf16.gmra.mxu1 %vm966_vm12, %v19959_v59  ;;  %10754 = vmatmul.msk.bf16.gmra.mxu2 %vm966_vm12, %v4274_v53 }
 0x5a3   :  { %10727 = vmatmul.msk.bf16.gmra.mxu1 %vm966_vm12, %v19960_v16  ;;  %10755 = vmatmul.msk.bf16.gmra.mxu2 %vm966_vm12, %v4275_v25  ;;  %v19969_v25 = vld [vmem:[#allocation8_spill] sm:$0xff] }
 0x5a4   :  { %v19970_v16 = vpack.c.b16 %v14593_v62, %v19969_v25  ;;  %v19972_v62 = vld [vmem:[#allocation11_spill] sm:$0xff] }
 0x5b0   :  { %v15194_v35 = vpop.f32.mrf.mxu1 }
 0x5b1   :  { %v4601_v53 = vsel %vm966_vm12, %v15194_v35, -inf }
 0x5b2   :  { %4602 = vmax.xlane.f32.xlu1 %v4601_v53 }
 0x5b3   :  { %10728 = vmatmul.msk.bf16.gmra.mxu1 %vm966_vm12, %v19963_v6  ;;  %10756 = vmatmul.msk.bf16.gmra.mxu2 %vm966_vm12, %v19964_v8  ;;  %v19973_v6 = vld [vmem:[#allocation25_spill] sm:$0xff] }
 0x5b4   :  { %v19974_v8 = vpack.c.b16 %v19972_v62, %v19973_v6 }
 0x5b8   :  { %v15206_v20 = vpop.f32.mrf.mxu1 }
 0x5b9   :  { %v4604_v32 = vsel %vm966_vm12, %v15206_v20, -inf }
 0x5ba   :  { %4605 = vmax.xlane.f32.xlu2 %v4604_v32 }
 0x5c0   :  { %v15210_v10 = vpop.f32.mrf.mxu1 }
 0x5c1   :  { %v4607_v59 = vsel %vm966_vm12, %v15210_v10, -inf }
 0x5c2   :  { %4608 = vmax.xlane.f32.xlu0 %v4607_v59 }
 0x5c3   :  { %10729 = vmatmul.msk.bf16.gmra.mxu1 %vm966_vm12, %v19967_v31  ;;  %10757 = vmatmul.msk.bf16.gmra.mxu2 %vm966_vm12, %v19968_v52  ;;  %v19977_v31 = vld [vmem:[#allocation9_spill] sm:$0xff] }
 0x5c4   :  { %v19978_v52 = vpack.c.b16 %v19976_v47, %v19977_v31  ;;  %v19986_v47 = vld [vmem:[#allocation86_spill] sm:$0xff] }
 0x5c8   :  { %v15222_v37 = vpop.f32.mrf.mxu1 }
 0x5c9   :  { %v4610_v17 = vsel %vm966_vm12, %v15222_v37, -inf }
 0x5ca   :  { %4611 = vmax.xlane.f32.xlu2 %v4610_v17  ;;  %v19981_v17 = vpack.c.b16 %v19979_v15, %v19980_v51 }
 0x5d0   :  { %v15226_v50 = vpop.f32.mrf.mxu1 }
 0x5d1   :  { %v4613_v41 = vsel %vm966_vm12, %v15226_v50, -inf }
 0x5d2   :  { %4614 = vmax.xlane.f32.xlu1 %v4613_v41 }
 0x5d3   :  { %10730 = vmatmul.msk.bf16.gmra.mxu1 %vm966_vm12, %v19970_v16  ;;  %10758 = vmatmul.msk.bf16.gmra.mxu2 %vm966_vm12, %v19971_v2 }
 0x5d8   :  { %v15238_v46 = vpop.f32.mrf.mxu1 }
 0x5d9   :  { %v4616_v53 = vsel %vm966_vm12, %v15238_v46, -inf }
 0x5da   :  { %4617 = vmax.xlane.f32.xlu0 %v4616_v53 }
 0x5e0   :  { %v15242_v42 = vpop.f32.mrf.mxu1 }
 0x5e1   :  { %v4619_v55 = vsel %vm966_vm12, %v15242_v42, -inf }
 0x5e2   :  { %4620 = vmax.xlane.f32.xlu2 %v4619_v55 }
 0x5e3   :  { %10731 = vmatmul.msk.bf16.gmra.mxu1 %vm966_vm12, %v19974_v8  ;;  %10759 = vmatmul.msk.bf16.gmra.mxu2 %vm966_vm12, %v19975_v45  ;;  %v19982_v8 = vld [vmem:[#allocation60_spill] sm:$0xff]  ;;  %v19983_v45 = vld [vmem:[#allocation21_spill] sm:$0xff] }
 0x5e8   :  { %v15254_v60 = vpop.f32.mrf.mxu1 }
 0x5e9   :  { %v4622_v32 = vsel %vm966_vm12, %v15254_v60, -inf }
 0x5ea   :  { %4623 = vmax.xlane.f32.xlu1 %v4622_v32  ;;  %v19984_v32 = vpack.c.b16 %v19982_v8, %v19983_v45  ;;  %v19988_v8 = vld [vmem:[#allocation39_spill] sm:$0xff]  ;;  %v19989_v45 = vld [vmem:[#allocation45_spill] sm:$0xff] }
 0x5f0   :  { %v15258_v59 = vpop.f32.mrf.mxu1 }
 0x5f1   :  { %v4625_v1 = vsel %vm966_vm12, %v15258_v59, -inf }
 0x5f2   :  { %4626 = vmax.xlane.f32.xlu1 %v4625_v1  ;;  %v19985_v1 = vld [vmem:[#allocation87_spill] sm:$0xff] }
 0x5f3   :  { %10732 = vmatmul.msk.bf16.gmra.mxu1 %vm966_vm12, %v19978_v52  ;;  %10760 = vmatmul.msk.bf16.gmra.mxu2 %vm966_vm12, %v19981_v17  ;;  %v19987_v31 = vpack.c.b16 %v19985_v1, %v19986_v47  ;;  %v19991_v1 = vpack.c.b16 %v14981_v9, %v14952_v29  ;;  %v19992_v9 = vld [vmem:[#allocation63_spill] sm:$0xff] }
 0x5f6   :  { %v15270_v41 = vpop.f32.mrf.mxu2 }
 0x5f7   :  { %v4793_v25 = vsel %vm966_vm12, %v15270_v41, -inf }
 0x5f8   :  { %v15274_v16 = vpop.f32.mrf.mxu1  ;;  %4794 = vmax.xlane.f32.xlu0 %v4793_v25 }
 0x5f9   :  { %v4628_v53 = vsel %vm966_vm12, %v15274_v16, -inf }
 0x5fe   :  { %v15276_v2 = vpop.f32.mrf.mxu2 }
 0x5ff   :  { %v4796_v55 = vsel %vm966_vm12, %v15276_v2, -inf }
 0x600   :  { %v15282_v62 = vpop.f32.mrf.mxu1  ;;  %4629 = vmax.xlane.f32.xlu0 %v4628_v53  ;;  %4797 = vmax.xlane.f32.xlu2 %v4796_v55 }
 0x601   :  { %v4631_v6 = vsel %vm966_vm12, %v15282_v62, -inf }
 0x602   :  { %4632 = vmax.xlane.f32.xlu1 %v4631_v6 }
 0x603   :  { %10733 = vmatmul.msk.bf16.gmra.mxu1 %vm966_vm12, %v19984_v32  ;;  %10761 = vmatmul.msk.bf16.gmra.mxu2 %vm966_vm12, %v19987_v31  ;;  %v19990_v32 = vpack.c.b16 %v19988_v8, %v19989_v45  ;;  %v19993_v45 = vld [vmem:[#allocation24_spill] sm:$0xff] }
 0x606   :  { %v15294_v52 = vpop.f32.mrf.mxu2 }
 0x607   :  { %v4799_v15 = vsel %vm966_vm12, %v15294_v52, -inf }
 0x608   :  { %v15298_v51 = vpop.f32.mrf.mxu1  ;;  %4800 = vmax.xlane.f32.xlu0 %v4799_v15 }
 0x609   :  { %v4634_v25 = vsel %vm966_vm12, %v15298_v51, -inf }
 0x60e   :  { %v15300_v17 = vpop.f32.mrf.mxu2 }
 0x60f   :  { %v4802_v53 = vsel %vm966_vm12, %v15300_v17, -inf }
 0x610   :  { %v15306_v55 = vpop.f32.mrf.mxu1  ;;  %4635 = vmax.xlane.f32.xlu0 %v4634_v25  ;;  %4803 = vmax.xlane.f32.xlu2 %v4802_v53 }
 0x611   :  { %v4637_v6 = vsel %vm966_vm12, %v15306_v55, -inf }
 0x612   :  { %4638 = vmax.xlane.f32.xlu1 %v4637_v6 }
 0x613   :  { %10734 = vmatmul.msk.bf16.gmra.mxu1 %vm966_vm12, %v19990_v32  ;;  %10762 = vmatmul.msk.bf16.gmra.mxu2 %vm966_vm12, %v19991_v1  ;;  %v19994_v32 = vpack.c.b16 %v19992_v9, %v19993_v45  ;;  %v19995_v1 = vpack.c.b16 %v15079_v13, %v15058_v12 }
 0x616   :  { %v15318_v47 = vpop.f32.mrf.mxu2 }
 0x617   :  { %v4805_v31 = vsel %vm966_vm12, %v15318_v47, -inf }
 0x618   :  { %v15322_v15 = vpop.f32.mrf.mxu1  ;;  %4806 = vmax.xlane.f32.xlu0 %v4805_v31 }
 0x619   :  { %v4640_v53 = vsel %vm966_vm12, %v15322_v15, -inf }
 0x61e   :  { %v15324_v25 = vpop.f32.mrf.mxu2 }
 0x61f   :  { %v4808_v6 = vsel %vm966_vm12, %v15324_v25, -inf }
 0x620   :  { %v15330_v8 = vpop.f32.mrf.mxu1  ;;  %4641 = vmax.xlane.f32.xlu0 %v4640_v53  ;;  %4809 = vmax.xlane.f32.xlu2 %v4808_v6 }
 0x621   :  { %v4643_v29 = vsel %vm966_vm12, %v15330_v8, -inf }
 0x622   :  { %4644 = vmax.xlane.f32.xlu1 %v4643_v29 }
 0x623   :  { %10735 = vmatmul.msk.bf16.gmra.mxu1 %vm966_vm12, %v19994_v32  ;;  %10763 = vmatmul.msk.bf16.gmra.mxu2 %vm966_vm12, %v19995_v1 }
 0x625   :  { %v4603_v31 = vpop.xlane.xlu1 %4602 }
 0x626   :  { %v4985_v49 = vsub.f32 %v15194_v35, %v4603_v31  ;;  %v15343_v39 = vpop.f32.mrf.mxu2  ;;  %v19996_v31 = vld [vmem:[#allocation14_spill] sm:$0xff] }
 0x627   :  { %v4811_v53 = vsel %vm966_vm12, %v15343_v39, -inf }
 0x628   :  { %v15347_v6 = vpop.f32.mrf.mxu1  ;;  %4812 = vmax.xlane.f32.xlu0 %v4811_v53  ;;  %v5113_v29 = vmul.f32 1.442695, %v4985_v49  ;;  %v19997_v53 = vld [vmem:[#allocation17_spill] sm:$0xff] }
 0x629   :  { %v4646_v12 = vsel %vm966_vm12, %v15347_v6, -inf  ;;  %v19998_v49 = vpack.c.b16 %v19996_v31, %v19997_v53 }
 0x62a   :  { %11447 = vpow2.f32 %v5113_v29  ;;  %v19999_v29 = vld [vmem:[#allocation76_spill] sm:$0xff] }
 0x62d   :  { %v4606_v9 = vpop.xlane.xlu2 %4605 }
 0x62e   :  { %v4986_v45 = vsub.f32 %v15206_v20, %v4606_v9  ;;  %v15350_v32 = vpop.f32.mrf.mxu2  ;;  %v20000_v20 = vld [vmem:[#allocation73_spill] sm:$0xff] }
 0x62f   :  { %v4814_v13 = vsel %vm966_vm12, %v15350_v32, -inf  ;;  %v20001_v9 = vpack.c.b16 %v19999_v29, %v20000_v20 }
 0x630   :  { %v15356_v35 = vpop.f32.mrf.mxu1  ;;  %4647 = vmax.xlane.f32.xlu0 %v4646_v12  ;;  %4815 = vmax.xlane.f32.xlu2 %v4814_v13  ;;  %v5115_v1 = vmul.f32 1.442695, %v4986_v45  ;;  %v15366_v3 = vpop.eup %11447 }
 0x631   :  { %v5369_v45 = vsel %vm966_vm12, %v15366_v3, 0.0  ;;  %v4649_v12 = vsel %vm966_vm12, %v15356_v35, -inf }
 0x632   :  { %11449 = vpow2.f32 %v5115_v1 }
 0x633   :  { %10736 = vmatmul.msk.bf16.gmra.mxu1 %vm966_vm12, %v19998_v49  ;;  %10764 = vmatmul.msk.bf16.gmra.mxu2 %vm966_vm12, %v20001_v9 }
 0x635   :  { %v4609_v44 = vpop.xlane.xlu0 %4608 }
 0x636   :  { %v4987_v56 = vsub.f32 %v15210_v10, %v4609_v44  ;;  %v15369_v36 = vpop.f32.mrf.mxu2 }
 0x637   :  { %v4817_v13 = vsel %vm966_vm12, %v15369_v36, -inf }
 0x638   :  { %v15377_v31 = vpop.f32.mrf.mxu1  ;;  %5370 = vadd.xlane.f32.xlu0 %v5369_v45  ;;  %4650 = vmax.xlane.f32.xlu2 %v4649_v12  ;;  %v5117_v53 = vmul.f32 1.442695, %v4987_v56  ;;  %v15379_v1 = vpop.eup %11449  ;;  %v20002_v45 = vld [vmem:[#allocation59_spill] sm:$0xff] }
 0x639   :  { %4818 = vmax.xlane.f32.xlu1 %v4817_v13  ;;  %v5372_v29 = vsel %vm966_vm12, %v15379_v1, 0.0  ;;  %v4652_v56 = vsel %vm966_vm12, %v15377_v31, -inf  ;;  %v20005_v13 = vld [vmem:[#allocation89_spill] sm:$0xff] }
 0x63a   :  { %11451 = vpow2.f32 %v5117_v53  ;;  %v20006_v53 = vld [vmem:[#allocation88_spill] sm:$0xff] }
 0x63d   :  { %v4612_v44 = vpop.xlane.xlu2 %4611 }
 0x63e   :  { %v4988_v10 = vsub.f32 %v15222_v37, %v4612_v44  ;;  %v15382_v49 = vpop.f32.mrf.mxu2  ;;  %v20003_v37 = vld [vmem:[#allocation13_spill] sm:$0xff]  ;;  %v20007_v44 = vpack.c.b16 %v20005_v13, %v20006_v53 }
 0x63f   :  { %v4820_v20 = vsel %vm966_vm12, %v15382_v49, -inf  ;;  %v20004_v12 = vpack.c.b16 %v20002_v45, %v20003_v37 }
 0x640   :  { %v5119_v9 = vmul.f32 1.442695, %v4988_v10  ;;  %v15388_v30 = vpop.f32.mrf.mxu1  ;;  %5373 = vadd.xlane.f32.xlu2 %v5372_v29  ;;  %4821 = vmax.xlane.f32.xlu0 %v4820_v20  ;;  %v15400_v10 = vpop.eup %11451 }
 0x641   :  { %4653 = vmax.xlane.f32.xlu1 %v4652_v56  ;;  %v5375_v29 = vsel %vm966_vm12, %v15400_v10, 0.0  ;;  %v4655_v20 = vsel %vm966_vm12, %v15388_v30, -inf }
 0x642   :  { %11453 = vpow2.f32 %v5119_v9 }
 0x643   :  { %10737 = vmatmul.msk.bf16.gmra.mxu1 %vm966_vm12, %v20004_v12  ;;  %10765 = vmatmul.msk.bf16.gmra.mxu2 %vm966_vm12, %v20007_v44 }
 0x645   :  { %v4615_v37 = vpop.xlane.xlu1 %4614 }
 0x646   :  { %v15402_v23 = vpop.f32.mrf.mxu2  ;;  %v4989_v13 = vsub.f32 %v15226_v50, %v4615_v37  ;;  %v20011_v50 = vpack.c.b16 %v14983_v0, %v14954_v54 }
 0x647   :  { %v4823_v44 = vsel %vm966_vm12, %v15402_v23, -inf }
 0x648   :  { %v15408_v9 = vpop.eup %11453  ;;  %v15410_v56 = vpop.f32.mrf.mxu1  ;;  %5376 = vadd.xlane.f32.xlu2 %v5375_v29  ;;  %4656 = vmax.xlane.f32.xlu0 %v4655_v20  ;;  %v5121_v20 = vmul.f32 1.442695, %v4989_v13 }
 0x649   :  { %v5378_v45 = vsel %vm966_vm12, %v15408_v9, 0.0 }
 0x64a   :  { %5379 = vadd.xlane.f32.xlu1 %v5378_v45  ;;  %v20008_v45 = vld [vmem:[#allocation50_spill] sm:$0xff]  ;;  %11455 = vpow2.f32 %v5121_v20 }
 0x64b   :  { %v20010_v11 = vpack.c.b16 %v20008_v45, %v20009_v7 }
 0x64d   :  { %v4618_v12 = vpop.xlane.xlu0 %4617 }
 0x64e   :  { %v15415_v53 = vpop.f32.mrf.mxu2  ;;  %v4990_v24 = vsub.f32 %v15238_v46, %v4618_v12  ;;  %v4658_v12 = vsel %vm966_vm12, %v15410_v56, -inf }
 0x64f   :  { %v4826_v29 = vsel %vm966_vm12, %v15415_v53, -inf }
 0x650   :  { %v15420_v34 = vpop.f32.mrf.mxu1  ;;  %4824 = vmax.xlane.f32.xlu2 %v4823_v44  ;;  %v5123_v37 = vmul.f32 1.442695, %v4990_v24 }
 0x651   :  { %v4661_v54 = vsel %vm966_vm12, %v15420_v34, -inf }
 0x652   :  { %4827 = vmax.xlane.f32.xlu1 %v4826_v29  ;;  %11457 = vpow2.f32 %v5123_v37 }
 0x653   :  { %10738 = vmatmul.msk.bf16.gmra.mxu1 %vm966_vm12, %v20010_v11  ;;  %10766 = vmatmul.msk.bf16.gmra.mxu2 %vm966_vm12, %v20011_v50  ;;  %v15442_v11 = vpop.eup %11455 }
 0x654   :  { %v5381_v45 = vsel %vm966_vm12, %v15442_v11, 0.0 }
 0x655   :  { %v4621_v0 = vpop.xlane.xlu2 %4620 }
 0x656   :  { %v15432_v46 = vpop.f32.mrf.mxu2  ;;  %v4991_v29 = vsub.f32 %v15242_v42, %v4621_v0  ;;  %v20013_v42 = vld [vmem:[#allocation65_spill] sm:$0xff]  ;;  %v20014_v0 = vld [vmem:[#allocation64_spill] sm:$0xff] }
 0x657   :  { %v4829_v13 = vsel %vm966_vm12, %v15432_v46, -inf  ;;  %v20015_v38 = vpack.c.b16 %v20013_v42, %v20014_v0 }
 0x658   :  { %v15438_v44 = vpop.f32.mrf.mxu1  ;;  %4659 = vmax.xlane.f32.xlu2 %v4658_v12  ;;  %4830 = vmax.xlane.f32.xlu0 %v4829_v13  ;;  %v15444_v7 = vpop.eup %11457 }
 0x659   :  { %20012 = vst [vmem:[#allocation48_spill] sm:$0xff] %v15438_v44  ;;  %v4664_v50 = vsel %vm966_vm12, %v15438_v44, -inf  ;;  %v5384_v13 = vsel %vm966_vm12, %v15444_v7, 0.0  ;;  %v20024_v44 = vpack.c.b16 %v20022_v27, %v20023_v22 }
 0x65a   :  { %4662 = vmax.xlane.f32.xlu1 %v4661_v54  ;;  %v5125_v54 = vmul.f32 1.442695, %v4991_v29 }
 0x65c   :  { %11459 = vpow2.f32 %v5125_v54 }
 0x65d   :  { %v4624_v24 = vpop.xlane.xlu1 %4623 }
 0x65e   :  { %v15447_v20 = vpop.f32.mrf.mxu2  ;;  %v4992_v37 = vsub.f32 %v15254_v60, %v4624_v24 }
 0x660   :  { %v15454_v12 = vpop.f32.mrf.mxu1  ;;  %5382 = vadd.xlane.f32.xlu2 %v5381_v45  ;;  %4665 = vmax.xlane.f32.xlu0 %v4664_v50  ;;  %v5127_v60 = vmul.f32 1.442695, %v4992_v37  ;;  %v4832_v45 = vsel %vm966_vm12, %v15447_v20, -inf }
 0x662   :  { %5385 = vadd.xlane.f32.xlu1 %v5384_v13  ;;  %11461 = vpow2.f32 %v5127_v60  ;;  %v15474_v4 = vpop.eup %11459 }
 0x663   :  { %10739 = vmatmul.msk.bf16.gmra.mxu1 %vm966_vm12, %v20015_v38  ;;  %10767 = vmatmul.msk.bf16.gmra.mxu2 %vm966_vm12, %v20016_v21  ;;  %v5387_v54 = vsel %vm966_vm12, %v15474_v4, 0.0 }
 0x665   :  { %v4627_v38 = vpop.xlane.xlu1 %4626 }
 0x666   :  { %v15466_v24 = vpop.f32.mrf.mxu2  ;;  %v4993_v21 = vsub.f32 %v15258_v59, %v4627_v38 }
 0x667   :  { %20017 = vst [vmem:[#allocation47_spill] sm:$0xff] %v15466_v24  ;;  %v4835_v29 = vsel %vm966_vm12, %v15466_v24, -inf }
 0x668   :  { %4833 = vmax.xlane.f32.xlu2 %v4832_v45  ;;  %v15472_v50 = vpop.f32.mrf.mxu1  ;;  %v15476_v61 = vpop.eup %11461  ;;  %v5129_v45 = vmul.f32 1.442695, %v4993_v21 }
 0x669   :  { %v5390_v60 = vsel %vm966_vm12, %v15476_v61, 0.0 }
 0x66a   :  { %4836 = vmax.xlane.f32.xlu1 %v4835_v29  ;;  %v20019_v29 = vld [vmem:[#allocation57_spill] sm:$0xff]  ;;  %11463 = vpow2.f32 %v5129_v45 }
 0x66b   :  { %v4795_v13 = vpop.xlane.xlu0 %4794  ;;  %v20021_v59 = vpack.c.b16 %v20019_v29, %v20020_v18  ;;  %v4667_v18 = vsel %vm966_vm12, %v15454_v12, -inf }
 0x66c   :  { %v5049_v0 = vsub.f32 %v15270_v41, %v4795_v13 }
 0x66e   :  { %v15479_v37 = vpop.f32.mrf.mxu2  ;;  %v5241_v41 = vmul.f32 1.442695, %v5049_v0 }
 0x66f   :  { %20018 = vst [vmem:[#allocation55_spill] sm:$0xff] %v15479_v37  ;;  %v4838_v42 = vsel %vm966_vm12, %v15479_v37, -inf  ;;  %v20035_v37 = vld [vmem:[#allocation5_spill] sm:$0xff] }
 0x670   :  { %5388 = vadd.xlane.f32.xlu2 %v5387_v54  ;;  %4839 = vmax.xlane.f32.xlu0 %v4838_v42  ;;  %v15496_v13 = vpop.f32.mrf.mxu1  ;;  %11465 = vpow2.f32 %v5241_v41 }
 0x671   :  { %20025 = vst [vmem:[#allocation19_spill] sm:$0xff] %v15496_v13  ;;  %v4673_v29 = vsel %vm966_vm12, %v15496_v13, -inf }
 0x672   :  { %5391 = vadd.xlane.f32.xlu1 %v5390_v60 }
 0x673   :  { %10740 = vmatmul.msk.bf16.gmra.mxu1 %vm966_vm12, %v20021_v59  ;;  %v4630_v38 = vpop.xlane.xlu0 %4629  ;;  %v4798_v24 = vpop.xlane.xlu2 %4797  ;;  %10768 = vmatmul.msk.bf16.gmra.mxu2 %vm966_vm12, %v20024_v44 }
 0x674   :  { %v5050_v54 = vsub.f32 %v15276_v2, %v4798_v24  ;;  %v4994_v27 = vsub.f32 %v15274_v16, %v4630_v38  ;;  %v4670_v2 = vsel %vm966_vm12, %v15472_v50, -inf  ;;  %v15509_v24 = vpop.eup %11463 }
 0x675   :  { %v4633_v42 = vpop.xlane.xlu1 %4632  ;;  %v5393_v16 = vsel %vm966_vm12, %v15509_v24, 0.0 }
 0x676   :  { %v5243_v21 = vmul.f32 1.442695, %v5050_v54  ;;  %v4995_v60 = vsub.f32 %v15282_v62, %v4633_v42  ;;  %v15505_v22 = vpop.f32.mrf.mxu2  ;;  %v5131_v0 = vmul.f32 1.442695, %v4994_v27  ;;  %v15511_v45 = vpop.eup %11465  ;;  %v20029_v27 = vld [vmem:[#allocation91_spill] sm:$0xff] }
 0x677   :  { %v5561_v54 = vsel %vm966_vm12, %v15511_v45, 0.0 }
 0x678   :  { %4668 = vmax.xlane.f32.xlu2 %v4667_v18  ;;  %4674 = vmax.xlane.f32.xlu0 %v4673_v29  ;;  %11467 = vpow2.f32 %v5243_v21  ;;  %v5133_v44 = vmul.f32 1.442695, %v4995_v60  ;;  %v15519_v41 = vpop.f32.mrf.mxu1  ;;  %v20026_v21 = vld [vmem:[#allocation34_spill] sm:$0xff]  ;;  %v20027_v60 = vld [vmem:[#allocation61_spill] sm:$0xff] }
 0x679   :  { %v20028_v18 = vpack.c.b16 %v20026_v21, %v20027_v60 }
 0x67a   :  { %4671 = vmax.xlane.f32.xlu1 %v4670_v2  ;;  %11469 = vpow2.f32 %v5133_v44  ;;  %v20030_v2 = vld [vmem:[#allocation90_spill] sm:$0xff] }
 0x67b   :  { %v4801_v62 = vpop.xlane.xlu0 %4800  ;;  %11471 = vpow2.f32 %v5131_v0  ;;  %v20031_v44 = vpack.c.b16 %v20029_v27, %v20030_v2 }
 0x67e   :  { %v15513_v59 = vpop.eup %11467  ;;  %v15523_v42 = vpop.f32.mrf.mxu2 }
 0x67f   :  { %v5564_v38 = vsel %vm966_vm12, %v15513_v59, 0.0 }
 0x680   :  { %5394 = vadd.xlane.f32.xlu2 %v5393_v16  ;;  %5565 = vadd.xlane.f32.xlu0 %v5564_v38  ;;  %v15533_v0 = vpop.eup %11469  ;;  %v5051_v38 = vsub.f32 %v15294_v52, %v4801_v62  ;;  %v15544_v27 = vpop.f32.mrf.mxu1 }
 0x681   :  { %20032 = vst [vmem:[#allocation8_spill] sm:$0xff] %v15533_v0  ;;  %v15535_v16 = vpop.eup %11471  ;;  %v5399_v21 = vsel %vm966_vm12, %v15533_v0, 0.0 }
 0x682   :  { %5562 = vadd.xlane.f32.xlu1 %v5561_v54  ;;  %v4841_v54 = vsel %vm966_vm12, %v15505_v22, -inf  ;;  %v5396_v60 = vsel %vm966_vm12, %v15535_v16, 0.0  ;;  %20033 = vst [vmem:[#allocation11_spill] sm:$0xff] %v15544_v27 }
 0x683   :  { %10741 = vmatmul.msk.bf16.gmra.mxu1 %vm966_vm12, %v20028_v18  ;;  %v4636_v29 = vpop.xlane.xlu0 %4635  ;;  %10769 = vmatmul.msk.bf16.gmra.mxu2 %vm966_vm12, %v20031_v44  ;;  %v5245_v18 = vmul.f32 1.442695, %v5051_v38  ;;  %v4804_v44 = vpop.xlane.xlu2 %4803 }
 0x684   :  { %v4996_v52 = vsub.f32 %v15298_v51, %v4636_v29  ;;  %v20036_v51 = vld [vmem:[#allocation41_spill] sm:$0xff] }
 0x685   :  { %11473 = vpow2.f32 %v5245_v18  ;;  %v20037_v29 = vpack.c.b16 %v20035_v37, %v20036_v51 }
 0x686   :  { %v15546_v13 = vpop.f32.mrf.mxu2  ;;  %v5135_v0 = vmul.f32 1.442695, %v4996_v52 }
 0x687   :  { %20034 = vst [vmem:[#allocation25_spill] sm:$0xff] %v15546_v13  ;;  %v4847_v38 = vsel %vm966_vm12, %v15546_v13, -inf }
 0x688   :  { %4842 = vmax.xlane.f32.xlu2 %v4841_v54  ;;  %5400 = vadd.xlane.f32.xlu0 %v5399_v21  ;;  %v4676_v54 = vsel %vm966_vm12, %v15519_v41, -inf  ;;  %v5052_v21 = vsub.f32 %v15300_v17, %v4804_v44  ;;  %v20038_v17 = vpack.c.b16 %v14989_v28, %v14987_v57  ;;  %11475 = vpow2.f32 %v5135_v0 }
 0x689   :  { %v4679_v28 = vsel %vm966_vm12, %v15544_v27, -inf }
 0x68a   :  { %5397 = vadd.xlane.f32.xlu1 %v5396_v60  ;;  %v4844_v60 = vsel %vm966_vm12, %v15523_v42, -inf  ;;  %v5247_v44 = vmul.f32 1.442695, %v5052_v21 }
 0x68b   :  { %v4807_v2 = vpop.xlane.xlu0 %4806 }
 0x68c   :  { %v5053_v62 = vsub.f32 %v15318_v47, %v4807_v2  ;;  %v15565_v2 = vpop.eup %11473 }
 0x68d   :  { %v5567_v37 = vsel %vm966_vm12, %v15565_v2, 0.0 }
 0x68e   :  { %v5249_v18 = vmul.f32 1.442695, %v5053_v62 }
 0x690   :  { %4677 = vmax.xlane.f32.xlu2 %v4676_v54  ;;  %4848 = vmax.xlane.f32.xlu0 %v4847_v38  ;;  %v4639_v54 = vpop.xlane.xlu1 %4638  ;;  %v15567_v38 = vpop.f32.mrf.mxu1  ;;  %11477 = vpow2.f32 %v5249_v18 }
 0x691   :  { %20039 = vst [vmem:[#allocation28_spill] sm:$0xff] %v15567_v38  ;;  %11479 = vpow2.f32 %v5247_v44  ;;  %v4997_v62 = vsub.f32 %v15306_v55, %v4639_v54  ;;  %v4682_v57 = vsel %vm966_vm12, %v15567_v38, -inf  ;;  %v15579_v18 = vpop.eup %11475 }
 0x692   :  { %4845 = vmax.xlane.f32.xlu1 %v4844_v60  ;;  %v15573_v60 = vpop.f32.mrf.mxu2 }
 0x693   :  { %10742 = vmatmul.msk.bf16.gmra.mxu1 %vm966_vm12, %v20037_v29  ;;  %v4642_v47 = vpop.xlane.xlu0 %4641  ;;  %10770 = vmatmul.msk.bf16.gmra.mxu2 %vm966_vm12, %v20038_v17  ;;  %20040 = vst [vmem:[#allocation9_spill] sm:$0xff] %v15573_v60  ;;  %v4810_v21 = vpop.xlane.xlu2 %4809  ;;  %v5137_v51 = vmul.f32 1.442695, %v4997_v62  ;;  %v20044_v62 = vld [vmem:[#allocation66_spill] sm:$0xff] }
 0x694   :  { %v4998_v52 = vsub.f32 %v15322_v15, %v4642_v47  ;;  %v5402_v47 = vsel %vm966_vm12, %v15579_v18, 0.0  ;;  %v5054_v38 = vsub.f32 %v15324_v25, %v4810_v21 }
 0x696   :  { %v5139_v0 = vmul.f32 1.442695, %v4998_v52  ;;  %v15581_v29 = vpop.eup %11477 }
 0x697   :  { %20041 = vst [vmem:[#allocation75_spill] sm:$0xff] %v15581_v29  ;;  %v15583_v55 = vpop.eup %11479  ;;  %v5573_v44 = vsel %vm966_vm12, %v15581_v29, 0.0 }
 0x698   :  { %5568 = vadd.xlane.f32.xlu2 %v5567_v37  ;;  %4683 = vmax.xlane.f32.xlu0 %v4682_v57  ;;  %11481 = vpow2.f32 %v5139_v0  ;;  %v15587_v17 = vpop.f32.mrf.mxu1  ;;  %v5570_v54 = vsel %vm966_vm12, %v15583_v55, 0.0  ;;  %v20043_v37 = vld [vmem:[#allocation67_spill] sm:$0xff] }
 0x699   :  { %11483 = vpow2.f32 %v5137_v51  ;;  %v20045_v57 = vpack.c.b16 %v20043_v37, %v20044_v62  ;;  %v20046_v51 = vpack.c.b16 %v15087_v58, %v15085_v43  ;;  %v5251_v62 = vmul.f32 1.442695, %v5054_v38 }
 0x69a   :  { %4680 = vmax.xlane.f32.xlu1 %v4679_v28  ;;  %v15593_v52 = vpop.f32.mrf.mxu2  ;;  %v4685_v38 = vsel %vm966_vm12, %v15587_v17, -inf }
 0x69b   :  { %v4813_v15 = vpop.xlane.xlu0 %4812  ;;  %20042 = vst [vmem:[#allocation72_spill] sm:$0xff] %v15593_v52  ;;  %11485 = vpow2.f32 %v5251_v62  ;;  %v4853_v62 = vsel %vm966_vm12, %v15593_v52, -inf }
 0x6a0   :  { %5403 = vadd.xlane.f32.xlu2 %v5402_v47  ;;  %5574 = vadd.xlane.f32.xlu0 %v5573_v44  ;;  %v4645_v47 = vpop.xlane.xlu1 %4644  ;;  %v15603_v44 = vpop.eup %11481 }
 0x6a1   :  { %v15606_v29 = vpop.eup %11483  ;;  %v5408_v37 = vsel %vm966_vm12, %v15603_v44, 0.0  ;;  %v15614_v58 = vpop.f32.mrf.mxu1 }
 0x6a2   :  { %5571 = vadd.xlane.f32.xlu1 %v5570_v54  ;;  %v4850_v54 = vsel %vm966_vm12, %v15573_v60, -inf  ;;  %v5405_v43 = vsel %vm966_vm12, %v15606_v29, 0.0  ;;  %v15618_v21 = vpop.f32.mrf.mxu2  ;;  %v4999_v60 = vsub.f32 %v15330_v8, %v4645_v47  ;;  %v15629_v13 = vpop.eup %11485  ;;  %v20048_v47 = vld [vmem:[#allocation42_spill] sm:$0xff] }
 0x6a3   :  { %10743 = vmatmul.msk.bf16.gmra.mxu1 %vm966_vm12, %v20045_v57  ;;  %v4648_v28 = vpop.xlane.xlu0 %4647  ;;  %v4816_v0 = vpop.xlane.xlu2 %4815  ;;  %10771 = vmatmul.msk.bf16.gmra.mxu2 %vm966_vm12, %v20046_v51  ;;  %20047 = vst [vmem:[#allocation60_spill] sm:$0xff] %v15618_v21 }
 0x6a4   :  { %v5141_v27 = vmul.f32 1.442695, %v4999_v60 }
 0x6a8   :  { %4851 = vmax.xlane.f32.xlu2 %v4850_v54  ;;  %5409 = vadd.xlane.f32.xlu0 %v5408_v37  ;;  %v5056_v54 = vsub.f32 %v15350_v32, %v4816_v0  ;;  %v5055_v37 = vsub.f32 %v15343_v39, %v4813_v15  ;;  %v20049_v32 = vld [vmem:[#allocation56_spill] sm:$0xff]  ;;  %v20051_v39 = vld [vmem:[#allocation83_spill] sm:$0xff]  ;;  %v20052_v15 = vld [vmem:[#allocation82_spill] sm:$0xff] }
 0x6a9   :  { %v20050_v0 = vpack.c.b16 %v20048_v47, %v20049_v32  ;;  %v15639_v52 = vpop.f32.mrf.mxu1  ;;  %v5576_v47 = vsel %vm966_vm12, %v15629_v13, 0.0  ;;  %v5000_v32 = vsub.f32 %v15347_v6, %v4648_v28 }
 0x6aa   :  { %5406 = vadd.xlane.f32.xlu1 %v5405_v43  ;;  %v4856_v43 = vsel %vm966_vm12, %v15618_v21, -inf  ;;  %v5255_v8 = vmul.f32 1.442695, %v5056_v54  ;;  %v5253_v21 = vmul.f32 1.442695, %v5055_v37  ;;  %20054 = vst [vmem:[#allocation21_spill] sm:$0xff] %v15639_v52 }
 0x6ab   :  { %v5371_v57 = vpop.xlane.xlu0 %5370  ;;  %v4651_v51 = vpop.xlane.xlu2 %4650  ;;  %v4691_v37 = vsel %vm966_vm12, %v15639_v52, -inf  ;;  %v5143_v6 = vmul.f32 1.442695, %v5000_v32 }
 0x6ac   :  { %v15616_v25 = vpop.xlane.xlu1 %4818  ;;  %11487 = vrcp.f32 %v5371_v57 }
 0x6b0   :  { %4686 = vmax.xlane.f32.xlu2 %v4685_v38  ;;  %4857 = vmax.xlane.f32.xlu0 %v4856_v43  ;;  %v20053_v38 = vpack.c.b16 %v20051_v39, %v20052_v15 }
 0x6b2   :  { %4854 = vmax.xlane.f32.xlu1 %v4853_v62  ;;  %v11488_v43 = vpop.eup %11487  ;;  %v5001_v62 = vsub.f32 %v15356_v35, %v4651_v51 }
 0x6b3   :  { %10744 = vmatmul.msk.bf16.gmra.mxu1 %vm966_vm12, %v20050_v0  ;;  %v5374_v57 = vpop.xlane.xlu2 %5373  ;;  %10772 = vmatmul.msk.bf16.gmra.mxu2 %vm966_vm12, %v20053_v38  ;;  %v5881_v54 = vmul.f32 %v11488_v43, %v15366_v3  ;;  %v15650_v0 = vpop.f32.mrf.mxu2 }
 0x6b4   :  { %11489 = vrcp.f32 %v5374_v57  ;;  %v15641_v60 = vpop.xlane.xlu1 %4653  ;;  %v5145_v35 = vmul.f32 1.442695, %v5001_v62  ;;  %v15665_v62 = vpop.f32.mrf.mxu1 }
 0x6b5   :  { %11491 = vpow2.f32 %v5141_v27  ;;  %v4688_v27 = vsel %vm966_vm12, %v15614_v58, -inf  ;;  %v6009_v3 = vpack.c.bf16 %v5881_v54, %v5881_v54  ;;  %20055 = vst [vmem:[#allocation87_spill] sm:$0xff] %v15665_v62 }
 0x6b6   :  { %11493 = vpow2.f32 %v5255_v8 }
 0x6b7   :  { %11495 = vpow2.f32 %v5253_v21  ;;  %v6201_v43 = vunpack.c.l.b16 %v6009_v3 }
 0x6b8   :  { %5577 = vadd.xlane.f32.xlu2 %v5576_v47  ;;  %4692 = vmax.xlane.f32.xlu0 %v4691_v37  ;;  %v4822_v37 = vpop.xlane.xlu0 %4821 }
 0x6ba   :  { %v11490_v8 = vpop.eup %11489  ;;  %4689 = vmax.xlane.f32.xlu1 %v4688_v27 }
 0x6bb   :  { %v5882_v51 = vmul.f32 %v11490_v8, %v15379_v1  ;;  %v5377_v57 = vpop.xlane.xlu2 %5376  ;;  %v15655_v21 = vpop.eup %11491 }
 0x6bc   :  { %v15657_v28 = vpop.eup %11493  ;;  %11497 = vrcp.f32 %v5377_v57  ;;  %v5411_v54 = vsel %vm966_vm12, %v15655_v21, 0.0  ;;  %v15669_v3 = vpop.f32.mrf.mxu2 }
 0x6bd   :  { %v6010_v39 = vpack.c.bf16 %v5882_v51, %v5882_v51  ;;  %v5380_v15 = vpop.xlane.xlu1 %5379  ;;  %v15659_v38 = vpop.eup %11495  ;;  %v5582_v1 = vsel %vm966_vm12, %v15657_v28, 0.0  ;;  %v20057_v51 = vld [vmem:[#allocation68_spill] sm:$0xff] }
 0x6be   :  { %11499 = vrcp.f32 %v5380_v15  ;;  %v5579_v27 = vsel %vm966_vm12, %v15659_v38, 0.0  ;;  %v20059_v15 = vpack.c.b16 %v14948_v14, %v14946_v40 }
 0x6bf   :  { %11501 = vpow2.f32 %v5145_v35  ;;  %v6202_v47 = vunpack.c.l.b16 %v6010_v39  ;;  %v20056_v35 = vld [vmem:[#allocation69_spill] sm:$0xff] }
 0x6c0   :  { %11503 = vpow2.f32 %v5143_v6  ;;  %5412 = vadd.xlane.f32.xlu2 %v5411_v54  ;;  %5583 = vadd.xlane.f32.xlu0 %v5582_v1  ;;  %v20058_v57 = vpack.c.b16 %v20056_v35, %v20057_v51  ;;  %v4859_v35 = vsel %vm966_vm12, %v15650_v0, -inf  ;;  %v4657_v40 = vpop.xlane.xlu0 %4656 }
 0x6c1   :  { %v6265_v32 = vpack.c.b16 %v6202_v47, %v6201_v43 }
 0x6c2   :  { %5580 = vadd.xlane.f32.xlu1 %v5579_v27  ;;  %v11498_v8 = vpop.eup %11497  ;;  %v5057_v27 = vsub.f32 %v15369_v36, %v15616_v25 }
 0x6c3   :  { %10745 = vmatmul.msk.bf16.gmra.mxu1 %vm966_vm12, %v20058_v57  ;;  %10784 = vmatmul.msk.bf16.vlgmr.msrb.gmra.mxu3 %vm966_vm12, %v6265_v32  ;;  %v4825_v6 = vpop.xlane.xlu2 %4824  ;;  %v5883_v32 = vmul.f32 %v11498_v8, %v15400_v10  ;;  %v5002_v10 = vsub.f32 %v15377_v31, %v15641_v60  ;;  %v4862_v60 = vsel %vm966_vm12, %v15669_v3, -inf }
 0x6c4   :  { %v11500_v39 = vpop.eup %11499  ;;  %10773 = vmatmul.msk.bf16.gmra.mxu2 %vm966_vm12, %v20059_v15  ;;  %v5257_v57 = vmul.f32 1.442695, %v5057_v27  ;;  %v15700_v8 = vpop.f32.mrf.mxu2 }
 0x6c5   :  { %v15680_v43 = vpop.eup %11501  ;;  %v5884_v47 = vmul.f32 %v11500_v39, %v15408_v9  ;;  %v15683_v54 = vpop.xlane.xlu1 %4827  ;;  %v6011_v36 = vpack.c.bf16 %v5883_v32, %v5883_v32  ;;  %v4865_v32 = vsel %vm966_vm12, %v15700_v8, -inf  ;;  %v5147_v52 = vmul.f32 1.442695, %v5002_v10 }
 0x6c6   :  { %v15685_v1 = vpop.eup %11503  ;;  %v5417_v14 = vsel %vm966_vm12, %v15680_v43, 0.0  ;;  %v15696_v39 = vpop.f32.mrf.mxu1  ;;  %11505 = vpow2.f32 %v5257_v57  ;;  %v20061_v57 = vld [vmem:[#allocation70_spill] sm:$0xff]  ;;  %v20063_v10 = vpack.c.b16 %v15041_v19, %v15039_v5 }
 0x6c7   :  { %v6012_v51 = vpack.c.bf16 %v5884_v47, %v5884_v47  ;;  %v5414_v9 = vsel %vm966_vm12, %v15685_v1, 0.0  ;;  %v5059_v47 = vsub.f32 %v15402_v23, %v4825_v6  ;;  %v6203_v27 = vunpack.c.l.b16 %v6011_v36  ;;  %v20060_v6 = vld [vmem:[#allocation71_spill] sm:$0xff] }
 0x6c8   :  { %4860 = vmax.xlane.f32.xlu2 %v4859_v35  ;;  %5418 = vadd.xlane.f32.xlu0 %v5417_v14  ;;  %v4694_v14 = vsel %vm966_vm12, %v15665_v62, -inf  ;;  %v20062_v62 = vpack.c.b16 %v20060_v6, %v20061_v57  ;;  %v4697_v19 = vsel %vm966_vm12, %v15696_v39, -inf }
 0x6c9   :  { %v6204_v35 = vunpack.c.l.b16 %v6012_v51  ;;  %v5261_v23 = vmul.f32 1.442695, %v5059_v47 }
 0x6ca   :  { %5415 = vadd.xlane.f32.xlu1 %v5414_v9  ;;  %v5058_v9 = vsub.f32 %v15382_v49, %v4822_v37 }
 0x6cb   :  { %v4660_v25 = vpop.xlane.xlu2 %4659  ;;  %v15710_v31 = vpop.xlane.xlu0 %4830  ;;  %v6266_v51 = vpack.c.b16 %v6204_v35, %v6203_v27  ;;  %v5003_v27 = vsub.f32 %v15388_v30, %v4657_v40 }
 0x6cc   :  { %v15719_v37 = vpop.eup %11505  ;;  %v5259_v36 = vmul.f32 1.442695, %v5058_v9  ;;  %v15731_v9 = vpop.f32.mrf.mxu2 }
 0x6cd   :  { %v15702_v15 = vpop.xlane.xlu1 %4662 }
 0x6ce   :  { %v15725_v35 = vpop.f32.mrf.mxu1 }
 0x6cf   :  { %v4700_v5 = vsel %vm966_vm12, %v15725_v35, -inf }
 0x6d0   :  { %4695 = vmax.xlane.f32.xlu2 %v4694_v14  ;;  %4866 = vmax.xlane.f32.xlu0 %v4865_v32  ;;  %v5585_v14 = vsel %vm966_vm12, %v15719_v37, 0.0 }
 0x6d2   :  { %4863 = vmax.xlane.f32.xlu1 %v4862_v60 }
 0x6d3   :  { %10746 = vmatmul.msk.bf16.gmra.mxu1 %vm966_vm12, %v20062_v62  ;;  %10785 = vmatmul.msk.bf16.gmra.mxu3 %vm966_vm12, %v6266_v51  ;;  %v5383_v49 = vpop.xlane.xlu2 %5382  ;;  %v5004_v62 = vsub.f32 %v15410_v56, %v4660_v25  ;;  %v15740_v60 = vpop.xlane.xlu0 %4665  ;;  %v5149_v51 = vmul.f32 1.442695, %v5003_v27 }
 0x6d4   :  { %11507 = vrcp.f32 %v5383_v49  ;;  %10774 = vmatmul.msk.bf16.gmra.mxu2 %vm966_vm12, %v20063_v10 }
 0x6d5   :  { %11509 = vpow2.f32 %v5147_v52  ;;  %v5386_v47 = vpop.xlane.xlu1 %5385  ;;  %v5151_v56 = vmul.f32 1.442695, %v5004_v62 }
 0x6d6   :  { %11511 = vrcp.f32 %v5386_v47  ;;  %v15753_v47 = vpop.f32.mrf.mxu1 }
 0x6d7   :  { %11513 = vpow2.f32 %v5261_v23 }
 0x6d8   :  { %11515 = vpow2.f32 %v5259_v36  ;;  %5586 = vadd.xlane.f32.xlu2 %v5585_v14  ;;  %4701 = vmax.xlane.f32.xlu0 %v4700_v5  ;;  %v15759_v5 = vpop.f32.mrf.mxu2 }
 0x6d9   :  { %11517 = vpow2.f32 %v5151_v56 }
 0x6da   :  { %v11508_v52 = vpop.eup %11507  ;;  %4698 = vmax.xlane.f32.xlu1 %v4697_v19  ;;  %11519 = vpow2.f32 %v5149_v51  ;;  %v20064_v19 = vld [vmem:[#allocation80_spill] sm:$0xff] }
 0x6db   :  { %v15737_v32 = vpop.eup %11509  ;;  %v5885_v25 = vmul.f32 %v11508_v52, %v15442_v11  ;;  %v15742_v30 = vpop.xlane.xlu2 %4833  ;;  %v20065_v52 = vld [vmem:[#allocation79_spill] sm:$0xff] }
 0x6dc   :  { %v11512_v40 = vpop.eup %11511  ;;  %v5420_v11 = vsel %vm966_vm12, %v15737_v32, 0.0  ;;  %v20066_v56 = vpack.c.b16 %v20064_v19, %v20065_v52 }
 0x6dd   :  { %v15744_v23 = vpop.eup %11513  ;;  %v6013_v6 = vpack.c.bf16 %v5885_v25, %v5885_v25  ;;  %v5886_v57 = vmul.f32 %v11512_v40, %v15444_v7  ;;  %v15747_v49 = vpop.xlane.xlu1 %4836 }
 0x6de   :  { %v15749_v36 = vpop.eup %11515  ;;  %v5591_v62 = vsel %vm966_vm12, %v15744_v23, 0.0  ;;  %v15784_v19 = vpop.f32.mrf.mxu1 }
 0x6df   :  { %v6014_v10 = vpack.c.bf16 %v5886_v57, %v5886_v57  ;;  %v5588_v7 = vsel %vm966_vm12, %v15749_v36, 0.0  ;;  %v6205_v14 = vunpack.c.l.b16 %v6013_v6  ;;  %v20067_v57 = vpack.c.b16 %v15118_v63, %v15116_v33  ;;  %v15771_v6 = vpop.eup %11517 }
 0x6e0   :  { %5421 = vadd.xlane.f32.xlu2 %v5420_v11  ;;  %5592 = vadd.xlane.f32.xlu0 %v5591_v62  ;;  %v15774_v11 = vpop.eup %11519  ;;  %v5060_v62 = vsub.f32 %v15415_v53, %v15683_v54  ;;  %v5061_v53 = vsub.f32 %v15432_v46, %v15710_v31  ;;  %v5062_v46 = vsub.f32 %v15447_v20, %v15742_v30  ;;  %v4703_v31 = vsel %vm966_vm12, %v15753_v47, -inf  ;;  %v20069_v20 = vld [vmem:[#allocation77_spill] sm:$0xff] }
 0x6e1   :  { %v6206_v27 = vunpack.c.l.b16 %v6014_v10  ;;  %v5423_v33 = vsel %vm966_vm12, %v15774_v11, 0.0 }
 0x6e2   :  { %5589 = vadd.xlane.f32.xlu1 %v5588_v7  ;;  %v4868_v7 = vsel %vm966_vm12, %v15731_v9, -inf }
 0x6e3   :  { %10747 = vmatmul.msk.bf16.gmra.mxu1 %vm966_vm12, %v20066_v56  ;;  %v5389_v25 = vpop.xlane.xlu2 %5388  ;;  %v15765_v40 = vpop.xlane.xlu0 %4839  ;;  %v6267_v51 = vpack.c.b16 %v6206_v27, %v6205_v14  ;;  %v5426_v14 = vsel %vm966_vm12, %v15771_v6, 0.0  ;;  %v5263_v27 = vmul.f32 1.442695, %v5060_v62 }
 0x6e4   :  { %11521 = vrcp.f32 %v5389_v25  ;;  %10775 = vmatmul.msk.bf16.gmra.mxu2 %vm966_vm12, %v20067_v57  ;;  %v15793_v57 = vpop.f32.mrf.mxu2 }
 0x6e5   :  { %10786 = vmatmul.msk.bf16.gmra.mxu3 %vm966_vm12, %v6267_v51  ;;  %v5392_v10 = vpop.xlane.xlu1 %5391  ;;  %v5005_v51 = vsub.f32 %v15420_v34, %v15702_v15  ;;  %v4874_v34 = vsel %vm966_vm12, %v15793_v57, -inf }
 0x6e6   :  { %11523 = vrcp.f32 %v5392_v10 }
 0x6e7   :  { %11525 = vpow2.f32 %v5263_v27  ;;  %v5267_v27 = vmul.f32 1.442695, %v5062_v46 }
 0x6e8   :  { %4869 = vmax.xlane.f32.xlu2 %v4868_v7  ;;  %5427 = vadd.xlane.f32.xlu0 %v5426_v14  ;;  %v5265_v14 = vmul.f32 1.442695, %v5061_v53  ;;  %v20068_v53 = vld [vmem:[#allocation81_spill] sm:$0xff] }
 0x6e9   :  { %v20070_v30 = vpack.c.b16 %v20068_v53, %v20069_v20 }
 0x6ea   :  { %v11522_v63 = vpop.eup %11521  ;;  %5424 = vadd.xlane.f32.xlu1 %v5423_v33  ;;  %v5153_v33 = vmul.f32 1.442695, %v5005_v51  ;;  %11527 = vpow2.f32 %v5265_v14 }
 0x6eb   :  { %v5887_v54 = vmul.f32 %v11522_v63, %v15474_v4  ;;  %v4669_v52 = vpop.xlane.xlu2 %4668  ;;  %v15789_v56 = vpop.xlane.xlu0 %4674 }
 0x6ec   :  { %v11524_v25 = vpop.eup %11523  ;;  %11529 = vpow2.f32 %v5153_v33  ;;  %v15819_v46 = vpop.f32.mrf.mxu2 }
 0x6ed   :  { %v6015_v10 = vpack.c.bf16 %v5887_v54, %v5887_v54  ;;  %v5888_v62 = vmul.f32 %v11524_v25, %v15476_v61  ;;  %v15796_v7 = vpop.xlane.xlu1 %4671  ;;  %v4871_v61 = vsel %vm966_vm12, %v15759_v5, -inf  ;;  %v15810_v51 = vpop.eup %11525 }
 0x6ee   :  { %v5594_v33 = vsel %vm966_vm12, %v15810_v51, 0.0 }
 0x6ef   :  { %v6016_v4 = vpack.c.bf16 %v5888_v62, %v5888_v62  ;;  %v6207_v15 = vunpack.c.l.b16 %v6015_v10  ;;  %v15816_v10 = vpop.f32.mrf.mxu1 }
 0x6f0   :  { %4704 = vmax.xlane.f32.xlu2 %v4703_v31  ;;  %4875 = vmax.xlane.f32.xlu0 %v4874_v34  ;;  %v20071_v31 = vpack.c.b16 %v15003_v26, %v15001_v48  ;;  %20072 = vst [vmem:[#allocation86_spill] sm:$0xff] %v15816_v10  ;;  %v20073_v34 = vld [vmem:[#allocation48_spill] sm:$0xff]  ;;  %v4709_v26 = vsel %vm966_vm12, %v15816_v10, -inf  ;;  %v20078_v10 = vld [vmem:[#allocation99_spill] sm:$0xff] }
 0x6f1   :  { %v6208_v63 = vunpack.c.l.b16 %v6016_v4  ;;  %v5007_v4 = vsub.f32 %v15454_v12, %v4669_v52  ;;  %v5006_v48 = vsub.f32 %v20073_v34, %v15740_v60 }
 0x6f2   :  { %4872 = vmax.xlane.f32.xlu1 %v4871_v61  ;;  %v15828_v61 = vpop.eup %11527 }
 0x6f3   :  { %10748 = vmatmul.msk.bf16.gmra.mxu1 %vm966_vm12, %v20070_v30  ;;  %v5395_v54 = vpop.xlane.xlu2 %5394  ;;  %v6268_v25 = vpack.c.b16 %v6208_v63, %v6207_v15  ;;  %v5566_v62 = vpop.xlane.xlu0 %5565  ;;  %v4706_v15 = vsel %vm966_vm12, %v15784_v19, -inf  ;;  %v5157_v52 = vmul.f32 1.442695, %v5007_v4  ;;  %v5155_v60 = vmul.f32 1.442695, %v5006_v48 }
 0x6f4   :  { %10776 = vmatmul.msk.bf16.gmra.mxu2 %vm966_vm12, %v20071_v31  ;;  %11531 = vrcp.f32 %v5566_v62  ;;  %v15832_v63 = vpop.eup %11529  ;;  %v15842_v34 = vpop.f32.mrf.mxu2 }
 0x6f5   :  { %10787 = vmatmul.msk.bf16.gmra.mxu3 %vm966_vm12, %v6268_v25  ;;  %v5563_v14 = vpop.xlane.xlu1 %5562  ;;  %v5429_v4 = vsel %vm966_vm12, %v15832_v63, 0.0  ;;  %20074 = vst [vmem:[#allocation39_spill] sm:$0xff] %v15842_v34 }
 0x6f6   :  { %11533 = vrcp.f32 %v5563_v14 }
 0x6f7   :  { %11535 = vpow2.f32 %v5267_v27  ;;  %v15846_v48 = vpop.f32.mrf.mxu1 }
 0x6f8   :  { %11537 = vrcp.f32 %v5395_v54  ;;  %5595 = vadd.xlane.f32.xlu2 %v5594_v33  ;;  %4710 = vmax.xlane.f32.xlu0 %v4709_v26 }
 0x6fa   :  { %4707 = vmax.xlane.f32.xlu1 %v4706_v15  ;;  %v11532_v12 = vpop.eup %11531 }
 0x6fb   :  { %v15834_v27 = vpop.xlane.xlu2 %4842  ;;  %v5946_v20 = vmul.f32 %v11532_v12, %v15513_v59  ;;  %v5401_v30 = vpop.xlane.xlu0 %5400  ;;  %v5597_v12 = vsel %vm966_vm12, %v15828_v61, 0.0 }
 0x6fc   :  { %v11534_v53 = vpop.eup %11533 }
 0x6fd   :  { %v15837_v54 = vpop.eup %11535  ;;  %v5945_v25 = vmul.f32 %v11534_v53, %v15511_v45  ;;  %v5398_v62 = vpop.xlane.xlu1 %5397  ;;  %v6074_v14 = vpack.c.bf16 %v5946_v20, %v5946_v20  ;;  %v20075_v53 = vld [vmem:[#allocation84_spill] sm:$0xff] }
 0x6fe   :  { %v11538_v31 = vpop.eup %11537  ;;  %11539 = vrcp.f32 %v5398_v62  ;;  %v5600_v59 = vsel %vm966_vm12, %v15837_v54, 0.0 }
 0x6ff   :  { %11541 = vpow2.f32 %v5157_v52  ;;  %v6073_v33 = vpack.c.bf16 %v5945_v25, %v5945_v25  ;;  %v5889_v45 = vmul.f32 %v11538_v31, %v15509_v24  ;;  %v6651_v26 = vunpack.c.l.b16 %v6074_v14  ;;  %v20079_v24 = vld [vmem:[#allocation98_spill] sm:$0xff] }
 0x700   :  { %11543 = vpow2.f32 %v5155_v60  ;;  %5430 = vadd.xlane.f32.xlu2 %v5429_v4  ;;  %5601 = vadd.xlane.f32.xlu0 %v5600_v59  ;;  %v20076_v60 = vld [vmem:[#allocation85_spill] sm:$0xff]  ;;  %v20080_v31 = vpack.c.b16 %v20078_v10, %v20079_v24  ;;  %v4877_v10 = vsel %vm966_vm12, %v15819_v46, -inf }
 0x701   :  { %v6650_v15 = vunpack.c.l.b16 %v6073_v33  ;;  %v20077_v20 = vpack.c.b16 %v20075_v53, %v20076_v60  ;;  %v20081_v33 = vld [vmem:[#allocation47_spill] sm:$0xff] }
 0x702   :  { %5598 = vadd.xlane.f32.xlu1 %v5597_v12  ;;  %v5063_v59 = vsub.f32 %v20081_v33, %v15747_v49 }
 0x703   :  { %v6714_v52 = vpack.c.b16 %v6651_v26, %v6650_v15  ;;  %10749 = vmatmul.msk.bf16.gmra.mxu1 %vm966_vm12, %v20077_v20  ;;  %v15855_v25 = vpop.xlane.xlu2 %4677  ;;  %v15857_v4 = vpop.xlane.xlu0 %4848  ;;  %v6017_v26 = vpack.c.bf16 %v5889_v45, %v5889_v45 }
 0x704   :  { %v11540_v62 = vpop.eup %11539  ;;  %10777 = vmatmul.msk.bf16.gmra.mxu2 %vm966_vm12, %v20080_v31  ;;  %v5269_v24 = vmul.f32 1.442695, %v5063_v59 }
 0x705   :  { %v15863_v14 = vpop.eup %11541  ;;  %v5890_v15 = vmul.f32 %v11540_v62, %v15535_v16  ;;  %10816 = vmatmul.msk.bf16.vlgmr.msra.gmra.mxu0 %vm966_vm12, %v6714_v52  ;;  %v15869_v12 = vpop.xlane.xlu1 %4845  ;;  %v6209_v16 = vunpack.c.l.b16 %v6017_v26  ;;  %v5065_v26 = vsub.f32 %v15505_v22, %v15834_v27  ;;  %v20085_v27 = vld [vmem:[#allocation93_spill] sm:$0xff] }
 0x706   :  { %v15871_v53 = vpop.eup %11543  ;;  %v5435_v20 = vsel %vm966_vm12, %v15863_v14, 0.0  ;;  %v15879_v52 = vpop.f32.mrf.mxu2  ;;  %11545 = vpow2.f32 %v5269_v24 }
 0x707   :  { %v6018_v60 = vpack.c.bf16 %v5890_v15, %v5890_v15  ;;  %v5432_v49 = vsel %vm966_vm12, %v15871_v53, 0.0  ;;  %20082 = vst [vmem:[#allocation45_spill] sm:$0xff] %v15879_v52  ;;  %v15881_v62 = vpop.f32.mrf.mxu1  ;;  %11547 = vrcp.f32 %v5401_v30  ;;  %v4883_v24 = vsel %vm966_vm12, %v15879_v52, -inf }
 0x708   :  { %4878 = vmax.xlane.f32.xlu2 %v4877_v10  ;;  %5436 = vadd.xlane.f32.xlu0 %v5435_v20  ;;  %20083 = vst [vmem:[#allocation63_spill] sm:$0xff] %v15881_v62  ;;  %v5008_v10 = vsub.f32 %v15472_v50, %v15796_v7  ;;  %v20084_v20 = vld [vmem:[#allocation55_spill] sm:$0xff]  ;;  %v4880_v7 = vsel %vm966_vm12, %v15842_v34, -inf  ;;  %v5273_v22 = vmul.f32 1.442695, %v5065_v26 }
 0x709   :  { %v6210_v45 = vunpack.c.l.b16 %v6018_v60  ;;  %v4712_v60 = vsel %vm966_vm12, %v15846_v48, -inf }
 0x70a   :  { %5433 = vadd.xlane.f32.xlu1 %v5432_v49  ;;  %v5064_v49 = vsub.f32 %v20084_v20, %v15765_v40  ;;  %v5159_v50 = vmul.f32 1.442695, %v5008_v10  ;;  %v20089_v20 = vld [vmem:[#allocation103_spill] sm:$0xff] }
 0x70b   :  { %v5569_v31 = vpop.xlane.xlu2 %5568  ;;  %v6269_v33 = vpack.c.b16 %v6210_v45, %v6209_v16  ;;  %v15883_v15 = vpop.xlane.xlu0 %4683  ;;  %v20086_v16 = vld [vmem:[#allocation92_spill] sm:$0xff] }
 0x70c   :  { %11549 = vrcp.f32 %v5569_v31  ;;  %v15900_v30 = vpop.eup %11545  ;;  %v20087_v45 = vpack.c.b16 %v20085_v27, %v20086_v16  ;;  %v20093_v16 = vld [vmem:[#allocation8_spill] sm:$0xff] }
 0x70d   :  { %10788 = vmatmul.msk.bf16.gmra.mxu3 %vm966_vm12, %v6269_v33  ;;  %v15888_v59 = vpop.xlane.xlu1 %4680  ;;  %v11548_v31 = vpop.eup %11547  ;;  %v5271_v33 = vmul.f32 1.442695, %v5064_v49  ;;  %v5010_v49 = vsub.f32 %v15519_v41, %v15855_v25 }
 0x710   :  { %4713 = vmax.xlane.f32.xlu2 %v4712_v60  ;;  %4884 = vmax.xlane.f32.xlu0 %v4883_v24  ;;  %v15906_v60 = vpop.f32.mrf.mxu2  ;;  %v20090_v24 = vld [vmem:[#allocation102_spill] sm:$0xff] }
 0x711   :  { %20088 = vst [vmem:[#allocation24_spill] sm:$0xff] %v15906_v60  ;;  %v20091_v52 = vpack.c.b16 %v20089_v20, %v20090_v24  ;;  %v20094_v20 = vld [vmem:[#allocation19_spill] sm:$0xff] }
 0x712   :  { %4881 = vmax.xlane.f32.xlu1 %v4880_v7  ;;  %v15914_v7 = vpop.f32.mrf.mxu1  ;;  %v11550_v27 = vpop.eup %11549  ;;  %v5009_v24 = vsub.f32 %v20094_v20, %v15789_v56 }
 0x713   :  { %10750 = vmatmul.msk.bf16.gmra.mxu1 %vm966_vm12, %v20087_v45  ;;  %v5404_v40 = vpop.xlane.xlu2 %5403  ;;  %v15908_v10 = vpop.xlane.xlu0 %5574  ;;  %20092 = vst [vmem:[#allocation14_spill] sm:$0xff] %v15914_v7  ;;  %v5891_v45 = vmul.f32 %v11548_v31, %v20093_v16 }
 0x714   :  { %11551 = vrcp.f32 %v5404_v40  ;;  %10778 = vmatmul.msk.bf16.gmra.mxu2 %vm966_vm12, %v20091_v52  ;;  %v5603_v40 = vsel %vm966_vm12, %v15900_v30, 0.0  ;;  %v4718_v52 = vsel %vm966_vm12, %v15914_v7, -inf }
 0x715   :  { %11553 = vpow2.f32 %v5159_v50  ;;  %v5572_v26 = vpop.xlane.xlu1 %5571  ;;  %v5947_v50 = vmul.f32 %v11550_v27, %v15565_v2  ;;  %v6019_v25 = vpack.c.bf16 %v5891_v45, %v5891_v45 }
 0x716   :  { %11555 = vrcp.f32 %v5572_v26  ;;  %v5163_v26 = vmul.f32 1.442695, %v5010_v49 }
 0x717   :  { %11557 = vpow2.f32 %v5273_v22  ;;  %v4715_v22 = vsel %vm966_vm12, %v15881_v62, -inf  ;;  %v6075_v2 = vpack.c.bf16 %v5947_v50, %v5947_v50  ;;  %v6211_v49 = vunpack.c.l.b16 %v6019_v25 }
 0x718   :  { %11559 = vpow2.f32 %v5271_v33  ;;  %5604 = vadd.xlane.f32.xlu2 %v5603_v40  ;;  %4719 = vmax.xlane.f32.xlu0 %v4718_v52  ;;  %v5161_v40 = vmul.f32 1.442695, %v5009_v24  ;;  %v15938_v34 = vpop.f32.mrf.mxu2 }
 0x71a   :  { %v11552_v31 = vpop.eup %11551  ;;  %4716 = vmax.xlane.f32.xlu1 %v4715_v22 }
 0x71b   :  { %v15928_v41 = vpop.eup %11553  ;;  %v5892_v33 = vmul.f32 %v11552_v31, %v15579_v18  ;;  %v15931_v16 = vpop.xlane.xlu2 %4851 }
 0x71c   :  { %v11556_v56 = vpop.eup %11555  ;;  %v5410_v20 = vpop.xlane.xlu0 %5409  ;;  %v5438_v18 = vsel %vm966_vm12, %v15928_v41, 0.0 }
 0x71d   :  { %v15933_v7 = vpop.eup %11557  ;;  %v6020_v27 = vpack.c.bf16 %v5892_v33, %v5892_v33  ;;  %v5948_v52 = vmul.f32 %v11556_v56, %v15583_v55  ;;  %11561 = vrcp.f32 %v5410_v20  ;;  %v5407_v62 = vpop.xlane.xlu1 %5406 }
 0x71e   :  { %20095 = vst [vmem:[#allocation17_spill] sm:$0xff] %v15933_v7  ;;  %v15936_v22 = vpop.eup %11559  ;;  %11563 = vrcp.f32 %v5407_v62  ;;  %v5609_v50 = vsel %vm966_vm12, %v15933_v7, 0.0  ;;  %v15944_v55 = vpop.f32.mrf.mxu1  ;;  %v6652_v62 = vunpack.c.l.b16 %v6075_v2  ;;  %v20100_v7 = vld [vmem:[#allocation58_spill] sm:$0xff] }
 0x71f   :  { %20096 = vst [vmem:[#allocation76_spill] sm:$0xff] %v15936_v22  ;;  %11565 = vpow2.f32 %v5163_v26  ;;  %v6076_v45 = vpack.c.bf16 %v5948_v52, %v5948_v52  ;;  %v6212_v24 = vunpack.c.l.b16 %v6020_v27  ;;  %v5606_v31 = vsel %vm966_vm12, %v15936_v22, 0.0  ;;  %v20097_v26 = vld [vmem:[#allocation95_spill] sm:$0xff]  ;;  %v20098_v52 = vld [vmem:[#allocation94_spill] sm:$0xff] }
 0x720   :  { %11567 = vpow2.f32 %v5161_v40  ;;  %5439 = vadd.xlane.f32.xlu2 %v5438_v18  ;;  %5610 = vadd.xlane.f32.xlu0 %v5609_v50  ;;  %v20099_v25 = vpack.c.b16 %v20097_v26, %v20098_v52  ;;  %v20101_v22 = vld [vmem:[#allocation15_spill] sm:$0xff]  ;;  %v20105_v26 = vld [vmem:[#allocation25_spill] sm:$0xff] }
 0x721   :  { %v6270_v33 = vpack.c.b16 %v6212_v24, %v6211_v49  ;;  %v6653_v56 = vunpack.c.l.b16 %v6076_v45  ;;  %v20102_v49 = vpack.c.b16 %v20100_v7, %v20101_v22  ;;  %v5066_v45 = vsub.f32 %v15523_v42, %v15869_v12  ;;  %v15975_v22 = vpop.f32.mrf.mxu2 }
 0x722   :  { %5607 = vadd.xlane.f32.xlu1 %v5606_v31  ;;  %11569 = vrcp.f32 %v15908_v10  ;;  %v4886_v7 = vsel %vm966_vm12, %v15906_v60, -inf  ;;  %20104 = vst [vmem:[#allocation59_spill] sm:$0xff] %v15975_v22  ;;  %v5067_v10 = vsub.f32 %v20105_v26, %v15857_v4  ;;  %v20108_v4 = vld [vmem:[#allocation9_spill] sm:$0xff] }
 0x723   :  { %v11562_v20 = vpop.eup %11561  ;;  %10751 = vmatmul.msk.bf16.gmra.mxu1 %vm966_vm12, %v20099_v25  ;;  %10789 = vmatmul.msk.bf16.gmra.mxu3 %vm966_vm12, %v6270_v33  ;;  %v15953_v40 = vpop.xlane.xlu2 %4686  ;;  %v6715_v27 = vpack.c.b16 %v6653_v56, %v6652_v62 }
 0x724   :  { %v11564_v18 = vpop.eup %11563  ;;  %v15955_v50 = vpop.xlane.xlu0 %4857  ;;  %10779 = vmatmul.msk.bf16.gmra.mxu2 %vm966_vm12, %v20102_v49  ;;  %v5894_v62 = vmul.f32 %v11562_v20, %v15603_v44 }
 0x725   :  { %v15961_v2 = vpop.eup %11565  ;;  %v5893_v24 = vmul.f32 %v11564_v18, %v15606_v29  ;;  %10817 = vmatmul.msk.bf16.gmra.mxu0 %vm966_vm12, %v6715_v27  ;;  %v15967_v31 = vpop.xlane.xlu1 %4854  ;;  %v5275_v29 = vmul.f32 1.442695, %v5066_v45  ;;  %v20106_v27 = vld [vmem:[#allocation11_spill] sm:$0xff] }
 0x726   :  { %20103 = vst [vmem:[#allocation73_spill] sm:$0xff] %v15961_v2  ;;  %v15969_v33 = vpop.eup %11567  ;;  %v5444_v42 = vsel %vm966_vm12, %v15961_v2, 0.0  ;;  %v15983_v44 = vpop.f32.mrf.mxu1  ;;  %v6022_v20 = vpack.c.bf16 %v5894_v62, %v5894_v62  ;;  %v5011_v18 = vsub.f32 %v20106_v27, %v15888_v59  ;;  %v4721_v62 = vsel %vm966_vm12, %v15944_v55, -inf }
 0x727   :  { %v6021_v12 = vpack.c.bf16 %v5893_v24, %v5893_v24  ;;  %v5441_v56 = vsel %vm966_vm12, %v15969_v33, 0.0  ;;  %v4892_v59 = vsel %vm966_vm12, %v15975_v22, -inf }
 0x728   :  { %4887 = vmax.xlane.f32.xlu2 %v4886_v7  ;;  %5445 = vadd.xlane.f32.xlu0 %v5444_v42  ;;  %v11570_v25 = vpop.eup %11569  ;;  %v5277_v7 = vmul.f32 1.442695, %v5067_v10  ;;  %v20107_v42 = vld [vmem:[#allocation75_spill] sm:$0xff]  ;;  %v6214_v26 = vunpack.c.l.b16 %v6022_v20  ;;  %v5165_v2 = vmul.f32 1.442695, %v5011_v18 }
 0x729   :  { %v6213_v24 = vunpack.c.l.b16 %v6021_v12  ;;  %v5949_v60 = vmul.f32 %v11570_v25, %v20107_v42 }
 0x72a   :  { %5442 = vadd.xlane.f32.xlu1 %v5441_v56  ;;  %v5068_v56 = vsub.f32 %v20108_v4, %v15931_v16  ;;  %v20110_v4 = vld [vmem:[#allocation97_spill] sm:$0xff] }
 0x72b   :  { %v5578_v52 = vpop.xlane.xlu2 %5577  ;;  %v6271_v12 = vpack.c.b16 %v6214_v26, %v6213_v24  ;;  %v6077_v16 = vpack.c.bf16 %v5949_v60, %v5949_v60 }
 0x72c   :  { %11571 = vrcp.f32 %v5578_v52  ;;  %v15987_v49 = vpop.xlane.xlu0 %4692  ;;  %v16000_v52 = vpop.f32.mrf.mxu2  ;;  %v5279_v27 = vmul.f32 1.442695, %v5068_v56  ;;  %v20114_v56 = vld [vmem:[#allocation28_spill] sm:$0xff] }
 0x72d   :  { %11573 = vpow2.f32 %v5275_v29  ;;  %v15989_v45 = vpop.xlane.xlu1 %4689  ;;  %v4889_v29 = vsel %vm966_vm12, %v15938_v34, -inf  ;;  %20109 = vst [vmem:[#allocation13_spill] sm:$0xff] %v16000_v52 }
 0x72e   :  { %11575 = vpow2.f32 %v5277_v7  ;;  %v16010_v24 = vpop.f32.mrf.mxu1 }
 0x72f   :  { %11577 = vpow2.f32 %v5165_v2  ;;  %20113 = vst [vmem:[#allocation89_spill] sm:$0xff] %v16010_v24  ;;  %v6654_v2 = vunpack.c.l.b16 %v6077_v16 }
 0x730   :  { %4722 = vmax.xlane.f32.xlu2 %v4721_v62  ;;  %4893 = vmax.xlane.f32.xlu0 %v4892_v59  ;;  %v20111_v62 = vld [vmem:[#allocation96_spill] sm:$0xff] }
 0x731   :  { %v20112_v59 = vpack.c.b16 %v20110_v4, %v20111_v62 }
 0x732   :  { %v11572_v10 = vpop.eup %11571  ;;  %4890 = vmax.xlane.f32.xlu1 %v4889_v29 }
 0x733   :  { %v16002_v25 = vpop.eup %11573  ;;  %v5950_v20 = vmul.f32 %v11572_v10, %v15629_v13  ;;  %10790 = vmatmul.msk.bf16.gmra.mxu3 %vm966_vm12, %v6271_v12  ;;  %v5413_v18 = vpop.xlane.xlu2 %5412  ;;  %v5013_v13 = vsub.f32 %v15587_v17, %v15953_v40  ;;  %v5012_v12 = vsub.f32 %v20114_v56, %v15883_v15  ;;  %v4727_v10 = vsel %vm966_vm12, %v16010_v24, -inf }
 0x734   :  { %v5584_v42 = vpop.xlane.xlu0 %5583  ;;  %10780 = vmatmul.msk.bf16.gmra.mxu2 %vm966_vm12, %v20112_v59  ;;  %v5612_v60 = vsel %vm966_vm12, %v16002_v25, 0.0  ;;  %v16029_v62 = vpop.f32.mrf.mxu2 }
 0x735   :  { %v6078_v26 = vpack.c.bf16 %v5950_v20, %v5950_v20  ;;  %11579 = vrcp.f32 %v5584_v42  ;;  %v5581_v29 = vpop.xlane.xlu1 %5580  ;;  %v16020_v20 = vpop.eup %11575  ;;  %v4724_v42 = vsel %vm966_vm12, %v15983_v44, -inf  ;;  %v5169_v40 = vmul.f32 1.442695, %v5013_v13 }
 0x736   :  { %11581 = vrcp.f32 %v5581_v29  ;;  %v16024_v4 = vpop.eup %11577 }
 0x737   :  { %11583 = vpow2.f32 %v5279_v27  ;;  %v6655_v7 = vunpack.c.l.b16 %v6078_v26  ;;  %20115 = vst [vmem:[#allocation88_spill] sm:$0xff] %v16024_v4  ;;  %v5447_v13 = vsel %vm966_vm12, %v16024_v4, 0.0 }
 0x738   :  { %11585 = vrcp.f32 %v5413_v18  ;;  %5613 = vadd.xlane.f32.xlu2 %v5612_v60  ;;  %4728 = vmax.xlane.f32.xlu0 %v4727_v10  ;;  %v5167_v18 = vmul.f32 1.442695, %v5012_v12  ;;  %v16039_v12 = vpop.f32.mrf.mxu1 }
 0x739   :  { %v6716_v27 = vpack.c.b16 %v6655_v7, %v6654_v2 }
 0x73a   :  { %4725 = vmax.xlane.f32.xlu1 %v4724_v42 }
 0x73b   :  { %v11580_v17 = vpop.eup %11579  ;;  %10818 = vmatmul.msk.bf16.gmra.mxu0 %vm966_vm12, %v6716_v27  ;;  %v16027_v15 = vpop.xlane.xlu2 %4860 }
 0x73c   :  { %v11582_v16 = vpop.eup %11581  ;;  %v5419_v59 = vpop.xlane.xlu0 %5418  ;;  %v5952_v7 = vmul.f32 %v11580_v17, %v15657_v28 }
 0x73d   :  { %v16031_v26 = vpop.eup %11583  ;;  %v5951_v29 = vmul.f32 %v11582_v16, %v15659_v38  ;;  %v5416_v60 = vpop.xlane.xlu1 %5415  ;;  %v5615_v38 = vsel %vm966_vm12, %v16020_v20, 0.0 }
 0x73e   :  { %20116 = vst [vmem:[#allocation50_spill] sm:$0xff] %v16031_v26  ;;  %v11586_v2 = vpop.eup %11585  ;;  %11587 = vrcp.f32 %v5416_v60  ;;  %v5618_v56 = vsel %vm966_vm12, %v16031_v26, 0.0  ;;  %v6080_v27 = vpack.c.bf16 %v5952_v7, %v5952_v7  ;;  %v20118_v60 = vld [vmem:[#allocation101_spill] sm:$0xff]  ;;  %v16061_v22 = vpop.f32.mrf.mxu2 }
 0x73f   :  { %11589 = vpow2.f32 %v5169_v40  ;;  %v5895_v10 = vmul.f32 %v11586_v2, %v15655_v21  ;;  %v6079_v42 = vpack.c.bf16 %v5951_v29, %v5951_v29  ;;  %v20117_v40 = vld [vmem:[#allocation72_spill] sm:$0xff] }
 0x740   :  { %11591 = vpow2.f32 %v5167_v18  ;;  %5448 = vadd.xlane.f32.xlu2 %v5447_v13  ;;  %5619 = vadd.xlane.f32.xlu0 %v5618_v56  ;;  %v5069_v16 = vsub.f32 %v20117_v40, %v15967_v31  ;;  %v20119_v13 = vld [vmem:[#allocation100_spill] sm:$0xff]  ;;  %v16071_v26 = vpop.f32.mrf.mxu1 }
 0x741   :  { %v20120_v24 = vpack.c.b16 %v20118_v60, %v20119_v13  ;;  %v6023_v29 = vpack.c.bf16 %v5895_v10, %v5895_v10  ;;  %v6656_v7 = vunpack.c.l.b16 %v6079_v42  ;;  %v4895_v60 = vsel %vm966_vm12, %v16000_v52, -inf  ;;  %20121 = vst [vmem:[#allocation53_spill] sm:$0xff] %v16071_v26 }
 0x742   :  { %5616 = vadd.xlane.f32.xlu1 %v5615_v38  ;;  %v6657_v13 = vunpack.c.l.b16 %v6080_v27 }
 0x743   :  { %v16044_v28 = vpop.xlane.xlu2 %4695 }
 0x744   :  { %v11588_v17 = vpop.eup %11587  ;;  %v16048_v18 = vpop.xlane.xlu0 %4866  ;;  %10781 = vmatmul.msk.bf16.gmra.mxu2 %vm966_vm12, %v20120_v24  ;;  %v5281_v24 = vmul.f32 1.442695, %v5069_v16  ;;  %v6717_v42 = vpack.c.b16 %v6657_v13, %v6656_v7  ;;  %v5014_v16 = vsub.f32 %v15614_v58, %v15989_v45  ;;  %v5071_v7 = vsub.f32 %v15650_v0, %v16027_v15  ;;  %v20123_v13 = vld [vmem:[#allocation60_spill] sm:$0xff] }
 0x745   :  { %v16054_v21 = vpop.eup %11589  ;;  %v5896_v2 = vmul.f32 %v11588_v17, %v15685_v1  ;;  %v16057_v56 = vpop.xlane.xlu1 %4863  ;;  %v6215_v17 = vunpack.c.l.b16 %v6023_v29  ;;  %v4901_v58 = vsel %vm966_vm12, %v16061_v22, -inf }
 0x746   :  { %v16059_v38 = vpop.eup %11591  ;;  %v16063_v31 = vpop.f32.mrf.mxu3  ;;  %v5453_v10 = vsel %vm966_vm12, %v16054_v21, 0.0  ;;  %11593 = vpow2.f32 %v5281_v24  ;;  %v5070_v24 = vsub.f32 %v20123_v13, %v15955_v50  ;;  %v5171_v45 = vmul.f32 1.442695, %v5014_v16  ;;  %v20124_v50 = vld [vmem:[#allocation105_spill] sm:$0xff] }
 0x747   :  { %v6024_v40 = vpack.c.bf16 %v5896_v2, %v5896_v2  ;;  %v5450_v1 = vsel %vm966_vm12, %v16059_v38, 0.0  ;;  %11595 = vrcp.f32 %v5419_v59  ;;  %v5285_v15 = vmul.f32 1.442695, %v5071_v7  ;;  %v20128_v7 = vld [vmem:[#allocation87_spill] sm:$0xff] }
 0x748   :  { %4896 = vmax.xlane.f32.xlu2 %v4895_v60  ;;  %5454 = vadd.xlane.f32.xlu0 %v5453_v10  ;;  %v16103_v16 = vpop.f32.mrf.mxu1 }
 0x749   :  { %v6216_v4 = vunpack.c.l.b16 %v6024_v40  ;;  %v4730_v40 = vsel %vm966_vm12, %v16039_v12, -inf  ;;  %20127 = vst [vmem:[#allocation64_spill] sm:$0xff] %v16103_v16 }
 0x74a   :  { %5451 = vadd.xlane.f32.xlu1 %v5450_v1  ;;  %v5283_v1 = vmul.f32 1.442695, %v5070_v24  ;;  %v5016_v24 = vsub.f32 %v20128_v7, %v16044_v28 }
 0x74b   :  { %10819 = vmatmul.msk.bf16.gmra.mxu0 %vm966_vm12, %v6717_v42  ;;  %v5587_v2 = vpop.xlane.xlu2 %5586  ;;  %v6272_v52 = vpack.c.b16 %v6216_v4, %v6215_v17  ;;  %v16087_v4 = vpop.f32.mrf.mxu2  ;;  %v20125_v17 = vld [vmem:[#allocation104_spill] sm:$0xff] }
 0x74c   :  { %v16074_v27 = vpop.xlane.xlu0 %4701  ;;  %11597 = vrcp.f32 %v5587_v2  ;;  %v16095_v0 = vpop.eup %11593  ;;  %v20126_v2 = vpack.c.b16 %v20124_v50, %v20125_v17 }
 0x74d   :  { %10791 = vmatmul.msk.bf16.gmra.mxu3 %vm966_vm12, %v6272_v52  ;;  %v16079_v60 = vpop.xlane.xlu1 %4698  ;;  %v4898_v52 = vsel %vm966_vm12, %v16029_v62, -inf  ;;  %v11596_v10 = vpop.eup %11595 }
 0x74e   :  { %v16081_v29 = vpop.f32.mrf.mxu3 }
 0x74f   :  { %20122 = vst [vmem:[#allocation65_spill] sm:$0xff] %v16081_v29 }
 0x750   :  { %4731 = vmax.xlane.f32.xlu2 %v4730_v40  ;;  %4902 = vmax.xlane.f32.xlu0 %v4901_v58  ;;  %v5897_v58 = vmul.f32 %v11596_v10, %v15680_v43  ;;  %v4733_v43 = vsel %vm966_vm12, %v16071_v26, -inf }
 0x752   :  { %4899 = vmax.xlane.f32.xlu1 %v4898_v52  ;;  %v11598_v13 = vpop.eup %11597  ;;  %v5621_v52 = vsel %vm966_vm12, %v16095_v0, 0.0 }
 0x753   :  { %v5422_v59 = vpop.xlane.xlu2 %5421 }
 0x754   :  { %11599 = vrcp.f32 %v5422_v59  ;;  %v16097_v42 = vpop.xlane.xlu0 %5592  ;;  %10782 = vmatmul.msk.bf16.gmra.mxu2 %vm966_vm12, %v20126_v2  ;;  %v20129_v59 = vld [vmem:[#allocation21_spill] sm:$0xff]  ;;  %v5953_v2 = vmul.f32 %v11598_v13, %v15719_v37 }
 0x755   :  { %11601 = vpow2.f32 %v5171_v45  ;;  %v5590_v40 = vpop.xlane.xlu1 %5589  ;;  %v5015_v50 = vsub.f32 %v20129_v59, %v15987_v49  ;;  %v4736_v45 = vsel %vm966_vm12, %v16103_v16, -inf  ;;  %v5175_v49 = vmul.f32 1.442695, %v5016_v24 }
 0x756   :  { %11603 = vrcp.f32 %v5590_v40  ;;  %v16112_v17 = vpop.f32.mrf.mxu3  ;;  %v6081_v13 = vpack.c.bf16 %v5953_v2, %v5953_v2  ;;  %v16135_v2 = vpop.f32.mrf.mxu1 }
 0x757   :  { %11605 = vpow2.f32 %v5285_v15  ;;  %v16119_v15 = vpop.f32.mrf.mxu2  ;;  %v5173_v59 = vmul.f32 1.442695, %v5015_v50 }
 0x758   :  { %11607 = vpow2.f32 %v5283_v1  ;;  %5622 = vadd.xlane.f32.xlu2 %v5621_v52  ;;  %4737 = vmax.xlane.f32.xlu0 %v4736_v45  ;;  %v6025_v1 = vpack.c.bf16 %v5897_v58, %v5897_v58 }
 0x75a   :  { %v11600_v28 = vpop.eup %11599  ;;  %4734 = vmax.xlane.f32.xlu1 %v4733_v43  ;;  %v6217_v24 = vunpack.c.l.b16 %v6025_v1 }
 0x75b   :  { %v16121_v10 = vpop.eup %11601  ;;  %v5898_v40 = vmul.f32 %v11600_v28, %v15737_v32  ;;  %v16124_v7 = vpop.xlane.xlu2 %4869 }
 0x75c   :  { %v11604_v52 = vpop.eup %11603  ;;  %v5428_v29 = vpop.xlane.xlu0 %5427  ;;  %v5456_v58 = vsel %vm966_vm12, %v16121_v10, 0.0 }
 0x75d   :  { %v16126_v37 = vpop.eup %11605  ;;  %v6026_v45 = vpack.c.bf16 %v5898_v40, %v5898_v40  ;;  %v5954_v16 = vmul.f32 %v11604_v52, %v15749_v36  ;;  %11609 = vrcp.f32 %v5428_v29  ;;  %v5425_v26 = vpop.xlane.xlu1 %5424 }
 0x75e   :  { %20130 = vst [vmem:[#allocation57_spill] sm:$0xff] %v16126_v37  ;;  %v16129_v43 = vpop.eup %11607  ;;  %11611 = vrcp.f32 %v5425_v26  ;;  %v5627_v50 = vsel %vm966_vm12, %v16126_v37, 0.0  ;;  %v6658_v26 = vunpack.c.l.b16 %v6081_v13  ;;  %v16139_v52 = vpop.f32.mrf.mxu3  ;;  %v20134_v37 = vld [vmem:[#allocation106_spill] sm:$0xff] }
 0x75f   :  { %20131 = vst [vmem:[#allocation12_spill] sm:$0xff] %v16129_v43  ;;  %11613 = vpow2.f32 %v5175_v49  ;;  %v6082_v32 = vpack.c.bf16 %v5954_v16, %v5954_v16  ;;  %v6218_v28 = vunpack.c.l.b16 %v6026_v45  ;;  %v5624_v36 = vsel %vm966_vm12, %v16129_v43, 0.0  ;;  %v16144_v45 = vpop.f32.mrf.mxu2 }
 0x760   :  { %11615 = vpow2.f32 %v5173_v59  ;;  %5457 = vadd.xlane.f32.xlu2 %v5456_v58  ;;  %5628 = vadd.xlane.f32.xlu0 %v5627_v50  ;;  %20132 = vst [vmem:[#allocation78_spill] sm:$0xff] %v16139_v52  ;;  %v20133_v50 = vld [vmem:[#allocation107_spill] sm:$0xff] }
 0x761   :  { %v6273_v29 = vpack.c.b16 %v6218_v28, %v6217_v24  ;;  %v6659_v40 = vunpack.c.l.b16 %v6082_v32  ;;  %v20135_v43 = vpack.c.b16 %v20133_v50, %v20134_v37  ;;  %v5072_v32 = vsub.f32 %v15669_v3, %v16057_v56 }
 0x762   :  { %5625 = vadd.xlane.f32.xlu1 %v5624_v36  ;;  %11617 = vrcp.f32 %v16097_v42  ;;  %v4904_v37 = vsel %vm966_vm12, %v16087_v4, -inf }
 0x763   :  { %v11610_v16 = vpop.eup %11609  ;;  %10792 = vmatmul.msk.bf16.gmra.mxu3 %vm966_vm12, %v6273_v29  ;;  %v16142_v1 = vpop.xlane.xlu2 %4704  ;;  %v6718_v49 = vpack.c.b16 %v6659_v40, %v6658_v26  ;;  %v5287_v3 = vmul.f32 1.442695, %v5072_v32  ;;  %v5073_v26 = vsub.f32 %v15700_v8, %v16048_v18  ;;  %v5074_v18 = vsub.f32 %v15731_v9, %v16124_v7 }
 0x764   :  { %v11612_v59 = vpop.eup %11611  ;;  %v16146_v58 = vpop.xlane.xlu0 %4875  ;;  %10783 = vmatmul.msk.bf16.gmra.mxu2 %vm966_vm12, %v20135_v43  ;;  %v5900_v29 = vmul.f32 %v11610_v16, %v15771_v6 }
 0x765   :  { %v16152_v13 = vpop.eup %11613  ;;  %v5899_v24 = vmul.f32 %v11612_v59, %v15774_v11  ;;  %10820 = vmatmul.msk.bf16.gmra.mxu0 %vm966_vm12, %v6718_v49  ;;  %v16158_v28 = vpop.xlane.xlu1 %4872  ;;  %v5017_v59 = vsub.f32 %v15696_v39, %v16079_v60  ;;  %v4910_v39 = vsel %vm966_vm12, %v16144_v45, -inf  ;;  %v4907_v60 = vsel %vm966_vm12, %v16119_v15, -inf }
 0x766   :  { %v16160_v36 = vpop.eup %11615  ;;  %v5462_v43 = vsel %vm966_vm12, %v16152_v13, 0.0  ;;  %v16174_v6 = vpop.f32.mrf.mxu1  ;;  %v6028_v42 = vpack.c.bf16 %v5900_v29, %v5900_v29  ;;  %v4739_v29 = vsel %vm966_vm12, %v16135_v2, -inf  ;;  %v5291_v7 = vmul.f32 1.442695, %v5074_v18 }
 0x767   :  { %v6027_v56 = vpack.c.bf16 %v5899_v24, %v5899_v24  ;;  %v5459_v11 = vsel %vm966_vm12, %v16160_v36, 0.0 }
 0x768   :  { %4905 = vmax.xlane.f32.xlu2 %v4904_v37  ;;  %5463 = vadd.xlane.f32.xlu0 %v5462_v43  ;;  %v16172_v40 = vpop.f32.mrf.mxu3  ;;  %v11618_v49 = vpop.eup %11617  ;;  %v5289_v37 = vmul.f32 1.442695, %v5073_v26  ;;  %v6220_v43 = vunpack.c.l.b16 %v6028_v42 }
 0x769   :  { %v6219_v24 = vunpack.c.l.b16 %v6027_v56  ;;  %v5955_v8 = vmul.f32 %v11618_v49, %v15744_v23 }
 0x76a   :  { %5460 = vadd.xlane.f32.xlu1 %v5459_v11  ;;  %v5177_v11 = vmul.f32 1.442695, %v5017_v59 }
 0x76b   :  { %v5596_v16 = vpop.xlane.xlu2 %5595  ;;  %v6083_v9 = vpack.c.bf16 %v5955_v8, %v5955_v8 }
 0x76c   :  { %11619 = vrcp.f32 %v5596_v16  ;;  %v16178_v50 = vpop.xlane.xlu0 %4710 }
 0x76d   :  { %11621 = vpow2.f32 %v5287_v3  ;;  %v16180_v32 = vpop.xlane.xlu1 %4707  ;;  %v6274_v3 = vpack.c.b16 %v6220_v43, %v6219_v24  ;;  %v6660_v8 = vunpack.c.l.b16 %v6083_v9  ;;  %v5018_v43 = vsub.f32 %v15725_v35, %v16074_v27 }
 0x76e   :  { %11623 = vpow2.f32 %v5289_v37  ;;  %v16197_v59 = vpop.f32.mrf.mxu1 }
 0x76f   :  { %11625 = vpow2.f32 %v5177_v11  ;;  %v4745_v11 = vsel %vm966_vm12, %v16197_v59, -inf }
 0x770   :  { %4740 = vmax.xlane.f32.xlu2 %v4739_v29  ;;  %4911 = vmax.xlane.f32.xlu0 %v4910_v39  ;;  %v16195_v16 = vpop.f32.mrf.mxu3 }
 0x771   :  { %20136 = vst [vmem:[#allocation74_spill] sm:$0xff] %v16195_v16 }
 0x772   :  { %v11620_v56 = vpop.eup %11619  ;;  %4908 = vmax.xlane.f32.xlu1 %v4907_v60  ;;  %v16209_v60 = vpop.f32.mrf.mxu2 }
 0x773   :  { %v16191_v23 = vpop.eup %11621  ;;  %v5956_v26 = vmul.f32 %v11620_v56, %v15810_v51  ;;  %10793 = vmatmul.msk.bf16.gmra.mxu3 %vm966_vm12, %v6274_v3  ;;  %v5431_v42 = vpop.xlane.xlu2 %5430  ;;  %v5019_v51 = vsub.f32 %v15753_v47, %v16142_v1  ;;  %v4742_v3 = vsel %vm966_vm12, %v16174_v6, -inf }
 0x774   :  { %v5602_v49 = vpop.xlane.xlu0 %5601  ;;  %v5630_v37 = vsel %vm966_vm12, %v16191_v23, 0.0  ;;  %v16207_v39 = vpop.eup %11623 }
 0x775   :  { %v6084_v29 = vpack.c.bf16 %v5956_v26, %v5956_v26  ;;  %11627 = vrcp.f32 %v5602_v49  ;;  %v5599_v24 = vpop.xlane.xlu1 %5598  ;;  %v16213_v47 = vpop.eup %11625  ;;  %v5181_v9 = vmul.f32 1.442695, %v5019_v51 }
 0x776   :  { %11629 = vrcp.f32 %v5599_v24  ;;  %20137 = vst [vmem:[#allocation34_spill] sm:$0xff] %v16213_v47  ;;  %v5465_v51 = vsel %vm966_vm12, %v16213_v47, 0.0 }
 0x777   :  { %11631 = vpow2.f32 %v5291_v7  ;;  %v6661_v18 = vunpack.c.l.b16 %v6084_v29  ;;  %v5179_v7 = vmul.f32 1.442695, %v5018_v43  ;;  %v16228_v43 = vpop.f32.mrf.mxu1 }
 0x778   :  { %11633 = vrcp.f32 %v5431_v42  ;;  %5631 = vadd.xlane.f32.xlu2 %v5630_v37  ;;  %4746 = vmax.xlane.f32.xlu0 %v4745_v11  ;;  %v16221_v37 = vpop.f32.mrf.mxu3 }
 0x779   :  { %v6719_v56 = vpack.c.b16 %v6661_v18, %v6660_v8 }
 0x77a   :  { %4743 = vmax.xlane.f32.xlu1 %v4742_v3  ;;  %v5633_v3 = vsel %vm966_vm12, %v16207_v39, 0.0 }
 0x77b   :  { %v11628_v1 = vpop.eup %11627  ;;  %10821 = vmatmul.msk.bf16.gmra.mxu0 %vm966_vm12, %v6719_v56  ;;  %v16216_v35 = vpop.xlane.xlu2 %4878 }
 0x77c   :  { %v11630_v27 = vpop.eup %11629  ;;  %v5437_v26 = vpop.xlane.xlu0 %5436  ;;  %v5958_v8 = vmul.f32 %v11628_v1, %v15837_v54 }
 0x77d   :  { %v16218_v42 = vpop.eup %11631  ;;  %v5957_v49 = vmul.f32 %v11630_v27, %v15828_v61  ;;  %v5434_v29 = vpop.xlane.xlu1 %5433  ;;  %v5075_v27 = vsub.f32 %v15759_v5, %v16158_v28 }
 0x77e   :  { %v11634_v24 = vpop.eup %11633  ;;  %11635 = vrcp.f32 %v5434_v29  ;;  %v5636_v18 = vsel %vm966_vm12, %v16218_v42, 0.0  ;;  %v16233_v56 = vpop.f32.mrf.mxu2  ;;  %v6086_v54 = vpack.c.bf16 %v5958_v8, %v5958_v8  ;;  %v4913_v8 = vsel %vm966_vm12, %v16209_v60, -inf }
 0x77f   :  { %11637 = vpow2.f32 %v5181_v9  ;;  %v5901_v61 = vmul.f32 %v11634_v24, %v15832_v63  ;;  %v6085_v11 = vpack.c.bf16 %v5957_v49, %v5957_v49  ;;  %v5293_v52 = vmul.f32 1.442695, %v5075_v27 }
 0x780   :  { %11639 = vpow2.f32 %v5179_v7  ;;  %5466 = vadd.xlane.f32.xlu2 %v5465_v51  ;;  %5637 = vadd.xlane.f32.xlu0 %v5636_v18  ;;  %v6663_v16 = vunpack.c.l.b16 %v6086_v54  ;;  %v16250_v47 = vpop.f32.mrf.mxu3 }
 0x781   :  { %v6029_v63 = vpack.c.bf16 %v5901_v61, %v5901_v61  ;;  %v6662_v51 = vunpack.c.l.b16 %v6085_v11  ;;  %20139 = vst [vmem:[#allocation91_spill] sm:$0xff] %v16250_v47  ;;  %11641 = vpow2.f32 %v5293_v52  ;;  %v20141_v52 = vld [vmem:[#allocation52_spill] sm:$0xff] }
 0x782   :  { %5634 = vadd.xlane.f32.xlu1 %v5633_v3  ;;  %11643 = vrcp.f32 %v5437_v26  ;;  %v20142_v26 = vld [vmem:[#allocation22_spill] sm:$0xff] }
 0x783   :  { %v16235_v1 = vpop.xlane.xlu2 %4713  ;;  %v6720_v28 = vpack.c.b16 %v6663_v16, %v6662_v51  ;;  %v6221_v61 = vunpack.c.l.b16 %v6029_v63  ;;  %v5077_v63 = vsub.f32 %v15819_v46, %v16216_v35  ;;  %v4748_v51 = vsel %vm966_vm12, %v16228_v43, -inf }
 0x784   :  { %v11636_v9 = vpop.eup %11635  ;;  %v16239_v7 = vpop.xlane.xlu0 %4884  ;;  %v4916_v46 = vsel %vm966_vm12, %v16233_v56, -inf }
 0x785   :  { %v16241_v29 = vpop.eup %11637  ;;  %v5902_v49 = vmul.f32 %v11636_v9, %v15871_v53  ;;  %v16244_v24 = vpop.xlane.xlu1 %4881 }
 0x786   :  { %20138 = vst [vmem:[#allocation61_spill] sm:$0xff] %v16241_v29  ;;  %v16246_v18 = vpop.eup %11639  ;;  %v5471_v5 = vsel %vm966_vm12, %v16241_v29, 0.0  ;;  %v16256_v9 = vpop.f32.mrf.mxu1 }
 0x787   :  { %v6030_v3 = vpack.c.bf16 %v5902_v49, %v5902_v49  ;;  %v5468_v53 = vsel %vm966_vm12, %v16246_v18, 0.0  ;;  %20140 = vst [vmem:[#allocation90_spill] sm:$0xff] %v16256_v9  ;;  %v16261_v47 = vpop.f32.mrf.mxu2  ;;  %v16281_v35 = vpop.eup %11641 }
 0x788   :  { %4914 = vmax.xlane.f32.xlu2 %v4913_v8  ;;  %5472 = vadd.xlane.f32.xlu0 %v5471_v5  ;;  %v5020_v8 = vsub.f32 %v15784_v19, %v16180_v32  ;;  %v4919_v19 = vsel %vm966_vm12, %v16261_v47, -inf  ;;  %v7035_v32 = vmul.f32 %v16063_v31, %v20141_v52  ;;  %20143 = vst [vmem:[#allocation5_spill] sm:$0xff] %v16281_v35 }
 0x789   :  { %v6222_v11 = vunpack.c.l.b16 %v6030_v3  ;;  %v5076_v3 = vsub.f32 %v15793_v57, %v16146_v58  ;;  %v5297_v57 = vmul.f32 1.442695, %v5077_v63  ;;  %v5022_v63 = vsub.f32 %v15846_v48, %v16235_v1 }
 0x78a   :  { %5469 = vadd.xlane.f32.xlu1 %v5468_v53  ;;  %v5183_v53 = vmul.f32 1.442695, %v5020_v8  ;;  %v4751_v48 = vsel %vm966_vm12, %v16256_v9, -inf }
 0x78b   :  { %10822 = vmatmul.msk.bf16.gmra.mxu0 %vm966_vm12, %v6720_v28  ;;  %v5605_v54 = vpop.xlane.xlu2 %5604  ;;  %v6275_v27 = vpack.c.b16 %v6222_v11, %v6221_v61  ;;  %v11644_v11 = vpop.eup %11643 }
 0x78c   :  { %v16259_v49 = vpop.xlane.xlu0 %4719  ;;  %11645 = vrcp.f32 %v5605_v54  ;;  %v5295_v54 = vmul.f32 1.442695, %v5076_v3  ;;  %v20145_v3 = vld [vmem:[#allocation86_spill] sm:$0xff] }
 0x78d   :  { %10794 = vmatmul.msk.bf16.gmra.mxu3 %vm966_vm12, %v6275_v27  ;;  %v16266_v16 = vpop.xlane.xlu1 %4716 }
 0x78e   :  { %v16287_v31 = vpop.f32.mrf.mxu1 }
 0x78f   :  { %20144 = vst [vmem:[#allocation41_spill] sm:$0xff] %v16287_v31 }
 0x790   :  { %v6446_v5 = vpop.f32.mrf.mxu3  ;;  %4749 = vmax.xlane.f32.xlu2 %v4748_v51  ;;  %4920 = vmax.xlane.f32.xlu0 %v4919_v19  ;;  %v5639_v19 = vsel %vm966_vm12, %v16281_v35, 0.0 }
 0x791   :  { %v7051_v28 = vmul.f32 %v6446_v5, %v20142_v26  ;;  %v5903_v5 = vmul.f32 %v11644_v11, %v15863_v14 }
 0x792   :  { %4917 = vmax.xlane.f32.xlu1 %v4916_v46  ;;  %v11646_v51 = vpop.eup %11645  ;;  %v16300_v46 = vpop.f32.mrf.mxu2 }
 0x793   :  { %v16283_v58 = vadd.f32 %v7051_v28, %v7035_v32  ;;  %v5440_v61 = vpop.xlane.xlu2 %5439  ;;  %v5021_v32 = vsub.f32 %v20145_v3, %v16178_v50  ;;  %v16296_v28 = vpop.f32.mrf.mxu0  ;;  %20146 = vst [vmem:[#allocation67_spill] sm:$0xff] %v16300_v46  ;;  %v5959_v14 = vmul.f32 %v11646_v51, %v15900_v30  ;;  %v5187_v50 = vmul.f32 1.442695, %v5022_v63 }
 0x794   :  { %11647 = vrcp.f32 %v5440_v61  ;;  %v16285_v27 = vpop.xlane.xlu0 %5610  ;;  %v6031_v61 = vpack.c.bf16 %v5903_v5, %v5903_v5 }
 0x795   :  { %11649 = vpow2.f32 %v5183_v53  ;;  %v5608_v8 = vpop.xlane.xlu1 %5607  ;;  %v4754_v53 = vsel %vm966_vm12, %v16287_v31, -inf  ;;  %v6087_v30 = vpack.c.bf16 %v5959_v14, %v5959_v14 }
 0x796   :  { %11651 = vrcp.f32 %v5608_v8  ;;  %v6223_v63 = vunpack.c.l.b16 %v6031_v61 }
 0x797   :  { %11653 = vpow2.f32 %v5297_v57 }
 0x798   :  { %11655 = vpow2.f32 %v5295_v54  ;;  %5640 = vadd.xlane.f32.xlu2 %v5639_v19  ;;  %4755 = vmax.xlane.f32.xlu0 %v4754_v53  ;;  %v5185_v19 = vmul.f32 1.442695, %v5021_v32  ;;  %v20149_v53 = vld [vmem:[#allocation76_spill] sm:$0xff]  ;;  %v16315_v9 = vpop.f32.mrf.mxu3 }
 0x799   :  { %20151 = vst [vmem:[#allocation83_spill] sm:$0xff] %v16315_v9 }
 0x79a   :  { %v11648_v1 = vpop.eup %11647  ;;  %4752 = vmax.xlane.f32.xlu1 %v4751_v48  ;;  %v16327_v61 = vpop.f32.mrf.mxu2 }
 0x79b   :  { %v16305_v57 = vpop.eup %11649  ;;  %v5904_v11 = vmul.f32 %v11648_v1, %v15928_v41  ;;  %v16308_v54 = vpop.xlane.xlu2 %4887 }
 0x79c   :  { %20147 = vst [vmem:[#allocation66_spill] sm:$0xff] %v16305_v57  ;;  %v11652_v8 = vpop.eup %11651  ;;  %v5446_v3 = vpop.xlane.xlu0 %5445  ;;  %v5474_v41 = vsel %vm966_vm12, %v16305_v57, 0.0 }
 0x79d   :  { %v16310_v35 = vpop.eup %11653  ;;  %v6032_v51 = vpack.c.bf16 %v5904_v11, %v5904_v11  ;;  %v5960_v29 = vmul.f32 %v11652_v8, %v20149_v53  ;;  %11657 = vrcp.f32 %v5446_v3  ;;  %v5443_v31 = vpop.xlane.xlu1 %5442 }
 0x79e   :  { %20148 = vst [vmem:[#allocation42_spill] sm:$0xff] %v16310_v35  ;;  %v16313_v48 = vpop.eup %11655  ;;  %11659 = vrcp.f32 %v5443_v31  ;;  %v5645_v14 = vsel %vm966_vm12, %v16310_v35, 0.0  ;;  %v16321_v1 = vpop.f32.mrf.mxu1  ;;  %v6664_v31 = vunpack.c.l.b16 %v6087_v30 }
 0x79f   :  { %20150 = vst [vmem:[#allocation56_spill] sm:$0xff] %v16313_v48  ;;  %11661 = vpow2.f32 %v5187_v50  ;;  %v6088_v5 = vpack.c.bf16 %v5960_v29, %v5960_v29  ;;  %v6224_v32 = vunpack.c.l.b16 %v6032_v51  ;;  %v5642_v11 = vsel %vm966_vm12, %v16313_v48, 0.0  ;;  %v16325_v53 = vpop.f32.mrf.mxu0 }
 0x7a0   :  { %11663 = vpow2.f32 %v5185_v19  ;;  %5475 = vadd.xlane.f32.xlu2 %v5474_v41  ;;  %5646 = vadd.xlane.f32.xlu0 %v5645_v14  ;;  %20152 = vst [vmem:[#allocation82_spill] sm:$0xff] %v16325_v53 }
 0x7a1   :  { %v6276_v8 = vpack.c.b16 %v6224_v32, %v6223_v63  ;;  %v6665_v3 = vunpack.c.l.b16 %v6088_v5  ;;  %v20154_v63 = vld [vmem:[#allocation39_spill] sm:$0xff]  ;;  %11665 = vrcp.f32 %v16285_v27 }
 0x7a2   :  { %5643 = vadd.xlane.f32.xlu1 %v5642_v11  ;;  %v5078_v30 = vsub.f32 %v20154_v63, %v16244_v24  ;;  %v4922_v24 = vsel %vm966_vm12, %v16300_v46, -inf }
 0x7a3   :  { %v11658_v29 = vpop.eup %11657  ;;  %10795 = vmatmul.msk.bf16.gmra.mxu3 %vm966_vm12, %v6276_v8  ;;  %v16330_v50 = vpop.xlane.xlu2 %4722  ;;  %v6721_v19 = vpack.c.b16 %v6665_v3, %v6664_v31  ;;  %v7037_v31 = vmul.f32 %v16112_v17, %v20141_v52  ;;  %v20156_v3 = vld [vmem:[#allocation73_spill] sm:$0xff] }
 0x7a4   :  { %v11660_v51 = vpop.eup %11659  ;;  %v16332_v41 = vpop.xlane.xlu0 %4893  ;;  %v5906_v53 = vmul.f32 %v11658_v29, %v20156_v3  ;;  %v5299_v63 = vmul.f32 1.442695, %v5078_v30  ;;  %v20158_v29 = vld [vmem:[#allocation14_spill] sm:$0xff] }
 0x7a5   :  { %v16334_v14 = vpop.eup %11661  ;;  %v5905_v5 = vmul.f32 %v11660_v51, %v15969_v33  ;;  %10823 = vmatmul.msk.bf16.gmra.mxu0 %vm966_vm12, %v6721_v19  ;;  %v16340_v32 = vpop.xlane.xlu1 %4890  ;;  %v20157_v33 = vld [vmem:[#allocation45_spill] sm:$0xff] }
 0x7a6   :  { %20153 = vst [vmem:[#allocation69_spill] sm:$0xff] %v16334_v14  ;;  %v16342_v11 = vpop.eup %11663  ;;  %v6451_v8 = vpop.f32.mrf.mxu3  ;;  %v5079_v19 = vsub.f32 %v20157_v33, %v16239_v7  ;;  %v5480_v51 = vsel %vm966_vm12, %v16334_v14, 0.0  ;;  %v20160_v7 = vld [vmem:[#allocation63_spill] sm:$0xff] }
 0x7a7   :  { %20155 = vst [vmem:[#allocation68_spill] sm:$0xff] %v16342_v11  ;;  %v7053_v9 = vmul.f32 %v6451_v8, %v20142_v26  ;;  %v6033_v27 = vpack.c.bf16 %v5905_v5, %v5905_v5  ;;  %v5477_v17 = vsel %vm966_vm12, %v16342_v11, 0.0  ;;  %v5024_v8 = vsub.f32 %v20158_v29, %v16259_v49  ;;  %v16361_v3 = vpop.f32.mrf.mxu0  ;;  %v16363_v48 = vpop.f32.mrf.mxu1 }
 0x7a8   :  { %4923 = vmax.xlane.f32.xlu2 %v4922_v24  ;;  %5481 = vadd.xlane.f32.xlu0 %v5480_v51  ;;  %20159 = vst [vmem:[#allocation71_spill] sm:$0xff] %v16363_v48  ;;  %v5023_v33 = vsub.f32 %v20160_v7, %v16266_v16  ;;  %v6034_v24 = vpack.c.bf16 %v5906_v53, %v5906_v53  ;;  %v11666_v5 = vpop.eup %11665  ;;  %v16371_v11 = vpop.f32.mrf.mxu2  ;;  %v20163_v53 = vld [vmem:[#allocation17_spill] sm:$0xff] }
 0x7a9   :  { %v16355_v35 = vadd.f32 %v7053_v9, %v7037_v31  ;;  %v5301_v9 = vmul.f32 1.442695, %v5079_v19  ;;  %v20161_v31 = vld [vmem:[#allocation24_spill] sm:$0xff]  ;;  %v5191_v29 = vmul.f32 1.442695, %v5024_v8  ;;  %v5961_v7 = vmul.f32 %v11666_v5, %v20163_v53 }
 0x7aa   :  { %5478 = vadd.xlane.f32.xlu1 %v5477_v17  ;;  %v5080_v51 = vsub.f32 %v20161_v31, %v16308_v54  ;;  %v6225_v17 = vunpack.c.l.b16 %v6033_v27  ;;  %v5189_v16 = vmul.f32 1.442695, %v5023_v33  ;;  %v4757_v19 = vsel %vm966_vm12, %v16321_v1, -inf }
 0x7ab   :  { %v5614_v30 = vpop.xlane.xlu2 %5613  ;;  %v6226_v57 = vunpack.c.l.b16 %v6034_v24  ;;  %v6089_v5 = vpack.c.bf16 %v5961_v7, %v5961_v7 }
 0x7ac   :  { %11667 = vrcp.f32 %v5614_v30  ;;  %v16369_v14 = vpop.xlane.xlu0 %4728  ;;  %v5303_v54 = vmul.f32 1.442695, %v5080_v51  ;;  %v4928_v30 = vsel %vm966_vm12, %v16371_v11, -inf }
 0x7ad   :  { %11669 = vpow2.f32 %v5299_v63  ;;  %v16373_v49 = vpop.xlane.xlu1 %4725  ;;  %v4760_v63 = vsel %vm966_vm12, %v16363_v48, -inf  ;;  %v6277_v27 = vpack.c.b16 %v6226_v57, %v6225_v17  ;;  %v5081_v57 = vsub.f32 %v15938_v34, %v16340_v32 }
 0x7ae   :  { %v16375_v46 = vpop.f32.mrf.mxu3  ;;  %11671 = vpow2.f32 %v5301_v9 }
 0x7af   :  { %20162 = vst [vmem:[#allocation70_spill] sm:$0xff] %v16375_v46  ;;  %11673 = vpow2.f32 %v5191_v29  ;;  %v16388_v31 = vpop.f32.mrf.mxu0  ;;  %v16390_v53 = vpop.f32.mrf.mxu1 }
 0x7b0   :  { %4758 = vmax.xlane.f32.xlu2 %v4757_v19  ;;  %4929 = vmax.xlane.f32.xlu0 %v4928_v30  ;;  %11675 = vpow2.f32 %v5189_v16  ;;  %20164 = vst [vmem:[#allocation80_spill] sm:$0xff] %v16388_v31  ;;  %v20169_v31 = vld [vmem:[#allocation88_spill] sm:$0xff] }
 0x7b1   :  { %11677 = vpow2.f32 %v5303_v54  ;;  %v5025_v54 = vsub.f32 %v15944_v55, %v16330_v50 }
 0x7b2   :  { %v11668_v8 = vpop.eup %11667  ;;  %4761 = vmax.xlane.f32.xlu1 %v4760_v63  ;;  %v6666_v63 = vunpack.c.l.b16 %v6089_v5 }
 0x7b3   :  { %v16384_v33 = vpop.eup %11669  ;;  %v5962_v24 = vmul.f32 %v11668_v8, %v16002_v25  ;;  %10796 = vmatmul.msk.bf16.gmra.mxu3 %vm966_vm12, %v6277_v27  ;;  %v5449_v9 = vpop.xlane.xlu2 %5448  ;;  %v7039_v25 = vmul.f32 %v16172_v40, %v20141_v52  ;;  %v4763_v27 = vsel %vm966_vm12, %v16390_v53, -inf  ;;  %v5305_v8 = vmul.f32 1.442695, %v5081_v57 }
 0x7b4   :  { %v5620_v51 = vpop.xlane.xlu0 %5619  ;;  %v16394_v19 = vpop.eup %11671  ;;  %v5648_v7 = vsel %vm966_vm12, %v16384_v33, 0.0 }
 0x7b5   :  { %v6090_v17 = vpack.c.bf16 %v5962_v24, %v5962_v24  ;;  %11679 = vrcp.f32 %v5620_v51  ;;  %v5617_v29 = vpop.xlane.xlu1 %5616  ;;  %20165 = vst [vmem:[#allocation79_spill] sm:$0xff] %v16394_v19  ;;  %v16403_v32 = vpop.eup %11673  ;;  %v5651_v55 = vsel %vm966_vm12, %v16394_v19, 0.0 }
 0x7b6   :  { %11681 = vrcp.f32 %v5617_v29  ;;  %v6456_v16 = vpop.f32.mrf.mxu3  ;;  %20166 = vst [vmem:[#allocation81_spill] sm:$0xff] %v16403_v32  ;;  %v16407_v40 = vpop.eup %11675 }
 0x7b7   :  { %v7055_v30 = vmul.f32 %v6456_v16, %v20142_v26  ;;  %v6667_v34 = vunpack.c.l.b16 %v6090_v17  ;;  %11683 = vrcp.f32 %v5449_v9  ;;  %v16413_v51 = vpop.eup %11677  ;;  %v5193_v17 = vmul.f32 1.442695, %v5025_v54  ;;  %v20168_v54 = vld [vmem:[#allocation13_spill] sm:$0xff] }
 0x7b8   :  { %5649 = vadd.xlane.f32.xlu2 %v5648_v7  ;;  %4764 = vmax.xlane.f32.xlu0 %v4763_v27  ;;  %v16416_v16 = vpop.f32.mrf.mxu0  ;;  %11685 = vpow2.f32 %v5305_v8  ;;  %v5654_v8 = vsel %vm966_vm12, %v16413_v51, 0.0 }
 0x7b9   :  { %v16409_v24 = vadd.f32 %v7055_v30, %v7039_v25  ;;  %v6722_v50 = vpack.c.b16 %v6667_v34, %v6666_v63  ;;  %v5026_v63 = vsub.f32 %v15983_v44, %v16373_v49  ;;  %v20167_v34 = vld [vmem:[#allocation50_spill] sm:$0xff]  ;;  %v5486_v44 = vsel %vm966_vm12, %v16403_v32, 0.0 }
 0x7ba   :  { %5652 = vadd.xlane.f32.xlu1 %v5651_v55 }
 0x7bb   :  { %v11680_v5 = vpop.eup %11679  ;;  %10824 = vmatmul.msk.bf16.gmra.mxu0 %vm966_vm12, %v6722_v50  ;;  %v4897_v9 = vpop.xlane.xlu2 %4896  ;;  %v5483_v50 = vsel %vm966_vm12, %v16407_v40, 0.0  ;;  %v5195_v49 = vmul.f32 1.442695, %v5026_v63 }
 0x7bc   :  { %v11682_v29 = vpop.eup %11681  ;;  %v5455_v7 = vpop.xlane.xlu0 %5454  ;;  %v5964_v27 = vmul.f32 %v11680_v5, %v20167_v34  ;;  %v5083_v55 = vsub.f32 %v20168_v54, %v4897_v9 }
 0x7bd   :  { %v5963_v57 = vmul.f32 %v11682_v29, %v16020_v20  ;;  %v5452_v25 = vpop.xlane.xlu1 %5451  ;;  %v11684_v30 = vpop.eup %11683 }
 0x7be   :  { %11687 = vrcp.f32 %v5452_v25  ;;  %v5907_v20 = vmul.f32 %v11684_v30, %v20169_v31  ;;  %v6092_v5 = vpack.c.bf16 %v5964_v27, %v5964_v27  ;;  %v5309_v9 = vmul.f32 1.442695, %v5083_v55  ;;  %v16432_v54 = vpop.f32.mrf.mxu2  ;;  %v16446_v32 = vpop.f32.mrf.mxu3 }
 0x7bf   :  { %11689 = vpow2.f32 %v5193_v17  ;;  %v6091_v29 = vpack.c.bf16 %v5963_v57, %v5963_v57  ;;  %v16430_v17 = vpop.eup %11685  ;;  %20172 = vst [vmem:[#allocation48_spill] sm:$0xff] %v16446_v32 }
 0x7c0   :  { %5484 = vadd.xlane.f32.xlu2 %v5483_v50  ;;  %5655 = vadd.xlane.f32.xlu0 %v5654_v8  ;;  %v20170_v50 = vld [vmem:[#allocation59_spill] sm:$0xff]  ;;  %v6035_v57 = vpack.c.bf16 %v5907_v20, %v5907_v20  ;;  %11691 = vpow2.f32 %v5195_v49  ;;  %v5657_v27 = vsel %vm966_vm12, %v16430_v17, 0.0  ;;  %v16450_v20 = vpop.f32.mrf.mxu1 }
 0x7c1   :  { %v5082_v46 = vsub.f32 %v20170_v50, %v16332_v41  ;;  %v6668_v8 = vunpack.c.l.b16 %v6091_v29  ;;  %11693 = vpow2.f32 %v5309_v9  ;;  %v6669_v41 = vunpack.c.l.b16 %v6092_v5 }
 0x7c2   :  { %5487 = vadd.xlane.f32.xlu1 %v5486_v44  ;;  %v16441_v44 = vpop.f32.mrf.mxu0  ;;  %v4925_v29 = vsel %vm966_vm12, %v16327_v61, -inf  ;;  %v4766_v32 = vsel %vm966_vm12, %v16450_v20, -inf }
 0x7c3   :  { %v4732_v25 = vpop.xlane.xlu2 %4731  ;;  %20171 = vst [vmem:[#allocation77_spill] sm:$0xff] %v16441_v44  ;;  %v5307_v50 = vmul.f32 1.442695, %v5082_v46  ;;  %v6723_v49 = vpack.c.b16 %v6669_v41, %v6668_v8 }
 0x7c4   :  { %v11688_v34 = vpop.eup %11687  ;;  %v16436_v19 = vpop.xlane.xlu0 %4902  ;;  %v5028_v48 = vsub.f32 %v16039_v12, %v4732_v25 }
 0x7c5   :  { %v16438_v31 = vpop.eup %11689  ;;  %v5908_v30 = vmul.f32 %v11688_v34, %v16059_v38  ;;  %v4900_v63 = vpop.xlane.xlu1 %4899  ;;  %v6227_v34 = vunpack.c.l.b16 %v6035_v57  ;;  %11695 = vpow2.f32 %v5307_v50  ;;  %v20175_v57 = vld [vmem:[#allocation89_spill] sm:$0xff] }
 0x7c6   :  { %v5489_v38 = vsel %vm966_vm12, %v16438_v31, 0.0  ;;  %v16455_v5 = vpop.eup %11691  ;;  %v16464_v8 = vpop.f32.mrf.mxu2  ;;  %11697 = vrcp.f32 %v5455_v7 }
 0x7c7   :  { %v6036_v55 = vpack.c.bf16 %v5908_v30, %v5908_v30  ;;  %v5199_v30 = vmul.f32 1.442695, %v5028_v48  ;;  %20174 = vst [vmem:[#allocation85_spill] sm:$0xff] %v16464_v8  ;;  %v5492_v48 = vsel %vm966_vm12, %v16455_v5, 0.0 }
 0x7c8   :  { %5658 = vadd.xlane.f32.xlu2 %v5657_v27  ;;  %5490 = vadd.xlane.f32.xlu0 %v5489_v38  ;;  %v16459_v27 = vpop.eup %11693 }
 0x7c9   :  { %v6228_v9 = vunpack.c.l.b16 %v6036_v55  ;;  %20173 = vst [vmem:[#allocation84_spill] sm:$0xff] %v16459_v27  ;;  %11699 = vpow2.f32 %v5199_v30  ;;  %v5027_v55 = vsub.f32 %v20175_v57, %v16369_v14  ;;  %v5663_v50 = vsel %vm966_vm12, %v16459_v27, 0.0  ;;  %v16481_v14 = vpop.f32.mrf.mxu1 }
 0x7ca   :  { %4926 = vmax.xlane.f32.xlu1 %v4925_v29  ;;  %v16470_v41 = vpop.f32.mrf.mxu0  ;;  %v5084_v57 = vsub.f32 %v16029_v62, %v4900_v63 }
 0x7cb   :  { %10825 = vmatmul.msk.bf16.gmra.mxu0 %vm966_vm12, %v6723_v49  ;;  %v5623_v12 = vpop.xlane.xlu2 %5622  ;;  %v6278_v46 = vpack.c.b16 %v6228_v9, %v6227_v34  ;;  %v7041_v49 = vmul.f32 %v16221_v37, %v20141_v52  ;;  %v4934_v34 = vsel %vm966_vm12, %v16464_v8, -inf  ;;  %v16479_v9 = vpop.eup %11695 }
 0x7cc   :  { %v16457_v25 = vpop.xlane.xlu0 %4737  ;;  %11701 = vrcp.f32 %v5623_v12 }
 0x7cd   :  { %10797 = vmatmul.msk.bf16.gmra.mxu3 %vm966_vm12, %v6278_v46  ;;  %v16462_v38 = vpop.xlane.xlu1 %4734  ;;  %v11698_v46 = vpop.eup %11697 }
 0x7d0   :  { %v6461_v29 = vpop.f32.mrf.mxu3  ;;  %5493 = vadd.xlane.f32.xlu2 %v5492_v48  ;;  %5664 = vadd.xlane.f32.xlu0 %v5663_v50  ;;  %v5197_v48 = vmul.f32 1.442695, %v5027_v55  ;;  %v5311_v55 = vmul.f32 1.442695, %v5084_v57 }
 0x7d1   :  { %v7057_v7 = vmul.f32 %v6461_v29, %v20142_v26  ;;  %v16488_v29 = vpop.eup %11699  ;;  %v16503_v57 = vpop.f32.mrf.mxu1 }
 0x7d2   :  { %4935 = vmax.xlane.f32.xlu1 %v4934_v34  ;;  %20176 = vst [vmem:[#allocation99_spill] sm:$0xff] %v16488_v29  ;;  %v11702_v44 = vpop.eup %11701  ;;  %v5909_v34 = vmul.f32 %v11698_v46, %v16054_v21  ;;  %v5498_v62 = vsel %vm966_vm12, %v16488_v29, 0.0  ;;  %v16500_v21 = vpop.f32.mrf.mxu0 }
 0x7d3   :  { %v16483_v30 = vadd.f32 %v7057_v7, %v7041_v49  ;;  %v5458_v12 = vpop.xlane.xlu2 %5457  ;;  %v5085_v49 = vsub.f32 %v16061_v22, %v16436_v19  ;;  %v5965_v63 = vmul.f32 %v11702_v44, %v16095_v0  ;;  %v5660_v7 = vsel %vm966_vm12, %v16479_v9, 0.0  ;;  %20177 = vst [vmem:[#allocation98_spill] sm:$0xff] %v16500_v21  ;;  %v20178_v44 = vld [vmem:[#allocation12_spill] sm:$0xff] }
 0x7d4   :  { %11703 = vrcp.f32 %v5458_v12  ;;  %v16486_v37 = vpop.xlane.xlu0 %5628  ;;  %v6037_v46 = vpack.c.bf16 %v5909_v34, %v5909_v34 }
 0x7d5   :  { %v5626_v50 = vpop.xlane.xlu1 %5625  ;;  %v5313_v19 = vmul.f32 1.442695, %v5085_v49  ;;  %v6093_v27 = vpack.c.bf16 %v5965_v63, %v5965_v63 }
 0x7d6   :  { %11705 = vrcp.f32 %v5626_v50  ;;  %v6229_v63 = vunpack.c.l.b16 %v6037_v46 }
 0x7d7   :  { %11707 = vpow2.f32 %v5197_v48 }
 0x7d8   :  { %4767 = vmax.xlane.f32.xlu2 %v4766_v32  ;;  %5499 = vadd.xlane.f32.xlu0 %v5498_v62  ;;  %11709 = vpow2.f32 %v5311_v55  ;;  %v16510_v21 = vpop.f32.mrf.mxu3 }
 0x7d9   :  { %20180 = vst [vmem:[#allocation47_spill] sm:$0xff] %v16510_v21 }
 0x7da   :  { %v11704_v12 = vpop.eup %11703  ;;  %5661 = vadd.xlane.f32.xlu1 %v5660_v7  ;;  %v20179_v7 = vld [vmem:[#allocation53_spill] sm:$0xff] }
 0x7db   :  { %v5910_v48 = vmul.f32 %v11704_v12, %v16121_v10  ;;  %v4906_v50 = vpop.xlane.xlu2 %4905  ;;  %v5029_v34 = vsub.f32 %v20179_v7, %v16462_v38  ;;  %v4931_v10 = vsel %vm966_vm12, %v16432_v54, -inf }
 0x7dc   :  { %v11706_v22 = vpop.eup %11705  ;;  %v5464_v32 = vpop.xlane.xlu0 %5463  ;;  %v5086_v55 = vsub.f32 %v16087_v4, %v4906_v50 }
 0x7dd   :  { %v6038_v0 = vpack.c.bf16 %v5910_v48, %v5910_v48  ;;  %v5966_v62 = vmul.f32 %v11706_v22, %v20178_v44  ;;  %11711 = vrcp.f32 %v5464_v32  ;;  %v5461_v29 = vpop.xlane.xlu1 %5460  ;;  %v16506_v8 = vpop.eup %11707  ;;  %v20181_v48 = vld [vmem:[#allocation64_spill] sm:$0xff]  ;;  %v4772_v32 = vsel %vm966_vm12, %v16503_v57, -inf }
 0x7de   :  { %11713 = vrcp.f32 %v5461_v29  ;;  %v5030_v22 = vsub.f32 %v20181_v48, %v16457_v25  ;;  %v5495_v38 = vsel %vm966_vm12, %v16506_v8, 0.0  ;;  %v6670_v44 = vunpack.c.l.b16 %v6093_v27 }
 0x7df   :  { %v6094_v49 = vpack.c.bf16 %v5966_v62, %v5966_v62  ;;  %v6230_v12 = vunpack.c.l.b16 %v6038_v0  ;;  %11715 = vpow2.f32 %v5313_v19  ;;  %v16521_v62 = vpop.eup %11709  ;;  %v5201_v4 = vmul.f32 1.442695, %v5029_v34 }
 0x7e0   :  { %4932 = vmax.xlane.f32.xlu2 %v4931_v10  ;;  %4773 = vmax.xlane.f32.xlu0 %v4772_v32  ;;  %v7043_v25 = vmul.f32 %v16296_v28, %v20141_v52  ;;  %v5315_v19 = vmul.f32 1.442695, %v5086_v55  ;;  %11717 = vrcp.f32 %v16486_v37 }
 0x7e1   :  { %v6279_v29 = vpack.c.b16 %v6230_v12, %v6229_v63  ;;  %v6671_v7 = vunpack.c.l.b16 %v6094_v49  ;;  %v5203_v63 = vmul.f32 1.442695, %v5030_v22  ;;  %v16529_v49 = vpop.f32.mrf.mxu2  ;;  %11719 = vpow2.f32 %v5201_v4 }
 0x7e2   :  { %v6895_v46 = vpop.f32.mrf.mxu0  ;;  %5496 = vadd.xlane.f32.xlu1 %v5495_v38  ;;  %v5666_v22 = vsel %vm966_vm12, %v16521_v62, 0.0  ;;  %11721 = vpow2.f32 %v5315_v19 }
 0x7e3   :  { %v11712_v50 = vpop.eup %11711  ;;  %v7059_v0 = vmul.f32 %v6895_v46, %v20142_v26  ;;  %10798 = vmatmul.msk.bf16.gmra.mxu3 %vm966_vm12, %v6279_v29  ;;  %v4741_v10 = vpop.xlane.xlu2 %4740  ;;  %v6724_v48 = vpack.c.b16 %v6671_v7, %v6670_v44  ;;  %11723 = vpow2.f32 %v5203_v63  ;;  %v4937_v46 = vsel %vm966_vm12, %v16529_v49, -inf }
 0x7e4   :  { %v11714_v32 = vpop.eup %11713  ;;  %v16527_v27 = vpop.xlane.xlu0 %4911  ;;  %v5912_v44 = vmul.f32 %v11712_v50, %v16152_v13  ;;  %v5031_v37 = vsub.f32 %v16135_v2, %v4741_v10 }
 0x7e5   :  { %v5911_v34 = vmul.f32 %v11714_v32, %v16160_v36  ;;  %v16533_v12 = vadd.f32 %v7059_v0, %v7043_v25  ;;  %10826 = vmatmul.msk.bf16.gmra.mxu0 %vm966_vm12, %v6724_v48  ;;  %v4909_v28 = vpop.xlane.xlu1 %4908  ;;  %v16536_v55 = vpop.eup %11715  ;;  %v20182_v36 = vld [vmem:[#allocation54_spill] sm:$0xff] }
 0x7e6   :  { %v5087_v38 = vsub.f32 %v16119_v15, %v4909_v28  ;;  %v6466_v29 = vpop.f32.mrf.mxu3  ;;  %v5669_v15 = vsel %vm966_vm12, %v16536_v55, 0.0  ;;  %v11718_v13 = vpop.eup %11717  ;;  %v6040_v50 = vpack.c.bf16 %v5912_v44, %v5912_v44  ;;  %v5205_v2 = vmul.f32 1.442695, %v5031_v37  ;;  %v20183_v28 = vld [vmem:[#allocation57_spill] sm:$0xff] }
 0x7e7   :  { %v7083_v7 = vmul.f32 %v6466_v29, %v20182_v36  ;;  %v6039_v25 = vpack.c.bf16 %v5911_v34, %v5911_v34  ;;  %v16551_v10 = vpop.eup %11719  ;;  %v5967_v29 = vmul.f32 %v11718_v13, %v20183_v28 }
 0x7e8   :  { %5667 = vadd.xlane.f32.xlu2 %v5666_v22  ;;  %4938 = vmax.xlane.f32.xlu0 %v4937_v46  ;;  %v5317_v0 = vmul.f32 1.442695, %v5087_v38  ;;  %v16555_v32 = vpop.eup %11721  ;;  %v5501_v44 = vsel %vm966_vm12, %v16551_v10, 0.0  ;;  %v6232_v37 = vunpack.c.l.b16 %v6040_v50 }
 0x7e9   :  { %v16547_v4 = vadd.f32 %v7083_v7, %v16283_v58  ;;  %v6231_v58 = vunpack.c.l.b16 %v6039_v25  ;;  %v16557_v34 = vpop.eup %11723  ;;  %v5672_v25 = vsel %vm966_vm12, %v16555_v32, 0.0  ;;  %v6095_v13 = vpack.c.bf16 %v5967_v29, %v5967_v29 }
 0x7ea   :  { %5670 = vadd.xlane.f32.xlu1 %v5669_v15  ;;  %v16565_v7 = vpop.f32.mrf.mxu0  ;;  %v5504_v15 = vsel %vm966_vm12, %v16557_v34, 0.0 }
 0x7eb   :  { %v5632_v19 = vpop.xlane.xlu2 %5631  ;;  %20185 = vst [vmem:[#allocation93_spill] sm:$0xff] %v16565_v7  ;;  %v6672_v29 = vunpack.c.l.b16 %v6095_v13 }
 0x7ec   :  { %11725 = vrcp.f32 %v5632_v19  ;;  %v16553_v48 = vpop.xlane.xlu0 %4746 }
 0x7ed   :  { %v4744_v63 = vpop.xlane.xlu1 %4743  ;;  %11727 = vpow2.f32 %v5317_v0  ;;  %v6280_v0 = vpack.c.b16 %v6232_v37, %v6231_v58 }
 0x7ee   :  { %v5032_v38 = vsub.f32 %v16174_v6, %v4744_v63  ;;  %v16561_v22 = vpop.f32.mrf.mxu3  ;;  %11729 = vpow2.f32 %v5205_v2  ;;  %v16575_v63 = vpop.f32.mrf.mxu1 }
 0x7ef   :  { %20184 = vst [vmem:[#allocation55_spill] sm:$0xff] %v16561_v22 }
 0x7f0   :  { %v5207_v46 = vmul.f32 1.442695, %v5032_v38  ;;  %5502 = vadd.xlane.f32.xlu2 %v5501_v44  ;;  %5673 = vadd.xlane.f32.xlu0 %v5672_v25 }
 0x7f2   :  { %v11726_v6 = vpop.eup %11725  ;;  %5505 = vadd.xlane.f32.xlu1 %v5504_v15  ;;  %11731 = vpow2.f32 %v5207_v46  ;;  %v7045_v46 = vmul.f32 %v16361_v3, %v20141_v52 }
 0x7f3   :  { %v5968_v2 = vmul.f32 %v11726_v6, %v16191_v23  ;;  %10799 = vmatmul.msk.bf16.gmra.mxu3 %vm966_vm12, %v6280_v0  ;;  %v5467_v50 = vpop.xlane.xlu2 %5466  ;;  %v16573_v19 = vpop.eup %11727  ;;  %v5088_v23 = vsub.f32 %v16144_v45, %v16527_v27  ;;  %v4769_v27 = vsel %vm966_vm12, %v16481_v14, -inf }
 0x7f4   :  { %v5638_v28 = vpop.xlane.xlu0 %5637  ;;  %v16577_v38 = vpop.eup %11729  ;;  %v5675_v15 = vsel %vm966_vm12, %v16573_v19, 0.0 }
 0x7f5   :  { %v6096_v44 = vpack.c.bf16 %v5968_v2, %v5968_v2  ;;  %11733 = vrcp.f32 %v5638_v28  ;;  %v5635_v25 = vpop.xlane.xlu1 %5634  ;;  %v5507_v2 = vsel %vm966_vm12, %v16577_v38, 0.0 }
 0x7f6   :  { %11735 = vrcp.f32 %v5635_v25  ;;  %v6471_v58 = vpop.f32.mrf.mxu3  ;;  %v16601_v21 = vpop.f32.mrf.mxu1 }
 0x7f7   :  { %v7085_v37 = vmul.f32 %v6471_v58, %v20182_v36  ;;  %v6673_v0 = vunpack.c.l.b16 %v6096_v44  ;;  %11737 = vrcp.f32 %v5467_v50  ;;  %v5319_v50 = vmul.f32 1.442695, %v5088_v23 }
 0x7f8   :  { %v6900_v6 = vpop.f32.mrf.mxu0  ;;  %5676 = vadd.xlane.f32.xlu2 %v5675_v15  ;;  %5508 = vadd.xlane.f32.xlu0 %v5507_v2  ;;  %v16594_v44 = vpop.eup %11731 }
 0x7f9   :  { %v16589_v13 = vadd.f32 %v7085_v37, %v16355_v35  ;;  %v7061_v45 = vmul.f32 %v6900_v6, %v20142_v26  ;;  %v6725_v28 = vpack.c.b16 %v6673_v0, %v6672_v29  ;;  %v5033_v29 = vsub.f32 %v16197_v59, %v16553_v48 }
 0x7fa   :  { %4770 = vmax.xlane.f32.xlu1 %v4769_v27  ;;  %v4778_v59 = vsel %vm966_vm12, %v16601_v21, -inf }
 0x7fb   :  { %v11734_v3 = vpop.eup %11733  ;;  %v16596_v25 = vadd.f32 %v7061_v45, %v7045_v46  ;;  %10827 = vmatmul.msk.bf16.gmra.mxu0 %vm966_vm12, %v6725_v28  ;;  %v4915_v58 = vpop.xlane.xlu2 %4914  ;;  %v5510_v46 = vsel %vm966_vm12, %v16594_v44, 0.0  ;;  %v5209_v48 = vmul.f32 1.442695, %v5033_v29 }
 0x7fc   :  { %v11736_v15 = vpop.eup %11735  ;;  %v5473_v35 = vpop.xlane.xlu0 %5472  ;;  %v5089_v37 = vsub.f32 %v16209_v60, %v4915_v58  ;;  %v5970_v23 = vmul.f32 %v11734_v3, %v16218_v42 }
 0x7fd   :  { %v5969_v6 = vmul.f32 %v11736_v15, %v16207_v39  ;;  %v5470_v2 = vpop.xlane.xlu1 %5469  ;;  %v11738_v7 = vpop.eup %11737  ;;  %v20187_v39 = vld [vmem:[#allocation34_spill] sm:$0xff] }
 0x7fe   :  { %v5321_v0 = vmul.f32 1.442695, %v5089_v37  ;;  %11739 = vrcp.f32 %v5470_v2  ;;  %v16608_v45 = vpop.f32.mrf.mxu2  ;;  %v5913_v27 = vmul.f32 %v11738_v7, %v20187_v39 }
 0x7ff   :  { %11741 = vpow2.f32 %v5319_v50  ;;  %v6097_v28 = vpack.c.bf16 %v5969_v6, %v5969_v6  ;;  %v6098_v50 = vpack.c.bf16 %v5970_v23, %v5970_v23  ;;  %v4940_v23 = vsel %vm966_vm12, %v16608_v45, -inf }
 0x800   :  { %11743 = vpow2.f32 %v5321_v0  ;;  %v16610_v60 = vpop.f32.mrf.mxu0  ;;  %5511 = vadd.xlane.f32.xlu2 %v5510_v46  ;;  %v6041_v2 = vpack.c.bf16 %v5913_v27, %v5913_v27 }
 0x801   :  { %20186 = vst [vmem:[#allocation92_spill] sm:$0xff] %v16610_v60  ;;  %v6674_v60 = vunpack.c.l.b16 %v6097_v28  ;;  %11745 = vpow2.f32 %v5209_v48  ;;  %v6675_v27 = vunpack.c.l.b16 %v6098_v50  ;;  %v16629_v28 = vpop.f32.mrf.mxu3 }
 0x802   :  { %4779 = vmax.xlane.f32.xlu1 %v4778_v59  ;;  %20189 = vst [vmem:[#allocation102_spill] sm:$0xff] %v16629_v28 }
 0x803   :  { %v4750_v58 = vpop.xlane.xlu2 %4749 }
 0x804   :  { %v11740_v42 = vpop.eup %11739  ;;  %v5034_v3 = vsub.f32 %v16228_v43, %v4750_v58  ;;  %v4921_v15 = vpop.xlane.xlu0 %4920 }
 0x805   :  { %v16616_v37 = vpop.eup %11741  ;;  %v5914_v0 = vmul.f32 %v11740_v42, %v16246_v18  ;;  %v4918_v46 = vpop.xlane.xlu1 %4917  ;;  %v5091_v43 = vsub.f32 %v16261_v47, %v4921_v15  ;;  %v7047_v18 = vmul.f32 %v16416_v16, %v20141_v52  ;;  %v6726_v42 = vpack.c.b16 %v6675_v27, %v6674_v60 }
 0x806   :  { %v16619_v7 = vpop.eup %11743  ;;  %v5211_v6 = vmul.f32 1.442695, %v5034_v3  ;;  %v5090_v29 = vsub.f32 %v16233_v56, %v4918_v46  ;;  %v5678_v56 = vsel %vm966_vm12, %v16616_v37, 0.0  ;;  %v6233_v47 = vunpack.c.l.b16 %v6041_v2  ;;  %v16634_v15 = vpop.f32.mrf.mxu2 }
 0x807   :  { %20188 = vst [vmem:[#allocation103_spill] sm:$0xff] %v16619_v7  ;;  %v6042_v39 = vpack.c.bf16 %v5914_v0, %v5914_v0  ;;  %v5681_v59 = vsel %vm966_vm12, %v16619_v7, 0.0  ;;  %v5325_v0 = vmul.f32 1.442695, %v5091_v43  ;;  %v4775_v27 = vsel %vm966_vm12, %v16575_v63, -inf  ;;  %v20201_v7 = vld [vmem:[#allocation56_spill] sm:$0xff] }
 0x808   :  { %11747 = vpow2.f32 %v5211_v6  ;;  %v6905_v48 = vpop.f32.mrf.mxu0  ;;  %5682 = vadd.xlane.f32.xlu0 %v5681_v59  ;;  %4941 = vmax.xlane.f32.xlu2 %v4940_v23  ;;  %v5323_v50 = vmul.f32 1.442695, %v5090_v29  ;;  %v16639_v23 = vpop.eup %11745 }
 0x809   :  { %v7063_v58 = vmul.f32 %v6905_v48, %v20142_v26  ;;  %v6234_v3 = vunpack.c.l.b16 %v6042_v39  ;;  %20190 = vst [vmem:[#allocation8_spill] sm:$0xff] %v16639_v23  ;;  %11749 = vrcp.f32 %v5473_v35  ;;  %v20191_v39 = vld [vmem:[#allocation90_spill] sm:$0xff] }
 0x80a   :  { %5679 = vadd.xlane.f32.xlu1 %v5678_v56  ;;  %11751 = vpow2.f32 %v5323_v50 }
 0x80b   :  { %v16636_v16 = vadd.f32 %v7063_v58, %v7047_v18  ;;  %10828 = vmatmul.msk.bf16.gmra.mxu0 %vm966_vm12, %v6726_v42  ;;  %v5641_v46 = vpop.xlane.xlu2 %5640  ;;  %v6281_v6 = vpack.c.b16 %v6234_v3, %v6233_v47  ;;  %11753 = vpow2.f32 %v5325_v0  ;;  %v20192_v18 = vld [vmem:[#allocation41_spill] sm:$0xff]  ;;  %v5513_v42 = vsel %vm966_vm12, %v16639_v23, 0.0 }
 0x80c   :  { %v4756_v59 = vpop.xlane.xlu0 %4755  ;;  %11755 = vrcp.f32 %v5641_v46 }
 0x80d   :  { %10800 = vmatmul.msk.bf16.gmra.mxu3 %vm966_vm12, %v6281_v6  ;;  %v4753_v60 = vpop.xlane.xlu1 %4752  ;;  %v5036_v48 = vsub.f32 %v20192_v18, %v4756_v59 }
 0x80e   :  { %v16642_v2 = vpop.eup %11747  ;;  %v5035_v29 = vsub.f32 %v20191_v39, %v4753_v60  ;;  %v16658_v46 = vpop.f32.mrf.mxu2 }
 0x80f   :  { %v5516_v43 = vsel %vm966_vm12, %v16642_v2, 0.0  ;;  %v11750_v47 = vpop.eup %11749  ;;  %20194 = vst [vmem:[#allocation95_spill] sm:$0xff] %v16658_v46  ;;  %v5215_v6 = vmul.f32 1.442695, %v5036_v48  ;;  %v4946_v18 = vsel %vm966_vm12, %v16658_v46, -inf  ;;  %v20197_v48 = vld [vmem:[#allocation5_spill] sm:$0xff] }
 0x810   :  { %v6476_v56 = vpop.f32.mrf.mxu3  ;;  %5517 = vadd.xlane.f32.xlu0 %v5516_v43  ;;  %4776 = vmax.xlane.f32.xlu2 %v4775_v27  ;;  %v5213_v35 = vmul.f32 1.442695, %v5035_v29  ;;  %v16656_v0 = vpop.eup %11751  ;;  %v20196_v43 = vld [vmem:[#allocation61_spill] sm:$0xff] }
 0x811   :  { %v7087_v58 = vmul.f32 %v6476_v56, %v20182_v36  ;;  %20193 = vst [vmem:[#allocation19_spill] sm:$0xff] %v16656_v0  ;;  %v16660_v60 = vpop.eup %11753  ;;  %v5915_v27 = vmul.f32 %v11750_v47, %v20196_v43  ;;  %v16674_v47 = vpop.f32.mrf.mxu1  ;;  %v20199_v43 = vld [vmem:[#allocation66_spill] sm:$0xff] }
 0x812   :  { %5514 = vadd.xlane.f32.xlu1 %v5513_v42  ;;  %20195 = vst [vmem:[#allocation94_spill] sm:$0xff] %v16660_v60  ;;  %v11756_v29 = vpop.eup %11755  ;;  %v16670_v42 = vpop.f32.mrf.mxu0 }
 0x813   :  { %v16654_v3 = vadd.f32 %v7087_v58, %v16409_v24  ;;  %v5476_v50 = vpop.xlane.xlu2 %5475  ;;  %v5684_v24 = vsel %vm966_vm12, %v16656_v0, 0.0  ;;  %v5971_v56 = vmul.f32 %v11756_v29, %v20197_v48  ;;  %v5687_v58 = vsel %vm966_vm12, %v16660_v60, 0.0  ;;  %20198 = vst [vmem:[#allocation58_spill] sm:$0xff] %v16670_v42 }
 0x814   :  { %11757 = vrcp.f32 %v5476_v50  ;;  %v5647_v59 = vpop.xlane.xlu0 %5646 }
 0x815   :  { %11759 = vpow2.f32 %v5213_v35  ;;  %v5644_v39 = vpop.xlane.xlu1 %5643  ;;  %v6099_v29 = vpack.c.bf16 %v5971_v56, %v5971_v56 }
 0x816   :  { %11761 = vrcp.f32 %v5644_v39  ;;  %v6043_v39 = vpack.c.bf16 %v5915_v27, %v5915_v27  ;;  %v4781_v27 = vsel %vm966_vm12, %v16674_v47, -inf }
 0x817   :  { %11763 = vpow2.f32 %v5215_v6 }
 0x818   :  { %5685 = vadd.xlane.f32.xlu2 %v5684_v24  ;;  %4947 = vmax.xlane.f32.xlu0 %v4946_v18  ;;  %v20200_v18 = vld [vmem:[#allocation67_spill] sm:$0xff] }
 0x81a   :  { %v11758_v35 = vpop.eup %11757  ;;  %5688 = vadd.xlane.f32.xlu1 %v5687_v58  ;;  %v16681_v58 = vpop.f32.mrf.mxu3 }
 0x81b   :  { %v16672_v50 = vpop.eup %11759  ;;  %v5916_v28 = vmul.f32 %v11758_v35, %v20199_v43  ;;  %v4924_v22 = vpop.xlane.xlu2 %4923  ;;  %20202 = vst [vmem:[#allocation15_spill] sm:$0xff] %v16681_v58 }
 0x81c   :  { %v11762_v6 = vpop.eup %11761  ;;  %v5482_v24 = vpop.xlane.xlu0 %5481  ;;  %v5092_v0 = vsub.f32 %v20200_v18, %v4924_v22  ;;  %v5519_v43 = vsel %vm966_vm12, %v16672_v50, 0.0  ;;  %v6235_v22 = vunpack.c.l.b16 %v6043_v39 }
 0x81d   :  { %v6044_v48 = vpack.c.bf16 %v5916_v28, %v5916_v28  ;;  %v5972_v60 = vmul.f32 %v11762_v6, %v20201_v7  ;;  %11765 = vrcp.f32 %v5482_v24  ;;  %v5479_v23 = vpop.xlane.xlu1 %5478  ;;  %v16679_v42 = vpop.eup %11763  ;;  %v6676_v6 = vunpack.c.l.b16 %v6099_v29  ;;  %v20203_v29 = vld [vmem:[#allocation68_spill] sm:$0xff] }
 0x81e   :  { %v5327_v46 = vmul.f32 1.442695, %v5092_v0  ;;  %11767 = vrcp.f32 %v5479_v23  ;;  %v5522_v7 = vsel %vm966_vm12, %v16679_v42, 0.0 }
 0x81f   :  { %v6100_v35 = vpack.c.bf16 %v5972_v60, %v5972_v60  ;;  %v6236_v56 = vunpack.c.l.b16 %v6044_v48  ;;  %v7049_v60 = vmul.f32 %v16470_v41, %v20141_v52 }
 0x820   :  { %11769 = vpow2.f32 %v5327_v46  ;;  %5520 = vadd.xlane.f32.xlu2 %v5519_v43  ;;  %4782 = vmax.xlane.f32.xlu0 %v4781_v27  ;;  %v16693_v27 = vpop.f32.mrf.mxu2 }
 0x821   :  { %v6282_v28 = vpack.c.b16 %v6236_v56, %v6235_v22  ;;  %v6677_v24 = vunpack.c.l.b16 %v6100_v35  ;;  %11771 = vrcp.f32 %v5647_v59  ;;  %v4943_v59 = vsel %vm966_vm12, %v16634_v15, -inf }
 0x822   :  { %v6910_v0 = vpop.f32.mrf.mxu0  ;;  %5523 = vadd.xlane.f32.xlu1 %v5522_v7 }
 0x823   :  { %v11766_v23 = vpop.eup %11765  ;;  %v7065_v18 = vmul.f32 %v6910_v0, %v20142_v26  ;;  %10801 = vmatmul.msk.bf16.gmra.mxu3 %vm966_vm12, %v6282_v28  ;;  %v4759_v39 = vpop.xlane.xlu2 %4758  ;;  %v6727_v46 = vpack.c.b16 %v6677_v24, %v6676_v6  ;;  %v20204_v6 = vld [vmem:[#allocation69_spill] sm:$0xff] }
 0x824   :  { %v11768_v48 = vpop.eup %11767  ;;  %v5037_v43 = vsub.f32 %v16321_v1, %v4759_v39  ;;  %v4930_v22 = vpop.xlane.xlu0 %4929  ;;  %v5918_v24 = vmul.f32 %v11766_v23, %v20204_v6 }
 0x825   :  { %v5917_v35 = vmul.f32 %v11768_v48, %v20203_v29  ;;  %v16697_v56 = vadd.f32 %v7065_v18, %v7049_v60  ;;  %10829 = vmatmul.msk.bf16.gmra.mxu0 %vm966_vm12, %v6727_v46  ;;  %v16700_v7 = vpop.xlane.xlu1 %4761  ;;  %v5094_v60 = vsub.f32 %v16371_v11, %v4930_v22 }
 0x826   :  { %v16702_v41 = vpop.eup %11769  ;;  %v5217_v28 = vmul.f32 1.442695, %v5037_v43  ;;  %v6481_v0 = vpop.f32.mrf.mxu3  ;;  %v6046_v46 = vpack.c.bf16 %v5918_v24, %v5918_v24 }
 0x827   :  { %v7089_v58 = vmul.f32 %v6481_v0, %v20182_v36  ;;  %v5690_v1 = vsel %vm966_vm12, %v16702_v41, 0.0  ;;  %v6045_v18 = vpack.c.bf16 %v5917_v35, %v5917_v35  ;;  %v11772_v23 = vpop.eup %11771  ;;  %v5331_v43 = vmul.f32 1.442695, %v5094_v60 }
 0x828   :  { %11773 = vpow2.f32 %v5217_v28  ;;  %5691 = vadd.xlane.f32.xlu0 %v5690_v1  ;;  %v16716_v11 = vpop.f32.mrf.mxu2  ;;  %v6238_v35 = vunpack.c.l.b16 %v6046_v46 }
 0x829   :  { %v16710_v39 = vadd.f32 %v7089_v58, %v16483_v30  ;;  %v6237_v6 = vunpack.c.l.b16 %v6045_v18  ;;  %20206 = vst [vmem:[#allocation11_spill] sm:$0xff] %v16716_v11  ;;  %v20208_v30 = vld [vmem:[#allocation42_spill] sm:$0xff]  ;;  %v4952_v18 = vsel %vm966_vm12, %v16716_v11, -inf }
 0x82a   :  { %4944 = vmax.xlane.f32.xlu1 %v4943_v59  ;;  %v5973_v58 = vmul.f32 %v11772_v23, %v20208_v30  ;;  %v16723_v24 = vpop.f32.mrf.mxu0 }
 0x82b   :  { %v5650_v48 = vpop.xlane.xlu2 %5649  ;;  %20209 = vst [vmem:[#allocation9_spill] sm:$0xff] %v16723_v24  ;;  %v6283_v59 = vpack.c.b16 %v6238_v35, %v6237_v6  ;;  %v20212_v24 = vld [vmem:[#allocation81_spill] sm:$0xff] }
 0x82c   :  { %11775 = vrcp.f32 %v5650_v48  ;;  %v4765_v29 = vpop.xlane.xlu0 %4764  ;;  %v6101_v52 = vpack.c.bf16 %v5973_v58, %v5973_v58 }
 0x82d   :  { %v5653_v0 = vpop.xlane.xlu1 %5652  ;;  %11777 = vpow2.f32 %v5331_v43  ;;  %v5039_v60 = vsub.f32 %v16390_v53, %v4765_v29 }
 0x82e   :  { %v16714_v28 = vpop.eup %11773  ;;  %v16718_v22 = vpop.f32.mrf.mxu3  ;;  %11779 = vrcp.f32 %v5653_v0  ;;  %v6678_v6 = vunpack.c.l.b16 %v6101_v52 }
 0x82f   :  { %20205 = vst [vmem:[#allocation25_spill] sm:$0xff] %v16714_v28  ;;  %v5525_v1 = vsel %vm966_vm12, %v16714_v28, 0.0  ;;  %v5221_v23 = vmul.f32 1.442695, %v5039_v60 }
 0x830   :  { %20207 = vst [vmem:[#allocation75_spill] sm:$0xff] %v16718_v22  ;;  %5526 = vadd.xlane.f32.xlu0 %v5525_v1 }
 0x832   :  { %v11776_v48 = vpop.eup %11775  ;;  %4953 = vmax.xlane.f32.xlu1 %v4952_v18  ;;  %v20211_v18 = vld [vmem:[#allocation51_spill] sm:$0xff] }
 0x833   :  { %v5974_v22 = vmul.f32 %v11776_v48, %v16384_v33  ;;  %10802 = vmatmul.msk.bf16.gmra.mxu3 %vm966_vm12, %v6283_v59  ;;  %v5485_v46 = vpop.xlane.xlu2 %5484  ;;  %v16730_v29 = vpop.eup %11777 }
 0x834   :  { %11781 = vrcp.f32 %v5485_v46  ;;  %v5656_v43 = vpop.xlane.xlu0 %5655  ;;  %20210 = vst [vmem:[#allocation97_spill] sm:$0xff] %v16730_v29  ;;  %v11780_v0 = vpop.eup %11779 }
 0x835   :  { %v6102_v30 = vpack.c.bf16 %v5974_v22, %v5974_v22  ;;  %11783 = vrcp.f32 %v5656_v43  ;;  %v5488_v53 = vpop.xlane.xlu1 %5487  ;;  %v5696_v22 = vsel %vm966_vm12, %v16730_v29, 0.0 }
 0x836   :  { %11785 = vrcp.f32 %v5488_v53  ;;  %v6486_v1 = vpop.f32.mrf.mxu3  ;;  %v16739_v53 = vpop.f32.mrf.mxu1 }
 0x837   :  { %v6679_v35 = vunpack.c.l.b16 %v6102_v30  ;;  %v7115_v58 = vmul.f32 %v6486_v1, %v20211_v18  ;;  %11787 = vpow2.f32 %v5221_v23 }
 0x838   :  { %v6915_v33 = vpop.f32.mrf.mxu0 }
 0x839   :  { %v16734_v59 = vadd.f32 %v7115_v58, %v16547_v4  ;;  %v7091_v60 = vmul.f32 %v6915_v33, %v20182_v36  ;;  %v6728_v48 = vpack.c.b16 %v6679_v35, %v6678_v6 }
 0x83a   :  { %v11782_v46 = vpop.eup %11781  ;;  %5697 = vadd.xlane.f32.xlu1 %v5696_v22 }
 0x83b   :  { %v11784_v43 = vpop.eup %11783  ;;  %v5919_v52 = vmul.f32 %v11782_v46, %v16407_v40  ;;  %v16743_v23 = vadd.f32 %v7091_v60, %v16533_v12  ;;  %10830 = vmatmul.msk.bf16.gmra.mxu0 %vm966_vm12, %v6728_v48  ;;  %v5659_v4 = vpop.xlane.xlu2 %5658  ;;  %v20213_v40 = vld [vmem:[#allocation71_spill] sm:$0xff] }
 0x83c   :  { %v11786_v30 = vpop.eup %11785  ;;  %v5491_v1 = vpop.xlane.xlu0 %5490  ;;  %v5976_v33 = vmul.f32 %v11784_v43, %v16413_v51  ;;  %v5038_v46 = vsub.f32 %v20213_v40, %v16700_v7  ;;  %v20214_v12 = vld [vmem:[#allocation79_spill] sm:$0xff] }
 0x83d   :  { %v6047_v58 = vpack.c.bf16 %v5919_v52, %v5919_v52  ;;  %v5920_v6 = vmul.f32 %v11786_v30, %v20212_v24  ;;  %v4927_v35 = vpop.xlane.xlu1 %4926  ;;  %v16748_v22 = vpop.eup %11787  ;;  %v5975_v60 = vmul.f32 %v11780_v0, %v20214_v12  ;;  %11789 = vrcp.f32 %v5491_v1 }
 0x83e   :  { %v5093_v26 = vsub.f32 %v16327_v61, %v4927_v35  ;;  %v6104_v11 = vpack.c.bf16 %v5976_v33, %v5976_v33  ;;  %v5531_v24 = vsel %vm966_vm12, %v16748_v22, 0.0  ;;  %v5219_v43 = vmul.f32 1.442695, %v5038_v46  ;;  %v16758_v0 = vpop.f32.mrf.mxu1 }
 0x83f   :  { %v6048_v28 = vpack.c.bf16 %v5920_v6, %v5920_v6  ;;  %v6239_v52 = vunpack.c.l.b16 %v6047_v58  ;;  %v6103_v61 = vpack.c.bf16 %v5975_v60, %v5975_v60  ;;  %v16765_v6 = vpop.f32.mrf.mxu3  ;;  %v4787_v46 = vsel %vm966_vm12, %v16758_v0, -inf }
 0x840   :  { %v5329_v48 = vmul.f32 1.442695, %v5093_v26  ;;  %v16754_v29 = vpop.f32.mrf.mxu0  ;;  %v6681_v1 = vunpack.c.l.b16 %v6104_v11 }
 0x841   :  { %20215 = vst [vmem:[#allocation96_spill] sm:$0xff] %v16754_v29  ;;  %v6240_v51 = vunpack.c.l.b16 %v6048_v28  ;;  %v6680_v28 = vunpack.c.l.b16 %v6103_v61 }
 0x842   :  { %11791 = vpow2.f32 %v5329_v48  ;;  %5532 = vadd.xlane.f32.xlu1 %v5531_v24 }
 0x843   :  { %v5494_v30 = vpop.xlane.xlu2 %5493  ;;  %v6284_v35 = vpack.c.b16 %v6240_v51, %v6239_v52  ;;  %v11790_v58 = vpop.eup %11789  ;;  %v6729_v48 = vpack.c.b16 %v6681_v1, %v6680_v28 }
 0x844   :  { %11793 = vrcp.f32 %v5494_v30  ;;  %v5665_v7 = vpop.xlane.xlu0 %5664  ;;  %v5921_v12 = vmul.f32 %v11790_v58, %v16438_v31 }
 0x845   :  { %10803 = vmatmul.msk.bf16.gmra.mxu3 %vm966_vm12, %v6284_v35  ;;  %v16761_v26 = vpop.xlane.xlu1 %4935  ;;  %11795 = vpow2.f32 %v5219_v43 }
 0x846   :  { %11797 = vrcp.f32 %v5659_v4  ;;  %v6049_v31 = vpack.c.bf16 %v5921_v12, %v5921_v12 }
 0x848   :  { %v16763_v33 = vpop.eup %11791  ;;  %v6920_v40 = vpop.f32.mrf.mxu0 }
 0x849   :  { %v7093_v11 = vmul.f32 %v6920_v40, %v20182_v36  ;;  %v5693_v60 = vsel %vm966_vm12, %v16763_v33, 0.0 }
 0x84a   :  { %v11794_v52 = vpop.eup %11793  ;;  %5694 = vadd.xlane.f32.xlu2 %v5693_v60  ;;  %4788 = vmax.xlane.f32.xlu1 %v4787_v46 }
 0x84b   :  { %v5922_v51 = vmul.f32 %v11794_v52, %v16455_v5  ;;  %v16775_v4 = vadd.f32 %v7093_v11, %v16596_v25  ;;  %v4768_v24 = vpop.xlane.xlu2 %4767  ;;  %10831 = vmatmul.msk.bf16.gmra.mxu0 %vm966_vm12, %v6729_v48  ;;  %v16778_v61 = vpop.eup %11795  ;;  %v6241_v5 = vunpack.c.l.b16 %v6049_v31 }
 0x84c   :  { %v5500_v43 = vpop.xlane.xlu0 %5499  ;;  %v11798_v58 = vpop.eup %11797  ;;  %v5528_v46 = vsel %vm966_vm12, %v16778_v61, 0.0 }
 0x84d   :  { %v6050_v30 = vpack.c.bf16 %v5922_v51, %v5922_v51  ;;  %v5662_v35 = vpop.xlane.xlu1 %5661  ;;  %v5977_v40 = vmul.f32 %v11798_v58, %v16430_v17  ;;  %v5040_v58 = vsub.f32 %v16450_v20, %v4768_v24 }
 0x84e   :  { %11799 = vrcp.f32 %v5662_v35 }
 0x84f   :  { %v6242_v1 = vunpack.c.l.b16 %v6050_v30  ;;  %11801 = vrcp.f32 %v5500_v43  ;;  %v6105_v43 = vpack.c.bf16 %v5977_v40, %v5977_v40 }
 0x850   :  { %v6491_v28 = vpop.f32.mrf.mxu3 }
 0x851   :  { %v7117_v25 = vmul.f32 %v6491_v28, %v20211_v18  ;;  %v6285_v60 = vpack.c.b16 %v6242_v1, %v6241_v5  ;;  %v20216_v5 = vld [vmem:[#allocation85_spill] sm:$0xff] }
 0x852   :  { %5529 = vadd.xlane.f32.xlu2 %v5528_v46 }
 0x853   :  { %v16785_v11 = vadd.f32 %v7117_v25, %v16589_v13  ;;  %v4933_v12 = vpop.xlane.xlu2 %4932  ;;  %v5096_v25 = vsub.f32 %v20216_v5, %v16761_v26  ;;  %v20219_v5 = vld [vmem:[#allocation84_spill] sm:$0xff] }
 0x854   :  { %v11800_v48 = vpop.eup %11799  ;;  %v4774_v52 = vpop.xlane.xlu0 %4773  ;;  %v5095_v51 = vsub.f32 %v16432_v54, %v4933_v12  ;;  %v4784_v54 = vsel %vm966_vm12, %v16739_v53, -inf  ;;  %v5223_v12 = vmul.f32 1.442695, %v5040_v58 }
 0x855   :  { %v5978_v30 = vmul.f32 %v11800_v48, %v16479_v9  ;;  %v5042_v17 = vsub.f32 %v16503_v57, %v4774_v52  ;;  %10804 = vmatmul.msk.bf16.gmra.mxu3 %vm966_vm12, %v6285_v60  ;;  %v5497_v31 = vpop.xlane.xlu1 %5496  ;;  %v11802_v35 = vpop.eup %11801  ;;  %v6682_v9 = vunpack.c.l.b16 %v6105_v43  ;;  %v20217_v57 = vld [vmem:[#allocation99_spill] sm:$0xff]  ;;  %v5335_v48 = vmul.f32 1.442695, %v5096_v25 }
 0x856   :  { %v5333_v28 = vmul.f32 1.442695, %v5095_v51  ;;  %11803 = vrcp.f32 %v5497_v31  ;;  %v5924_v40 = vmul.f32 %v11802_v35, %v20217_v57  ;;  %v16797_v60 = vpop.f32.mrf.mxu0 }
 0x857   :  { %11805 = vrcp.f32 %v5665_v7  ;;  %v6106_v13 = vpack.c.bf16 %v5978_v30, %v5978_v30  ;;  %v5227_v1 = vmul.f32 1.442695, %v5042_v17  ;;  %20218 = vst [vmem:[#allocation28_spill] sm:$0xff] %v16797_v60 }
 0x858   :  { %11807 = vpow2.f32 %v5333_v28  ;;  %v6052_v51 = vpack.c.bf16 %v5924_v40, %v5924_v40  ;;  %v16804_v35 = vpop.f32.mrf.mxu3 }
 0x859   :  { %v6683_v46 = vunpack.c.l.b16 %v6106_v13  ;;  %11809 = vpow2.f32 %v5227_v1 }
 0x85a   :  { %4785 = vmax.xlane.f32.xlu2 %v4784_v54 }
 0x85b   :  { %v5668_v20 = vpop.xlane.xlu2 %5667  ;;  %v6730_v7 = vpack.c.b16 %v6683_v46, %v6682_v9  ;;  %v6244_v9 = vunpack.c.l.b16 %v6052_v51 }
 0x85c   :  { %v11804_v24 = vpop.eup %11803  ;;  %11811 = vrcp.f32 %v5668_v20  ;;  %v4939_v52 = vpop.xlane.xlu0 %4938 }
 0x85d   :  { %v11806_v26 = vpop.eup %11805  ;;  %v5923_v30 = vmul.f32 %v11804_v24, %v16506_v8  ;;  %v5097_v43 = vsub.f32 %v16529_v49, %v4939_v52  ;;  %10832 = vmatmul.msk.bf16.gmra.mxu0 %vm966_vm12, %v6730_v7  ;;  %v5671_v17 = vpop.xlane.xlu1 %5670  ;;  %11813 = vpow2.f32 %v5223_v12  ;;  %v4949_v49 = vsel %vm966_vm12, %v16693_v27, -inf }
 0x85e   :  { %v16802_v31 = vpop.eup %11807  ;;  %11815 = vpow2.f32 %v5335_v48  ;;  %v5979_v25 = vmul.f32 %v11806_v26, %v20219_v5 }
 0x85f   :  { %v16806_v58 = vpop.eup %11809  ;;  %v6051_v28 = vpack.c.bf16 %v5923_v30, %v5923_v30  ;;  %v5337_v13 = vmul.f32 1.442695, %v5097_v43  ;;  %v5699_v1 = vsel %vm966_vm12, %v16802_v31, 0.0 }
 0x860   :  { %5700 = vadd.xlane.f32.xlu0 %v5699_v1  ;;  %v5540_v8 = vsel %vm966_vm12, %v16806_v58, 0.0  ;;  %v6107_v52 = vpack.c.bf16 %v5979_v25, %v5979_v25 }
 0x861   :  { %v6243_v54 = vunpack.c.l.b16 %v6051_v28  ;;  %11817 = vpow2.f32 %v5337_v13  ;;  %5541 = vadd.xlane.f32.xlu1 %v5540_v8 }
 0x862   :  { %v11812_v57 = vpop.eup %11811  ;;  %v6925_v40 = vpop.f32.mrf.mxu0  ;;  %4950 = vmax.xlane.f32.xlu2 %v4949_v49  ;;  %v6684_v49 = vunpack.c.l.b16 %v6107_v52 }
 0x863   :  { %v5980_v46 = vmul.f32 %v11812_v57, %v16521_v62  ;;  %v7095_v12 = vmul.f32 %v6925_v40, %v20182_v36  ;;  %v5503_v20 = vpop.xlane.xlu2 %5502  ;;  %v6286_v7 = vpack.c.b16 %v6244_v9, %v6243_v54  ;;  %v16817_v24 = vpop.eup %11813 }
 0x864   :  { %11819 = vrcp.f32 %v5503_v20  ;;  %v5674_v48 = vpop.xlane.xlu0 %5673  ;;  %v16823_v43 = vpop.eup %11815  ;;  %v5534_v1 = vsel %vm966_vm12, %v16817_v24, 0.0 }
 0x865   :  { %v6108_v30 = vpack.c.bf16 %v5980_v46, %v5980_v46  ;;  %v16820_v26 = vadd.f32 %v7095_v12, %v16636_v16  ;;  %11821 = vrcp.f32 %v5674_v48  ;;  %10805 = vmatmul.msk.bf16.gmra.mxu3 %vm966_vm12, %v6286_v7  ;;  %v5506_v51 = vpop.xlane.xlu1 %5505  ;;  %v5702_v25 = vsel %vm966_vm12, %v16823_v43, 0.0  ;;  %v16841_v20 = vpop.f32.mrf.mxu1 }
 0x866   :  { %11823 = vrcp.f32 %v5506_v51  ;;  %v6496_v62 = vpop.f32.mrf.mxu3 }
 0x867   :  { %v16825_v28 = vpop.eup %11817  ;;  %11825 = vrcp.f32 %v5671_v17  ;;  %v7119_v13 = vmul.f32 %v6496_v62, %v20211_v18  ;;  %v6685_v8 = vunpack.c.l.b16 %v6108_v30  ;;  %v11303_v17 = vld [vmem:[%s19299_s14 + $0x18] sm:$0xff] }
 0x868   :  { %5535 = vadd.xlane.f32.xlu0 %v5534_v1  ;;  %v5705_v16 = vsel %vm966_vm12, %v16825_v28, 0.0  ;;  %7347 = vmatpush.bf16.msra.mxu1 %v11303_v17  ;;  %v4790_v1 = vsel %vm966_vm12, %v16841_v20, -inf  ;;  %v16854_v17 = vpop.f32.mrf.mxu2 }
 0x869   :  { %v16833_v5 = vadd.f32 %v7119_v13, %v16654_v3  ;;  %5706 = vadd.xlane.f32.xlu1 %v5705_v16  ;;  %v6731_v46 = vpack.c.b16 %v6685_v8, %v6684_v49 }
 0x86a   :  { %v11820_v54 = vpop.eup %11819  ;;  %5703 = vadd.xlane.f32.xlu2 %v5702_v25  ;;  %v16852_v16 = vpop.f32.mrf.mxu0 }
 0x86b   :  { %v11822_v9 = vpop.eup %11821  ;;  %v5925_v57 = vmul.f32 %v11820_v54, %v16551_v10  ;;  %v5677_v40 = vpop.xlane.xlu2 %5676  ;;  %20220 = vst [vmem:[#allocation72_spill] sm:$0xff] %v16852_v16 }
 0x86c   :  { %v11824_v12 = vpop.eup %11823  ;;  %v5509_v52 = vpop.xlane.xlu0 %5508  ;;  %v5982_v10 = vmul.f32 %v11822_v9, %v16555_v32 }
 0x86d   :  { %v11826_v3 = vpop.eup %11825  ;;  %v6053_v7 = vpack.c.bf16 %v5925_v57, %v5925_v57  ;;  %v5926_v48 = vmul.f32 %v11824_v12, %v16557_v34  ;;  %10833 = vmatmul.msk.bf16.gmra.mxu0 %vm966_vm12, %v6731_v46  ;;  %v4771_v30 = vpop.xlane.xlu1 %4770  ;;  %11827 = vrcp.f32 %v5509_v52 }
 0x86e   :  { %v5041_v51 = vsub.f32 %v16481_v14, %v4771_v30  ;;  %v16846_v62 = vpop.f32.mrf.mxu3  ;;  %v5981_v8 = vmul.f32 %v11826_v3, %v16536_v55  ;;  %v6110_v14 = vpack.c.bf16 %v5982_v10, %v5982_v10 }
 0x86f   :  { %v6054_v13 = vpack.c.bf16 %v5926_v48, %v5926_v48  ;;  %v6245_v49 = vunpack.c.l.b16 %v6053_v7  ;;  %v4955_v7 = vsel %vm966_vm12, %v16854_v17, -inf }
 0x870   :  { %v5225_v34 = vmul.f32 1.442695, %v5041_v51  ;;  %4791 = vmax.xlane.f32.xlu0 %v4790_v1  ;;  %v6109_v32 = vpack.c.bf16 %v5981_v8, %v5981_v8  ;;  %v6687_v3 = vunpack.c.l.b16 %v6110_v14 }
 0x871   :  { %v6246_v25 = vunpack.c.l.b16 %v6054_v13 }
 0x872   :  { %11829 = vpow2.f32 %v5225_v34  ;;  %v6686_v30 = vunpack.c.l.b16 %v6109_v32 }
 0x873   :  { %v5512_v54 = vpop.xlane.xlu2 %5511  ;;  %v6287_v57 = vpack.c.b16 %v6246_v25, %v6245_v49  ;;  %v11828_v46 = vpop.eup %11827 }
 0x874   :  { %11831 = vrcp.f32 %v5512_v54  ;;  %v5927_v13 = vmul.f32 %v11828_v46, %v16577_v38  ;;  %v6732_v54 = vpack.c.b16 %v6687_v3, %v6686_v30  ;;  %v16874_v38 = vpop.f32.mrf.mxu2 }
 0x875   :  { %10806 = vmatmul.msk.bf16.gmra.mxu3 %vm966_vm12, %v6287_v57  ;;  %v4780_v9 = vpop.xlane.xlu1 %4779  ;;  %11833 = vrcp.f32 %v5677_v40 }
 0x876   :  { %v5044_v55 = vsub.f32 %v16601_v21, %v4780_v9  ;;  %v6501_v12 = vpop.f32.mrf.mxu3  ;;  %v6055_v57 = vpack.c.bf16 %v5927_v13, %v5927_v13 }
 0x877   :  { %v7121_v48 = vmul.f32 %v6501_v12, %v20211_v18 }
 0x878   :  { %v16861_v52 = vpop.eup %11829  ;;  %v5231_v51 = vmul.f32 1.442695, %v5044_v55  ;;  %v6930_v10 = vpop.f32.mrf.mxu0  ;;  %4956 = vmax.xlane.f32.xlu0 %v4955_v7  ;;  %v4958_v7 = vsel %vm966_vm12, %v16874_v38, -inf }
 0x879   :  { %v16865_v1 = vadd.f32 %v7121_v48, %v16710_v39  ;;  %v7097_v21 = vmul.f32 %v6930_v10, %v20182_v36  ;;  %v5537_v8 = vsel %vm966_vm12, %v16861_v52, 0.0  ;;  %v6247_v48 = vunpack.c.l.b16 %v6055_v57 }
 0x87a   :  { %v11832_v34 = vpop.eup %11831  ;;  %11835 = vpow2.f32 %v5231_v51  ;;  %5538 = vadd.xlane.f32.xlu2 %v5537_v8 }
 0x87b   :  { %v5928_v49 = vmul.f32 %v11832_v34, %v16594_v44  ;;  %v16872_v40 = vadd.f32 %v7097_v21, %v16697_v56  ;;  %v5683_v25 = vpop.xlane.xlu0 %5682  ;;  %v4942_v14 = vpop.xlane.xlu2 %4941 }
 0x87c   :  { %v5098_v39 = vsub.f32 %v16608_v45, %v4942_v14  ;;  %v11834_v46 = vpop.eup %11833  ;;  %v16892_v14 = vpop.f32.mrf.mxu2 }
 0x87d   :  { %v6056_v32 = vpack.c.bf16 %v5928_v49, %v5928_v49  ;;  %v5680_v9 = vpop.xlane.xlu1 %5679  ;;  %10834 = vmatmul.msk.bf16.gmra.mxu0 %vm966_vm12, %v6732_v54  ;;  %v5983_v3 = vmul.f32 %v11834_v46, %v16573_v19 }
 0x87e   :  { %v5339_v55 = vmul.f32 1.442695, %v5098_v39  ;;  %11837 = vrcp.f32 %v5680_v9 }
 0x87f   :  { %v6248_v12 = vunpack.c.l.b16 %v6056_v32  ;;  %v6111_v8 = vpack.c.bf16 %v5983_v3, %v5983_v3  ;;  %v16896_v32 = vpop.f32.mrf.mxu3 }
 0x880   :  { %v16878_v44 = vpop.eup %11835  ;;  %11839 = vpow2.f32 %v5339_v55  ;;  %v16880_v56 = vpop.f32.mrf.mxu0 }
 0x881   :  { %20221 = vst [vmem:[#allocation101_spill] sm:$0xff] %v16880_v56  ;;  %v5546_v45 = vsel %vm966_vm12, %v16878_v44, 0.0  ;;  %v6288_v10 = vpack.c.b16 %v6248_v12, %v6247_v48 }
 0x882   :  { %5547 = vadd.xlane.f32.xlu1 %v5546_v45  ;;  %4959 = vmax.xlane.f32.xlu2 %v4958_v7 }
 0x883   :  { %v5518_v30 = vpop.xlane.xlu0 %5517  ;;  %v4777_v51 = vpop.xlane.xlu2 %4776 }
 0x884   :  { %v11838_v13 = vpop.eup %11837  ;;  %11841 = vrcp.f32 %v5518_v30  ;;  %v5043_v21 = vsub.f32 %v16575_v63, %v4777_v51  ;;  %v20222_v30 = vld [vmem:[#allocation95_spill] sm:$0xff] }
 0x885   :  { %v5984_v34 = vmul.f32 %v11838_v13, %v16616_v37  ;;  %v5515_v19 = vpop.xlane.xlu1 %5514  ;;  %10807 = vmatmul.msk.bf16.gmra.mxu3 %vm966_vm12, %v6288_v10  ;;  %v6688_v37 = vunpack.c.l.b16 %v6111_v8 }
 0x886   :  { %v16890_v49 = vpop.eup %11839  ;;  %v5229_v54 = vmul.f32 1.442695, %v5043_v21  ;;  %11843 = vrcp.f32 %v5515_v19  ;;  %v20223_v21 = vld [vmem:[#allocation8_spill] sm:$0xff] }
 0x887   :  { %11845 = vrcp.f32 %v5683_v25  ;;  %v6112_v39 = vpack.c.bf16 %v5984_v34, %v5984_v34  ;;  %v5708_v57 = vsel %vm966_vm12, %v16890_v49, 0.0 }
 0x888   :  { %11847 = vpow2.f32 %v5229_v54  ;;  %v6935_v63 = vpop.f32.mrf.mxu0  ;;  %5709 = vadd.xlane.f32.xlu0 %v5708_v57  ;;  %v16912_v57 = vpop.f32.mrf.mxu2 }
 0x889   :  { %v6689_v9 = vunpack.c.l.b16 %v6112_v39  ;;  %v7123_v46 = vmul.f32 %v6935_v63, %v20211_v18  ;;  %v4961_v39 = vsel %vm966_vm12, %v16892_v14, -inf }
 0x88a   :  { %v11842_v55 = vpop.eup %11841 }
 0x88b   :  { %v5930_v12 = vmul.f32 %v11842_v55, %v16642_v2  ;;  %v16901_v3 = vadd.f32 %v7123_v46, %v16743_v23  ;;  %v5686_v25 = vpop.xlane.xlu2 %5685  ;;  %v4948_v48 = vpop.xlane.xlu0 %4947  ;;  %v6733_v45 = vpack.c.b16 %v6689_v9, %v6688_v37  ;;  %v20224_v37 = vld [vmem:[#allocation103_spill] sm:$0xff] }
 0x88c   :  { %v11844_v7 = vpop.eup %11843  ;;  %11849 = vrcp.f32 %v5686_v25  ;;  %v5100_v51 = vsub.f32 %v20222_v30, %v4948_v48 }
 0x88d   :  { %v11846_v10 = vpop.eup %11845  ;;  %v6058_v13 = vpack.c.bf16 %v5930_v12, %v5930_v12  ;;  %v5929_v8 = vmul.f32 %v11844_v7, %v20223_v21  ;;  %v5689_v34 = vpop.xlane.xlu1 %5688  ;;  %10835 = vmatmul.msk.bf16.gmra.mxu0 %vm966_vm12, %v6733_v45  ;;  %v20225_v12 = vld [vmem:[#allocation16_spill] sm:$0xff]  ;;  %v20226_v45 = vld [vmem:[#allocation19_spill] sm:$0xff] }
 0x88e   :  { %v16906_v19 = vpop.eup %11847  ;;  %v5343_v2 = vmul.f32 1.442695, %v5100_v51  ;;  %v5985_v9 = vmul.f32 %v11846_v10, %v20224_v37 }
 0x88f   :  { %v6057_v54 = vpack.c.bf16 %v5929_v8, %v5929_v8  ;;  %v5543_v23 = vsel %vm966_vm12, %v16906_v19, 0.0  ;;  %v6250_v46 = vunpack.c.l.b16 %v6058_v13 }
 0x890   :  { %11851 = vpow2.f32 %v5343_v2  ;;  %v6506_v63 = vpop.f32.mrf.mxu3  ;;  %5544 = vadd.xlane.f32.xlu2 %v5543_v23  ;;  %4962 = vmax.xlane.f32.xlu0 %v4961_v39  ;;  %v6113_v23 = vpack.c.bf16 %v5985_v9, %v5985_v9  ;;  %v16928_v9 = vpop.f32.mrf.mxu2 }
 0x891   :  { %v6249_v55 = vunpack.c.l.b16 %v6057_v54  ;;  %v7147_v25 = vmul.f32 %v6506_v63, %v20225_v12  ;;  %v4964_v63 = vsel %vm966_vm12, %v16912_v57, -inf }
 0x892   :  { %v11850_v48 = vpop.eup %11849 }
 0x893   :  { %v5986_v7 = vmul.f32 %v11850_v48, %v20226_v45  ;;  %v16918_v30 = vadd.f32 %v7147_v25, %v16734_v59  ;;  %v5521_v51 = vpop.xlane.xlu2 %5520  ;;  %v4783_v21 = vpop.xlane.xlu0 %4782  ;;  %v6289_v8 = vpack.c.b16 %v6250_v46, %v6249_v55 }
 0x894   :  { %11853 = vrcp.f32 %v5521_v51  ;;  %v5045_v2 = vsub.f32 %v16674_v47, %v4783_v21  ;;  %v6690_v47 = vunpack.c.l.b16 %v6113_v23  ;;  %v16930_v46 = vpop.f32.mrf.mxu0 }
 0x895   :  { %v6114_v39 = vpack.c.bf16 %v5986_v7, %v5986_v7  ;;  %v5524_v56 = vpop.xlane.xlu1 %5523  ;;  %10808 = vmatmul.msk.bf16.gmra.mxu3 %vm966_vm12, %v6289_v8  ;;  %20227 = vst [vmem:[#allocation100_spill] sm:$0xff] %v16930_v46 }
 0x896   :  { %v16922_v10 = vpop.eup %11851  ;;  %v5233_v13 = vmul.f32 1.442695, %v5045_v2  ;;  %11855 = vrcp.f32 %v5524_v56 }
 0x897   :  { %v6691_v54 = vunpack.c.l.b16 %v6114_v39  ;;  %11857 = vrcp.f32 %v5689_v34  ;;  %v5714_v59 = vsel %vm966_vm12, %v16922_v10, 0.0  ;;  %v4967_v39 = vsel %vm966_vm12, %v16928_v9, -inf }
 0x898   :  { %11859 = vpow2.f32 %v5233_v13  ;;  %5715 = vadd.xlane.f32.xlu0 %v5714_v59  ;;  %4965 = vmax.xlane.f32.xlu2 %v4964_v63  ;;  %v16937_v8 = vpop.f32.mrf.mxu3 }
 0x899   :  { %v6734_v25 = vpack.c.b16 %v6691_v54, %v6690_v47 }
 0x89a   :  { %v11854_v37 = vpop.eup %11853 }
 0x89b   :  { %v5931_v55 = vmul.f32 %v11854_v37, %v16672_v50  ;;  %v5692_v56 = vpop.xlane.xlu0 %5691 }
 0x89c   :  { %v11856_v34 = vpop.eup %11855  ;;  %11861 = vrcp.f32 %v5692_v56 }
 0x89d   :  { %v11858_v48 = vpop.eup %11857  ;;  %v6059_v45 = vpack.c.bf16 %v5931_v55, %v5931_v55  ;;  %v5932_v7 = vmul.f32 %v11856_v34, %v16679_v42  ;;  %10836 = vmatmul.msk.bf16.gmra.mxu0 %vm966_vm12, %v6734_v25  ;;  %v4945_v51 = vpop.xlane.xlu1 %4944  ;;  %v20228_v42 = vld [vmem:[#allocation94_spill] sm:$0xff] }
 0x89e   :  { %v16935_v21 = vpop.eup %11859  ;;  %v5099_v2 = vsub.f32 %v16634_v15, %v4945_v51  ;;  %v5987_v54 = vmul.f32 %v11858_v48, %v20228_v42  ;;  %v16947_v25 = vpop.f32.mrf.mxu2 }
 0x89f   :  { %v6060_v23 = vpack.c.bf16 %v5932_v7, %v5932_v7  ;;  %v5549_v50 = vsel %vm966_vm12, %v16935_v21, 0.0  ;;  %v6251_v59 = vunpack.c.l.b16 %v6059_v45  ;;  %v20229_v45 = vld [vmem:[#allocation11_spill] sm:$0xff] }
 0x8a0   :  { %v5341_v13 = vmul.f32 1.442695, %v5099_v2  ;;  %5550 = vadd.xlane.f32.xlu2 %v5549_v50  ;;  %4968 = vmax.xlane.f32.xlu0 %v4967_v39  ;;  %v6115_v34 = vpack.c.bf16 %v5987_v54, %v5987_v54 }
 0x8a1   :  { %v6252_v63 = vunpack.c.l.b16 %v6060_v23 }
 0x8a2   :  { %v11862_v47 = vpop.eup %11861  ;;  %11863 = vpow2.f32 %v5341_v13  ;;  %v6940_v37 = vpop.f32.mrf.mxu0  ;;  %v6692_v54 = vunpack.c.l.b16 %v6115_v34 }
 0x8a3   :  { %v5988_v55 = vmul.f32 %v11862_v47, %v16702_v41  ;;  %v7125_v15 = vmul.f32 %v6940_v37, %v20211_v18  ;;  %v6290_v56 = vpack.c.b16 %v6252_v63, %v6251_v59  ;;  %v4970_v41 = vsel %vm966_vm12, %v16947_v25, -inf }
 0x8a5   :  { %v6116_v7 = vpack.c.bf16 %v5988_v55, %v5988_v55  ;;  %v16950_v51 = vadd.f32 %v7125_v15, %v16775_v4  ;;  %10809 = vmatmul.msk.bf16.gmra.mxu3 %vm966_vm12, %v6290_v56  ;;  %v4954_v48 = vpop.xlane.xlu1 %4953 }
 0x8a6   :  { %v5102_v2 = vsub.f32 %v20229_v45, %v4954_v48  ;;  %v6511_v23 = vpop.f32.mrf.mxu3  ;;  %v16975_v34 = vpop.f32.mrf.mxu2 }
 0x8a7   :  { %v6693_v50 = vunpack.c.l.b16 %v6116_v7  ;;  %v7149_v39 = vmul.f32 %v6511_v23, %v20225_v12 }
 0x8a8   :  { %v16957_v13 = vpop.eup %11863  ;;  %v5347_v42 = vmul.f32 1.442695, %v5102_v2  ;;  %4971 = vmax.xlane.f32.xlu2 %v4970_v41  ;;  %v5527_v41 = vpop.xlane.xlu0 %5526 }
 0x8a9   :  { %v16960_v4 = vadd.f32 %v7149_v39, %v16785_v11  ;;  %v5711_v59 = vsel %vm966_vm12, %v16957_v13, 0.0  ;;  %v6735_v63 = vpack.c.b16 %v6693_v50, %v6692_v54  ;;  %v4973_v50 = vsel %vm966_vm12, %v16975_v34, -inf }
 0x8aa   :  { %11865 = vpow2.f32 %v5347_v42  ;;  %5712 = vadd.xlane.f32.xlu1 %v5711_v59  ;;  %v16969_v15 = vpop.f32.mrf.mxu0 }
 0x8ab   :  { %20230 = vst [vmem:[#allocation60_spill] sm:$0xff] %v16969_v15 }
 0x8ad   :  { %10837 = vmatmul.msk.bf16.gmra.mxu0 %vm966_vm12, %v6735_v63  ;;  %v5698_v47 = vpop.xlane.xlu1 %5697 }
 0x8ae   :  { %v16965_v37 = vpop.f32.mrf.mxu3  ;;  %11867 = vrcp.f32 %v5698_v47  ;;  %v20231_v47 = vld [vmem:[#allocation97_spill] sm:$0xff] }
 0x8b0   :  { %v16967_v55 = vpop.eup %11865 }
 0x8b1   :  { %v5720_v56 = vsel %vm966_vm12, %v16967_v55, 0.0 }
 0x8b2   :  { %5721 = vadd.xlane.f32.xlu0 %v5720_v56 }
 0x8b4   :  { %v11868_v42 = vpop.eup %11867 }
 0x8b5   :  { %v16973_v11 = vpop.xlane.xlu1 %5532 }
 0x8b6   :  { %v6516_v7 = vpop.f32.mrf.mxu3 }
 0x8b7   :  { %v7151_v48 = vmul.f32 %v6516_v7, %v20225_v12 }
 0x8b8   :  { %v6945_v45 = vpop.f32.mrf.mxu0 }
 0x8b9   :  { %v16979_v2 = vadd.f32 %v7151_v48, %v16833_v5  ;;  %v7127_v23 = vmul.f32 %v6945_v45, %v20211_v18  ;;  %v5990_v5 = vmul.f32 %v11868_v42, %v20231_v47 }
 0x8ba   :  { %4974 = vmax.xlane.f32.xlu0 %v4973_v50 }
 0x8bb   :  { %v16985_v39 = vadd.f32 %v7127_v23, %v16820_v26  ;;  %v6118_v50 = vpack.c.bf16 %v5990_v5, %v5990_v5 }
 0x8bd   :  { %v5695_v54 = vpop.xlane.xlu2 %5694  ;;  %v4789_v59 = vpop.xlane.xlu1 %4788 }
 0x8be   :  { %11869 = vrcp.f32 %v5695_v54  ;;  %v5047_v63 = vsub.f32 %v16758_v0, %v4789_v59  ;;  %v16989_v7 = vpop.f32.mrf.mxu3  ;;  %v20233_v0 = vld [vmem:[#allocation25_spill] sm:$0xff]  ;;  %v6695_v59 = vunpack.c.l.b16 %v6118_v50  ;;  %v17007_v50 = vpop.f32.mrf.mxu2 }
 0x8bf   :  { %11871 = vrcp.f32 %v5527_v41 }
 0x8c0   :  { %v5237_v56 = vmul.f32 1.442695, %v5047_v63  ;;  %v16991_v48 = vpop.f32.mrf.mxu0 }
 0x8c1   :  { %20232 = vst [vmem:[#allocation105_spill] sm:$0xff] %v16991_v48 }
 0x8c2   :  { %11873 = vpow2.f32 %v5237_v56 }
 0x8c4   :  { %v11870_v45 = vpop.eup %11869 }
 0x8c5   :  { %v11872_v26 = vpop.eup %11871  ;;  %v5989_v23 = vmul.f32 %v11870_v45, %v16763_v33  ;;  %v5530_v16 = vpop.xlane.xlu2 %5529 }
 0x8c6   :  { %11875 = vrcp.f32 %v5530_v16  ;;  %v5933_v41 = vmul.f32 %v11872_v26, %v20233_v0 }
 0x8c7   :  { %v6117_v15 = vpack.c.bf16 %v5989_v23, %v5989_v23 }
 0x8c8   :  { %v16994_v54 = vpop.eup %11873  ;;  %v6521_v42 = vpop.f32.mrf.mxu3  ;;  %v6061_v23 = vpack.c.bf16 %v5933_v41, %v5933_v41 }
 0x8c9   :  { %v6950_v63 = vpop.f32.mrf.mxu0  ;;  %v6694_v47 = vunpack.c.l.b16 %v6117_v15  ;;  %v7153_v60 = vmul.f32 %v6521_v42, %v20225_v12  ;;  %v5555_v5 = vsel %vm966_vm12, %v16994_v54, 0.0 }
 0x8ca   :  { %v7129_v56 = vmul.f32 %v6950_v63, %v20211_v18  ;;  %5556 = vadd.xlane.f32.xlu2 %v5555_v5 }
 0x8cb   :  { %v17002_v33 = vadd.f32 %v7153_v60, %v16865_v1  ;;  %v6736_v45 = vpack.c.b16 %v6695_v59, %v6694_v47  ;;  %v6253_v60 = vunpack.c.l.b16 %v6061_v23 }
 0x8cc   :  { %v17005_v16 = vadd.f32 %v7129_v56, %v16872_v40  ;;  %v11876_v26 = vpop.eup %11875  ;;  %v4976_v40 = vsel %vm966_vm12, %v17007_v50, -inf  ;;  %v17019_v56 = vpop.f32.mrf.mxu2 }
 0x8cd   :  { %v5934_v15 = vmul.f32 %v11876_v26, %v16778_v61  ;;  %v4786_v0 = vpop.xlane.xlu2 %4785  ;;  %10838 = vmatmul.msk.bf16.gmra.mxu0 %vm966_vm12, %v6736_v45 }
 0x8ce   :  { %v5046_v42 = vsub.f32 %v16739_v53, %v4786_v0 }
 0x8cf   :  { %v6062_v63 = vpack.c.bf16 %v5934_v15, %v5934_v15  ;;  %v20235_v15 = vld [vmem:[#allocation38_spill] sm:$0xff] }
 0x8d0   :  { %v5235_v5 = vmul.f32 1.442695, %v5046_v42  ;;  %v17012_v48 = vpop.f32.mrf.mxu3 }
 0x8d1   :  { %v6254_v1 = vunpack.c.l.b16 %v6062_v63  ;;  %v17016_v59 = vpop.f32.mrf.mxu0  ;;  %v4979_v63 = vsel %vm966_vm12, %v17019_v56, -inf }
 0x8d2   :  { %11877 = vpow2.f32 %v5235_v5  ;;  %20234 = vst [vmem:[#allocation104_spill] sm:$0xff] %v17016_v59  ;;  %4977 = vmax.xlane.f32.xlu2 %v4976_v40 }
 0x8d3   :  { %v5701_v41 = vpop.xlane.xlu0 %5700  ;;  %v6291_v61 = vpack.c.b16 %v6254_v1, %v6253_v60  ;;  %11879 = vrcp.f32 %v16973_v11 }
 0x8d4   :  { %11881 = vrcp.f32 %v5701_v41 }
 0x8d5   :  { %10810 = vmatmul.msk.bf16.gmra.mxu3 %vm966_vm12, %v6291_v61  ;;  %v4951_v47 = vpop.xlane.xlu2 %4950 }
 0x8d6   :  { %v5101_v53 = vsub.f32 %v16693_v27, %v4951_v47 }
 0x8d8   :  { %v17023_v45 = vpop.eup %11877  ;;  %v5345_v26 = vmul.f32 1.442695, %v5101_v53  ;;  %v6526_v23 = vpop.f32.mrf.mxu3 }
 0x8d9   :  { %v7179_v0 = vmul.f32 %v6526_v23, %v20235_v15  ;;  %v5552_v42 = vsel %vm966_vm12, %v17023_v45, 0.0  ;;  %v11880_v1 = vpop.eup %11879 }
 0x8da   :  { %11883 = vpow2.f32 %v5345_v26  ;;  %v6955_v5 = vpop.f32.mrf.mxu0  ;;  %5553 = vadd.xlane.f32.xlu1 %v5552_v42  ;;  %4980 = vmax.xlane.f32.xlu2 %v4979_v63  ;;  %v11882_v61 = vpop.eup %11881  ;;  %v5935_v47 = vmul.f32 %v11880_v1, %v16748_v22 }
 0x8db   :  { %v17031_v11 = vadd.f32 %v7179_v0, %v16918_v30  ;;  %v7155_v27 = vmul.f32 %v6955_v5, %v20225_v12  ;;  %v5536_v60 = vpop.xlane.xlu0 %5535  ;;  %v5991_v30 = vmul.f32 %v11882_v61, %v16802_v31 }
 0x8dc   :  { %11885 = vrcp.f32 %v5536_v60  ;;  %v5542_v60 = vpop.xlane.xlu1 %5541 }
 0x8dd   :  { %v17035_v40 = vadd.f32 %v7155_v27, %v16901_v3  ;;  %v5704_v41 = vpop.xlane.xlu2 %5703  ;;  %v6063_v3 = vpack.c.bf16 %v5935_v47, %v5935_v47  ;;  %v6119_v1 = vpack.c.bf16 %v5991_v30, %v5991_v30  ;;  %v11302_v47 = vld [vmem:[%s19299_s14 + $0x10] sm:$0xff] }
 0x8de   :  { %11887 = vrcp.f32 %v5704_v41  ;;  %7348 = vmatpush.bf16.msra.mxu1 %v11302_v47 }
 0x8df   :  { %v6255_v61 = vunpack.c.l.b16 %v6063_v3  ;;  %11889 = vrcp.f32 %v5542_v60 }
 0x8e0   :  { %v17038_v53 = vpop.eup %11883  ;;  %v17040_v26 = vpop.f32.mrf.mxu3 }
 0x8e1   :  { %v5717_v23 = vsel %vm966_vm12, %v17038_v53, 0.0 }
 0x8e2   :  { %v11886_v0 = vpop.eup %11885  ;;  %v17045_v42 = vpop.f32.mrf.mxu0  ;;  %5718 = vadd.xlane.f32.xlu1 %v5717_v23  ;;  %v6696_v23 = vunpack.c.l.b16 %v6119_v1 }
 0x8e3   :  { %20236 = vst [vmem:[#allocation87_spill] sm:$0xff] %v17045_v42  ;;  %v5936_v63 = vmul.f32 %v11886_v0, %v16817_v24  ;;  %v4792_v5 = vpop.xlane.xlu0 %4791 }
 0x8e4   :  { %v11888_v27 = vpop.eup %11887  ;;  %v5048_v22 = vsub.f32 %v16841_v20, %v4792_v5 }
 0x8e5   :  { %v6064_v41 = vpack.c.bf16 %v5936_v63, %v5936_v63  ;;  %v5992_v59 = vmul.f32 %v11888_v27, %v16823_v43  ;;  %v11890_v27 = vpop.eup %11889 }
 0x8e6   :  { %v5239_v31 = vmul.f32 1.442695, %v5048_v22 }
 0x8e7   :  { %v6256_v46 = vunpack.c.l.b16 %v6064_v41  ;;  %v6120_v29 = vpack.c.bf16 %v5992_v59, %v5992_v59 }
 0x8e8   :  { %11891 = vpow2.f32 %v5239_v31  ;;  %v6531_v24 = vpop.f32.mrf.mxu3 }
 0x8e9   :  { %v6697_v0 = vunpack.c.l.b16 %v6120_v29  ;;  %v7181_v42 = vmul.f32 %v6531_v24, %v20235_v15  ;;  %v6292_v20 = vpack.c.b16 %v6256_v46, %v6255_v61 }
 0x8ea   :  { %v6960_v30 = vpop.f32.mrf.mxu0 }
 0x8eb   :  { %v17055_v43 = vadd.f32 %v7181_v42, %v16960_v4  ;;  %v7157_v3 = vmul.f32 %v6960_v30, %v20225_v12  ;;  %10811 = vmatmul.msk.bf16.gmra.mxu3 %vm966_vm12, %v6292_v20  ;;  %v4957_v59 = vpop.xlane.xlu0 %4956  ;;  %v6737_v63 = vpack.c.b16 %v6697_v0, %v6696_v23 }
 0x8ec   :  { %v5103_v5 = vsub.f32 %v16854_v17, %v4957_v59  ;;  %v5938_v17 = vmul.f32 %v11890_v27, %v16806_v58 }
 0x8ed   :  { %v17061_v60 = vadd.f32 %v7157_v3, %v16950_v51  ;;  %v5539_v29 = vpop.xlane.xlu2 %5538  ;;  %10839 = vmatmul.msk.bf16.gmra.mxu0 %vm966_vm12, %v6737_v63  ;;  %v5707_v51 = vpop.xlane.xlu1 %5706 }
 0x8ee   :  { %v17064_v46 = vpop.eup %11891  ;;  %v5349_v22 = vmul.f32 1.442695, %v5103_v5  ;;  %11893 = vrcp.f32 %v5539_v29  ;;  %v6066_v31 = vpack.c.bf16 %v5938_v17, %v5938_v17  ;;  %v17084_v17 = vpop.f32.mrf.mxu2 }
 0x8ef   :  { %v5558_v4 = vsel %vm966_vm12, %v17064_v46, 0.0 }
 0x8f0   :  { %11895 = vpow2.f32 %v5349_v22  ;;  %v17068_v42 = vpop.f32.mrf.mxu3  ;;  %5559 = vadd.xlane.f32.xlu1 %v5558_v4  ;;  %v6258_v58 = vunpack.c.l.b16 %v6066_v31 }
 0x8f1   :  { %11897 = vrcp.f32 %v5707_v51 }
 0x8f2   :  { %v17071_v1 = vpop.f32.mrf.mxu0 }
 0x8f4   :  { %v11894_v41 = vpop.eup %11893 }
 0x8f5   :  { %v5937_v61 = vmul.f32 %v11894_v41, %v16861_v52  ;;  %v4960_v47 = vpop.xlane.xlu2 %4959  ;;  %v5548_v52 = vpop.xlane.xlu1 %5547 }
 0x8f6   :  { %v17074_v24 = vpop.eup %11895  ;;  %v5104_v23 = vsub.f32 %v16874_v38, %v4960_v47 }
 0x8f7   :  { %v6065_v0 = vpack.c.bf16 %v5937_v61, %v5937_v61  ;;  %v5723_v20 = vsel %vm966_vm12, %v17074_v24, 0.0  ;;  %v11898_v4 = vpop.eup %11897 }
 0x8f8   :  { %v5351_v30 = vmul.f32 1.442695, %v5104_v23  ;;  %v6536_v3 = vpop.f32.mrf.mxu3  ;;  %5724 = vadd.xlane.f32.xlu1 %v5723_v20  ;;  %v5993_v41 = vmul.f32 %v11898_v4, %v16825_v28 }
 0x8f9   :  { %v6257_v59 = vunpack.c.l.b16 %v6065_v0  ;;  %v7183_v63 = vmul.f32 %v6536_v3, %v20235_v15 }
 0x8fa   :  { %11899 = vpow2.f32 %v5351_v30  ;;  %v6965_v5 = vpop.f32.mrf.mxu0 }
 0x8fb   :  { %v17081_v27 = vadd.f32 %v7183_v63, %v16979_v2  ;;  %v7159_v29 = vmul.f32 %v6965_v5, %v20225_v12  ;;  %v5710_v38 = vpop.xlane.xlu0 %5709  ;;  %v6293_v22 = vpack.c.b16 %v6258_v58, %v6257_v59  ;;  %v4982_v2 = vsel %vm966_vm12, %v17084_v17, -inf }
 0x8fc   :  { %11901 = vrcp.f32 %v5710_v38 }
 0x8fd   :  { %v17087_v51 = vadd.f32 %v7159_v29, %v16985_v39  ;;  %10812 = vmatmul.msk.bf16.gmra.mxu3 %vm966_vm12, %v6293_v22  ;;  %11903 = vrcp.f32 %v5548_v52  ;;  %v6121_v39 = vpack.c.bf16 %v5993_v41, %v5993_v41 }
 0x8ff   :  { %v6698_v5 = vunpack.c.l.b16 %v6121_v39 }
 0x900   :  { %v17093_v31 = vpop.eup %11899  ;;  %v17095_v61 = vpop.f32.mrf.mxu3  ;;  %4983 = vmax.xlane.f32.xlu1 %v4982_v2 }
 0x901   :  { %v5726_v47 = vsel %vm966_vm12, %v17093_v31, 0.0 }
 0x902   :  { %v11902_v23 = vpop.eup %11901  ;;  %v17099_v0 = vpop.f32.mrf.mxu0  ;;  %5727 = vadd.xlane.f32.xlu0 %v5726_v47 }
 0x903   :  { %v5994_v20 = vmul.f32 %v11902_v23, %v16890_v49  ;;  %v5545_v30 = vpop.xlane.xlu2 %5544  ;;  %v4963_v28 = vpop.xlane.xlu0 %4962 }
 0x904   :  { %v11904_v3 = vpop.eup %11903  ;;  %11905 = vrcp.f32 %v5545_v30  ;;  %v5105_v58 = vsub.f32 %v16892_v14, %v4963_v28 }
 0x905   :  { %v6122_v59 = vpack.c.bf16 %v5994_v20, %v5994_v20  ;;  %v5940_v52 = vmul.f32 %v11904_v3, %v16878_v44 }
 0x906   :  { %v5353_v63 = vmul.f32 1.442695, %v5105_v58 }
 0x907   :  { %v6699_v29 = vunpack.c.l.b16 %v6122_v59  ;;  %v6068_v49 = vpack.c.bf16 %v5940_v52, %v5940_v52 }
 0x908   :  { %11907 = vpow2.f32 %v5353_v63  ;;  %v6541_v38 = vpop.f32.mrf.mxu3 }
 0x909   :  { %v7185_v22 = vmul.f32 %v6541_v38, %v20235_v15  ;;  %v6738_v4 = vpack.c.b16 %v6699_v29, %v6698_v5  ;;  %v6260_v59 = vunpack.c.l.b16 %v6068_v49 }
 0x90a   :  { %v11906_v41 = vpop.eup %11905  ;;  %v6970_v2 = vpop.f32.mrf.mxu0 }
 0x90b   :  { %v5939_v47 = vmul.f32 %v11906_v41, %v16906_v19  ;;  %v17107_v23 = vadd.f32 %v7185_v22, %v17002_v33  ;;  %v7161_v14 = vmul.f32 %v6970_v2, %v20225_v12  ;;  %10840 = vmatmul.msk.bf16.gmra.mxu0 %vm966_vm12, %v6738_v4  ;;  %v5716_v39 = vpop.xlane.xlu0 %5715  ;;  %v4966_v44 = vpop.xlane.xlu2 %4965  ;;  %v20237_v2 = vld [vmem:[#allocation49_spill] sm:$0xff] }
 0x90c   :  { %v5106_v20 = vsub.f32 %v16912_v57, %v4966_v44 }
 0x90d   :  { %v6067_v30 = vpack.c.bf16 %v5939_v47, %v5939_v47  ;;  %v17113_v28 = vadd.f32 %v7161_v14, %v17005_v16 }
 0x90e   :  { %v17115_v3 = vpop.eup %11907  ;;  %v5355_v58 = vmul.f32 1.442695, %v5106_v20 }
 0x90f   :  { %v6259_v19 = vunpack.c.l.b16 %v6067_v30  ;;  %v5729_v33 = vsel %vm966_vm12, %v17115_v3, 0.0 }
 0x910   :  { %11909 = vpow2.f32 %v5355_v58  ;;  %v17119_v63 = vpop.f32.mrf.mxu3  ;;  %5730 = vadd.xlane.f32.xlu0 %v5729_v33 }
 0x911   :  { %v6294_v5 = vpack.c.b16 %v6260_v59, %v6259_v19  ;;  %11911 = vrcp.f32 %v5716_v39 }
 0x912   :  { %v17121_v52 = vpop.f32.mrf.mxu0 }
 0x913   :  { %10813 = vmatmul.msk.bf16.gmra.mxu3 %vm966_vm12, %v6294_v5  ;;  %v5551_v57 = vpop.xlane.xlu2 %5550  ;;  %v4969_v16 = vpop.xlane.xlu0 %4968 }
 0x914   :  { %v5107_v29 = vsub.f32 %v16928_v9, %v4969_v16 }
 0x916   :  { %v17125_v38 = vpop.eup %11909  ;;  %v5357_v22 = vmul.f32 1.442695, %v5107_v29 }
 0x917   :  { %v5732_v4 = vsel %vm966_vm12, %v17125_v38, 0.0  ;;  %v11912_v30 = vpop.eup %11911 }
 0x918   :  { %11913 = vpow2.f32 %v5357_v22  ;;  %v6546_v41 = vpop.f32.mrf.mxu3  ;;  %5733 = vadd.xlane.f32.xlu2 %v5732_v4  ;;  %v5996_v5 = vmul.f32 %v11912_v30, %v16922_v10 }
 0x919   :  { %v7211_v49 = vmul.f32 %v6546_v41, %v20237_v2 }
 0x91a   :  { %v6975_v47 = vpop.f32.mrf.mxu0  ;;  %v6124_v29 = vpack.c.bf16 %v5996_v5, %v5996_v5 }
 0x91b   :  { %v17131_v14 = vadd.f32 %v7211_v49, %v17031_v11  ;;  %v7187_v44 = vmul.f32 %v6975_v47, %v20235_v15  ;;  %v4972_v20 = vpop.xlane.xlu2 %4971 }
 0x91c   :  { %v5108_v9 = vsub.f32 %v16947_v25, %v4972_v20 }
 0x91d   :  { %v17136_v39 = vadd.f32 %v7187_v44, %v17035_v40  ;;  %v5713_v58 = vpop.xlane.xlu1 %5712  ;;  %v6701_v44 = vunpack.c.l.b16 %v6124_v29 }
 0x91e   :  { %v17138_v59 = vpop.eup %11913  ;;  %v5359_v19 = vmul.f32 1.442695, %v5108_v9  ;;  %11915 = vrcp.f32 %v5713_v58 }
 0x91f   :  { %v5735_v33 = vsel %vm966_vm12, %v17138_v59, 0.0 }
 0x920   :  { %11917 = vpow2.f32 %v5359_v19  ;;  %v17142_v11 = vpop.f32.mrf.mxu3  ;;  %5736 = vadd.xlane.f32.xlu1 %v5735_v33 }
 0x922   :  { %v17145_v16 = vpop.f32.mrf.mxu0 }
 0x924   :  { %v11916_v25 = vpop.eup %11915 }
 0x925   :  { %v5995_v40 = vmul.f32 %v11916_v25, %v16957_v13  ;;  %v5722_v22 = vpop.xlane.xlu0 %5721 }
 0x926   :  { %v17148_v4 = vpop.eup %11917 }
 0x927   :  { %v6123_v41 = vpack.c.bf16 %v5995_v40, %v5995_v40  ;;  %v5738_v49 = vsel %vm966_vm12, %v17148_v4, 0.0 }
 0x928   :  { %v6551_v47 = vpop.f32.mrf.mxu3  ;;  %5739 = vadd.xlane.f32.xlu0 %v5738_v49 }
 0x929   :  { %v6700_v20 = vunpack.c.l.b16 %v6123_v41  ;;  %v7213_v9 = vmul.f32 %v6551_v47, %v20237_v2 }
 0x92a   :  { %v6980_v10 = vpop.f32.mrf.mxu0 }
 0x92b   :  { %v17154_v30 = vadd.f32 %v7213_v9, %v17055_v43  ;;  %v7189_v58 = vmul.f32 %v6980_v10, %v20235_v15  ;;  %v6739_v13 = vpack.c.b16 %v6701_v44, %v6700_v20 }
 0x92d   :  { %v17158_v19 = vadd.f32 %v7189_v58, %v17061_v60  ;;  %10841 = vmatmul.msk.bf16.gmra.mxu0 %vm966_vm12, %v6739_v13  ;;  %v4975_v33 = vpop.xlane.xlu0 %4974 }
 0x92e   :  { %v5109_v5 = vsub.f32 %v16975_v34, %v4975_v33 }
 0x930   :  { %v5361_v25 = vmul.f32 1.442695, %v5109_v5 }
 0x932   :  { %11919 = vpow2.f32 %v5361_v25  ;;  %v17166_v41 = vpop.f32.mrf.mxu0 }
 0x933   :  { %11921 = vrcp.f32 %v5551_v57 }
 0x938   :  { %v17162_v29 = vpop.eup %11919 }
 0x939   :  { %v5741_v40 = vsel %vm966_vm12, %v17162_v29, 0.0  ;;  %v11922_v20 = vpop.eup %11921 }
 0x93a   :  { %5742 = vadd.xlane.f32.xlu2 %v5741_v40  ;;  %v5941_v5 = vmul.f32 %v11922_v20, %v16935_v21 }
 0x93c   :  { %v6069_v40 = vpack.c.bf16 %v5941_v5, %v5941_v5 }
 0x93d   :  { %v5557_v43 = vpop.xlane.xlu2 %5556 }
 0x93e   :  { %v6261_v21 = vunpack.c.l.b16 %v6069_v40 }
 0x945   :  { %v4978_v49 = vpop.xlane.xlu2 %4977 }
 0x946   :  { %v5110_v60 = vsub.f32 %v17007_v50, %v4978_v49  ;;  %v17177_v50 = vpop.f32.mrf.mxu3 }
 0x948   :  { %v5363_v47 = vmul.f32 1.442695, %v5110_v60 }
 0x94a   :  { %11923 = vpow2.f32 %v5363_v47  ;;  %v6985_v44 = vpop.f32.mrf.mxu0 }
 0x94b   :  { %v7191_v34 = vmul.f32 %v6985_v44, %v20235_v15 }
 0x94d   :  { %v17171_v9 = vadd.f32 %v7191_v34, %v17087_v51  ;;  %v5554_v10 = vpop.xlane.xlu1 %5553  ;;  %v4981_v58 = vpop.xlane.xlu2 %4980 }
 0x94e   :  { %11925 = vrcp.f32 %v5554_v10  ;;  %v5111_v13 = vsub.f32 %v17019_v56, %v4981_v58 }
 0x94f   :  { %11927 = vrcp.f32 %v5722_v22 }
 0x950   :  { %v17174_v33 = vpop.eup %11923  ;;  %v5365_v57 = vmul.f32 1.442695, %v5111_v13 }
 0x951   :  { %v5744_v25 = vsel %vm966_vm12, %v17174_v33, 0.0 }
 0x952   :  { %11929 = vpow2.f32 %v5365_v57  ;;  %5745 = vadd.xlane.f32.xlu1 %v5744_v25 }
 0x954   :  { %v11926_v51 = vpop.eup %11925 }
 0x955   :  { %v5942_v49 = vmul.f32 %v11926_v51, %v17023_v45  ;;  %v5719_v60 = vpop.xlane.xlu1 %5718  ;;  %v11928_v47 = vpop.eup %11927 }
 0x956   :  { %11931 = vrcp.f32 %v5719_v60  ;;  %v5998_v34 = vmul.f32 %v11928_v47, %v16967_v55 }
 0x957   :  { %v6070_v56 = vpack.c.bf16 %v5942_v49, %v5942_v49  ;;  %11933 = vrcp.f32 %v5557_v43  ;;  %v17193_v49 = vpop.f32.mrf.mxu0 }
 0x958   :  { %v17182_v44 = vpop.eup %11929  ;;  %v6556_v22 = vpop.f32.mrf.mxu3  ;;  %v6126_v57 = vpack.c.bf16 %v5998_v34, %v5998_v34 }
 0x959   :  { %v6262_v20 = vunpack.c.l.b16 %v6070_v56  ;;  %v7215_v10 = vmul.f32 %v6556_v22, %v20237_v2  ;;  %v5747_v58 = vsel %vm966_vm12, %v17182_v44, 0.0 }
 0x95a   :  { %5748 = vadd.xlane.f32.xlu0 %v5747_v58  ;;  %v6703_v55 = vunpack.c.l.b16 %v6126_v57 }
 0x95b   :  { %v17189_v13 = vadd.f32 %v7215_v10, %v17081_v27  ;;  %v6295_v45 = vpack.c.b16 %v6262_v20, %v6261_v21  ;;  %v11301_v27 = vld [vmem:[%s19299_s14 + $0x8] sm:$0xff] }
 0x95c   :  { %v11932_v5 = vpop.eup %11931  ;;  %7349 = vmatpush.bf16.msra.mxu1 %v11301_v27 }
 0x95d   :  { %v5997_v25 = vmul.f32 %v11932_v5, %v17038_v53  ;;  %10814 = vmatmul.msk.bf16.gmra.mxu3 %vm966_vm12, %v6295_v45  ;;  %v11934_v56 = vpop.eup %11933 }
 0x95e   :  { %v5943_v43 = vmul.f32 %v11934_v56, %v16994_v54 }
 0x95f   :  { %v6125_v51 = vpack.c.bf16 %v5997_v25, %v5997_v25 }
 0x960   :  { %v17199_v53 = vpop.f32.mrf.mxu3  ;;  %v6071_v34 = vpack.c.bf16 %v5943_v43, %v5943_v43  ;;  %v11311_v43 = vld [vmem:[%s19300_s17 + $0x38] sm:$0xff] }
 0x961   :  { %v6702_v40 = vunpack.c.l.b16 %v6125_v51  ;;  %8500 = vmatpush.bf16.msra.mxu2 %v11311_v43  ;;  %v7148_v43 = vmul.f32 %v16937_v8, %v20225_v12 }
 0x962   :  { %v6263_v25 = vunpack.c.l.b16 %v6071_v34 }
 0x963   :  { %v5560_v60 = vpop.xlane.xlu1 %5559  ;;  %v6740_v47 = vpack.c.b16 %v6703_v55, %v6702_v40 }
 0x964   :  { %11935 = vrcp.f32 %v5560_v60 }
 0x965   :  { %10842 = vmatmul.msk.bf16.gmra.mxu0 %vm966_vm12, %v6740_v47 }
 0x96a   :  { %v11936_v21 = vpop.eup %11935  ;;  %v6990_v22 = vpop.f32.mrf.mxu0 }
 0x96b   :  { %v5944_v20 = vmul.f32 %v11936_v21, %v17064_v46  ;;  %v7193_v10 = vmul.f32 %v6990_v22, %v20235_v15  ;;  %v5725_v58 = vpop.xlane.xlu1 %5724  ;;  %v20239_v22 = vld [vmem:[#allocation83_spill] sm:$0xff] }
 0x96c   :  { %11937 = vrcp.f32 %v5725_v58  ;;  %v20241_v58 = vld [vmem:[#allocation65_spill] sm:$0xff] }
 0x96d   :  { %v6072_v45 = vpack.c.bf16 %v5944_v20, %v5944_v20  ;;  %v17205_v5 = vadd.f32 %v7193_v10, %v17113_v28  ;;  %v11300_v28 = vld [vmem:[%s19299_s14] sm:$0xff]  ;;  %v20240_v10 = vld [vmem:[#allocation52_spill] sm:$0xff] }
 0x96e   :  { %v6561_v57 = vpop.f32.mrf.mxu3  ;;  %7350 = vmatpush.bf16.msra.mxu1 %v11300_v28 }
 0x96f   :  { %v6264_v51 = vunpack.c.l.b16 %v6072_v45  ;;  %v7217_v55 = vmul.f32 %v6561_v57, %v20237_v2  ;;  %v7036_v45 = vmul.f32 %v20241_v58, %v20240_v10  ;;  %v20242_v57 = vld [vmem:[#allocation55_spill] sm:$0xff] }
 0x971   :  { %v17209_v54 = vadd.f32 %v7217_v55, %v17107_v23  ;;  %v6296_v40 = vpack.c.b16 %v6264_v51, %v6263_v25  ;;  %v7084_v25 = vmul.f32 %v20242_v57, %v20182_v36 }
 0x972   :  { %v11938_v27 = vpop.eup %11937 }
 0x973   :  { %10815 = vmatmul.msk.bf16.gmra.mxu3 %vm966_vm12, %v6296_v40  ;;  %v4984_v46 = vpop.xlane.xlu1 %4983  ;;  %v5999_v21 = vmul.f32 %v11938_v27, %v17074_v24  ;;  %v7116_v24 = vmul.f32 %v16765_v6, %v20211_v18  ;;  %v17235_v27 = vpop.f32.mrf.mxu0 }
 0x974   :  { %v5112_v60 = vsub.f32 %v17084_v17, %v4984_v46  ;;  %v20238_v17 = vld [vmem:[#allocation22_spill] sm:$0xff] }
 0x975   :  { %v5728_v47 = vpop.xlane.xlu0 %5727  ;;  %v7052_v34 = vmul.f32 %v20239_v22, %v20238_v17  ;;  %v6127_v51 = vpack.c.bf16 %v5999_v21, %v5999_v21 }
 0x976   :  { %v5367_v56 = vmul.f32 1.442695, %v5112_v60  ;;  %11939 = vrcp.f32 %v5728_v47  ;;  %v17219_v23 = vpop.f32.mrf.mxu3 }
 0x977   :  { %v7068_v46 = vadd.f32 %v7052_v34, %v7036_v45  ;;  %v6704_v21 = vunpack.c.l.b16 %v6127_v51  ;;  %v7180_v34 = vmul.f32 %v17040_v26, %v20235_v15  ;;  %v7212_v45 = vmul.f32 %v17142_v11, %v20237_v2 }
 0x978   :  { %11941 = vpow2.f32 %v5367_v56 }
 0x979   :  { %v7100_v28 = vadd.f32 %v7084_v25, %v7068_v46  ;;  %v20243_v25 = vld [vmem:[#allocation23_spill] sm:$0xff] }
 0x97b   :  { %v7132_v22 = vadd.f32 %v7116_v24, %v7100_v28 }
 0x97c   :  { %v11940_v20 = vpop.eup %11939 }
 0x97d   :  { %v6000_v55 = vmul.f32 %v11940_v20, %v17093_v31  ;;  %v7164_v58 = vadd.f32 %v7148_v43, %v7132_v22 }
 0x97e   :  { %v17229_v40 = vpop.eup %11941 }
 0x97f   :  { %v6128_v60 = vpack.c.bf16 %v6000_v55, %v6000_v55  ;;  %v5750_v47 = vsel %vm966_vm12, %v17229_v40, 0.0  ;;  %v7196_v57 = vadd.f32 %v7180_v34, %v7164_v58 }
 0x980   :  { %v6566_v56 = vpop.f32.mrf.mxu3  ;;  %5751 = vadd.xlane.f32.xlu2 %v5750_v47 }
 0x981   :  { %v6705_v31 = vunpack.c.l.b16 %v6128_v60  ;;  %v7243_v55 = vmul.f32 %v6566_v56, %v20243_v25  ;;  %v7228_v51 = vadd.f32 %v7212_v45, %v7196_v57  ;;  %v20244_v56 = vld [vmem:[#allocation70_spill] sm:$0xff] }
 0x982   :  { %v7054_v22 = vmul.f32 %v20244_v56, %v20238_v17 }
 0x983   :  { %v5731_v20 = vpop.xlane.xlu0 %5730  ;;  %v6741_v6 = vpack.c.b16 %v6705_v31, %v6704_v21  ;;  %v7259_v26 = vadd.f32 %v7243_v55, %v17131_v14  ;;  %v20246_v14 = vld [vmem:[#allocation102_spill] sm:$0xff] }
 0x984   :  { %11943 = vrcp.f32 %v5731_v20  ;;  %v20245_v20 = vld [vmem:[#allocation78_spill] sm:$0xff]  ;;  %v7086_v58 = vmul.f32 %v20246_v14, %v20182_v36 }
 0x985   :  { %10843 = vmatmul.msk.bf16.gmra.mxu0 %vm966_vm12, %v6741_v6  ;;  %v7038_v6 = vmul.f32 %v20245_v20, %v20240_v10 }
 0x987   :  { %v7070_v55 = vadd.f32 %v7054_v22, %v7038_v6 }
 0x988   :  { %v6568_v46 = vpop.f32.mrf.mxu3  ;;  %v6995_v8 = vpop.f32.mrf.mxu0 }
 0x989   :  { %v7244_v24 = vmul.f32 %v6568_v46, %v20243_v25  ;;  %v7219_v60 = vmul.f32 %v6995_v8, %v20237_v2 }
 0x98a   :  { %v11944_v43 = vpop.eup %11943 }
 0x98b   :  { %v7260_v47 = vadd.f32 %v7244_v24, %v7228_v51  ;;  %v17249_v28 = vadd.f32 %v7219_v60, %v17136_v39  ;;  %v5734_v11 = vpop.xlane.xlu2 %5733  ;;  %v6001_v31 = vmul.f32 %v11944_v43, %v17115_v3  ;;  %v7118_v3 = vmul.f32 %v16804_v35, %v20211_v18 }
 0x98c   :  { %11945 = vrcp.f32 %v5734_v11  ;;  %v7102_v51 = vadd.f32 %v7086_v58, %v7070_v55  ;;  %v7150_v24 = vmul.f32 %v16965_v37, %v20225_v12  ;;  %v7182_v11 = vmul.f32 %v17068_v42, %v20235_v15 }
 0x98d   :  { %v7275_v21 = vpack.c.bf16 %v7260_v47, %v7259_v26  ;;  %v6129_v39 = vpack.c.bf16 %v6001_v31, %v6001_v31 }
 0x98e   :  { %v7134_v47 = vadd.f32 %v7118_v3, %v7102_v51 }
 0x98f   :  { %10864 = vmatmul.msk.bf16.vlgmr.msra.gmra.mxu1 %vm966_vm12, %v7275_v21  ;;  %v6706_v60 = vunpack.c.l.b16 %v6129_v39  ;;  %v7214_v21 = vmul.f32 %v17177_v50, %v20237_v2 }
 0x990   :  { %v17273_v39 = vpop.f32.mrf.mxu0 }
 0x992   :  { %v11946_v34 = vpop.eup %11945 }
 0x993   :  { %v6002_v45 = vmul.f32 %v11946_v34, %v17125_v38  ;;  %v5737_v57 = vpop.xlane.xlu1 %5736  ;;  %v7166_v38 = vadd.f32 %v7150_v24, %v7134_v47  ;;  %v11310_v24 = vld [vmem:[%s19300_s17 + $0x30] sm:$0xff] }
 0x994   :  { %11947 = vrcp.f32 %v5737_v57  ;;  %8501 = vmatpush.bf16.msra.mxu2 %v11310_v24 }
 0x995   :  { %v6130_v46 = vpack.c.bf16 %v6002_v45, %v6002_v45  ;;  %v7198_v56 = vadd.f32 %v7182_v11, %v7166_v38 }
 0x996   :  { %v6571_v8 = vpop.f32.mrf.mxu3 }
 0x997   :  { %v6707_v26 = vunpack.c.l.b16 %v6130_v46  ;;  %v7245_v22 = vmul.f32 %v6571_v8, %v20243_v25  ;;  %v7230_v34 = vadd.f32 %v7214_v21, %v7198_v56 }
 0x999   :  { %v6742_v43 = vpack.c.b16 %v6707_v26, %v6706_v60  ;;  %v7261_v42 = vadd.f32 %v7245_v22, %v17154_v30  ;;  %v20247_v22 = vld [vmem:[#allocation48_spill] sm:$0xff] }
 0x99a   :  { %v11948_v35 = vpop.eup %11947 }
 0x99b   :  { %v5740_v31 = vpop.xlane.xlu0 %5739  ;;  %10844 = vmatmul.msk.bf16.gmra.mxu0 %vm966_vm12, %v6742_v43  ;;  %v6003_v20 = vmul.f32 %v11948_v35, %v17138_v59 }
 0x99c   :  { %11949 = vrcp.f32 %v5740_v31 }
 0x99d   :  { %v6131_v50 = vpack.c.bf16 %v6003_v20, %v6003_v20 }
 0x99e   :  { %v6573_v37 = vpop.f32.mrf.mxu3 }
 0x99f   :  { %v7246_v6 = vmul.f32 %v6573_v37, %v20243_v25  ;;  %v6708_v3 = vunpack.c.l.b16 %v6131_v50  ;;  %v7056_v37 = vmul.f32 %v20247_v22, %v20238_v17  ;;  %v7152_v50 = vmul.f32 %v16989_v7, %v20225_v12 }
 0x9a0   :  { %v7122_v22 = vmul.f32 %v16896_v32, %v20211_v18 }
 0x9a1   :  { %v7262_v14 = vadd.f32 %v7246_v6, %v7230_v34  ;;  %v20248_v34 = vld [vmem:[#allocation74_spill] sm:$0xff] }
 0x9a2   :  { %v11950_v58 = vpop.eup %11949  ;;  %v7040_v20 = vmul.f32 %v20248_v34, %v20240_v10 }
 0x9a3   :  { %v6004_v45 = vmul.f32 %v11950_v58, %v17148_v4  ;;  %v7276_v57 = vpack.c.bf16 %v7262_v14, %v7261_v42 }
 0x9a4   :  { %v7072_v42 = vadd.f32 %v7056_v37, %v7040_v20  ;;  %v7154_v20 = vmul.f32 %v17012_v48, %v20225_v12 }
 0x9a5   :  { %v6132_v55 = vpack.c.bf16 %v6004_v45, %v6004_v45  ;;  %10865 = vmatmul.msk.bf16.gmra.mxu1 %vm966_vm12, %v7276_v57 }
 0x9a7   :  { %v6709_v46 = vunpack.c.l.b16 %v6132_v55  ;;  %v7184_v55 = vmul.f32 %v17095_v61, %v20235_v15 }
 0x9a9   :  { %v6743_v8 = vpack.c.b16 %v6709_v46, %v6708_v3 }
 0x9aa   :  { %v7000_v51 = vpop.f32.mrf.mxu0 }
 0x9ab   :  { %v7221_v59 = vmul.f32 %v7000_v51, %v20237_v2  ;;  %10845 = vmatmul.msk.bf16.gmra.mxu0 %vm966_vm12, %v6743_v8  ;;  %v7216_v8 = vmul.f32 %v17199_v53, %v20237_v2 }
 0x9ad   :  { %v17280_v30 = vadd.f32 %v7221_v59, %v17158_v19  ;;  %v5743_v4 = vpop.xlane.xlu2 %5742 }
 0x9ae   :  { %11951 = vrcp.f32 %v5743_v4 }
 0x9b2   :  { %v17288_v56 = vpop.f32.mrf.mxu0 }
 0x9b4   :  { %v11952_v26 = vpop.eup %11951 }
 0x9b5   :  { %v6005_v47 = vmul.f32 %v11952_v26, %v17162_v29  ;;  %v20249_v29 = vld [vmem:[#allocation15_spill] sm:$0xff] }
 0x9b6   :  { %v7088_v6 = vmul.f32 %v20249_v29, %v20182_v36 }
 0x9b7   :  { %v6133_v43 = vpack.c.bf16 %v6005_v47, %v6005_v47 }
 0x9b8   :  { %v7104_v58 = vadd.f32 %v7088_v6, %v7072_v42  ;;  %v7186_v42 = vmul.f32 %v17119_v63, %v20235_v15  ;;  %v11327_v63 = vld [vmem:[%s19300_s17 + $0xb8] sm:$0xff] }
 0x9b9   :  { %v6710_v31 = vunpack.c.l.b16 %v6133_v43  ;;  %v20251_v43 = vld [vmem:[#allocation91_spill] sm:$0xff]  ;;  %8598 = vmatpush.bf16.msrb.mxu0 %v11327_v63 }
 0x9c5   :  { %v5746_v60 = vpop.xlane.xlu1 %5745 }
 0x9c6   :  { %11953 = vrcp.f32 %v5746_v60 }
 0x9cc   :  { %v11954_v11 = vpop.eup %11953 }
 0x9cd   :  { %v6006_v38 = vmul.f32 %v11954_v11, %v17174_v33  ;;  %v7120_v33 = vmul.f32 %v16846_v62, %v20211_v18  ;;  %v5749_v60 = vpop.xlane.xlu0 %5748  ;;  %v11319_v11 = vld [vmem:[%s19300_s17 + $0x78] sm:$0xff] }
 0x9ce   :  { %11955 = vrcp.f32 %v5749_v60  ;;  %8549 = vmatpush.bf16.msra.mxu3 %v11319_v11  ;;  %v20253_v11 = vld [vmem:[#allocation37_spill] sm:$0xff] }
 0x9cf   :  { %v6134_v21 = vpack.c.bf16 %v6006_v38, %v6006_v38  ;;  %v7136_v57 = vadd.f32 %v7120_v33, %v7104_v58  ;;  %v7042_v38 = vmul.f32 %v20251_v43, %v20240_v10 }
 0x9d1   :  { %v6711_v19 = vunpack.c.l.b16 %v6134_v21  ;;  %v7168_v46 = vadd.f32 %v7152_v50, %v7136_v57  ;;  %v20252_v21 = vld [vmem:[#allocation75_spill] sm:$0xff]  ;;  %v7218_v50 = vmul.f32 %v17219_v23, %v20237_v2 }
 0x9d3   :  { %v6744_v35 = vpack.c.b16 %v6711_v19, %v6710_v31  ;;  %v7200_v62 = vadd.f32 %v7184_v55, %v7168_v46  ;;  %v7090_v31 = vmul.f32 %v20252_v21, %v20182_v36 }
 0x9d4   :  { %v11956_v19 = vpop.eup %11955 }
 0x9d5   :  { %10846 = vmatmul.msk.bf16.gmra.mxu0 %vm966_vm12, %v6744_v35  ;;  %v7232_v4 = vadd.f32 %v7216_v8, %v7200_v62  ;;  %v6007_v29 = vmul.f32 %v11956_v19, %v17182_v44  ;;  %v11309_v44 = vld [vmem:[%s19300_s17 + $0x28] sm:$0xff] }
 0x9d6   :  { %8502 = vmatpush.bf16.msra.mxu2 %v11309_v44 }
 0x9e0   :  { %v6576_v14 = vpop.f32.mrf.mxu3 }
 0x9e1   :  { %v7247_v59 = vmul.f32 %v6576_v14, %v20243_v25 }
 0x9e2   :  { %v7005_v45 = vpop.f32.mrf.mxu0 }
 0x9e3   :  { %v7223_v3 = vmul.f32 %v7005_v45, %v20237_v2  ;;  %v7263_v26 = vadd.f32 %v7247_v59, %v17189_v13  ;;  %v6135_v45 = vpack.c.bf16 %v6007_v29, %v6007_v29 }
 0x9e5   :  { %v17306_v51 = vadd.f32 %v7223_v3, %v17171_v9  ;;  %v20250_v9 = vld [vmem:[#allocation47_spill] sm:$0xff]  ;;  %v6712_v8 = vunpack.c.l.b16 %v6135_v45 }
 0x9e6   :  { %v7058_v53 = vmul.f32 %v20250_v9, %v20238_v17  ;;  %v20254_v9 = vmax.f32 %v20253_v11, 0.0 }
 0x9e8   :  { %v6578_v24 = vpop.f32.mrf.mxu3  ;;  %v7074_v35 = vadd.f32 %v7058_v53, %v7042_v38  ;;  %v20256_v38 = vld [vmem:[#allocation93_spill] sm:$0xff] }
 0x9e9   :  { %v7248_v7 = vmul.f32 %v6578_v24, %v20243_v25  ;;  %v7060_v21 = vmul.f32 %v20256_v38, %v20238_v17 }
 0x9ea   :  { %v7106_v34 = vadd.f32 %v7090_v31, %v7074_v35  ;;  %v17328_v14 = vpop.f32.mrf.mxu0  ;;  %v20258_v35 = vld [vmem:[#allocation96_spill] sm:$0xff] }
 0x9eb   :  { %v7264_v61 = vadd.f32 %v7248_v7, %v7232_v4 }
 0x9ec   :  { %v7138_v6 = vadd.f32 %v7122_v22, %v7106_v34  ;;  %v7092_v22 = vmul.f32 %v20258_v35, %v20182_v36 }
 0x9ed   :  { %v7277_v47 = vpack.c.bf16 %v7264_v61, %v7263_v26  ;;  %v17351_v61 = vld [vmem:[%s19301_s15] ss:$0 sm:$0xff] }
 0x9ee   :  { %v7170_v58 = vadd.f32 %v7154_v20, %v7138_v6 }
 0x9ef   :  { %10866 = vmatmul.msk.bf16.gmra.mxu1 %vm966_vm12, %v7277_v47 }
 0x9f0   :  { %v7202_v57 = vadd.f32 %v7186_v42, %v7170_v58  ;;  %v20259_v42 = vld [vmem:[#allocation100_spill] sm:$0xff] }
 0x9f2   :  { %v7234_v46 = vadd.f32 %v7218_v50, %v7202_v57  ;;  %v20260_v50 = vld [vmem:[#allocation36_spill] sm:$0xff] }
 0x9f3   :  { %v5752_v13 = vpop.xlane.xlu2 %5751  ;;  %v20261_v45 = vmax.f32 %v20260_v50, 0.0 }
 0x9f4   :  { %11957 = vrcp.f32 %v5752_v13  ;;  %v20257_v13 = vld [vmem:[#allocation82_spill] sm:$0xff] }
 0x9f5   :  { %v7044_v19 = vmul.f32 %v20257_v13, %v20240_v10 }
 0x9f6   :  { %v6581_v37 = vpop.f32.mrf.mxu3 }
 0x9f7   :  { %v7249_v48 = vmul.f32 %v6581_v37, %v20243_v25  ;;  %v7076_v6 = vadd.f32 %v7060_v21, %v7044_v19 }
 0x9f9   :  { %v7108_v57 = vadd.f32 %v7092_v22, %v7076_v6  ;;  %v11318_v6 = vld [vmem:[%s19300_s17 + $0x70] sm:$0xff] }
 0x9fa   :  { %v11958_v33 = vpop.eup %11957  ;;  %8550 = vmatpush.bf16.msra.mxu3 %v11318_v6 }
 0x9fb   :  { %v6008_v32 = vmul.f32 %v11958_v33, %v17229_v40  ;;  %v7265_v40 = vadd.f32 %v7249_v48, %v17209_v54  ;;  %v7124_v33 = vmul.f32 %v20259_v42, %v20211_v18  ;;  %v11308_v42 = vld [vmem:[%s19300_s17 + $0x20] sm:$0xff] }
 0x9fc   :  { %8503 = vmatpush.bf16.msra.mxu2 %v11308_v42 }
 0x9fd   :  { %v6136_v55 = vpack.c.bf16 %v6008_v32, %v6008_v32 }
 0x9fe   :  { %v6583_v3 = vpop.f32.mrf.mxu3 }
 0x9ff   :  { %v6713_v62 = vunpack.c.l.b16 %v6136_v55  ;;  %v7250_v23 = vmul.f32 %v6583_v3, %v20243_v25  ;;  %v20263_v55 = vld [vmem:[#allocation87_spill] sm:$0xff] }
 0xa00   :  { %v7156_v48 = vmul.f32 %v20263_v55, %v20225_v12 }
 0xa01   :  { %v7266_v59 = vadd.f32 %v7250_v23, %v7234_v46  ;;  %v6745_v24 = vpack.c.b16 %v6713_v62, %v6712_v8  ;;  %v7140_v8 = vadd.f32 %v7124_v33, %v7108_v57  ;;  %v7188_v62 = vmul.f32 %v17145_v16, %v20235_v15  ;;  %v20266_v57 = vld [vmem:[#allocation92_spill] sm:$0xff] }
 0xa02   :  { %v7010_v4 = vpop.f32.mrf.mxu0  ;;  %v7062_v55 = vmul.f32 %v20266_v57, %v20238_v17 }
 0xa03   :  { %v7278_v7 = vpack.c.bf16 %v7266_v59, %v7265_v40  ;;  %v7225_v60 = vmul.f32 %v7010_v4, %v20237_v2  ;;  %10847 = vmatmul.msk.bf16.gmra.mxu0 %vm966_vm12, %v6745_v24 }
 0xa05   :  { %v17345_v26 = vadd.f32 %v7225_v60, %v17205_v5  ;;  %10867 = vmatmul.msk.bf16.gmra.mxu1 %vm966_vm12, %v7278_v7  ;;  %v7172_v7 = vadd.f32 %v7156_v48, %v7140_v8  ;;  %v7220_v60 = vmul.f32 %v17273_v39, %v20237_v2  ;;  %v20268_v8 = vld [vmem:[#allocation46_spill] sm:$0xff] }
 0xa0a   :  { %v17358_v43 = vpop.f32.mrf.mxu0 }
 0xa0c   :  { %v7352_v47 = vpop.f32.mrf.mxu1 }
 0xa0d   :  { %v7353_v54 = vadd.f32 %v17351_v61, %v7352_v47 }
 0xa0f   :  { %v17356_v53 = vadd.f32 %v7353_v54, %v20254_v9  ;;  %v7204_v9 = vadd.f32 %v7188_v62, %v7172_v7  ;;  %v20269_v62 = vmax.f32 %v20268_v8, 0.0 }
 0xa11   :  { %20255 = vst [vmem:[#allocation21_spill] sm:$0xff] %v17356_v53  ;;  %v7408_v5 = vpack.c.bf16 %v17356_v53, %v17356_v53  ;;  %v7236_v13 = vadd.f32 %v7220_v60, %v7204_v9  ;;  %v20272_v9 = vld [vmem:[#allocation60_spill] sm:$0xff] }
 0xa13   :  { %v7425_v31 = vshrl.u32 %v7408_v5, 16  ;;  %v7428_v20 = vshll.u32 %v7408_v5, 16 }
 0xa14   :  { %v7354_v37 = vpop.f32.mrf.mxu1 }
 0xa15   :  { %v7427_v34 = vrot.slane %v7425_v31, 7  ;;  %v7355_v29 = vadd.f32 %v17351_v61, %v7354_v37 }
 0xa17   :  { %v7430_v58 = vor.u32 %v7428_v20, %v7427_v34  ;;  %v17373_v32 = vadd.f32 %v7355_v29, %v20261_v45 }
 0xa18   :  { %v7015_v44 = vpop.f32.mrf.mxu0 }
 0xa19   :  { %20262 = vst [vmem:[#allocation107_spill] sm:$0xff] %v17373_v32  ;;  %v7552_v3 = vsel %vm12130_vm2, 0, %v7430_v58  ;;  %v7409_v46 = vpack.c.bf16 %v17373_v32, %v17373_v32  ;;  %v7251_v38 = vmul.f32 %v7015_v44, %v20243_v25  ;;  %v20267_v44 = vld [vmem:[#allocation80_spill] sm:$0xff] }
 0xa1a   :  { %v7568_v40 = vsel %vm12134_vm5, %v7552_v3, 0  ;;  %v7046_v3 = vmul.f32 %v20267_v44, %v20240_v10 }
 0xa1b   :  { %v17385_v59 = vunpack.c.l.b16 %v7568_v40  ;;  %v7599_v24 = vunpack.c.h.b16 %v7568_v40  ;;  %v7432_v4 = vshrl.u32 %v7409_v46, 16  ;;  %v7435_v11 = vshll.u32 %v7409_v46, 16 }
 0xa1c   :  { %v7267_v58 = vadd.f32 %v7251_v38, %v17249_v28 }
 0xa1d   :  { %v17391_v47 = vpack.c.b16 %v17385_v59, %v17385_v59  ;;  %v7434_v54 = vrot.slane %v7432_v4, 7  ;;  %v17393_v5 = vpack.c.b16 %v7599_v24, %v7599_v24  ;;  %v20271_v24 = vld [vmem:[#allocation28_spill] sm:$0xff] }
 0xa1e   :  { %v7094_v28 = vmul.f32 %v20271_v24, %v20182_v36 }
 0xa1f   :  { %v7437_v16 = vor.u32 %v7435_v11, %v7434_v54  ;;  %v7655_v21 = vshrl.u32 %v17391_v47, 16  ;;  %v7658_v31 = vshll.u32 %v17391_v47, 16  ;;  %v7664_v29 = vshll.u32 %v17393_v5, 16 }
 0xa20   :  { %v7017_v19 = vpop.f32.mrf.mxu0  ;;  %v7078_v11 = vadd.f32 %v7062_v55, %v7046_v3 }
 0xa21   :  { %v7553_v39 = vsel %vm12130_vm2, 0, %v7437_v16  ;;  %v7252_v35 = vmul.f32 %v7017_v19, %v20243_v25  ;;  %v7657_v22 = vrot.slane %v7655_v21, 4  ;;  %v7660_v37 = vrot.slane %v7658_v31, 5 }
 0xa22   :  { %v7569_v34 = vsel %vm12134_vm5, %v7553_v39, 0  ;;  %v7357_v20 = vpop.f32.mrf.mxu1  ;;  %v7666_v60 = vrot.slane %v7664_v29, 5  ;;  %v7126_v16 = vmul.f32 %v20272_v9, %v20211_v18  ;;  %v7110_v39 = vadd.f32 %v7094_v28, %v7078_v11  ;;  %v20274_v29 = vld [vmem:[#allocation10_spill] sm:$0xff] }
 0xa23   :  { %v17410_v33 = vunpack.c.l.b16 %v7569_v34  ;;  %v7268_v50 = vadd.f32 %v7252_v35, %v7236_v13  ;;  %v7358_v45 = vadd.f32 %v17351_v61, %v7357_v20  ;;  %v7661_v48 = vor.u32 %v7660_v37, %v7657_v22 }
 0xa24   :  { %v7158_v35 = vmul.f32 %v17071_v1, %v20225_v12  ;;  %v7222_v1 = vmul.f32 %v17288_v56, %v20237_v2 }
 0xa25   :  { %v7279_v46 = vpack.c.bf16 %v7268_v50, %v7267_v58  ;;  %v17420_v40 = vadd.f32 %v7358_v45, %v20269_v62  ;;  %v17426_v4 = vpack.c.b16 %v17410_v33, %v17410_v33  ;;  %v7662_v7 = vrot.slane %v7661_v48, 4 }
 0xa26   :  { %v7142_v58 = vadd.f32 %v7126_v16, %v7110_v39  ;;  %v7190_v50 = vmul.f32 %v17166_v41, %v20235_v15  ;;  %v7601_v45 = vunpack.c.h.b16 %v7569_v34  ;;  %v11326_v39 = vld [vmem:[%s19300_s17 + $0xb0] sm:$0xff] }
 0xa27   :  { %20270 = vst [vmem:[#allocation106_spill] sm:$0xff] %v17420_v40  ;;  %v7410_v54 = vpack.c.bf16 %v17420_v40, %v17420_v40  ;;  %10868 = vmatmul.msk.bf16.gmra.mxu1 %vm966_vm12, %v7279_v46  ;;  %v7667_v31 = vsel %vm12157_vm8, %v7662_v7, %v7666_v60  ;;  %v7669_v22 = vshrl.u32 %v17426_v4, 16  ;;  %v7672_v42 = vshll.u32 %v17426_v4, 16  ;;  %8599 = vmatpush.bf16.msrb.mxu0 %v11326_v39 }
 0xa28   :  { %v7020_v38 = vpop.f32.mrf.mxu0  ;;  %v17435_v19 = vunpack.c.l.b16 %v7667_v31  ;;  %v7174_v55 = vadd.f32 %v7158_v35, %v7142_v58  ;;  %v17453_v34 = vpack.c.b16 %v7601_v45, %v7601_v45 }
 0xa29   :  { %v7439_v13 = vshrl.u32 %v7410_v54, 16  ;;  %v7442_v20 = vshll.u32 %v7410_v54, 16  ;;  %v7671_v44 = vrot.slane %v7669_v22, 4  ;;  %v7674_v3 = vrot.slane %v7672_v42, 5 }
 0xa2a   :  { %v7974_v6 = vpack.c.b16 %v17435_v19, %v20274_v29  ;;  %v7206_v46 = vadd.f32 %v7190_v50, %v7174_v55  ;;  %v7253_v62 = vmul.f32 %v7020_v38, %v20243_v25  ;;  %v7678_v38 = vshll.u32 %v17453_v34, 16 }
 0xa2b   :  { %v7441_v37 = vrot.slane %v7439_v13, 7  ;;  %v7675_v11 = vor.u32 %v7674_v3, %v7671_v44  ;;  %v20275_v44 = vld [vmem:[#allocation58_spill] sm:$0xff] }
 0xa2c   :  { %7982 = vrot.lane.b32.xlu1 %v7974_v6, %s11961_s24  ;;  %v7238_v7 = vadd.f32 %v7222_v1, %v7206_v46  ;;  %v7269_v9 = vadd.f32 %v7253_v62, %v17280_v30  ;;  %v7680_v30 = vrot.slane %v7678_v38, 5  ;;  %v7064_v3 = vmul.f32 %v20275_v44, %v20238_v17  ;;  %v20276_v46 = vld [vmem:[#allocation77_spill] sm:$0xff]  ;;  %v20277_v62 = vld [vmem:[#allocation72_spill] sm:$0xff]  ;;  %v7359_v38 = vpop.f32.mrf.mxu1 }
 0xa2d   :  { %v7444_v57 = vor.u32 %v7442_v20, %v7441_v37  ;;  %v7676_v22 = vrot.slane %v7675_v11, 4  ;;  %v7360_v39 = vadd.f32 %v17351_v61, %v7359_v38 }
 0xa2f   :  { %v7554_v48 = vsel %vm12130_vm2, 0, %v7444_v57  ;;  %v7681_v58 = vsel %vm12157_vm8, %v7676_v22, %v7680_v30  ;;  %v7224_v22 = vmul.f32 %v17328_v14, %v20237_v2 }
 0xa30   :  { %v7570_v8 = vsel %vm12134_vm5, %v7554_v48, 0  ;;  %v7022_v41 = vpop.f32.mrf.mxu0  ;;  %v17477_v55 = vunpack.c.l.b16 %v7681_v58 }
 0xa31   :  { %v17455_v24 = vunpack.c.l.b16 %v7570_v8  ;;  %v7603_v28 = vunpack.c.h.b16 %v7570_v8  ;;  %v7254_v56 = vmul.f32 %v7022_v41, %v20243_v25  ;;  %v7048_v8 = vmul.f32 %v20276_v46, %v20240_v10 }
 0xa32   :  { %v7096_v41 = vmul.f32 %v20277_v62, %v20182_v36 }
 0xa33   :  { %v17460_v60 = vpack.c.b16 %v17455_v24, %v17455_v24  ;;  %v17462_v54 = vpack.c.b16 %v7603_v28, %v7603_v28  ;;  %v7270_v16 = vadd.f32 %v7254_v56, %v7238_v7  ;;  %v7080_v28 = vadd.f32 %v7064_v3, %v7048_v8  ;;  %v20278_v7 = vld [vmem:[#allocation105_spill] sm:$0xff] }
 0xa34   :  { %v7128_v56 = vmul.f32 %v20278_v7, %v20211_v18 }
 0xa35   :  { %v7683_v31 = vshrl.u32 %v17460_v60, 16  ;;  %v7686_v13 = vshll.u32 %v17460_v60, 16  ;;  %v7280_v35 = vpack.c.bf16 %v7270_v16, %v7269_v9  ;;  %v7692_v6 = vshll.u32 %v17462_v54, 16 }
 0xa36   :  { %v7112_v9 = vadd.f32 %v7096_v41, %v7080_v28  ;;  %v7160_v16 = vmul.f32 %v17099_v0, %v20225_v12  ;;  %v20282_v28 = vld [vmem:[#allocation20_spill] sm:$0xff] }
 0xa37   :  { %v7685_v37 = vrot.slane %v7683_v31, 4  ;;  %v7688_v20 = vrot.slane %v7686_v13, 5  ;;  %10869 = vmatmul.msk.bf16.gmra.mxu1 %vm966_vm12, %v7280_v35  ;;  %v7694_v45 = vrot.slane %v7692_v6, 5  ;;  %v7192_v13 = vmul.f32 %v17193_v49, %v20235_v15  ;;  %v20279_v6 = vld [vmem:[#allocation44_spill] sm:$0xff] }
 0xa38   :  { %v7144_v31 = vadd.f32 %v7128_v56, %v7112_v9  ;;  %v20280_v30 = vmax.f32 %v20279_v6, 0.0  ;;  %v20283_v7 = vmax.f32 %v20282_v28, 0.0  ;;  %v20286_v6 = vld [vmem:[#allocation30_spill] sm:$0xff]  ;;  %v11307_v28 = vld [vmem:[%s19300_s17 + $0x18] sm:$0xff] }
 0xa39   :  { %v7689_v42 = vor.u32 %v7688_v20, %v7685_v37  ;;  %8504 = vmatpush.bf16.msra.mxu2 %v11307_v28 }
 0xa3a   :  { %v7176_v35 = vadd.f32 %v7160_v16, %v7144_v31 }
 0xa3b   :  { %v7690_v50 = vrot.slane %v7689_v42, 4  ;;  %v17502_v42 = vadd.f32 %v7360_v39, %v20280_v30  ;;  %v20287_v30 = vmax.f32 %v20286_v6, 0.0 }
 0xa3c   :  { %v7208_v37 = vadd.f32 %v7192_v13, %v7176_v35  ;;  %v20285_v35 = vld [vmem:[#allocation9_spill] sm:$0xff] }
 0xa3d   :  { %v7695_v57 = vsel %vm12157_vm8, %v7690_v50, %v7694_v45  ;;  %20281 = vst [vmem:[#allocation86_spill] sm:$0xff] %v17502_v42 }
 0xa3e   :  { %v17479_v1 = vunpack.c.l.b16 %v7695_v57  ;;  %v7240_v0 = vadd.f32 %v7224_v22, %v7208_v37  ;;  %v7411_v57 = vpack.c.bf16 %v17502_v42, %v17502_v42  ;;  %v7066_v22 = vmul.f32 %v20285_v35, %v20238_v17  ;;  %v11306_v35 = vld [vmem:[%s19300_s17 + $0x10] sm:$0xff] }
 0xa3f   :  { %8505 = vmatpush.bf16.msra.mxu2 %v11306_v35 }
 0xa40   :  { %v7975_v48 = vpack.c.b16 %v17479_v1, %v17477_v55  ;;  %v7446_v14 = vshrl.u32 %v7411_v57, 16  ;;  %v7449_v3 = vshll.u32 %v7411_v57, 16 }
 0xa42   :  { %7984 = vrot.lane.b32.xlu0 %v7975_v48, %s11961_s24  ;;  %v7448_v44 = vrot.slane %v7446_v14, 7 }
 0xa44   :  { %v7451_v46 = vor.u32 %v7449_v3, %v7448_v44  ;;  %v20291_v44 = vld [vmem:[#allocation104_spill] sm:$0xff] }
 0xa45   :  { %v7130_v3 = vmul.f32 %v20291_v44, %v20211_v18  ;;  %v11325_v18 = vld [vmem:[%s19300_s17 + $0xa8] sm:$0xff] }
 0xa46   :  { %v7555_v41 = vsel %vm12130_vm2, 0, %v7451_v46  ;;  %8600 = vmatpush.bf16.msrb.mxu0 %v11325_v18 }
 0xa47   :  { %v7571_v56 = vsel %vm12134_vm5, %v7555_v41, 0  ;;  %v11317_v41 = vld [vmem:[%s19300_s17 + $0x68] sm:$0xff] }
 0xa48   :  { %v17520_v16 = vunpack.c.l.b16 %v7571_v56  ;;  %v7605_v37 = vunpack.c.h.b16 %v7571_v56  ;;  %8551 = vmatpush.bf16.msra.mxu3 %v11317_v41 }
 0xa4a   :  { %v17535_v57 = vpack.c.b16 %v17520_v16, %v17520_v16  ;;  %v17545_v46 = vpack.c.b16 %v7605_v37, %v7605_v37  ;;  %v7162_v37 = vmul.f32 %v17121_v52, %v20225_v12  ;;  %v10873_v52 = vrot.slane %v17426_v4, 9 }
 0xa4c   :  { %v7697_v56 = vshrl.u32 %v17535_v57, 16 }
 0xa52   :  { %v7025_v11 = vpop.f32.mrf.mxu0 }
 0xa53   :  { %v7255_v20 = vmul.f32 %v7025_v11, %v20243_v25 }
 0xa55   :  { %v7271_v45 = vadd.f32 %v7255_v20, %v17306_v51 }
 0xa5a   :  { %v7027_v58 = vpop.f32.mrf.mxu0 }
 0xa5b   :  { %v7256_v50 = vmul.f32 %v7027_v58, %v20243_v25 }
 0xa5d   :  { %v7272_v49 = vadd.f32 %v7256_v50, %v7240_v0  ;;  %v20289_v0 = vld [vmem:[#allocation98_spill] sm:$0xff] }
 0xa5e   :  { %v7050_v50 = vmul.f32 %v20289_v0, %v20240_v10 }
 0xa5f   :  { %v7281_v48 = vpack.c.bf16 %v7272_v49, %v7271_v45  ;;  %v20290_v45 = vld [vmem:[#allocation101_spill] sm:$0xff] }
 0xa60   :  { %v7098_v49 = vmul.f32 %v20290_v45, %v20182_v36  ;;  %v7082_v14 = vadd.f32 %v7066_v22, %v7050_v50  ;;  %v7706_v50 = vshll.u32 %v17545_v46, 16 }
 0xa61   :  { %10870 = vmatmul.msk.bf16.gmra.mxu1 %vm966_vm12, %v7281_v48 }
 0xa6c   :  { %v7362_v8 = vpop.f32.mrf.mxu1 }
 0xa6d   :  { %v7363_v62 = vadd.f32 %v17351_v61, %v7362_v8 }
 0xa6f   :  { %v17514_v51 = vadd.f32 %v7363_v62, %v20283_v7  ;;  %v7114_v7 = vadd.f32 %v7098_v49, %v7082_v14  ;;  %v7856_v14 = vrot.slane %v17453_v34, 5  ;;  %v11333_v34 = vld [vmem:[%s19300_s17 + $0xe8] sm:$0xff] }
 0xa71   :  { %20284 = vst [vmem:[#allocation76_spill] sm:$0xff] %v17514_v51  ;;  %v7412_v11 = vpack.c.bf16 %v17514_v51, %v17514_v51  ;;  %v7146_v22 = vadd.f32 %v7130_v3, %v7114_v7  ;;  %v7708_v7 = vrot.slane %v7706_v50, 5  ;;  %v11332_v50 = vld [vmem:[%s19300_s17 + $0xe0] sm:$0xff] }
 0xa73   :  { %v7453_v9 = vshrl.u32 %v7412_v11, 16  ;;  %v7456_v13 = vshll.u32 %v7412_v11, 16  ;;  %v7700_v11 = vshll.u32 %v17535_v57, 16  ;;  %v7178_v41 = vadd.f32 %v7162_v37, %v7146_v22  ;;  %v20293_v22 = vld [vmem:[#allocation62_spill] sm:$0xff] }
 0xa74   :  { %v7364_v38 = vpop.f32.mrf.mxu1  ;;  %v20294_v37 = vmax.f32 %v20293_v22, 0.0 }
 0xa75   :  { %v7455_v31 = vrot.slane %v7453_v9, 7  ;;  %v7365_v39 = vadd.f32 %v17351_v61, %v7364_v38  ;;  %v11335_v9 = vld [vmem:[%s19300_s17 + $0xf8] sm:$0xff]  ;;  %v7702_v6 = vrot.slane %v7700_v11, 5  ;;  %v7226_v11 = vmul.f32 %v17358_v43, %v20237_v2  ;;  %v11304_v2 = vld [vmem:[%s19300_s17] sm:$0xff] }
 0xa76   :  { %8647 = vmatpush.bf16.msrb.mxu1 %v11335_v9 }
 0xa77   :  { %v7458_v20 = vor.u32 %v7456_v13, %v7455_v31  ;;  %v17527_v58 = vadd.f32 %v7365_v39, %v20287_v30  ;;  %v11334_v30 = vld [vmem:[%s19300_s17 + $0xf0] sm:$0xff] }
 0xa79   :  { %20288 = vst [vmem:[#allocation39_spill] sm:$0xff] %v17527_v58  ;;  %v7556_v48 = vsel %vm12130_vm2, 0, %v7458_v20  ;;  %v7413_v17 = vpack.c.bf16 %v17527_v58, %v17527_v58  ;;  %v7699_v20 = vrot.slane %v7697_v56, 4 }
 0xa7a   :  { %v7572_v10 = vsel %vm12134_vm5, %v7556_v48, 0  ;;  %v7194_v48 = vmul.f32 %v17235_v27, %v20235_v15  ;;  %8648 = vmatpush.bf16.msrb.mxu1 %v11334_v30 }
 0xa7b   :  { %v17547_v36 = vunpack.c.l.b16 %v7572_v10  ;;  %v7607_v8 = vunpack.c.h.b16 %v7572_v10  ;;  %v7460_v62 = vshrl.u32 %v7413_v17, 16  ;;  %v7463_v39 = vshll.u32 %v7413_v17, 16 }
 0xa7c   :  { %v7703_v12 = vor.u32 %v7702_v6, %v7699_v20  ;;  %v7210_v56 = vadd.f32 %v7194_v48, %v7178_v41 }
 0xa7d   :  { %v17565_v38 = vpack.c.b16 %v17547_v36, %v17547_v36  ;;  %v17567_v31 = vpack.c.b16 %v7607_v8, %v7607_v8  ;;  %v7462_v13 = vrot.slane %v7460_v62, 7  ;;  %v11305_v62 = vld [vmem:[%s19300_s17 + $0x8] sm:$0xff] }
 0xa7e   :  { %v7704_v4 = vrot.slane %v7703_v12, 4  ;;  %8506 = vmatpush.bf16.msra.mxu2 %v11305_v62  ;;  %8649 = vmatpush.bf16.msrb.mxu1 %v11333_v34 }
 0xa7f   :  { %v7465_v0 = vor.u32 %v7463_v39, %v7462_v13  ;;  %v7711_v45 = vshrl.u32 %v17565_v38, 16  ;;  %v7714_v49 = vshll.u32 %v17565_v38, 16  ;;  %v7720_v8 = vshll.u32 %v17567_v31, 16  ;;  %v11351_v13 = vld [vmem:[%s19304_s20 + $0x58] sm:$0xff] }
 0xa80   :  { %v7030_v17 = vpop.f32.mrf.mxu0  ;;  %v17602_v39 = vsel %vm12525_vm11, %v10873_v52, %v7856_v14  ;;  %v7709_v6 = vsel %vm12157_vm8, %v7704_v4, %v7708_v7  ;;  %v10876_v53 = vrot.slane %v17565_v38, 9 }
 0xa81   :  { %v7557_v44 = vsel %vm12130_vm2, 0, %v7465_v0  ;;  %v7713_v3 = vrot.slane %v7711_v45, 4  ;;  %v7716_v10 = vrot.slane %v7714_v49, 5  ;;  %v7257_v35 = vmul.f32 %v7030_v17, %v20243_v25 }
 0xa82   :  { %v7573_v15 = vsel %vm12134_vm5, %v7557_v44, 0  ;;  %v7367_v27 = vpop.f32.mrf.mxu1  ;;  %v7722_v30 = vrot.slane %v7720_v8, 5  ;;  %v10874_v45 = vrot.slane %v17460_v60, 9  ;;  %v7860_v49 = vrot.slane %v17462_v54, 5  ;;  %8507 = vmatpush.bf16.msra.mxu2 %v11304_v2  ;;  %8650 = vmatpush.bf16.msrb.mxu1 %v11332_v50 }
 0xa83   :  { %v17595_v28 = vunpack.c.l.b16 %v7573_v15  ;;  %v7368_v18 = vadd.f32 %v17351_v61, %v7367_v27  ;;  %v7717_v9 = vor.u32 %v7716_v10, %v7713_v3  ;;  %v7242_v17 = vadd.f32 %v7226_v11, %v7210_v56 }
 0xa84   :  { %v17629_v14 = vsel %vm12525_vm11, %v10874_v45, %v7860_v49  ;;  %v19573_v44 = vunpack.c.l.b16 %v17602_v39  ;;  %v17633_v60 = vunpack.c.l.b16 %v7709_v6  ;;  %v7273_v8 = vadd.f32 %v7257_v35, %v17345_v26 }
 0xa85   :  { %v17607_v20 = vadd.f32 %v7368_v18, %v20294_v37  ;;  %v17616_v43 = vpack.c.b16 %v17595_v28, %v17595_v28  ;;  %v7718_v0 = vrot.slane %v7717_v9, 4  ;;  %v19574_v27 = vunpack.c.l.b16 %v17629_v14 }
 0xa86   :  { %v7609_v26 = vunpack.c.h.b16 %v7573_v15  ;;  %v10875_v9 = vrot.slane %v17535_v57, 9  ;;  %v7864_v35 = vrot.slane %v17545_v46, 5 }
 0xa87   :  { %20295 = vst [vmem:[#allocation73_spill] sm:$0xff] %v17607_v20  ;;  %v7414_v48 = vpack.c.bf16 %v17607_v20, %v17607_v20  ;;  %v7723_v52 = vsel %vm12157_vm8, %v7718_v0, %v7722_v30  ;;  %v7725_v62 = vshrl.u32 %v17616_v43, 16  ;;  %v7728_v41 = vshll.u32 %v17616_v43, 16 }
 0xa88   :  { %v7032_v12 = vpop.f32.mrf.mxu0  ;;  %v17635_v54 = vunpack.c.l.b16 %v7723_v52  ;;  %v17647_v7 = vpack.c.b16 %v19574_v27, %v19573_v44  ;;  %v17659_v15 = vsel %vm12525_vm11, %v10875_v9, %v7864_v35  ;;  %v17661_v2 = vpack.c.b16 %v7609_v26, %v7609_v26  ;;  %v20296_v9 = vld [vmem:[#allocation4_spill] sm:$0xff] }
 0xa89   :  { %v7467_v3 = vshrl.u32 %v7414_v48, 16  ;;  %v7258_v10 = vmul.f32 %v7032_v12, %v20243_v25  ;;  %v7470_v34 = vshll.u32 %v7414_v48, 16  ;;  %v7727_v37 = vrot.slane %v7725_v62, 4  ;;  %v11331_v12 = vld [vmem:[%s19300_s17 + $0xd8] sm:$0xff]  ;;  %v11330_v62 = vld [vmem:[%s19300_s17 + $0xd0] sm:$0xff] }
 0xa8a   :  { %v7976_v25 = vpack.c.b16 %v17635_v54, %v17633_v60  ;;  %v7730_v6 = vrot.slane %v7728_v41, 5  ;;  %v7734_v49 = vshll.u32 %v17661_v2, 16  ;;  %8651 = vmatpush.bf16.msrb.mxu1 %v11331_v12  ;;  %v17683_v26 = vpop.f32.mrf.mxu1  ;;  %v7952_v35 = vpack.c.b16 %v17385_v59, %v20296_v9 }
 0xa8b   :  { %v7469_v4 = vrot.slane %v7467_v3, 7  ;;  %v7274_v18 = vadd.f32 %v7258_v10, %v7242_v17 }
 0xa8c   :  { %7986 = vrot.lane.b32.xlu2 %v7976_v25, %s11961_s24  ;;  %v7731_v45 = vor.u32 %v7730_v6, %v7727_v37  ;;  %v7736_v41 = vrot.slane %v7734_v49, 5 }
 0xa8d   :  { %v7472_v56 = vor.u32 %v7470_v34, %v7469_v4  ;;  %v7282_v11 = vpack.c.bf16 %v7274_v18, %v7273_v8 }
 0xa8e   :  { %v7732_v52 = vrot.slane %v7731_v45, 4  ;;  %8652 = vmatpush.bf16.msrb.mxu1 %v11330_v62 }
 0xa8f   :  { %v7558_v22 = vsel %vm12130_vm2, 0, %v7472_v56  ;;  %10871 = vmatmul.msk.bf16.gmra.mxu1 %vm966_vm12, %v7282_v11  ;;  %v11329_v11 = vld [vmem:[%s19300_s17 + $0xc8] sm:$0xff] }
 0xa90   :  { %v7574_v30 = vsel %vm12134_vm5, %v7558_v22, 0  ;;  %v7737_v34 = vsel %vm12157_vm8, %v7732_v52, %v7736_v41 }
 0xa91   :  { %v17663_v0 = vunpack.c.l.b16 %v7574_v30  ;;  %v7611_v57 = vunpack.c.h.b16 %v7574_v30  ;;  %v17692_v22 = vunpack.c.l.b16 %v7737_v34  ;;  %v11328_v30 = vld [vmem:[%s19300_s17 + $0xc0] sm:$0xff] }
 0xa92   :  { %8653 = vmatpush.bf16.msrb.mxu1 %v11329_v11  ;;  %v11316_v34 = vld [vmem:[%s19300_s17 + $0x60] sm:$0xff] }
 0xa93   :  { %v17667_v46 = vpack.c.b16 %v17663_v0, %v17663_v0  ;;  %v17669_v50 = vpack.c.b16 %v7611_v57, %v7611_v57  ;;  %8552 = vmatpush.bf16.msra.mxu3 %v11316_v34 }
 0xa95   :  { %v7739_v48 = vshrl.u32 %v17667_v46, 16  ;;  %v7742_v17 = vshll.u32 %v17667_v46, 16  ;;  %v7748_v8 = vshll.u32 %v17669_v50, 16 }
 0xa96   :  { %8654 = vmatpush.bf16.msrb.mxu1 %v11328_v30 }
 0xa97   :  { %v7741_v3 = vrot.slane %v7739_v48, 4  ;;  %v7744_v10 = vrot.slane %v7742_v17, 5  ;;  %v7750_v25 = vrot.slane %v7748_v8, 5  ;;  %v20297_v17 = vld [vmem:[#allocation33_spill] sm:$0xff] }
 0xa98   :  { %v20298_v12 = vmax.f32 %v20297_v17, 0.0  ;;  %v7953_v17 = vpack.c.b16 %v17455_v24, %v17410_v33 }
 0xa99   :  { %v7745_v4 = vor.u32 %v7744_v10, %v7741_v3 }
 0xa9b   :  { %v7746_v18 = vrot.slane %v7745_v4, 4 }
 0xa9d   :  { %v7751_v56 = vsel %vm12157_vm8, %v7746_v18, %v7750_v25  ;;  %v11324_v18 = vld [vmem:[%s19300_s17 + $0xa0] sm:$0xff] }
 0xa9e   :  { %v17694_v37 = vunpack.c.l.b16 %v7751_v56  ;;  %v7983_v6 = vpop.permute.xlu1 %7982  ;;  %v20300_v56 = vld [vmem:[#allocation40_spill] sm:$0xff]  ;;  %8601 = vmatpush.bf16.msrb.mxu0 %v11324_v18 }
 0xa9f   :  { %v8092_v57 = vsel %vm966_vm12, %v7952_v35, %v7983_v6  ;;  %v20301_v11 = vmax.f32 %v20300_v56, 0.0 }
 0xaa0   :  { %v7977_v45 = vpack.c.b16 %v17694_v37, %v17692_v22  ;;  %8508 = vmatmul.bf16.vlgmr.msra.gmra.mxu2 %v8092_v57 }
 0xaa2   :  { %7988 = vrot.lane.b32.xlu1 %v7977_v45, %s11961_s24 }
 0xaa4   :  { %v7372_v49 = vpop.f32.mrf.mxu1 }
 0xaa5   :  { %v7373_v48 = vadd.f32 %v17351_v61, %v7372_v49 }
 0xaa7   :  { %v17706_v52 = vadd.f32 %v7373_v48, %v20298_v12 }
 0xaa9   :  { %20299 = vst [vmem:[#allocation45_spill] sm:$0xff] %v17706_v52  ;;  %v7416_v3 = vpack.c.bf16 %v17706_v52, %v17706_v52 }
 0xaab   :  { %v7481_v10 = vshrl.u32 %v7416_v3, 16  ;;  %v7484_v41 = vshll.u32 %v7416_v3, 16 }
 0xaac   :  { %v7374_v8 = vpop.f32.mrf.mxu1 }
 0xaad   :  { %v7483_v62 = vrot.slane %v7481_v10, 7  ;;  %v7375_v4 = vadd.f32 %v17351_v61, %v7374_v8 }
 0xaaf   :  { %v7486_v25 = vor.u32 %v7484_v41, %v7483_v62  ;;  %v17719_v35 = vadd.f32 %v7375_v4, %v20301_v11  ;;  %v20303_v11 = vld [vmem:[#allocation31_spill] sm:$0xff] }
 0xab1   :  { %20302 = vst [vmem:[#allocation14_spill] sm:$0xff] %v17719_v35  ;;  %v7560_v6 = vsel %vm12130_vm2, 0, %v7486_v25  ;;  %v7417_v30 = vpack.c.bf16 %v17719_v35, %v17719_v35 }
 0xab2   :  { %v7576_v57 = vsel %vm12134_vm5, %v7560_v6, 0  ;;  %v20304_v6 = vmax.f32 %v20303_v11, 0.0 }
 0xab3   :  { %v17727_v45 = vunpack.c.l.b16 %v7576_v57  ;;  %v7613_v49 = vunpack.c.h.b16 %v7576_v57  ;;  %v7488_v48 = vshrl.u32 %v7417_v30, 16  ;;  %v7491_v12 = vshll.u32 %v7417_v30, 16 }
 0xab4   :  { %v7985_v3 = vpop.permute.xlu0 %7984  ;;  %v7377_v41 = vpop.f32.mrf.mxu1 }
 0xab5   :  { %v17733_v10 = vpack.c.b16 %v17727_v45, %v17727_v45  ;;  %v17735_v8 = vpack.c.b16 %v7613_v49, %v7613_v49  ;;  %v7490_v62 = vrot.slane %v7488_v48, 7  ;;  %v8096_v4 = vsel %vm966_vm12, %v7953_v17, %v7985_v3 }
 0xab6   :  { %v7378_v34 = vadd.f32 %v17351_v61, %v7377_v41  ;;  %8513 = vmatmul.bf16.gmra.mxu2 %v8096_v4  ;;  %8655 = vmatmul.bf16.vlgmr.msrb.gmra.mxu1 %v8096_v4 }
 0xab7   :  { %v7493_v18 = vor.u32 %v7491_v12, %v7490_v62  ;;  %v7753_v25 = vshrl.u32 %v17733_v10, 16  ;;  %v7756_v56 = vshll.u32 %v17733_v10, 16  ;;  %v7762_v17 = vshll.u32 %v17735_v8, 16 }
 0xab8   :  { %v17743_v30 = vadd.f32 %v7378_v34, %v20304_v6 }
 0xab9   :  { %v7561_v57 = vsel %vm12130_vm2, 0, %v7493_v18  ;;  %v7755_v49 = vrot.slane %v7753_v25, 4  ;;  %v7758_v48 = vrot.slane %v7756_v56, 5  ;;  %v7764_v18 = vrot.slane %v7762_v17, 5 }
 0xaba   :  { %20305 = vst [vmem:[#allocation63_spill] sm:$0xff] %v17743_v30  ;;  %v7577_v3 = vsel %vm12134_vm5, %v7561_v57, 0  ;;  %v7418_v12 = vpack.c.bf16 %v17743_v30, %v17743_v30 }
 0xabb   :  { %v17752_v62 = vunpack.c.l.b16 %v7577_v3  ;;  %v7759_v41 = vor.u32 %v7758_v48, %v7755_v49  ;;  %v7615_v30 = vunpack.c.h.b16 %v7577_v3 }
 0xabc   :  { %v7495_v4 = vshrl.u32 %v7418_v12, 16  ;;  %v7498_v56 = vshll.u32 %v7418_v12, 16  ;;  %v7379_v6 = vpop.f32.mrf.mxu1 }
 0xabd   :  { %v17756_v34 = vpack.c.b16 %v17752_v62, %v17752_v62  ;;  %v7760_v11 = vrot.slane %v7759_v41, 4  ;;  %v7380_v48 = vadd.f32 %v17351_v61, %v7379_v6 }
 0xabe   :  { %v7497_v25 = vrot.slane %v7495_v4, 7 }
 0xabf   :  { %v7765_v44 = vsel %vm12157_vm8, %v7760_v11, %v7764_v18  ;;  %v7767_v57 = vshrl.u32 %v17756_v34, 16  ;;  %v7770_v27 = vshll.u32 %v17756_v34, 16  ;;  %v17771_v18 = vpack.c.b16 %v7615_v30, %v7615_v30 }
 0xac0   :  { %v7500_v35 = vor.u32 %v7498_v56, %v7497_v25  ;;  %v17762_v49 = vunpack.c.l.b16 %v7765_v44  ;;  %v20306_v44 = vld [vmem:[#allocation26_spill] sm:$0xff]  ;;  %v7370_v30 = vadd.f32 %v17351_v61, %v17683_v26 }
 0xac1   :  { %v7769_v12 = vrot.slane %v7767_v57, 4  ;;  %v7772_v4 = vrot.slane %v7770_v27, 5  ;;  %v20307_v25 = vmax.f32 %v20306_v44, 0.0  ;;  %v7776_v57 = vshll.u32 %v17771_v18, 16 }
 0xac2   :  { %v7562_v41 = vsel %vm12130_vm2, 0, %v7500_v35  ;;  %v7978_v17 = vpack.c.b16 %v17762_v49, %v20274_v29 }
 0xac3   :  { %v7578_v11 = vsel %vm12134_vm5, %v7562_v41, 0  ;;  %v17778_v56 = vadd.f32 %v7380_v48, %v20307_v25  ;;  %v7773_v27 = vor.u32 %v7772_v4, %v7769_v12  ;;  %v7778_v4 = vrot.slane %v7776_v57, 5 }
 0xac4   :  { %v17773_v52 = vunpack.c.l.b16 %v7578_v11  ;;  %v7617_v3 = vunpack.c.h.b16 %v7578_v11  ;;  %7990 = vrot.lane.b32.xlu0 %v7978_v17, %s11961_s24 }
 0xac5   :  { %20308 = vst [vmem:[#allocation24_spill] sm:$0xff] %v17778_v56  ;;  %v7419_v48 = vpack.c.bf16 %v17778_v56, %v17778_v56  ;;  %v7774_v11 = vrot.slane %v7773_v27, 4  ;;  %v7868_v27 = vrot.slane %v17567_v31, 5 }
 0xac6   :  { %v17782_v35 = vpack.c.b16 %v17773_v52, %v17773_v52  ;;  %v17784_v6 = vpack.c.b16 %v7617_v3, %v7617_v3  ;;  %v20309_v3 = vld [vmem:[#allocation35_spill] sm:$0xff] }
 0xac7   :  { %v20310_v58 = vmax.f32 %v20309_v3, 0.0  ;;  %v7502_v51 = vshrl.u32 %v7419_v48, 16  ;;  %v7779_v42 = vsel %vm12157_vm8, %v7774_v11, %v7778_v4  ;;  %v17812_v11 = vsel %vm12525_vm11, %v10876_v53, %v7868_v27 }
 0xac8   :  { %v7781_v41 = vshrl.u32 %v17782_v35, 16  ;;  %v7784_v17 = vshll.u32 %v17782_v35, 16  ;;  %v7790_v20 = vshll.u32 %v17784_v6, 16  ;;  %v19585_v38 = vunpack.c.l.b16 %v17812_v11 }
 0xac9   :  { %v17796_v12 = vadd.f32 %v7370_v30, %v20310_v58  ;;  %v7504_v58 = vrot.slane %v7502_v51, 7  ;;  %v17806_v30 = vunpack.c.l.b16 %v7779_v42  ;;  %v7505_v31 = vshll.u32 %v7419_v48, 16 }
 0xaca   :  { %v7783_v44 = vrot.slane %v7781_v41, 4  ;;  %v7786_v25 = vrot.slane %v7784_v17, 5  ;;  %v7792_v32 = vrot.slane %v7790_v20, 5  ;;  %v8001_v20 = vunpack.c.l.b16 %v17659_v15 }
 0xacb   :  { %20311 = vst [vmem:[#allocation17_spill] sm:$0xff] %v17796_v12  ;;  %v7415_v41 = vpack.c.bf16 %v17796_v12, %v17796_v12  ;;  %v8020_v15 = vpack.c.b16 %v17410_v33, %v17385_v59  ;;  %v10877_v59 = vrot.slane %v17616_v43, 9  ;;  %v7872_v33 = vrot.slane %v17661_v2, 5 }
 0xacc   :  { %v7787_v26 = vor.u32 %v7786_v25, %v7783_v44  ;;  %v10878_v43 = vrot.slane %v17667_v46, 9  ;;  %v7954_v2 = vpack.c.b16 %v17547_v36, %v17520_v16 }
 0xacd   :  { %v7474_v25 = vshrl.u32 %v7415_v41, 16  ;;  %v7477_v51 = vshll.u32 %v7415_v41, 16 }
 0xace   :  { %v7788_v40 = vrot.slane %v7787_v26, 4 }
 0xacf   :  { %v7476_v42 = vrot.slane %v7474_v25, 7 }
 0xad0   :  { %v7793_v17 = vsel %vm12157_vm8, %v7788_v40, %v7792_v32  ;;  %v17820_v32 = vpack.c.b16 %v19585_v38, %v8001_v20  ;;  %v7507_v40 = vor.u32 %v7505_v31, %v7504_v58  ;;  %v20312_v58 = vld [vmem:[#allocation32_spill] sm:$0xff] }
 0xad1   :  { %v17808_v57 = vunpack.c.l.b16 %v7793_v17  ;;  %v7479_v48 = vor.u32 %v7477_v51, %v7476_v42  ;;  %v20313_v31 = vmax.f32 %v20312_v58, 0.0  ;;  %v20315_v42 = vunpack.c.l.b16 %v17629_v14 }
 0xad2   :  { %v7563_v53 = vsel %vm12130_vm2, 0, %v7507_v40  ;;  %v17864_v14 = vsel %vm12525_vm11, %v10877_v59, %v7872_v33 }
 0xad3   :  { %v7979_v44 = vpack.c.b16 %v17808_v57, %v17806_v30  ;;  %v7579_v3 = vsel %vm12134_vm5, %v7563_v53, 0  ;;  %v7559_v17 = vsel %vm12130_vm2, 0, %v7479_v48  ;;  %v8057_v53 = vpack.c.b16 %v8001_v20, %v20315_v42  ;;  %v11315_v48 = vld [vmem:[%s19300_s17 + $0x58] sm:$0xff] }
 0xad4   :  { %v17830_v26 = vunpack.c.l.b16 %v7579_v3  ;;  %8553 = vmatpush.bf16.msra.mxu3 %v11315_v48  ;;  %v19586_v59 = vunpack.c.l.b16 %v17864_v14 }
 0xad5   :  { %7992 = vrot.lane.b32.xlu2 %v7979_v44, %s11961_s24  ;;  %v17843_v44 = vsel %vm12134_vm5, %v7559_v17, 0 }
 0xad6   :  { %v7646_v25 = vpack.c.b16 %v17830_v26, %v17830_v26 }
 0xad8   :  { %v7795_v46 = vshrl.u32 %v7646_v25, 16  ;;  %v7798_v58 = vshll.u32 %v7646_v25, 16 }
 0xadd   :  { %8028 = vrot.lane.b32.xlu2 %v8020_v15, %s11961_s24  ;;  %v17856_v15 = vunpack.c.l.b16 %v17843_v44 }
 0xade   :  { %v7382_v4 = vpop.f32.mrf.mxu1 }
 0xadf   :  { %v7383_v27 = vadd.f32 %v17351_v61, %v7382_v4  ;;  %v7876_v4 = vrot.slane %v17669_v50, 5  ;;  %v8023_v33 = vpack.c.b16 %v17856_v15, %v17663_v0 }
 0xae1   :  { %v17837_v41 = vadd.f32 %v7383_v27, %v20313_v31  ;;  %v7619_v31 = vunpack.c.h.b16 %v7579_v3 }
 0xae3   :  { %20314 = vst [vmem:[#allocation50_spill] sm:$0xff] %v17837_v41  ;;  %v7420_v40 = vpack.c.bf16 %v17837_v41, %v17837_v41  ;;  %v7647_v48 = vpack.c.b16 %v7619_v31, %v7619_v31  ;;  %v20316_v41 = vld [vmem:[#allocation27_spill] sm:$0xff] }
 0xae5   :  { %v7509_v51 = vshrl.u32 %v7420_v40, 16  ;;  %8066 = vrot.lane.b32.xlu2 %v8057_v53, %s11961_s24  ;;  %v7512_v27 = vshll.u32 %v7420_v40, 16  ;;  %v17869_v53 = vsel %vm12525_vm11, %v10878_v43, %v7876_v4  ;;  %v7804_v31 = vshll.u32 %v7647_v48, 16 }
 0xae6   :  { %v7987_v17 = vpop.permute.xlu2 %7986  ;;  %v19587_v50 = vunpack.c.l.b16 %v17869_v53  ;;  %v7384_v40 = vpop.f32.mrf.mxu1 }
 0xae7   :  { %v7511_v20 = vrot.slane %v7509_v51, 7  ;;  %v8100_v42 = vsel %vm966_vm12, %v7954_v2, %v7987_v17  ;;  %v7797_v51 = vrot.slane %v7795_v46, 4  ;;  %v7800_v2 = vrot.slane %v7798_v58, 5 }
 0xae8   :  { %8518 = vmatmul.bf16.gmra.mxu2 %v8100_v42  ;;  %8660 = vmatmul.bf16.gmra.mxu1 %v8100_v42  ;;  %v17881_v43 = vpack.c.b16 %v19587_v50, %v19586_v59  ;;  %v10882_v42 = vrot.slane %v7646_v25, 9  ;;  %v7892_v59 = vrot.slane %v7647_v48, 5 }
 0xae9   :  { %v7514_v38 = vor.u32 %v7512_v27, %v7511_v20  ;;  %v7801_v58 = vor.u32 %v7800_v2, %v7797_v51 }
 0xaea   :  { %v17908_v48 = vsel %vm12525_vm11, %v10882_v42, %v7892_v59 }
 0xaeb   :  { %v7564_v3 = vsel %vm12130_vm2, 0, %v7514_v38  ;;  %v7385_v38 = vadd.f32 %v17351_v61, %v7384_v40  ;;  %v8024_v61 = vpack.c.b16 %v17752_v62, %v17727_v45  ;;  %v7888_v40 = vrot.slane %v17784_v6, 5  ;;  %20319 = vst [vmem:[#allocation88_spill] sm:$0xff] %v17908_v48 }
 0xaec   :  { %v7580_v4 = vsel %vm12134_vm5, %v7564_v3, 0  ;;  %v19590_v6 = vunpack.c.l.b16 %v17908_v48 }
 0xaed   :  { %v17885_v20 = vunpack.c.l.b16 %v7580_v4  ;;  %v7621_v27 = vunpack.c.h.b16 %v7580_v4  ;;  %8034 = vrot.lane.b32.xlu2 %v8023_v33, %s11961_s24  ;;  %v20317_v4 = vmax.f32 %v20316_v41, 0.0  ;;  %v10881_v33 = vrot.slane %v17782_v35, 9 }
 0xaee   :  { %v7806_v41 = vrot.slane %v7804_v31, 5 }
 0xaef   :  { %v17891_v17 = vpack.c.b16 %v17885_v20, %v17885_v20  ;;  %v17893_v46 = vpack.c.b16 %v7621_v27, %v7621_v27  ;;  %v17899_v56 = vadd.f32 %v7385_v38, %v20317_v4  ;;  %v7802_v27 = vrot.slane %v7801_v58, 4 }
 0xaf0   :  { %v17915_v35 = vsel %vm12525_vm11, %v10881_v33, %v7888_v40  ;;  %v10872_v40 = vrot.slane %v17391_v47, 9 }
 0xaf1   :  { %v7809_v50 = vshrl.u32 %v17891_v17, 16  ;;  %v7812_v3 = vshll.u32 %v17891_v17, 16  ;;  %20318 = vst [vmem:[#allocation13_spill] sm:$0xff] %v17899_v56  ;;  %v7818_v2 = vshll.u32 %v17893_v46, 16  ;;  %v7421_v4 = vpack.c.bf16 %v17899_v56, %v17899_v56 }
 0xaf2   :  { %v19592_v59 = vunpack.c.l.b16 %v17915_v35 }
 0xaf3   :  { %v7811_v51 = vrot.slane %v7809_v50, 4  ;;  %v7814_v25 = vrot.slane %v7812_v3, 5  ;;  %v7807_v50 = vsel %vm12157_vm8, %v7802_v27, %v7806_v41  ;;  %v7820_v3 = vrot.slane %v7818_v2, 5  ;;  %v11323_v2 = vld [vmem:[%s19300_s17 + $0x98] sm:$0xff] }
 0xaf4   :  { %v7516_v31 = vshrl.u32 %v7421_v4, 16  ;;  %v8061_v33 = vpack.c.b16 %v19590_v6, %v19592_v59  ;;  %v7852_v27 = vrot.slane %v17393_v5, 5  ;;  %8602 = vmatpush.bf16.msrb.mxu0 %v11323_v2  ;;  %v7519_v47 = vshll.u32 %v7421_v4, 16 }
 0xaf5   :  { %8036 = vrot.lane.b32.xlu2 %v8024_v61, %s11961_s24  ;;  %v7815_v38 = vor.u32 %v7814_v25, %v7811_v51  ;;  %v17923_v61 = vunpack.c.l.b16 %v7807_v50  ;;  %v7909_v5 = vunpack.c.h.b16 %v17843_v44 }
 0xaf6   :  { %v7518_v41 = vrot.slane %v7516_v31, 7  ;;  %v17954_v31 = vpack.c.b16 %v17856_v15, %v17856_v15 }
 0xaf7   :  { %v7816_v58 = vrot.slane %v7815_v38, 4  ;;  %v17942_v38 = vsel %vm12525_vm11, %v10872_v40, %v7852_v27 }
 0xaf8   :  { %v7521_v50 = vor.u32 %v7519_v47, %v7518_v41  ;;  %v10886_v4 = vrot.slane %v17954_v31, 9  ;;  %v11314_v41 = vld [vmem:[%s19300_s17 + $0x50] sm:$0xff]  ;;  %v11959_v47 = vld [vmem:[%s19301_s15] ss:$0 sm:$0xff] }
 0xaf9   :  { %v7821_v42 = vsel %vm12157_vm8, %v7816_v58, %v7820_v3  ;;  %v19591_v58 = vunpack.c.l.b16 %v17942_v38  ;;  %v20320_v3 = vunpack.c.l.b16 %v17602_v39  ;;  %8554 = vmatpush.bf16.msra.mxu3 %v11314_v41  ;;  %v7955_v41 = vpack.c.b16 %v17663_v0, %v17595_v28 }
 0xafa   :  { %v17925_v51 = vunpack.c.l.b16 %v7821_v42  ;;  %v7565_v40 = vsel %vm12130_vm2, 0, %v7521_v50 }
 0xafb   :  { %v8056_v42 = vpack.c.b16 %v20320_v3, %v19591_v58  ;;  %v7581_v44 = vsel %vm12134_vm5, %v7565_v40, 0  ;;  %v20321_v3 = vld [vmem:[#allocation18_spill] sm:$0xff]  ;;  %v11313_v40 = vld [vmem:[%s19300_s17 + $0x48] sm:$0xff]  ;;  %v10880_v58 = vrot.slane %v17756_v34, 9 }
 0xafc   :  { %v7980_v25 = vpack.c.b16 %v17925_v51, %v17923_v61  ;;  %v17965_v2 = vunpack.c.l.b16 %v7581_v44 }
 0xafd   :  { %8074 = vrot.lane.b32.xlu2 %v8061_v33, %s11961_s24  ;;  %v17950_v33 = vpack.c.b16 %v7909_v5, %v7909_v5  ;;  %8555 = vmatpush.bf16.msra.mxu3 %v11313_v40 }
 0xafe   :  { %7994 = vrot.lane.b32.xlu1 %v7980_v25, %s11961_s24  ;;  %v8022_v25 = vpack.c.b16 %v17595_v28, %v17547_v36  ;;  %v20322_v36 = vmax.f32 %v20321_v3, 0.0  ;;  %v7880_v3 = vrot.slane %v17735_v8, 5  ;;  %v11312_v28 = vld [vmem:[%s19300_s17 + $0x40] sm:$0xff] }
 0xaff   :  { %v7946_v27 = vrot.slane %v17950_v33, 5 }
 0xb01   :  { %v17975_v50 = vsel %vm12525_vm11, %v10886_v4, %v7946_v27  ;;  %v17990_v4 = vpack.c.b16 %v17965_v2, %v17965_v2  ;;  %8556 = vmatpush.bf16.msra.mxu3 %v11312_v28 }
 0xb02   :  { %v19596_v6 = vunpack.c.l.b16 %v17975_v50 }
 0xb03   :  { %v7823_v40 = vshrl.u32 %v17990_v4, 16 }
 0xb06   :  { %8064 = vrot.lane.b32.xlu1 %v8056_v42, %s11961_s24 }
 0xb0c   :  { %v7387_v39 = vpop.f32.mrf.mxu1 }
 0xb0d   :  { %v7388_v5 = vadd.f32 %v11959_v47, %v7387_v39  ;;  %v7884_v39 = vrot.slane %v17771_v18, 5  ;;  %v20324_v18 = vunpack.c.l.b16 %v17869_v53  ;;  %v7623_v53 = vunpack.c.h.b16 %v7581_v44 }
 0xb0e   :  { %8032 = vrot.lane.b32.xlu1 %v8022_v25, %s11961_s24 }
 0xb0f   :  { %v17980_v42 = vadd.f32 %v7388_v5, %v20322_v36  ;;  %v10879_v5 = vrot.slane %v17733_v10, 9  ;;  %v8059_v59 = vpack.c.b16 %v19596_v6, %v20324_v18  ;;  %v7885_v56 = vsel %vm12525_vm11, %v10880_v58, %v7884_v39  ;;  %v20325_v6 = vld [vmem:[#allocation43_spill] sm:$0xff] }
 0xb10   :  { %v20326_v58 = vmax.f32 %v20325_v6, 0.0 }
 0xb11   :  { %20323 = vst [vmem:[#allocation59_spill] sm:$0xff] %v17980_v42  ;;  %v7422_v27 = vpack.c.bf16 %v17980_v42, %v17980_v42  ;;  %v7826_v42 = vshll.u32 %v17990_v4, 16  ;;  %v18017_v48 = vsel %vm12525_vm11, %v10879_v5, %v7880_v3 }
 0xb13   :  { %v7523_v25 = vshrl.u32 %v7422_v27, 16  ;;  %v7526_v10 = vshll.u32 %v7422_v27, 16  ;;  %v7825_v27 = vrot.slane %v7823_v40, 4 }
 0xb14   :  { %v7389_v36 = vpop.f32.mrf.mxu1  ;;  %v7989_v34 = vpop.permute.xlu1 %7988 }
 0xb15   :  { %v7525_v0 = vrot.slane %v7523_v25, 7  ;;  %v7390_v8 = vadd.f32 %v11959_v47, %v7389_v36  ;;  %v8104_v12 = vsel %vm966_vm12, %v7955_v41, %v7989_v34  ;;  %v8006_v25 = vunpack.c.l.b16 %v7885_v56 }
 0xb16   :  { %8070 = vrot.lane.b32.xlu1 %v8059_v59, %s11961_s24  ;;  %8523 = vmatmul.bf16.gmra.mxu2 %v8104_v12  ;;  %v7828_v47 = vrot.slane %v7826_v42, 5  ;;  %v18023_v41 = vpack.c.b16 %v7623_v53, %v7623_v53  ;;  %v20328_v34 = vunpack.c.l.b16 %v17915_v35 }
 0xb17   :  { %v7528_v18 = vor.u32 %v7526_v10, %v7525_v0  ;;  %v18013_v39 = vadd.f32 %v7390_v8, %v20326_v58  ;;  %8665 = vmatmul.bf16.gmra.mxu1 %v8104_v12  ;;  %v19598_v12 = vunpack.c.l.b16 %v18017_v48 }
 0xb18   :  { %v7829_v42 = vor.u32 %v7828_v47, %v7825_v27  ;;  %v18034_v40 = vpack.c.b16 %v20328_v34, %v8006_v25  ;;  %v7832_v53 = vshll.u32 %v18023_v41, 16 }
 0xb19   :  { %20327 = vst [vmem:[#allocation89_spill] sm:$0xff] %v18013_v39  ;;  %v7566_v44 = vsel %vm12130_vm2, 0, %v7528_v18  ;;  %v7423_v59 = vpack.c.bf16 %v18013_v39, %v18013_v39  ;;  %v8060_v56 = vpack.c.b16 %v8006_v25, %v19598_v12 }
 0xb1a   :  { %v7582_v6 = vsel %vm12134_vm5, %v7566_v44, 0 }
 0xb1b   :  { %v7625_v36 = vunpack.c.h.b16 %v7582_v6  ;;  %v7530_v5 = vshrl.u32 %v7423_v59, 16  ;;  %v18028_v3 = vunpack.c.l.b16 %v7582_v6  ;;  %v7533_v10 = vshll.u32 %v7423_v59, 16 }
 0xb1c   :  { %v7830_v6 = vrot.slane %v7829_v42, 4  ;;  %v7834_v59 = vrot.slane %v7832_v53, 5 }
 0xb1d   :  { %v7653_v28 = vpack.c.b16 %v7625_v36, %v7625_v36  ;;  %v7532_v0 = vrot.slane %v7530_v5, 7  ;;  %v7652_v8 = vpack.c.b16 %v18028_v3, %v18028_v3 }
 0xb1e   :  { %8072 = vrot.lane.b32.xlu1 %v8060_v56, %s11961_s24  ;;  %v7835_v42 = vsel %vm12157_vm8, %v7830_v6, %v7834_v59 }
 0xb1f   :  { %v7535_v18 = vor.u32 %v7533_v10, %v7532_v0  ;;  %v7837_v58 = vshrl.u32 %v7652_v8, 16  ;;  %v7840_v44 = vshll.u32 %v7652_v8, 16  ;;  %v7846_v12 = vshll.u32 %v7653_v28, 16 }
 0xb20   :  { %v10885_v36 = vrot.slane %v7652_v8, 9  ;;  %v7904_v39 = vrot.slane %v7653_v28, 5  ;;  %v8026_v0 = vpack.c.b16 %v17965_v2, %v17885_v20 }
 0xb21   :  { %v7567_v35 = vsel %vm12130_vm2, 0, %v7535_v18  ;;  %v7839_v25 = vrot.slane %v7837_v58, 4  ;;  %v7842_v27 = vrot.slane %v7840_v44, 5  ;;  %v7848_v10 = vrot.slane %v7846_v12, 5 }
 0xb22   :  { %v7583_v47 = vsel %vm12134_vm5, %v7567_v35, 0  ;;  %v18062_v44 = vsel %vm12525_vm11, %v10885_v36, %v7904_v39  ;;  %v18065_v35 = vunpack.c.l.b16 %v7835_v42  ;;  %v7917_v39 = vshrl.u32 %v17954_v31, 16 }
 0xb23   :  { %v7911_v5 = vunpack.c.h.b16 %v7583_v47  ;;  %v18044_v34 = vunpack.c.l.b16 %v7583_v47  ;;  %v7843_v56 = vor.u32 %v7842_v27, %v7839_v25  ;;  %v8011_v59 = vunpack.c.l.b16 %v18062_v44 }
 0xb24   :  { %v7920_v36 = vshll.u32 %v17954_v31, 16  ;;  %v7919_v42 = vrot.slane %v7917_v39, 4  ;;  %v7896_v31 = vrot.slane %v17893_v46, 5  ;;  %v7926_v39 = vshll.u32 %v17950_v33, 16 }
 0xb25   :  { %v18050_v18 = vpack.c.b16 %v7911_v5, %v7911_v5  ;;  %v7914_v58 = vpack.c.b16 %v18044_v34, %v18044_v34  ;;  %v8027_v8 = vpack.c.b16 %v18044_v34, %v18028_v3  ;;  %v7844_v53 = vrot.slane %v7843_v56, 4 }
 0xb26   :  { %8040 = vrot.lane.b32.xlu1 %v8026_v0, %s11961_s24  ;;  %v20330_v46 = vunpack.c.l.b16 %v17942_v38 }
 0xb27   :  { %8042 = vrot.lane.b32.xlu2 %v8027_v8, %s11961_s24  ;;  %v7849_v28 = vsel %vm12157_vm8, %v7844_v53, %v7848_v10  ;;  %v10887_v12 = vrot.slane %v7914_v58, 9  ;;  %v7950_v6 = vrot.slane %v18050_v18, 5  ;;  %v7922_v10 = vrot.slane %v7920_v36, 5  ;;  %v11322_v8 = vld [vmem:[%s19300_s17 + $0x90] sm:$0xff] }
 0xb28   :  { %v18067_v25 = vunpack.c.l.b16 %v7849_v28  ;;  %v10883_v53 = vrot.slane %v17891_v17, 9  ;;  %8603 = vmatpush.bf16.msrb.mxu0 %v11322_v8  ;;  %v20329_v17 = vld [vmem:[#allocation6_spill] sm:$0xff] }
 0xb29   :  { %v18071_v27 = vsel %vm12525_vm11, %v10887_v12, %v7950_v6  ;;  %v8021_v12 = vpack.c.b16 %v17520_v16, %v17455_v24  ;;  %v7923_v6 = vor.u32 %v7922_v10, %v7919_v42  ;;  %v7928_v24 = vrot.slane %v7926_v39, 5 }
 0xb2a   :  { %v7981_v47 = vpack.c.b16 %v18067_v25, %v18065_v35  ;;  %v19600_v5 = vunpack.c.l.b16 %v18071_v27  ;;  %v18092_v28 = vsel %vm12525_vm11, %v10883_v53, %v7896_v31  ;;  %v20331_v16 = vunpack.c.l.b16 %v17812_v11 }
 0xb2b   :  { %v7924_v31 = vrot.slane %v7923_v6, 4  ;;  %v7934_v6 = vshll.u32 %v7914_v58, 16  ;;  %v7957_v11 = vpack.c.b16 %v17773_v52, %v17752_v62  ;;  %v7940_v62 = vshll.u32 %v18050_v18, 16  ;;  %v11321_v18 = vld [vmem:[%s19300_s17 + $0x88] sm:$0xff] }
 0xb2c   :  { %7996 = vrot.lane.b32.xlu0 %v7981_v47, %s11961_s24  ;;  %v8063_v56 = vpack.c.b16 %v19600_v5, %v8011_v59  ;;  %v7956_v47 = vpack.c.b16 %v17727_v45, %v20296_v9  ;;  %v20332_v45 = vunpack.c.l.b16 %v17864_v14  ;;  %v10884_v14 = vrot.slane %v17990_v4, 9  ;;  %8604 = vmatpush.bf16.msrb.mxu0 %v11321_v18 }
 0xb2d   :  { %v7929_v33 = vsel %vm12157_vm8, %v7924_v31, %v7928_v24  ;;  %v11320_v24 = vld [vmem:[%s19300_s17 + $0x80] sm:$0xff]  ;;  %v20337_v44 = vunpack.c.l.b16 %v18071_v27 }
 0xb2e   :  { %8078 = vrot.lane.b32.xlu1 %v8063_v56, %s11961_s24  ;;  %v8012_v56 = vpack.c.b16 %v20330_v46, %v20329_v17  ;;  %v8058_v42 = vpack.c.b16 %v20332_v45, %v20331_v16  ;;  %v18112_v38 = vunpack.c.l.b16 %v7929_v33  ;;  %v8025_v46 = vpack.c.b16 %v17830_v26, %v17773_v52  ;;  %v11339_v33 = vld [vmem:[%s19300_s17 + $0x118] sm:$0xff] }
 0xb2f   :  { %v7993_v0 = vpop.permute.xlu2 %7992  ;;  %v7958_v45 = vpack.c.b16 %v17885_v20, %v17830_v26  ;;  %8700 = vmatpush.bf16.msrb.mxu2 %v11339_v33  ;;  %v11338_v26 = vld [vmem:[%s19300_s17 + $0x110] sm:$0xff] }
 0xb30   :  { %v8082_v10 = vpack.c.b16 %v20274_v29, %v18112_v38  ;;  %8605 = vmatpush.bf16.msrb.mxu0 %v11320_v24 }
 0xb33   :  { %8701 = vmatpush.bf16.msrb.mxu2 %v11338_v26 }
 0xb34   :  { %8030 = vrot.lane.b32.xlu0 %v8021_v12, %s11961_s24  ;;  %v7931_v12 = vshrl.u32 %v7914_v58, 16 }
 0xb36   :  { %v7991_v36 = vpop.permute.xlu0 %7990  ;;  %v7933_v39 = vrot.slane %v7931_v12, 4  ;;  %v8046_v12 = vpack.c.b16 %v17477_v55, %v17435_v19  ;;  %v11336_v19 = vld [vmem:[%s19300_s17 + $0x100] sm:$0xff]  ;;  %v7959_v55 = vpack.c.b16 %v18028_v3, %v17965_v2 }
 0xb37   :  { %v8029_v8 = vpop.permute.xlu2 %8028  ;;  %v8108_v53 = vsel %vm966_vm12, %v7956_v47, %v7991_v36  ;;  %v7900_v47 = vrot.slane %v18023_v41, 5  ;;  %v7936_v36 = vrot.slane %v7934_v6, 5  ;;  %v8009_v41 = vunpack.c.l.b16 %v18092_v28 }
 0xb38   :  { %v8124_v5 = vsel %vm966_vm12, %v8012_v56, %v8029_v8  ;;  %8528 = vmatmul.bf16.gmra.mxu2 %v8108_v53  ;;  %v7942_v8 = vrot.slane %v7940_v62, 5 }
 0xb39   :  { %8557 = vmatmul.bf16.vlgmr.msra.gmra.mxu3 %v8124_v5  ;;  %v18121_v5 = vsel %vm966_vm12, %v7957_v11, %v7993_v0  ;;  %v18129_v58 = vsel %vm12525_vm11, %v10884_v14, %v7900_v47  ;;  %v7937_v56 = vor.u32 %v7936_v36, %v7933_v39  ;;  %v8047_v14 = vpack.c.b16 %v17633_v60, %v17479_v1  ;;  %v11337_v47 = vld [vmem:[%s19300_s17 + $0x108] sm:$0xff]  ;;  %v18177_v1 = vpop.f32.mrf.mxu2 }
 0xb3a   :  { %v8010_v4 = vunpack.c.l.b16 %v18129_v58  ;;  %8702 = vmatpush.bf16.msrb.mxu2 %v11337_v47 }
 0xb3b   :  { %v7938_v0 = vrot.slane %v7937_v56, 4 }
 0xb3c   :  { %8068 = vrot.lane.b32.xlu0 %v8058_v42, %s11961_s24  ;;  %v8062_v52 = vpack.c.b16 %v8010_v4, %v8009_v41 }
 0xb3d   :  { %v7943_v53 = vsel %vm12157_vm8, %v7938_v0, %v7942_v8  ;;  %v8048_v0 = vpack.c.b16 %v17692_v22, %v17635_v54  ;;  %v8049_v22 = vpack.c.b16 %v18112_v38, %v17694_v37  ;;  %v8050_v37 = vpack.c.b16 %v17806_v30, %v17762_v49 }
 0xb3e   :  { %v18145_v31 = vunpack.c.l.b16 %v7943_v53  ;;  %8703 = vmatpush.bf16.msrb.mxu2 %v11336_v19  ;;  %v8080_v53 = vpack.c.b16 %v20296_v9, %v17856_v15  ;;  %v8051_v30 = vpack.c.b16 %v17923_v61, %v17808_v57  ;;  %v8052_v57 = vpack.c.b16 %v18065_v35, %v17925_v51 }
 0xb3f   :  { %v8067_v20 = vpop.permute.xlu2 %8066 }
 0xb40   :  { %v8083_v16 = vpack.c.b16 %v20274_v29, %v18145_v31  ;;  %v8160_v39 = vsel %vm966_vm12, %v8047_v14, %v8067_v20  ;;  %v20334_v14 = vunpack.c.l.b16 %v17975_v50 }
 0xb41   :  { %v18181_v62 = vpop.f32.mrf.mxu2 }
 0xb44   :  { %8084 = vrot.lane.b32.xlu0 %v8082_v10, %s11961_s24 }
 0xb47   :  { %v8035_v15 = vpop.permute.xlu2 %8034 }
 0xb48   :  { %8533 = vmatmul.bf16.gmra.mxu2 %v18121_v5  ;;  %v8136_v33 = vsel %vm966_vm12, %v17881_v43, %v8035_v15 }
 0xb49   :  { %v18188_v3 = vpop.f32.mrf.mxu2 }
 0xb4c   :  { %8038 = vrot.lane.b32.xlu0 %v8025_v46, %s11961_s24 }
 0xb54   :  { %8076 = vrot.lane.b32.xlu0 %v8062_v52, %s11961_s24 }
 0xb5c   :  { %8086 = vrot.lane.b32.xlu0 %v8083_v16, %s11961_s24 }
 0xb70   :  { %v7995_v42 = vpop.permute.xlu1 %7994 }
 0xb71   :  { %v8116_v10 = vsel %vm966_vm12, %v7958_v45, %v7995_v42  ;;  %v18197_v45 = vpop.f32.mrf.mxu2 }
 0xb72   :  { %8538 = vmatmul.bf16.gmra.mxu2 %v8116_v10 }
 0xb78   :  { %v8065_v6 = vpop.permute.xlu1 %8064 }
 0xb79   :  { %v8156_v11 = vsel %vm966_vm12, %v8046_v12, %v8065_v6  ;;  %v18202_v42 = vpop.f32.mrf.mxu2  ;;  %v8037_v6 = vpop.permute.xlu2 %8036 }
 0xb7a   :  { %8606 = vmatmul.bf16.vlgmr.msrb.gmra.mxu0 %v8156_v11  ;;  %v20333_v11 = vunpack.c.l.b16 %v18017_v48 }
 0xb7c   :  { %v8016_v26 = vpack.c.b16 %v20333_v11, %v20329_v17 }
 0xb7e   :  { %v8140_v20 = vsel %vm966_vm12, %v8016_v26, %v8037_v6 }
 0xb80   :  { %v8033_v2 = vpop.permute.xlu1 %8032 }
 0xb81   :  { %v8132_v24 = vsel %vm966_vm12, %v17820_v32, %v8033_v2  ;;  %v8075_v49 = vpop.permute.xlu2 %8074 }
 0xb82   :  { %v8176_v47 = vsel %vm966_vm12, %v8051_v30, %v8075_v49  ;;  %v18282_v30 = vld [vmem:[%s19302_s18] ss:$0 sm:$0xff] }
 0xb88   :  { %v8071_v54 = vpop.permute.xlu1 %8070 }
 0xb89   :  { %v8043_v28 = vpop.permute.xlu2 %8042 }
 0xb8a   :  { %8611 = vmatmul.bf16.gmra.mxu0 %v8160_v39 }
 0xb90   :  { %v8073_v12 = vpop.permute.xlu1 %8072 }
 0xb91   :  { %v8172_v38 = vsel %vm966_vm12, %v8050_v37, %v8073_v12 }
 0xb98   :  { %v8041_v50 = vpop.permute.xlu1 %8040 }
 0xb9e   :  { %v7997_v36 = vpop.permute.xlu0 %7996 }
 0xb9f   :  { %v8120_v46 = vsel %vm966_vm12, %v7959_v55, %v7997_v36 }
 0xba0   :  { %8543 = vmatmul.bf16.gmra.mxu2 %v8120_v46 }
 0xba6   :  { %v8031_v60 = vpop.permute.xlu0 %8030 }
 0xba7   :  { %v8128_v56 = vsel %vm966_vm12, %v17647_v7, %v8031_v60 }
 0xba8   :  { %8562 = vmatmul.bf16.gmra.mxu3 %v8128_v56  ;;  %v20335_v56 = vld [vmem:[#allocation88_spill] sm:$0xff] }
 0xbae   :  { %v8069_v8 = vpop.permute.xlu0 %8068 }
 0xbaf   :  { %v8164_v52 = vsel %vm966_vm12, %v8048_v0, %v8069_v8  ;;  %v20336_v0 = vunpack.c.l.b16 %v20335_v56  ;;  %v8081_v8 = vpack.c.b16 %v20296_v9, %v18044_v34  ;;  %v8019_v34 = vpack.c.b16 %v8011_v59, %v8010_v4 }
 0xbb0   :  { %8616 = vmatmul.bf16.gmra.mxu0 %v8164_v52  ;;  %11032 = vmatmul.msk.bf16.vlgmr.msrb.gmra.mxu2 %vm966_vm12, %v17647_v7  ;;  %v8168_v7 = vsel %vm966_vm12, %v8049_v22, %v8071_v54  ;;  %v8079_v52 = vpop.permute.xlu1 %8078  ;;  %v8089_v59 = vpack.c.b16 %v20329_v17, %v20337_v44 }
 0xbb6   :  { %v8085_v18 = vpop.permute.xlu0 %8084 }
 0xbb7   :  { %v8188_v16 = vsel %vm966_vm12, %v8080_v53, %v8085_v18  ;;  %v8152_v18 = vsel %vm966_vm12, %v8019_v34, %v8043_v28 }
 0xbb8   :  { %8567 = vmatmul.bf16.gmra.mxu3 %v8132_v24  ;;  %8670 = vmatmul.bf16.gmra.mxu1 %v8188_v16 }
 0xbbc   :  { %v8558_v22 = vpop.f32.mrf.mxu3 }
 0xbbd   :  { %v8559_v11 = vadd.f32 %v8558_v22, %v18177_v1  ;;  %v18288_v1 = vld [vmem:[%s19303_s19] ss:$0 sm:$0xff] }
 0xbbe   :  { %v8039_v39 = vpop.permute.xlu0 %8038 }
 0xbc0   :  { %8621 = vmatmul.bf16.gmra.mxu0 %v8168_v7  ;;  %11033 = vmatmul.msk.bf16.gmra.mxu2 %vm966_vm12, %v17820_v32  ;;  %v18212_v32 = vpop.f32.mrf.mxu2 }
 0xbc4   :  { %v8560_v4 = vpop.f32.mrf.mxu3 }
 0xbc6   :  { %v8077_v19 = vpop.permute.xlu0 %8076 }
 0xbc7   :  { %v8180_v61 = vsel %vm966_vm12, %v8052_v57, %v8077_v19 }
 0xbc8   :  { %8572 = vmatmul.bf16.gmra.mxu3 %v8136_v33  ;;  %8675 = vmatmul.bf16.gmra.mxu1 %v18121_v5  ;;  %v18218_v5 = vpop.f32.mrf.mxu2 }
 0xbce   :  { %v8087_v36 = vpop.permute.xlu0 %8086 }
 0xbcf   :  { %v8192_v35 = vsel %vm966_vm12, %v8081_v8, %v8087_v36 }
 0xbd0   :  { %8626 = vmatmul.bf16.gmra.mxu0 %v8172_v38  ;;  %11034 = vmatmul.msk.bf16.gmra.mxu2 %vm966_vm12, %v17881_v43  ;;  %v8088_v43 = vpack.c.b16 %v20329_v17, %v20334_v14  ;;  %v18227_v48 = vpop.f32.mrf.mxu2 }
 0xbd8   :  { %8577 = vmatmul.bf16.gmra.mxu3 %v8140_v20  ;;  %8680 = vmatmul.bf16.gmra.mxu1 %v8116_v10  ;;  %v8144_v10 = vsel %vm966_vm12, %v18034_v40, %v8039_v39  ;;  %v18231_v55 = vpop.f32.mrf.mxu2 }
 0xbe0   :  { %8631 = vmatmul.bf16.gmra.mxu0 %v8176_v47  ;;  %11035 = vmatmul.msk.bf16.gmra.mxu2 %vm966_vm12, %v8088_v43  ;;  %v18238_v60 = vpop.f32.mrf.mxu2  ;;  %v8561_v47 = vadd.f32 %v8560_v4, %v18181_v62 }
 0xbe8   :  { %8582 = vmatmul.bf16.gmra.mxu3 %v8144_v10  ;;  %8685 = vmatmul.bf16.gmra.mxu1 %v8120_v46  ;;  %v8018_v46 = vpack.c.b16 %v8009_v41, %v20336_v0  ;;  %v18250_v2 = vpop.f32.mrf.mxu2 }
 0xbea   :  { %v8148_v51 = vsel %vm966_vm12, %v8018_v46, %v8041_v50 }
 0xbf0   :  { %8636 = vmatmul.bf16.gmra.mxu0 %v8180_v61  ;;  %11036 = vmatmul.msk.bf16.gmra.mxu2 %vm966_vm12, %v18034_v40  ;;  %v8053_v40 = vpack.c.b16 %v18145_v31, %v18067_v25  ;;  %v18259_v24 = vpop.f32.mrf.mxu2  ;;  %v8656_v25 = vpop.f32.mrf.mxu1 }
 0xbf2   :  { %v8184_v53 = vsel %vm966_vm12, %v8053_v40, %v8079_v52 }
 0xbf7   :  { %v8607_v41 = vpop.f32.mrf.mxu0 }
 0xbf8   :  { %8587 = vmatmul.bf16.gmra.mxu3 %v8148_v51  ;;  %8690 = vmatmul.bf16.gmra.mxu1 %v8192_v35  ;;  %v18262_v31 = vpop.f32.mrf.mxu2  ;;  %v8658_v54 = vpop.f32.mrf.mxu1  ;;  %v8608_v20 = vadd.f32 %v8607_v41, %v8559_v11 }
 0xbfa   :  { %v8657_v27 = vadd.f32 %v8656_v25, %v8608_v20 }
 0xbff   :  { %v8609_v16 = vpop.f32.mrf.mxu0 }
 0xc00   :  { %8641 = vmatmul.bf16.gmra.mxu0 %v8184_v53  ;;  %11037 = vmatmul.msk.bf16.gmra.mxu2 %vm966_vm12, %v8018_v46  ;;  %v18264_v7 = vpop.f32.mrf.mxu2  ;;  %v8661_v15 = vpop.f32.mrf.mxu1  ;;  %v8610_v19 = vadd.f32 %v8609_v16, %v8561_v47 }
 0xc02   :  { %v8659_v0 = vadd.f32 %v8658_v54, %v8610_v19 }
 0xc07   :  { %v8612_v58 = vpop.f32.mrf.mxu0 }
 0xc08   :  { %8592 = vmatmul.bf16.gmra.mxu3 %v8152_v18  ;;  %v8663_v37 = vpop.f32.mrf.mxu1 }
 0xc0f   :  { %v8614_v12 = vpop.f32.mrf.mxu0 }
 0xc10   :  { %11038 = vmatmul.msk.bf16.gmra.mxu2 %vm966_vm12, %v8019_v34  ;;  %v18277_v49 = vpop.f32.mrf.mxu1 }
 0xc18   :  { %v18294_v50 = vpop.f32.mrf.mxu1 }
 0xc20   :  { %11039 = vmatmul.msk.bf16.gmra.mxu2 %vm966_vm12, %v8089_v59 }
 0xc23   :  { %v18270_v33 = vpop.f32.mrf.mxu2 }
 0xc2b   :  { %v18272_v38 = vpop.f32.mrf.mxu2  ;;  %v8563_v6 = vpop.f32.mrf.mxu3 }
 0xc2c   :  { %v8564_v36 = vadd.f32 %v8563_v6, %v18188_v3 }
 0xc2d   :  { %v18275_v26 = vpop.f32.mrf.mxu0 }
 0xc2e   :  { %v8613_v35 = vadd.f32 %v8612_v58, %v8564_v36 }
 0xc30   :  { %v8662_v54 = vadd.f32 %v8661_v15, %v8613_v35 }
 0xc33   :  { %v8565_v14 = vpop.f32.mrf.mxu3  ;;  %v8705_v43 = vpop.f32.mrf.mxu2 }
 0xc34   :  { %v8706_v39 = vadd.f32 %v8705_v43, %v8657_v27  ;;  %v8566_v18 = vadd.f32 %v8565_v14, %v18197_v45 }
 0xc35   :  { %v18290_v10 = vpop.f32.mrf.mxu0  ;;  %v18302_v3 = vpop.f32.mrf.mxu1 }
 0xc36   :  { %v8749_v57 = vmul.f32 %v18282_v30, %v8706_v39  ;;  %v8615_v6 = vadd.f32 %v8614_v12, %v8566_v18 }
 0xc38   :  { %v8769_v61 = vadd.f32 %v18288_v1, %v8749_v57  ;;  %v8664_v57 = vadd.f32 %v8663_v37, %v8615_v6 }
 0xc3a   :  { %v8785_v56 = vmax.f32 %v8769_v61, 0.0 }
 0xc3b   :  { %v8568_v62 = vpop.f32.mrf.mxu3  ;;  %v8707_v46 = vpop.f32.mrf.mxu2 }
 0xc3c   :  { %v8801_v8 = vpack.c.bf16 %v8785_v56, %v8785_v56  ;;  %v8708_v51 = vadd.f32 %v8707_v46, %v8659_v0  ;;  %v8569_v61 = vadd.f32 %v8568_v62, %v18202_v42 }
 0xc3d   :  { %v18298_v53 = vpop.f32.mrf.mxu0 }
 0xc3e   :  { %v8818_v52 = vshrl.u32 %v8801_v8, 16  ;;  %v8750_v40 = vmul.f32 %v18282_v30, %v8708_v51  ;;  %v8821_v34 = vshll.u32 %v8801_v8, 16  ;;  %v8618_v42 = vadd.f32 %v18275_v26, %v8569_v61 }
 0xc40   :  { %v8820_v28 = vrot.slane %v8818_v52, 7  ;;  %v8770_v41 = vadd.f32 %v18288_v1, %v8750_v40  ;;  %v18325_v52 = vpop.f32.mrf.mxu1  ;;  %v8667_v26 = vadd.f32 %v18277_v49, %v8618_v42 }
 0xc42   :  { %v8823_v25 = vor.u32 %v8821_v34, %v8820_v28  ;;  %v8786_v16 = vmax.f32 %v8770_v41, 0.0 }
 0xc43   :  { %v8570_v22 = vpop.f32.mrf.mxu3  ;;  %v8710_v44 = vpop.f32.mrf.mxu2 }
 0xc44   :  { %v8945_v58 = vsel %vm12130_vm2, 0, %v8823_v25  ;;  %v8802_v59 = vpack.c.bf16 %v8786_v16, %v8786_v16  ;;  %v8711_v4 = vadd.f32 %v8710_v44, %v8662_v54  ;;  %v8571_v54 = vadd.f32 %v8570_v22, %v18212_v32 }
 0xc45   :  { %v8961_v11 = vsel %vm12134_vm5, %v8945_v58, 0  ;;  %v18317_v19 = vpop.f32.mrf.mxu0 }
 0xc46   :  { %v18308_v20 = vunpack.c.l.b16 %v8961_v11  ;;  %v8992_v27 = vunpack.c.h.b16 %v8961_v11  ;;  %v8825_v45 = vshrl.u32 %v8802_v59, 16  ;;  %v8751_v14 = vmul.f32 %v18282_v30, %v8711_v4 }
 0xc47   :  { %v8828_v39 = vshll.u32 %v8802_v59, 16 }
 0xc48   :  { %v18313_v15 = vpack.c.b16 %v18308_v20, %v18308_v20  ;;  %v18315_v43 = vpack.c.b16 %v8992_v27, %v8992_v27  ;;  %v8827_v47 = vrot.slane %v8825_v45, 7  ;;  %v8771_v12 = vadd.f32 %v18288_v1, %v8751_v14 }
 0xc4a   :  { %v8830_v36 = vor.u32 %v8828_v39, %v8827_v47  ;;  %v9048_v56 = vshrl.u32 %v18313_v15, 16  ;;  %v9051_v0 = vshll.u32 %v18313_v15, 16  ;;  %v8787_v46 = vmax.f32 %v8771_v12, 0.0 }
 0xc4b   :  { %v8573_v8 = vpop.f32.mrf.mxu3  ;;  %v8712_v51 = vpop.f32.mrf.mxu2  ;;  %v9057_v34 = vshll.u32 %v18315_v43, 16 }
 0xc4c   :  { %v8946_v35 = vsel %vm12130_vm2, 0, %v8830_v36  ;;  %v8713_v40 = vadd.f32 %v8712_v51, %v8664_v57  ;;  %v9050_v28 = vrot.slane %v9048_v56, 4  ;;  %v8803_v37 = vpack.c.bf16 %v8787_v46, %v8787_v46  ;;  %v18352_v46 = vpop.f32.mrf.mxu1 }
 0xc4d   :  { %v9053_v41 = vrot.slane %v9051_v0, 5  ;;  %v8962_v62 = vsel %vm12134_vm5, %v8946_v35, 0  ;;  %v9059_v58 = vrot.slane %v9057_v34, 5  ;;  %v18336_v45 = vpop.f32.mrf.mxu0  ;;  %v8620_v56 = vadd.f32 %v18290_v10, %v8571_v54 }
 0xc4e   :  { %v8752_v18 = vmul.f32 %v18282_v30, %v8713_v40  ;;  %v8832_v25 = vshrl.u32 %v8803_v37, 16  ;;  %v18334_v59 = vunpack.c.l.b16 %v8962_v62  ;;  %v8835_v6 = vshll.u32 %v8803_v37, 16 }
 0xc4f   :  { %v9054_v16 = vor.u32 %v9053_v41, %v9050_v28  ;;  %v8994_v32 = vunpack.c.h.b16 %v8962_v62  ;;  %v8574_v54 = vadd.f32 %v8573_v8, %v18218_v5 }
 0xc50   :  { %v8772_v44 = vadd.f32 %v18288_v1, %v8752_v18  ;;  %v8834_v4 = vrot.slane %v8832_v25, 7  ;;  %v18345_v36 = vpack.c.b16 %v18334_v59, %v18334_v59  ;;  %v8669_v18 = vadd.f32 %v18294_v50, %v8620_v56 }
 0xc51   :  { %v9055_v11 = vrot.slane %v9054_v16, 4  ;;  %v18359_v37 = vpack.c.b16 %v8994_v32, %v8994_v32 }
 0xc52   :  { %v8788_v27 = vmax.f32 %v8772_v44, 0.0  ;;  %v8837_v14 = vor.u32 %v8835_v6, %v8834_v4  ;;  %v9062_v25 = vshrl.u32 %v18345_v36, 16 }
 0xc53   :  { %v8575_v47 = vpop.f32.mrf.mxu3  ;;  %v8715_v39 = vpop.f32.mrf.mxu2  ;;  %v9060_v12 = vsel %vm12157_vm8, %v9055_v11, %v9059_v58  ;;  %v9065_v58 = vshll.u32 %v18345_v36, 16  ;;  %v9071_v5 = vshll.u32 %v18359_v37, 16 }
 0xc54   :  { %v8804_v22 = vpack.c.bf16 %v8788_v27, %v8788_v27  ;;  %v8716_v57 = vadd.f32 %v8715_v39, %v8667_v26  ;;  %v18341_v61 = vunpack.c.l.b16 %v9060_v12  ;;  %v8947_v49 = vsel %vm12130_vm2, 0, %v8837_v14 }
 0xc55   :  { %v8963_v0 = vsel %vm12134_vm5, %v8947_v49, 0  ;;  %v9064_v27 = vrot.slane %v9062_v25, 4  ;;  %v18377_v39 = vpop.f32.mrf.mxu0  ;;  %v9067_v32 = vrot.slane %v9065_v58, 5 }
 0xc56   :  { %20338 = vst [vmem:[#allocation12_spill] sm:$0xff] %v18341_v61  ;;  %v8839_v51 = vshrl.u32 %v8804_v22, 16  ;;  %v18354_v35 = vunpack.c.l.b16 %v8963_v0  ;;  %v8996_v40 = vunpack.c.h.b16 %v8963_v0  ;;  %v8753_v28 = vmul.f32 %v18282_v30, %v8716_v57 }
 0xc57   :  { %v9367_v34 = vpack.c.b16 %v18341_v61, %v20274_v29  ;;  %v8842_v41 = vshll.u32 %v8804_v22, 16  ;;  %v8623_v57 = vadd.f32 %v18298_v53, %v8574_v54 }
 0xc58   :  { %20339 = vst [vmem:[#allocation53_spill] sm:$0xff] %v18354_v35  ;;  %v8841_v10 = vrot.slane %v8839_v51, 7  ;;  %v18363_v42 = vpack.c.b16 %v18354_v35, %v18354_v35  ;;  %v8773_v62 = vadd.f32 %v18288_v1, %v8753_v28  ;;  %v18369_v16 = vpack.c.b16 %v8996_v40, %v8996_v40  ;;  %v18384_v28 = vpop.f32.mrf.mxu1 }
 0xc59   :  { %9375 = vrot.lane.b32.xlu2 %v9367_v34, %s11961_s24  ;;  %v9068_v51 = vor.u32 %v9067_v32, %v9064_v27  ;;  %v8576_v34 = vadd.f32 %v8575_v47, %v18227_v48 }
 0xc5a   :  { %v8844_v44 = vor.u32 %v8842_v41, %v8841_v10  ;;  %v8789_v4 = vmax.f32 %v8773_v62, 0.0  ;;  %v9076_v26 = vshrl.u32 %v18363_v42, 16  ;;  %v9079_v14 = vshll.u32 %v18363_v42, 16 }
 0xc5b   :  { %v8578_v6 = vpop.f32.mrf.mxu3  ;;  %v8717_v11 = vpop.f32.mrf.mxu2  ;;  %v9073_v41 = vrot.slane %v9071_v5, 5  ;;  %v9085_v62 = vshll.u32 %v18369_v16, 16  ;;  %v9069_v53 = vrot.slane %v9068_v51, 4  ;;  %v8625_v5 = vadd.f32 %v18317_v19, %v8576_v34 }
 0xc5c   :  { %v8948_v50 = vsel %vm12130_vm2, 0, %v8844_v44  ;;  %v8718_v12 = vadd.f32 %v8717_v11, %v8669_v18  ;;  %v8805_v8 = vpack.c.bf16 %v8789_v4, %v8789_v4  ;;  %v9078_v22 = vrot.slane %v9076_v26, 4 }
 0xc5d   :  { %v8964_v49 = vsel %vm12134_vm5, %v8948_v50, 0  ;;  %v9081_v40 = vrot.slane %v9079_v14, 5  ;;  %v8672_v4 = vadd.f32 %v18302_v3, %v8623_v57  ;;  %v9074_v48 = vsel %vm12157_vm8, %v9069_v53, %v9073_v41 }
 0xc5e   :  { %v8754_v56 = vmul.f32 %v18282_v30, %v8718_v12  ;;  %v8846_v0 = vshrl.u32 %v8805_v8, 16  ;;  %v8849_v25 = vshll.u32 %v8805_v8, 16  ;;  %v18389_v44 = vunpack.c.l.b16 %v8964_v49 }
 0xc5f   :  { %v9082_v54 = vor.u32 %v9081_v40, %v9078_v22  ;;  %v9087_v14 = vrot.slane %v9085_v62, 5  ;;  %v8998_v32 = vunpack.c.h.b16 %v8964_v49  ;;  %v18407_v51 = vunpack.c.l.b16 %v9074_v48 }
 0xc60   :  { %v8774_v10 = vadd.f32 %v18288_v1, %v8754_v56  ;;  %v8848_v18 = vrot.slane %v8846_v0, 7  ;;  %20340 = vst [vmem:[#allocation64_spill] sm:$0xff] %v18389_v44  ;;  %v18401_v3 = vpack.c.b16 %v18389_v44, %v18389_v44  ;;  %v18405_v0 = vpop.f32.mrf.mxu0  ;;  %v8674_v53 = vadd.f32 %v18325_v52, %v8625_v5 }
 0xc61   :  { %v9083_v47 = vrot.slane %v9082_v54, 4  ;;  %20341 = vst [vmem:[#allocation54_spill] sm:$0xff] %v18407_v51  ;;  %v18422_v54 = vpop.f32.mrf.mxu1  ;;  %v18427_v48 = vpack.c.b16 %v8998_v32, %v8998_v32 }
 0xc62   :  { %v8790_v58 = vmax.f32 %v8774_v10, 0.0  ;;  %v8851_v11 = vor.u32 %v8849_v25, %v8848_v18 }
 0xc63   :  { %v8580_v27 = vpop.f32.mrf.mxu3  ;;  %v8720_v26 = vpop.f32.mrf.mxu2  ;;  %v9088_v22 = vsel %vm12157_vm8, %v9083_v47, %v9087_v14 }
 0xc64   :  { %v8806_v50 = vpack.c.bf16 %v8790_v58, %v8790_v58  ;;  %v8721_v12 = vadd.f32 %v8720_v26, %v8672_v4  ;;  %v8949_v8 = vsel %vm12130_vm2, 0, %v8851_v11  ;;  %v18412_v34 = vunpack.c.l.b16 %v9088_v22 }
 0xc65   :  { %v8965_v57 = vsel %vm12134_vm5, %v8949_v8, 0  ;;  %v8579_v58 = vadd.f32 %v8578_v6, %v18231_v55  ;;  %v9090_v11 = vshrl.u32 %v18401_v3, 16  ;;  %v9093_v26 = vshll.u32 %v18401_v3, 16 }
 0xc66   :  { %v8853_v56 = vshrl.u32 %v8806_v50, 16  ;;  %v18409_v49 = vunpack.c.l.b16 %v8965_v57  ;;  %v9000_v19 = vunpack.c.h.b16 %v8965_v57  ;;  %v8755_v40 = vmul.f32 %v18282_v30, %v8721_v12  ;;  %20342 = vst [vmem:[#allocation57_spill] sm:$0xff] %v18412_v34 }
 0xc67   :  { %v8856_v41 = vshll.u32 %v8806_v50, 16  ;;  %v9368_v25 = vpack.c.b16 %v18412_v34, %v18407_v51  ;;  %v9092_v6 = vrot.slane %v9090_v11, 4  ;;  %v9095_v57 = vrot.slane %v9093_v26, 5 }
 0xc68   :  { %v8855_v10 = vrot.slane %v8853_v56, 7  ;;  %v18416_v62 = vpack.c.b16 %v18409_v49, %v18409_v49  ;;  %v8775_v18 = vadd.f32 %v18288_v1, %v8755_v40  ;;  %v18429_v47 = vpack.c.b16 %v9000_v19, %v9000_v19 }
 0xc69   :  { %9377 = vrot.lane.b32.xlu1 %v9368_v25, %s11961_s24  ;;  %v8628_v32 = vadd.f32 %v18336_v45, %v8579_v58  ;;  %v18441_v25 = vpop.f32.mrf.mxu0 }
 0xc6a   :  { %v8858_v4 = vor.u32 %v8856_v41, %v8855_v10  ;;  %v8791_v14 = vmax.f32 %v8775_v18, 0.0  ;;  %v9104_v52 = vshrl.u32 %v18416_v62, 16  ;;  %v9107_v8 = vshll.u32 %v18416_v62, 16 }
 0xc6b   :  { %v8583_v50 = vpop.f32.mrf.mxu3  ;;  %v8722_v12 = vpop.f32.mrf.mxu2  ;;  %v9096_v10 = vor.u32 %v9095_v57, %v9092_v6  ;;  %v9099_v41 = vshll.u32 %v18427_v48, 16  ;;  %v9113_v11 = vshll.u32 %v18429_v47, 16 }
 0xc6c   :  { %v8950_v5 = vsel %vm12130_vm2, 0, %v8858_v4  ;;  %v8723_v55 = vadd.f32 %v8722_v12, %v8674_v53  ;;  %v8807_v22 = vpack.c.bf16 %v8791_v14, %v8791_v14  ;;  %v9106_v18 = vrot.slane %v9104_v52, 4 }
 0xc6d   :  { %v8966_v56 = vsel %vm12134_vm5, %v8950_v5, 0  ;;  %v9109_v4 = vrot.slane %v9107_v8, 5  ;;  %v9097_v14 = vrot.slane %v9096_v10, 4  ;;  %v8581_v12 = vadd.f32 %v8580_v27, %v18238_v60 }
 0xc6e   :  { %v8756_v19 = vmul.f32 %v18282_v30, %v8723_v55  ;;  %v8860_v40 = vshrl.u32 %v8807_v22, 16  ;;  %v18445_v26 = vunpack.c.l.b16 %v8966_v56  ;;  %v8863_v58 = vshll.u32 %v8807_v22, 16 }
 0xc6f   :  { %v8677_v55 = vadd.f32 %v18352_v46, %v8628_v32  ;;  %v9110_v6 = vor.u32 %v9109_v4, %v9106_v18  ;;  %v9101_v17 = vrot.slane %v9099_v41, 5  ;;  %v9002_v51 = vunpack.c.h.b16 %v8966_v56 }
 0xc70   :  { %v8776_v53 = vadd.f32 %v18288_v1, %v8756_v19  ;;  %v8862_v45 = vrot.slane %v8860_v40, 7  ;;  %v18449_v19 = vpop.f32.mrf.mxu1  ;;  %v18453_v40 = vpack.c.b16 %v18445_v26, %v18445_v26  ;;  %v9115_v27 = vrot.slane %v9113_v11, 5 }
 0xc71   :  { %v9111_v61 = vrot.slane %v9110_v6, 4  ;;  %v9102_v46 = vsel %vm12157_vm8, %v9097_v14, %v9101_v17  ;;  %v8630_v22 = vadd.f32 %v18377_v39, %v8581_v12  ;;  %v18467_v18 = vpack.c.b16 %v9002_v51, %v9002_v51  ;;  %v18480_v12 = vpop.f32.mrf.mxu0 }
 0xc72   :  { %v8792_v5 = vmax.f32 %v8776_v53, 0.0  ;;  %v8865_v57 = vor.u32 %v8863_v58, %v8862_v45  ;;  %v18469_v4 = vunpack.c.l.b16 %v9102_v46  ;;  %v8584_v11 = vadd.f32 %v8583_v50, %v18250_v2 }
 0xc73   :  { %v8585_v52 = vpop.f32.mrf.mxu3  ;;  %v8725_v34 = vpop.f32.mrf.mxu2  ;;  %v9116_v41 = vsel %vm12157_vm8, %v9111_v61, %v9115_v27  ;;  %v9118_v58 = vshrl.u32 %v18453_v40, 16  ;;  %v8679_v51 = vadd.f32 %v18384_v28, %v8630_v22 }
 0xc74   :  { %v8726_v8 = vadd.f32 %v8725_v34, %v8677_v55  ;;  %v8951_v60 = vsel %vm12130_vm2, 0, %v8865_v57  ;;  %v8808_v56 = vpack.c.bf16 %v8792_v5, %v8792_v5  ;;  %20344 = vst [vmem:[#allocation90_spill] sm:$0xff] %v18469_v4  ;;  %v18471_v17 = vunpack.c.l.b16 %v9116_v41 }
 0xc75   :  { %v8967_v32 = vsel %vm12134_vm5, %v8951_v60, 0  ;;  %v9121_v5 = vshll.u32 %v18453_v40, 16  ;;  %v8633_v41 = vadd.f32 %v18405_v0, %v8584_v11  ;;  %v8586_v35 = vadd.f32 %v8585_v52, %v18259_v24 }
 0xc76   :  { %v18462_v10 = vunpack.c.l.b16 %v8967_v32  ;;  %v8757_v34 = vmul.f32 %v18282_v30, %v8726_v8  ;;  %v9004_v53 = vunpack.c.h.b16 %v8967_v32  ;;  %20345 = vst [vmem:[#allocation41_spill] sm:$0xff] %v18471_v17  ;;  %v8867_v14 = vshrl.u32 %v8808_v56, 16 }
 0xc77   :  { %v9369_v61 = vpack.c.b16 %v18471_v17, %v18469_v4  ;;  %v9120_v8 = vrot.slane %v9118_v58, 4  ;;  %v9123_v27 = vrot.slane %v9121_v5, 5  ;;  %v9127_v32 = vshll.u32 %v18467_v18, 16 }
 0xc78   :  { %20343 = vst [vmem:[#allocation34_spill] sm:$0xff] %v18462_v10  ;;  %v18475_v39 = vpack.c.b16 %v18462_v10, %v18462_v10  ;;  %v8777_v45 = vadd.f32 %v18288_v1, %v8757_v34  ;;  %v18488_v60 = vpack.c.b16 %v9004_v53, %v9004_v53  ;;  %v18492_v22 = vpop.f32.mrf.mxu1  ;;  %v8682_v0 = vadd.f32 %v18422_v54, %v8633_v41 }
 0xc79   :  { %9379 = vrot.lane.b32.xlu0 %v9369_v61, %s11961_s24  ;;  %v9124_v17 = vor.u32 %v9123_v27, %v9120_v8  ;;  %v9129_v44 = vrot.slane %v9127_v32, 5  ;;  %v8635_v54 = vadd.f32 %v18441_v25, %v8586_v35 }
 0xc7a   :  { %20346 = vst [vmem:[#allocation61_spill] sm:$0xff] %v18475_v39  ;;  %v8793_v55 = vmax.f32 %v8777_v45, 0.0  ;;  %v9132_v2 = vshrl.u32 %v18475_v39, 16  ;;  %v9135_v50 = vshll.u32 %v18475_v39, 16  ;;  %v8869_v39 = vrot.slane %v8867_v14, 7 }
 0xc7b   :  { %v8588_v6 = vpop.f32.mrf.mxu3  ;;  %v8727_v57 = vpop.f32.mrf.mxu2  ;;  %v9141_v61 = vshll.u32 %v18488_v60, 16 }
 0xc7c   :  { %v8728_v46 = vadd.f32 %v8727_v57, %v8679_v51  ;;  %v8809_v34 = vpack.c.bf16 %v8793_v55, %v8793_v55  ;;  %v9134_v28 = vrot.slane %v9132_v2, 4  ;;  %v9137_v4 = vrot.slane %v9135_v50, 5 }
 0xc7d   :  { %v9125_v57 = vrot.slane %v9124_v17, 4  ;;  %v8870_v2 = vshll.u32 %v8808_v56, 16  ;;  %v9143_v27 = vrot.slane %v9141_v61, 5  ;;  %v8639_v56 = vpop.f32.mrf.mxu0 }
 0xc7e   :  { %v8758_v45 = vmul.f32 %v18282_v30, %v8728_v46  ;;  %v8874_v58 = vshrl.u32 %v8809_v34, 16  ;;  %v8877_v5 = vshll.u32 %v8809_v34, 16  ;;  %v9138_v55 = vor.u32 %v9137_v4, %v9134_v28 }
 0xc7f   :  { %v9130_v14 = vsel %vm12157_vm8, %v9125_v57, %v9129_v44  ;;  %v8872_v32 = vor.u32 %v8870_v2, %v8869_v39  ;;  %v8589_v2 = vadd.f32 %v8588_v6, %v18262_v31  ;;  %v11346_v31 = vld [vmem:[%s19304_s20 + $0x30] sm:$0xff] }
 0xc80   :  { %v8778_v53 = vadd.f32 %v18288_v1, %v8758_v45  ;;  %v8876_v51 = vrot.slane %v8874_v58, 7  ;;  %v9139_v50 = vrot.slane %v9138_v55, 4  ;;  %v18509_v34 = vunpack.c.l.b16 %v9130_v14  ;;  %v11347_v55 = vld [vmem:[%s19304_s20 + $0x38] sm:$0xff] }
 0xc81   :  { %v8952_v41 = vsel %vm12130_vm2, 0, %v8872_v32  ;;  %9893 = vmatpush.bf16.msrb.mxu3 %v11347_v55 }
 0xc82   :  { %v8794_v10 = vmax.f32 %v8778_v53, 0.0  ;;  %v8879_v11 = vor.u32 %v8877_v5, %v8876_v51  ;;  %v9144_v24 = vsel %vm12157_vm8, %v9139_v50, %v9143_v27  ;;  %20347 = vst [vmem:[#allocation5_spill] sm:$0xff] %v18509_v34  ;;  %v18518_v53 = vpop.f32.mrf.mxu1 }
 0xc83   :  { %v8590_v46 = vpop.f32.mrf.mxu3  ;;  %v8730_v8 = vpop.f32.mrf.mxu2  ;;  %v18514_v28 = vunpack.c.l.b16 %v9144_v24 }
 0xc84   :  { %v8810_v45 = vpack.c.bf16 %v8794_v10, %v8794_v10  ;;  %v8731_v58 = vadd.f32 %v8730_v8, %v8682_v0  ;;  %v8953_v4 = vsel %vm12130_vm2, 0, %v8879_v11  ;;  %v8684_v11 = vadd.f32 %v18449_v19, %v8635_v54 }
 0xc85   :  { %v8969_v52 = vsel %vm12134_vm5, %v8953_v4, 0  ;;  %20348 = vst [vmem:[#allocation66_spill] sm:$0xff] %v18514_v28  ;;  %v9370_v57 = vpack.c.b16 %v18514_v28, %v18509_v34  ;;  %v8968_v8 = vsel %vm12134_vm5, %v8952_v41, 0  ;;  %v8591_v6 = vadd.f32 %v8590_v46, %v18264_v7  ;;  %9894 = vmatpush.bf16.msrb.mxu3 %v11346_v31 }
 0xc86   :  { %v8881_v17 = vshrl.u32 %v8810_v45, 16  ;;  %v18511_v44 = vunpack.c.l.b16 %v8969_v52  ;;  %v9006_v39 = vunpack.c.h.b16 %v8969_v52  ;;  %v8759_v10 = vmul.f32 %v18282_v30, %v8731_v58 }
 0xc87   :  { %v8884_v35 = vshll.u32 %v8810_v45, 16  ;;  %9381 = vrot.lane.b32.xlu2 %v9370_v57, %s11961_s24  ;;  %v18550_v41 = vunpack.c.l.b16 %v8968_v8  ;;  %v8640_v46 = vadd.f32 %v8639_v56, %v8591_v6 }
 0xc88   :  { %v8883_v61 = vrot.slane %v8881_v17, 7  ;;  %v18522_v25 = vpack.c.b16 %v18511_v44, %v18511_v44  ;;  %v18524_v51 = vpack.c.b16 %v9006_v39, %v9006_v39  ;;  %v8779_v5 = vadd.f32 %v18288_v1, %v8759_v10 }
 0xc89   :  { %v8638_v39 = vadd.f32 %v18480_v12, %v8589_v2  ;;  %v11345_v12 = vld [vmem:[%s19304_s20 + $0x28] sm:$0xff]  ;;  %v18562_v56 = vpack.c.b16 %v18550_v41, %v18550_v41 }
 0xc8a   :  { %v8886_v0 = vor.u32 %v8884_v35, %v8883_v61  ;;  %v8795_v14 = vmax.f32 %v8779_v5, 0.0  ;;  %v9146_v32 = vshrl.u32 %v18522_v25, 16  ;;  %v9149_v45 = vshll.u32 %v18522_v25, 16  ;;  %v8642_v35 = vpop.f32.mrf.mxu0  ;;  %9895 = vmatpush.bf16.msrb.mxu3 %v11345_v12 }
 0xc8b   :  { %v8593_v50 = vpop.f32.mrf.mxu3  ;;  %v8732_v27 = vpop.f32.mrf.mxu2  ;;  %v9155_v4 = vshll.u32 %v18524_v51, 16  ;;  %v9302_v61 = vunpack.c.h.b16 %v8968_v8  ;;  %v8687_v31 = vadd.f32 %v18492_v22, %v8638_v39 }
 0xc8c   :  { %v8954_v19 = vsel %vm12130_vm2, 0, %v8886_v0  ;;  %v8733_v58 = vadd.f32 %v8732_v27, %v8684_v11  ;;  %v8811_v54 = vpack.c.bf16 %v8795_v14, %v8795_v14  ;;  %v9148_v52 = vrot.slane %v9146_v32, 4  ;;  %v8691_v8 = vpop.f32.mrf.mxu1 }
 0xc8d   :  { %v8970_v24 = vsel %vm12134_vm5, %v8954_v19, 0  ;;  %v9151_v17 = vrot.slane %v9149_v45, 5  ;;  %v8594_v55 = vadd.f32 %v8593_v50, %v18270_v33  ;;  %v9157_v27 = vrot.slane %v9155_v4, 5 }
 0xc8e   :  { %v8760_v10 = vmul.f32 %v18282_v30, %v8733_v58  ;;  %v8888_v5 = vshrl.u32 %v8811_v54, 16  ;;  %v18552_v7 = vunpack.c.l.b16 %v8970_v24  ;;  %v8891_v11 = vshll.u32 %v8811_v54, 16  ;;  %v11344_v58 = vld [vmem:[%s19304_s20 + $0x20] sm:$0xff] }
 0xc8f   :  { %v9152_v57 = vor.u32 %v9151_v17, %v9148_v52  ;;  %v9008_v32 = vunpack.c.h.b16 %v8970_v24  ;;  %v18575_v52 = vpack.c.b16 %v9302_v61, %v9302_v61  ;;  %v8643_v39 = vadd.f32 %v8642_v35, %v8594_v55  ;;  %9896 = vmatpush.bf16.msrb.mxu3 %v11344_v58 }
 0xc90   :  { %v8780_v0 = vadd.f32 %v18288_v1, %v8760_v10  ;;  %v8890_v2 = vrot.slane %v8888_v5, 7  ;;  %v18571_v4 = vpack.c.b16 %v18552_v7, %v18552_v7  ;;  %v8689_v10 = vadd.f32 %v18518_v53, %v8640_v46  ;;  %v11343_v53 = vld [vmem:[%s19304_s20 + $0x18] sm:$0xff] }
 0xc91   :  { %v9153_v14 = vrot.slane %v9152_v57, 4  ;;  %v18580_v5 = vpack.c.b16 %v9008_v32, %v9008_v32 }
 0xc92   :  { %v8796_v45 = vmax.f32 %v8780_v0, 0.0  ;;  %v8893_v33 = vor.u32 %v8891_v11, %v8890_v2  ;;  %v9160_v46 = vshrl.u32 %v18571_v4, 16 }
 0xc93   :  { %v8595_v50 = vpop.f32.mrf.mxu3  ;;  %v8735_v19 = vpop.f32.mrf.mxu2  ;;  %v9158_v6 = vsel %vm12157_vm8, %v9153_v14, %v9157_v27  ;;  %v9163_v27 = vshll.u32 %v18571_v4, 16  ;;  %9897 = vmatpush.bf16.msrb.mxu3 %v11343_v53 }
 0xc94   :  { %v8812_v22 = vpack.c.bf16 %v8796_v45, %v8796_v45  ;;  %v8736_v24 = vadd.f32 %v8735_v19, %v8687_v31  ;;  %v18573_v54 = vunpack.c.l.b16 %v9158_v6  ;;  %v8955_v17 = vsel %vm12130_vm2, 0, %v8893_v33  ;;  %v8644_v45 = vpop.f32.mrf.mxu0 }
 0xc95   :  { %v8971_v57 = vsel %vm12134_vm5, %v8955_v17, 0  ;;  %v8596_v12 = vadd.f32 %v8595_v50, %v18272_v38  ;;  %v8692_v33 = vadd.f32 %v8691_v8, %v8643_v39  ;;  %v9162_v6 = vrot.slane %v9160_v46, 4 }
 0xc96   :  { %20349 = vst [vmem:[#allocation67_spill] sm:$0xff] %v18573_v54  ;;  %v8895_v0 = vshrl.u32 %v8812_v22, 16  ;;  %v18585_v2 = vunpack.c.l.b16 %v8971_v57  ;;  %v9010_v11 = vunpack.c.h.b16 %v8971_v57  ;;  %v8761_v61 = vmul.f32 %v18282_v30, %v8736_v24 }
 0xc97   :  { %v9371_v14 = vpack.c.b16 %v18573_v54, %v20274_v29  ;;  %v8898_v55 = vshll.u32 %v8812_v22, 16  ;;  %v8645_v19 = vadd.f32 %v8644_v45, %v8596_v12  ;;  %v9165_v58 = vrot.slane %v9163_v27, 5 }
 0xc98   :  { %20350 = vst [vmem:[#allocation56_spill] sm:$0xff] %v18585_v2  ;;  %v8897_v35 = vrot.slane %v8895_v0, 7  ;;  %v18597_v38 = vpack.c.b16 %v18585_v2, %v18585_v2  ;;  %v18599_v32 = vpack.c.b16 %v9010_v11, %v9010_v11  ;;  %v8781_v31 = vadd.f32 %v18288_v1, %v8761_v61  ;;  %v11342_v11 = vld [vmem:[%s19304_s20 + $0x10] sm:$0xff] }
 0xc99   :  { %9383 = vrot.lane.b32.xlu1 %v9371_v14, %s11961_s24  ;;  %v9169_v17 = vshll.u32 %v18580_v5, 16  ;;  %v9166_v12 = vor.u32 %v9165_v58, %v9162_v6  ;;  %v8693_v14 = vpop.f32.mrf.mxu1  ;;  %9898 = vmatpush.bf16.msrb.mxu3 %v11342_v11  ;;  %v11371_v11 = vld [vmem:[%s19304_s20 + $0xf8] sm:$0xff] }
 0xc9a   :  { %v8900_v50 = vor.u32 %v8898_v55, %v8897_v35  ;;  %v8797_v22 = vmax.f32 %v8781_v31, 0.0  ;;  %v9174_v57 = vshrl.u32 %v18597_v38, 16  ;;  %v9177_v0 = vshll.u32 %v18597_v38, 16  ;;  %10040 = vmatpush.bf16.msra.mxu2 %v11371_v11 }
 0xc9b   :  { %v8737_v24 = vpop.f32.mrf.mxu2  ;;  %v9183_v61 = vshll.u32 %v18599_v32, 16  ;;  %v9167_v31 = vrot.slane %v9166_v12, 4  ;;  %v18617_v54 = vadd.f32 %v8693_v14, %v8645_v19  ;;  %v11042_v14 = vrot.slane %v18363_v42, 9  ;;  %v11370_v42 = vld [vmem:[%s19304_s20 + $0xf0] sm:$0xff] }
 0xc9c   :  { %v8956_v8 = vsel %vm12130_vm2, 0, %v8900_v50  ;;  %v8738_v39 = vadd.f32 %v8737_v24, %v8689_v10  ;;  %v8813_v55 = vpack.c.bf16 %v8797_v22, %v8797_v22  ;;  %v9176_v53 = vrot.slane %v9174_v57, 4 }
 0xc9d   :  { %v8972_v35 = vsel %vm12134_vm5, %v8956_v8, 0  ;;  %v9179_v46 = vrot.slane %v9177_v0, 5  ;;  %v9171_v50 = vrot.slane %v9169_v17, 5  ;;  %v11341_v17 = vld [vmem:[%s19304_s20 + $0x8] sm:$0xff] }
 0xc9e   :  { %v18614_v27 = vunpack.c.l.b16 %v8972_v35  ;;  %v8762_v45 = vmul.f32 %v18282_v30, %v8738_v39  ;;  %v8902_v28 = vshrl.u32 %v8813_v55, 16  ;;  %v9012_v58 = vunpack.c.h.b16 %v8972_v35  ;;  %9899 = vmatpush.bf16.msrb.mxu3 %v11341_v17  ;;  %10041 = vmatpush.bf16.msra.mxu2 %v11370_v42 }
 0xc9f   :  { %v9180_v10 = vor.u32 %v9179_v46, %v9176_v53  ;;  %v8905_v24 = vshll.u32 %v8813_v55, 16  ;;  %v9172_v19 = vsel %vm12157_vm8, %v9167_v31, %v9171_v50  ;;  %v9185_v39 = vrot.slane %v9183_v61, 5  ;;  %v11340_v46 = vld [vmem:[%s19304_s20] sm:$0xff] }
 0xca0   :  { %20351 = vst [vmem:[#allocation68_spill] sm:$0xff] %v18614_v27  ;;  %v18623_v22 = vpack.c.b16 %v18614_v27, %v18614_v27  ;;  %v8782_v57 = vadd.f32 %v18288_v1, %v8762_v45  ;;  %v8904_v0 = vrot.slane %v8902_v28, 7  ;;  %v9253_v35 = vrot.slane %v18369_v16, 5 }
 0xca1   :  { %v9181_v8 = vrot.slane %v9180_v10, 4  ;;  %v11043_v28 = vrot.slane %v18401_v3, 9  ;;  %v9257_v45 = vrot.slane %v18427_v48, 5  ;;  %v18647_v16 = vpack.c.b16 %v9012_v58, %v9012_v58 }
 0xca2   :  { %v8798_v12 = vmax.f32 %v8782_v57, 0.0  ;;  %v8907_v55 = vor.u32 %v8905_v24, %v8904_v0  ;;  %v9188_v31 = vshrl.u32 %v18623_v22, 16  ;;  %v18653_v57 = vunpack.c.l.b16 %v9172_v19  ;;  %9900 = vmatpush.bf16.msrb.mxu3 %v11340_v46 }
 0xca3   :  { %v8740_v53 = vpop.f32.mrf.mxu2  ;;  %v9186_v61 = vsel %vm12157_vm8, %v9181_v8, %v9185_v39  ;;  %v9413_v48 = vpack.c.b16 %v18334_v59, %v18308_v20  ;;  %v18659_v0 = vsel %vm12525_vm11, %v11043_v28, %v9257_v45  ;;  %v18666_v39 = vsel %vm12525_vm11, %v11042_v14, %v9253_v35  ;;  %v11369_v28 = vld [vmem:[%s19304_s20 + $0xe8] sm:$0xff] }
 0xca4   :  { %v8814_v3 = vpack.c.bf16 %v8798_v12, %v8798_v12  ;;  %v8741_v50 = vadd.f32 %v8740_v53, %v8692_v33  ;;  %v18649_v10 = vunpack.c.l.b16 %v9186_v61  ;;  %v8957_v24 = vsel %vm12130_vm2, 0, %v8907_v55  ;;  %20353 = vst [vmem:[#allocation42_spill] sm:$0xff] %v18653_v57  ;;  %10042 = vmatpush.bf16.msra.mxu2 %v11369_v28 }
 0xca5   :  { %v8973_v58 = vsel %vm12134_vm5, %v8957_v24, 0  ;;  %v9190_v12 = vrot.slane %v9188_v31, 4  ;;  %v9191_v14 = vshll.u32 %v18623_v22, 16  ;;  %v9197_v31 = vshll.u32 %v18647_v16, 16 }
 0xca6   :  { %20352 = vst [vmem:[#allocation69_spill] sm:$0xff] %v18649_v10  ;;  %v8909_v8 = vshrl.u32 %v8814_v3, 16  ;;  %v8763_v33 = vmul.f32 %v18282_v30, %v8741_v50  ;;  %v18668_v17 = vunpack.c.l.b16 %v8973_v58  ;;  %v9014_v19 = vunpack.c.h.b16 %v8973_v58 }
 0xca7   :  { %v9372_v11 = vpack.c.b16 %v18649_v10, %v18653_v57  ;;  %v8912_v53 = vshll.u32 %v8814_v3, 16  ;;  %v9193_v24 = vrot.slane %v9191_v14, 5  ;;  %v9310_v3 = vshrl.u32 %v18562_v56, 16 }
 0xca8   :  { %20354 = vst [vmem:[#allocation51_spill] sm:$0xff] %v18668_v17  ;;  %v8911_v55 = vrot.slane %v8909_v8, 7  ;;  %v8783_v61 = vadd.f32 %v18288_v1, %v8763_v33  ;;  %v18679_v35 = vpack.c.b16 %v18668_v17, %v18668_v17  ;;  %v18681_v45 = vpack.c.b16 %v9014_v19, %v9014_v19 }
 0xca9   :  { %9385 = vrot.lane.b32.xlu0 %v9372_v11, %s11961_s24  ;;  %v11368_v11 = vld [vmem:[%s19304_s20 + $0xe0] sm:$0xff]  ;;  %v9194_v14 = vor.u32 %v9193_v24, %v9190_v12  ;;  %v9199_v46 = vrot.slane %v9197_v31, 5 }
 0xcaa   :  { %20355 = vst [vmem:[#allocation81_spill] sm:$0xff] %v18679_v35  ;;  %v8914_v42 = vor.u32 %v8912_v53, %v8911_v55  ;;  %v8799_v50 = vmax.f32 %v8783_v61, 0.0  ;;  %v9202_v33 = vshrl.u32 %v18679_v35, 16  ;;  %v9205_v6 = vshll.u32 %v18679_v35, 16  ;;  %10043 = vmatpush.bf16.msra.mxu2 %v11368_v11 }
 0xcab   :  { %20356 = vst [vmem:[#allocation71_spill] sm:$0xff] %v18681_v45  ;;  %v8742_v58 = vpop.f32.mrf.mxu2  ;;  %v9211_v19 = vshll.u32 %v18681_v45, 16  ;;  %v9312_v35 = vrot.slane %v9310_v3, 4  ;;  %v9195_v2 = vrot.slane %v9194_v14, 4  ;;  %v9245_v14 = vrot.slane %v18315_v43, 5 }
 0xcac   :  { %v8958_v55 = vsel %vm12130_vm2, 0, %v8914_v42  ;;  %v8815_v53 = vpack.c.bf16 %v8799_v50, %v8799_v50  ;;  %v8743_v61 = vadd.f32 %v8742_v58, %v18617_v54  ;;  %v9204_v10 = vrot.slane %v9202_v33, 4  ;;  %v11367_v54 = vld [vmem:[%s19304_s20 + $0xd8] sm:$0xff] }
 0xcad   :  { %v8974_v8 = vsel %vm12134_vm5, %v8958_v55, 0  ;;  %v9207_v57 = vrot.slane %v9205_v6, 5  ;;  %v9213_v45 = vrot.slane %v9211_v19, 5  ;;  %v9313_v42 = vshll.u32 %v18562_v56, 16 }
 0xcae   :  { %v18699_v34 = vunpack.c.l.b16 %v8974_v8  ;;  %v8916_v28 = vshrl.u32 %v8815_v53, 16  ;;  %v8764_v27 = vmul.f32 %v18282_v30, %v8743_v61  ;;  %v9016_v12 = vunpack.c.h.b16 %v8974_v8  ;;  %10044 = vmatpush.bf16.msra.mxu2 %v11367_v54 }
 0xcaf   :  { %v9208_v17 = vor.u32 %v9207_v57, %v9204_v10  ;;  %v8919_v50 = vshll.u32 %v8815_v53, 16  ;;  %v9319_v6 = vshll.u32 %v18575_v52, 16  ;;  %v9200_v30 = vsel %vm12157_vm8, %v9195_v2, %v9199_v46  ;;  %v11366_v2 = vld [vmem:[%s19304_s20 + $0xd0] sm:$0xff] }
 0xcb0   :  { %v8918_v31 = vrot.slane %v8916_v28, 7  ;;  %v8784_v24 = vadd.f32 %v18288_v1, %v8764_v27  ;;  %v9315_v57 = vrot.slane %v9313_v42, 5  ;;  %v18713_v3 = vpack.c.b16 %v18699_v34, %v18699_v34 }
 0xcb1   :  { %9421 = vrot.lane.b32.xlu0 %v9413_v48, %s11961_s24  ;;  %v9209_v10 = vrot.slane %v9208_v17, 4  ;;  %v18715_v33 = vunpack.c.l.b16 %v9200_v30  ;;  %v9321_v8 = vrot.slane %v9319_v6, 5  ;;  %v11040_v48 = vrot.slane %v18313_v15, 9 }
 0xcb2   :  { %v8921_v58 = vor.u32 %v8919_v50, %v8918_v31  ;;  %v8800_v19 = vmax.f32 %v8784_v24, 0.0  ;;  %v9316_v27 = vor.u32 %v9315_v57, %v9312_v35  ;;  %v20357_v46 = vpack.c.b16 %v18308_v20, %v20296_v9  ;;  %10045 = vmatpush.bf16.msra.mxu2 %v11366_v2  ;;  %v11365_v24 = vld [vmem:[%s19304_s20 + $0xc8] sm:$0xff] }
 0xcb3   :  { %v9376_v11 = vpop.permute.xlu2 %9375  ;;  %v9214_v1 = vsel %vm12157_vm8, %v9209_v10, %v9213_v45  ;;  %v11041_v45 = vrot.slane %v18345_v36, 9  ;;  %v9249_v54 = vrot.slane %v18359_v37, 5  ;;  %v20358_v50 = vunpack.c.l.b16 %v18666_v39 }
 0xcb4   :  { %v8959_v17 = vsel %vm12130_vm2, 0, %v8921_v58  ;;  %v9485_v55 = vsel %vm966_vm12, %v20357_v46, %v9376_v11  ;;  %v18729_v53 = vunpack.c.l.b16 %v9214_v1  ;;  %v8816_v35 = vpack.c.bf16 %v8800_v19, %v8800_v19 }
 0xcb5   :  { %v8975_v15 = vsel %vm12134_vm5, %v8959_v17, 0  ;;  %9901 = vmatmul.bf16.vlgmr.msrb.gmra.mxu3 %v9485_v55  ;;  %v9317_v61 = vrot.slane %v9316_v27, 4  ;;  %v20359_v36 = vunpack.c.l.b16 %v18659_v0  ;;  %v18747_v43 = vpack.c.b16 %v9016_v12, %v9016_v12  ;;  %v11364_v55 = vld [vmem:[%s19304_s20 + $0xc0] sm:$0xff] }
 0xcb6   :  { %v18735_v28 = vunpack.c.l.b16 %v8975_v15  ;;  %v9018_v42 = vunpack.c.h.b16 %v8975_v15  ;;  %v9373_v20 = vpack.c.b16 %v18729_v53, %v18715_v33  ;;  %v8923_v31 = vshrl.u32 %v8816_v35, 16  ;;  %10046 = vmatpush.bf16.msra.mxu2 %v11365_v24 }
 0xcb7   :  { %v9450_v6 = vpack.c.b16 %v20359_v36, %v20358_v50  ;;  %v9322_v37 = vsel %vm12157_vm8, %v9317_v61, %v9321_v8  ;;  %v18758_v10 = vsel %vm12525_vm11, %v11041_v45, %v9249_v54  ;;  %v8926_v19 = vshll.u32 %v8816_v35, 16 }
 0xcb8   :  { %v18751_v30 = vpack.c.b16 %v18735_v28, %v18735_v28  ;;  %9387 = vrot.lane.b32.xlu2 %v9373_v20, %s11961_s24  ;;  %v18760_v57 = vpack.c.b16 %v9018_v42, %v9018_v42  ;;  %v8925_v58 = vrot.slane %v8923_v31, 7  ;;  %v18765_v12 = vsel %vm12525_vm11, %v11040_v48, %v9245_v14 }
 0xcb9   :  { %9459 = vrot.lane.b32.xlu0 %v9450_v6, %s11961_s24  ;;  %v9392_v11 = vunpack.c.l.b16 %v18758_v10  ;;  %v9216_v1 = vshrl.u32 %v18713_v3, 16  ;;  %v9219_v8 = vshll.u32 %v18713_v3, 16  ;;  %v18770_v2 = vunpack.c.l.b16 %v9322_v37 }
 0xcba   :  { %v8928_v27 = vor.u32 %v8926_v19, %v8925_v58  ;;  %v9230_v17 = vshrl.u32 %v18751_v30, 16  ;;  %v9233_v46 = vshll.u32 %v18751_v30, 16  ;;  %v9391_v48 = vunpack.c.l.b16 %v18765_v12  ;;  %10047 = vmatpush.bf16.msra.mxu2 %v11364_v55 }
 0xcbb   :  { %v9218_v45 = vrot.slane %v9216_v1, 4  ;;  %v9221_v15 = vrot.slane %v9219_v8, 5  ;;  %v9225_v35 = vshll.u32 %v18747_v43, 16  ;;  %v9239_v20 = vshll.u32 %v18760_v57, 16 }
 0xcbc   :  { %v8960_v61 = vsel %vm12130_vm2, 0, %v8928_v27  ;;  %v9232_v14 = vrot.slane %v9230_v17, 4  ;;  %v9235_v42 = vrot.slane %v9233_v46, 5  ;;  %v9449_v31 = vpack.c.b16 %v9392_v11, %v9391_v48 }
 0xcbd   :  { %v8976_v54 = vsel %vm12134_vm5, %v8960_v61, 0  ;;  %v9222_v50 = vor.u32 %v9221_v15, %v9218_v45  ;;  %v9475_v6 = vpack.c.b16 %v20274_v29, %v18770_v2  ;;  %v9227_v37 = vrot.slane %v9225_v35, 5 }
 0xcbe   :  { %v18788_v36 = vunpack.c.l.b16 %v8976_v54  ;;  %v9236_v63 = vor.u32 %v9235_v42, %v9232_v14  ;;  %v9241_v19 = vrot.slane %v9239_v20, 5  ;;  %v9304_v1 = vunpack.c.h.b16 %v8976_v54 }
 0xcbf   :  { %v9223_v24 = vrot.slane %v9222_v50, 4  ;;  %v11047_v27 = vrot.slane %v18522_v25, 9  ;;  %v11050_v46 = vrot.slane %v18623_v22, 9  ;;  %v9285_v55 = vrot.slane %v18647_v16, 5 }
 0xcc0   :  { %9457 = vrot.lane.b32.xlu2 %v9449_v31, %s11961_s24  ;;  %v18795_v23 = vpack.c.b16 %v18788_v36, %v18788_v36  ;;  %v9237_v58 = vrot.slane %v9236_v63, 4  ;;  %v9273_v45 = vrot.slane %v18524_v51, 5  ;;  %v11049_v14 = vrot.slane %v18597_v38, 9 }
 0xcc1   :  { %9477 = vrot.lane.b32.xlu0 %v9475_v6, %s11961_s24  ;;  %v9228_v8 = vsel %vm12157_vm8, %v9223_v24, %v9227_v37  ;;  %v9281_v42 = vrot.slane %v18599_v32, 5  ;;  %v18818_v20 = vpack.c.b16 %v9304_v1, %v9304_v1  ;;  %v9415_v51 = vpack.c.b16 %v18445_v26, %v18409_v49 }
 0xcc2   :  { %v9242_v17 = vsel %vm12157_vm8, %v9237_v58, %v9241_v19  ;;  %v18806_v15 = vunpack.c.l.b16 %v9228_v8  ;;  %v9324_v61 = vshrl.u32 %v18795_v23, 16  ;;  %v18815_v25 = vsel %vm12525_vm11, %v11047_v27, %v9273_v45 }
 0xcc3   :  { %v18808_v35 = vunpack.c.l.b16 %v9242_v17  ;;  %v9327_v22 = vshll.u32 %v18795_v23, 16  ;;  %v9417_v38 = vpack.c.b16 %v18552_v7, %v18511_v44  ;;  %v18828_v32 = vsel %vm12525_vm11, %v11050_v46, %v9285_v55  ;;  %v20360_v55 = vld [vmem:[#allocation34_spill] sm:$0xff] }
 0xcc4   :  { %v9326_v54 = vrot.slane %v9324_v61, 4  ;;  %v11044_v50 = vrot.slane %v18416_v62, 9  ;;  %v9261_v6 = vrot.slane %v18429_v47, 5  ;;  %v18837_v63 = vsel %vm12525_vm11, %v11049_v14, %v9281_v42  ;;  %v20361_v61 = vld [vmem:[#allocation53_spill] sm:$0xff]  ;;  %v20362_v14 = vld [vmem:[#allocation64_spill] sm:$0xff] }
 0xcc5   :  { %v9374_v16 = vpack.c.b16 %v18808_v35, %v18806_v15  ;;  %v9329_v31 = vrot.slane %v9327_v22, 5  ;;  %v9401_v37 = vunpack.c.l.b16 %v18828_v32  ;;  %v11048_v58 = vrot.slane %v18571_v4, 9 }
 0xcc6   :  { %v9333_v19 = vshll.u32 %v18818_v20, 16  ;;  %v9262_v62 = vsel %vm12525_vm11, %v11044_v50, %v9261_v6  ;;  %v9277_v1 = vrot.slane %v18580_v5, 5  ;;  %v11045_v47 = vrot.slane %v18453_v40, 9  ;;  %v20365_v6 = vld [vmem:[#allocation61_spill] sm:$0xff] }
 0xcc7   :  { %9389 = vrot.lane.b32.xlu1 %v9374_v16, %s11961_s24  ;;  %v9330_v24 = vor.u32 %v9329_v31, %v9326_v54  ;;  %v9265_v8 = vrot.slane %v18467_v18, 5  ;;  %v9395_v27 = vunpack.c.l.b16 %v9262_v62  ;;  %v9400_v17 = vunpack.c.l.b16 %v18837_v63 }
 0xcc8   :  { %9425 = vrot.lane.b32.xlu2 %v9415_v51, %s11961_s24  ;;  %v9416_v45 = vpack.c.b16 %v18550_v41, %v20360_v55  ;;  %v9414_v42 = vpack.c.b16 %v20362_v14, %v20361_v61  ;;  %v9335_v5 = vrot.slane %v9333_v19, 5  ;;  %v18858_v40 = vsel %vm12525_vm11, %v11048_v58, %v9277_v1 }
 0xcc9   :  { %9429 = vrot.lane.b32.xlu0 %v9417_v38, %s11961_s24  ;;  %v9331_v46 = vrot.slane %v9330_v24, 4  ;;  %v9454_v4 = vpack.c.b16 %v9401_v37, %v9400_v17  ;;  %v9266_v18 = vsel %vm12525_vm11, %v11045_v47, %v9265_v8  ;;  %v20363_v22 = vunpack.c.l.b16 %v18666_v39 }
 0xcca   :  { %v20364_v16 = vunpack.c.l.b16 %v18659_v0  ;;  %v9399_v31 = vunpack.c.l.b16 %v18858_v40  ;;  %v9396_v10 = vunpack.c.l.b16 %v9266_v18  ;;  %v11054_v39 = vrot.slane %v18562_v56, 9 }
 0xccb   :  { %v18866_v51 = vpack.c.b16 %v20363_v22, %v9392_v11  ;;  %v9336_v38 = vsel %vm12157_vm8, %v9331_v46, %v9335_v5  ;;  %v9339_v0 = vrot.slane %v18575_v52, 5  ;;  %v9398_v11 = vunpack.c.l.b16 %v18815_v25  ;;  %v11354_v5 = vld [vmem:[%s19304_s20 + $0x70] sm:$0xff] }
 0xccc   :  { %v18870_v54 = vpack.c.b16 %v9395_v27, %v20364_v16  ;;  %v18878_v50 = vunpack.c.l.b16 %v9336_v38  ;;  %v11046_v24 = vrot.slane %v20365_v6, 9  ;;  %v9269_v58 = vrot.slane %v18488_v60, 5  ;;  %v20367_v38 = vld [vmem:[#allocation56_spill] sm:$0xff] }
 0xccd   :  { %v9453_v21 = vpack.c.b16 %v9399_v31, %v9398_v11  ;;  %v9451_v19 = vpack.c.b16 %v9396_v10, %v9395_v27  ;;  %v18893_v56 = vsel %vm12525_vm11, %v11054_v39, %v9339_v0  ;;  %v9346_v47 = vpack.c.b16 %v20361_v61, %v18334_v59  ;;  %v20366_v27 = vld [vmem:[#allocation51_spill] sm:$0xff]  ;;  %v11363_v59 = vld [vmem:[%s19304_s20 + $0xb8] sm:$0xff] }
 0xcce   :  { %v9476_v62 = vpack.c.b16 %v20274_v29, %v18878_v50  ;;  %v9270_v60 = vsel %vm12525_vm11, %v11046_v24, %v9269_v58  ;;  %v9447_v52 = vunpack.c.l.b16 %v18893_v56  ;;  %v9419_v46 = vpack.c.b16 %v18699_v34, %v20366_v27  ;;  %v11355_v61 = vld [vmem:[%s19304_s20 + $0x78] sm:$0xff]  ;;  %9991 = vmatpush.bf16.msra.mxu1 %v11363_v59  ;;  %v20370_v24 = vld [vmem:[#allocation71_spill] sm:$0xff] }
 0xccf   :  { %9423 = vrot.lane.b32.xlu1 %v9414_v42, %s11961_s24  ;;  %v9397_v1 = vunpack.c.l.b16 %v9270_v60  ;;  %v11362_v42 = vld [vmem:[%s19304_s20 + $0xb0] sm:$0xff]  ;;  %9942 = vmatpush.bf16.msra.mxu0 %v11355_v61  ;;  %v11052_v18 = vrot.slane %v18713_v3, 9  ;;  %v9293_v22 = vrot.slane %v18747_v43, 5  ;;  %v9420_v16 = vpack.c.b16 %v18788_v36, %v18735_v28  ;;  %v20369_v0 = vld [vmem:[#allocation81_spill] sm:$0xff] }
 0xcd0   :  { %9427 = vrot.lane.b32.xlu2 %v9416_v45, %s11961_s24  ;;  %v11051_v6 = vrot.slane %v20369_v0, 9  ;;  %v9289_v58 = vrot.slane %v20370_v24, 5  ;;  %v11055_v60 = vrot.slane %v18795_v23, 9  ;;  %v11358_v61 = vld [vmem:[%s19304_s20 + $0x90] sm:$0xff]  ;;  %v9349_v40 = vpack.c.b16 %v18511_v44, %v20296_v9 }
 0xcd1   :  { %9467 = vrot.lane.b32.xlu0 %v9454_v4, %s11961_s24  ;;  %v9452_v4 = vpack.c.b16 %v9447_v52, %v9397_v1  ;;  %v18908_v45 = vpack.c.b16 %v9397_v1, %v9396_v10  ;;  %v20368_v10 = vld [vmem:[#allocation68_spill] sm:$0xff]  ;;  %v18939_v3 = vsel %vm12525_vm11, %v11052_v18, %v9293_v22  ;;  %v9343_v1 = vrot.slane %v18818_v20, 5  ;;  %v11357_v18 = vld [vmem:[%s19304_s20 + $0x88] sm:$0xff] }
 0xcd2   :  { %v9418_v39 = vpack.c.b16 %v20368_v10, %v20367_v38  ;;  %9992 = vmatpush.bf16.msra.mxu1 %v11362_v42  ;;  %v18943_v43 = vsel %vm12525_vm11, %v11051_v6, %v9289_v58  ;;  %v9348_v6 = vpack.c.b16 %v20360_v55, %v18445_v26  ;;  %v19008_v58 = vpack.c.b16 %v9400_v17, %v9399_v31  ;;  %v11348_v26 = vld [vmem:[%s19304_s20 + $0x40] sm:$0xff]  ;;  %v11375_v17 = vld [vmem:[%s19304_s20 + $0x118] sm:$0xff] }
 0xcd3   :  { %9943 = vmatpush.bf16.msra.mxu0 %v11354_v5  ;;  %10093 = vmatpush.bf16.msra.mxu3 %v11375_v17 }
 0xcd7   :  { %9461 = vrot.lane.b32.xlu1 %v9451_v19, %s11961_s24  ;;  %v11360_v19 = vld [vmem:[%s19304_s20 + $0xa0] sm:$0xff] }
 0xcd8   :  { %9465 = vrot.lane.b32.xlu2 %v9453_v21, %s11961_s24  ;;  %v11361_v21 = vld [vmem:[%s19304_s20 + $0xa8] sm:$0xff] }
 0xcd9   :  { %9479 = vrot.lane.b32.xlu0 %v9476_v62, %s11961_s24  ;;  %9993 = vmatpush.bf16.msra.mxu1 %v11361_v21  ;;  %v9403_v62 = vunpack.c.l.b16 %v18939_v3  ;;  %v11349_v21 = vld [vmem:[%s19304_s20 + $0x48] sm:$0xff] }
 0xcdb   :  { %v9378_v29 = vpop.permute.xlu1 %9377 }
 0xcdc   :  { %v9489_v8 = vsel %vm966_vm12, %v9346_v47, %v9378_v29  ;;  %v9347_v47 = vpack.c.b16 %v18409_v49, %v20362_v14  ;;  %v9402_v29 = vunpack.c.l.b16 %v18943_v43  ;;  %v18963_v49 = vsel %vm12525_vm11, %v11055_v60, %v9343_v1  ;;  %v11352_v14 = vld [vmem:[%s19304_s20 + $0x60] sm:$0xff] }
 0xcdd   :  { %9906 = vmatmul.bf16.gmra.mxu3 %v9489_v8  ;;  %10048 = vmatmul.bf16.vlgmr.msra.gmra.mxu2 %v9489_v8  ;;  %v9448_v42 = vunpack.c.l.b16 %v18963_v49  ;;  %v20372_v60 = vld [vmem:[#allocation54_spill] sm:$0xff] }
 0xcde   :  { %9994 = vmatpush.bf16.msra.mxu1 %v11360_v19  ;;  %v9455_v23 = vpack.c.b16 %v9403_v62, %v9402_v29  ;;  %v20371_v19 = vld [vmem:[#allocation12_spill] sm:$0xff] }
 0xcdf   :  { %9463 = vrot.lane.b32.xlu1 %v9452_v4, %s11961_s24  ;;  %v9297_v4 = vrot.slane %v18760_v57, 5  ;;  %v11359_v57 = vld [vmem:[%s19304_s20 + $0x98] sm:$0xff]  ;;  %v9439_v1 = vpack.c.b16 %v20372_v60, %v20371_v19  ;;  %v20378_v60 = vld [vmem:[#allocation66_spill] sm:$0xff] }
 0xce0   :  { %9433 = vrot.lane.b32.xlu2 %v9419_v46, %s11961_s24  ;;  %v11053_v46 = vrot.slane %v18751_v30, 9  ;;  %v11353_v30 = vld [vmem:[%s19304_s20 + $0x68] sm:$0xff] }
 0xce1   :  { %9944 = vmatpush.bf16.msra.mxu0 %v11353_v30  ;;  %v9382_v0 = vpop.permute.xlu2 %9381 }
 0xce2   :  { %v18974_v20 = vsel %vm12525_vm11, %v11053_v46, %v9297_v4  ;;  %9995 = vmatpush.bf16.msra.mxu1 %v11359_v57  ;;  %v9497_v24 = vsel %vm966_vm12, %v9348_v6, %v9382_v0  ;;  %v9350_v4 = vpack.c.b16 %v20367_v38, %v18552_v7  ;;  %v11373_v7 = vld [vmem:[%s19304_s20 + $0x108] sm:$0xff]  ;;  %v11372_v38 = vld [vmem:[%s19304_s20 + $0x100] sm:$0xff] }
 0xce3   :  { %v9404_v5 = vunpack.c.l.b16 %v18974_v20 }
 0xce5   :  { %9945 = vmatpush.bf16.msra.mxu0 %v11352_v14  ;;  %v9456_v22 = vpack.c.b16 %v9448_v42, %v9404_v5  ;;  %v9412_v32 = vpack.c.b16 %v9404_v5, %v9403_v62 }
 0xce6   :  { %9996 = vmatpush.bf16.msra.mxu1 %v11358_v61  ;;  %v20374_v61 = vld [vmem:[#allocation57_spill] sm:$0xff] }
 0xce7   :  { %9431 = vrot.lane.b32.xlu1 %v9418_v39, %s11961_s24  ;;  %v11356_v39 = vld [vmem:[%s19304_s20 + $0x80] sm:$0xff] }
 0xce8   :  { %9435 = vrot.lane.b32.xlu2 %v9420_v16, %s11961_s24  ;;  %v11350_v16 = vld [vmem:[%s19304_s20 + $0x50] sm:$0xff] }
 0xce9   :  { %9946 = vmatpush.bf16.msra.mxu0 %v11351_v13  ;;  %v20375_v13 = vld [vmem:[#allocation90_spill] sm:$0xff] }
 0xcea   :  { %9997 = vmatpush.bf16.msra.mxu1 %v11357_v18  ;;  %v9440_v18 = vpack.c.b16 %v20375_v13, %v20374_v61  ;;  %v9474_v13 = vpack.c.b16 %v20296_v9, %v18788_v36 }
 0xceb   :  { %v9380_v8 = vpop.permute.xlu0 %9379 }
 0xcec   :  { %v9493_v59 = vsel %vm966_vm12, %v9347_v47, %v9380_v8 }
 0xced   :  { %9911 = vmatmul.bf16.gmra.mxu3 %v9493_v59  ;;  %10053 = vmatmul.bf16.gmra.mxu2 %v9493_v59  ;;  %v11374_v59 = vld [vmem:[%s19304_s20 + $0x110] sm:$0xff] }
 0xcee   :  { %9947 = vmatpush.bf16.msra.mxu0 %v11350_v16  ;;  %9998 = vmatpush.bf16.msra.mxu1 %v11356_v39  ;;  %v9473_v39 = vpack.c.b16 %v20296_v9, %v18550_v41 }
 0xcef   :  { %9469 = vrot.lane.b32.xlu1 %v9455_v23, %s11961_s24  ;;  %v20373_v23 = vld [vmem:[#allocation6_spill] sm:$0xff]  ;;  %10094 = vmatpush.bf16.msra.mxu3 %v11374_v59 }
 0xcf0   :  { %v9405_v30 = vpack.c.b16 %v9391_v48, %v20373_v23  ;;  %v9351_v48 = vpack.c.b16 %v20366_v27, %v20368_v10  ;;  %v20376_v10 = vld [vmem:[#allocation41_spill] sm:$0xff]  ;;  %v9409_v61 = vpack.c.b16 %v9398_v11, %v20373_v23  ;;  %v9481_v9 = vpack.c.b16 %v20373_v23, %v9447_v52 }
 0xcf1   :  { %v9411_v52 = vpack.c.b16 %v9402_v29, %v9401_v37  ;;  %v9482_v62 = vpack.c.b16 %v20373_v23, %v9448_v42  ;;  %v19151_v42 = vld [vmem:[%s19305_s21] ss:$0 sm:$0xff] }
 0xcf2   :  { %9948 = vmatpush.bf16.msra.mxu0 %v11349_v21  ;;  %v9352_v21 = vpack.c.b16 %v18735_v28, %v18699_v34 }
 0xcf3   :  { %10095 = vmatpush.bf16.msra.mxu3 %v11373_v7 }
 0xcf6   :  { %9949 = vmatpush.bf16.msra.mxu0 %v11348_v26 }
 0xcf7   :  { %9471 = vrot.lane.b32.xlu1 %v9456_v22, %s11961_s24  ;;  %10096 = vmatpush.bf16.msra.mxu3 %v11372_v38 }
 0xcfd   :  { %9916 = vmatmul.bf16.gmra.mxu3 %v9497_v24  ;;  %10058 = vmatmul.bf16.gmra.mxu2 %v9497_v24 }
 0xd0b   :  { %v9384_v55 = vpop.permute.xlu1 %9383 }
 0xd0c   :  { %v9501_v63 = vsel %vm966_vm12, %v9349_v40, %v9384_v55  ;;  %v20377_v40 = vld [vmem:[#allocation5_spill] sm:$0xff] }
 0xd0d   :  { %9921 = vmatmul.bf16.gmra.mxu3 %v9501_v63  ;;  %v9441_v41 = vpack.c.b16 %v20377_v40, %v20376_v10 }
 0xd12   :  { %v9388_v31 = vpop.permute.xlu2 %9387 }
 0xd13   :  { %v9509_v16 = vsel %vm966_vm12, %v9351_v48, %v9388_v31  ;;  %v20381_v48 = vld [vmem:[#allocation69_spill] sm:$0xff] }
 0xd1a   :  { %v9458_v47 = vpop.permute.xlu2 %9457 }
 0xd1b   :  { %v9386_v8 = vpop.permute.xlu0 %9385  ;;  %v9549_v46 = vsel %vm966_vm12, %v9439_v1, %v9458_v47  ;;  %v9442_v1 = vpack.c.b16 %v18770_v2, %v20378_v60  ;;  %v20379_v2 = vld [vmem:[#allocation67_spill] sm:$0xff] }
 0xd1c   :  { %9999 = vmatmul.bf16.vlgmr.msra.gmra.mxu1 %v9549_v46  ;;  %v9505_v44 = vsel %vm966_vm12, %v9350_v4, %v9386_v8 }
 0xd1d   :  { %9926 = vmatmul.bf16.gmra.mxu3 %v9505_v44 }
 0xd22   :  { %v9426_v31 = vpop.permute.xlu2 %9425 }
 0xd23   :  { %v9422_v57 = vpop.permute.xlu0 %9421  ;;  %v9525_v34 = vsel %vm966_vm12, %v18870_v54, %v9426_v31 }
 0xd24   :  { %v9517_v14 = vsel %vm966_vm12, %v9405_v30, %v9422_v57  ;;  %v20380_v57 = vld [vmem:[#allocation42_spill] sm:$0xff] }
 0xd25   :  { %9950 = vmatmul.bf16.vlgmr.msra.gmra.mxu0 %v9517_v14  ;;  %v9443_v14 = vpack.c.b16 %v20380_v57, %v20379_v2 }
 0xd2a   :  { %v9428_v4 = vpop.permute.xlu2 %9427 }
 0xd2b   :  { %v9460_v22 = vpop.permute.xlu0 %9459 }
 0xd2c   :  { %v9553_v12 = vsel %vm966_vm12, %v9440_v18, %v9460_v22 }
 0xd2d   :  { %10004 = vmatmul.bf16.gmra.mxu1 %v9553_v12  ;;  %9931 = vmatmul.bf16.gmra.mxu3 %v9509_v16 }
 0xd32   :  { %v9466_v30 = vpop.permute.xlu2 %9465 }
 0xd33   :  { %v9478_v0 = vpop.permute.xlu0 %9477  ;;  %v9565_v38 = vsel %vm966_vm12, %v9443_v14, %v9466_v30 }
 0xd34   :  { %v9581_v6 = vsel %vm966_vm12, %v9473_v39, %v9478_v0 }
 0xd35   :  { %10063 = vmatmul.bf16.gmra.mxu2 %v9581_v6 }
 0xd38   :  { %v19058_v19 = vpop.f32.mrf.mxu3 }
 0xd39   :  { %v9390_v24 = vpop.permute.xlu1 %9389 }
 0xd3a   :  { %v9513_v26 = vsel %vm966_vm12, %v9352_v21, %v9390_v24  ;;  %v9434_v56 = vpop.permute.xlu2 %9433 }
 0xd3b   :  { %v9430_v46 = vpop.permute.xlu0 %9429 }
 0xd3c   :  { %v9533_v22 = vsel %vm966_vm12, %v9409_v61, %v9430_v46 }
 0xd3d   :  { %9936 = vmatmul.bf16.gmra.mxu3 %v9513_v26 }
 0xd40   :  { %v19066_v47 = vpop.f32.mrf.mxu3 }
 0xd41   :  { %v9424_v55 = vpop.permute.xlu1 %9423 }
 0xd42   :  { %v9521_v27 = vsel %vm966_vm12, %v18866_v51, %v9424_v55 }
 0xd43   :  { %9955 = vmatmul.bf16.gmra.mxu0 %v9521_v27  ;;  %v9468_v59 = vpop.permute.xlu0 %9467 }
 0xd45   :  { %10068 = vmatmul.bf16.gmra.mxu2 %v9505_v44  ;;  %v9529_v44 = vsel %vm966_vm12, %v18908_v45, %v9428_v4 }
 0xd49   :  { %v9462_v63 = vpop.permute.xlu1 %9461 }
 0xd4a   :  { %v9557_v17 = vsel %vm966_vm12, %v9441_v41, %v9462_v63 }
 0xd4b   :  { %10009 = vmatmul.bf16.gmra.mxu1 %v9557_v17 }
 0xd4d   :  { %11200 = vmatmul.msk.bf16.vlgmr.msra.gmra.mxu3 %vm966_vm12, %v18866_v51 }
 0xd51   :  { %v9464_v28 = vpop.permute.xlu1 %9463 }
 0xd52   :  { %v9561_v8 = vsel %vm966_vm12, %v9442_v1, %v9464_v28 }
 0xd53   :  { %9960 = vmatmul.bf16.gmra.mxu0 %v9525_v34 }
 0xd55   :  { %10073 = vmatmul.bf16.gmra.mxu2 %v9509_v16  ;;  %v9444_v16 = vpack.c.b16 %v18715_v33, %v20381_v48  ;;  %v9445_v33 = vpack.c.b16 %v18806_v15, %v18729_v53  ;;  %v9446_v15 = vpack.c.b16 %v18878_v50, %v18808_v35  ;;  %v20382_v48 = vld [vmem:[#allocation21_spill] sm:$0xff] }
 0xd57   :  { %v9569_v39 = vsel %vm966_vm12, %v9444_v16, %v9468_v59 }
 0xd59   :  { %v9432_v25 = vpop.permute.xlu1 %9431 }
 0xd5a   :  { %v9537_v11 = vsel %vm966_vm12, %v19008_v58, %v9432_v25 }
 0xd5b   :  { %10014 = vmatmul.bf16.gmra.mxu1 %v9561_v8 }
 0xd5d   :  { %11201 = vmatmul.msk.bf16.gmra.mxu3 %vm966_vm12, %v18870_v54  ;;  %v9480_v54 = vpop.permute.xlu0 %9479 }
 0xd5e   :  { %v9585_v12 = vsel %vm966_vm12, %v9474_v13, %v9480_v54 }
 0xd60   :  { %v19071_v51 = vpop.f32.mrf.mxu3  ;;  %v10049_v40 = vpop.f32.mrf.mxu2 }
 0xd61   :  { %v9470_v0 = vpop.permute.xlu1 %9469 }
 0xd62   :  { %v9573_v24 = vsel %vm966_vm12, %v9445_v33, %v9470_v0 }
 0xd63   :  { %9965 = vmatmul.bf16.gmra.mxu0 %v9529_v44 }
 0xd65   :  { %10078 = vmatmul.bf16.gmra.mxu2 %v9513_v26  ;;  %v9541_v26 = vsel %vm966_vm12, %v9411_v52, %v9434_v56 }
 0xd68   :  { %v19077_v7 = vpop.f32.mrf.mxu3  ;;  %v10051_v20 = vpop.f32.mrf.mxu2 }
 0xd69   :  { %v9472_v53 = vpop.permute.xlu1 %9471 }
 0xd6a   :  { %v9577_v27 = vsel %vm966_vm12, %v9446_v15, %v9472_v53 }
 0xd6b   :  { %10019 = vmatmul.bf16.gmra.mxu1 %v9565_v38 }
 0xd6d   :  { %11202 = vmatmul.msk.bf16.gmra.mxu3 %vm966_vm12, %v18908_v45 }
 0xd70   :  { %v19087_v18 = vpop.f32.mrf.mxu3  ;;  %v10054_v34 = vpop.f32.mrf.mxu2 }
 0xd73   :  { %9970 = vmatmul.bf16.gmra.mxu0 %v9533_v22 }
 0xd75   :  { %10083 = vmatmul.bf16.gmra.mxu2 %v9585_v12 }
 0xd78   :  { %v19093_v45 = vpop.f32.mrf.mxu3  ;;  %v10056_v44 = vpop.f32.mrf.mxu2 }
 0xd7b   :  { %10024 = vmatmul.bf16.gmra.mxu1 %v9569_v39 }
 0xd7d   :  { %11203 = vmatmul.msk.bf16.gmra.mxu3 %vm966_vm12, %v9481_v9 }
 0xd80   :  { %v19100_v36 = vpop.f32.mrf.mxu3  ;;  %v10059_v12 = vpop.f32.mrf.mxu2 }
 0xd83   :  { %9975 = vmatmul.bf16.gmra.mxu0 %v9537_v11 }
 0xd88   :  { %v19106_v6 = vpop.f32.mrf.mxu3 }
 0xd8b   :  { %10029 = vmatmul.bf16.gmra.mxu1 %v9573_v24 }
 0xd8d   :  { %11204 = vmatmul.msk.bf16.gmra.mxu3 %vm966_vm12, %v19008_v58  ;;  %v9436_v58 = vpop.permute.xlu2 %9435 }
 0xd8e   :  { %v9545_v43 = vsel %vm966_vm12, %v9412_v32, %v9436_v58 }
 0xd90   :  { %v19115_v21 = vpop.f32.mrf.mxu3 }
 0xd93   :  { %9980 = vmatmul.bf16.gmra.mxu0 %v9541_v26 }
 0xd98   :  { %v19120_v55 = vpop.f32.mrf.mxu3 }
 0xd99   :  { %v10000_v50 = vpop.f32.mrf.mxu1 }
 0xd9b   :  { %10034 = vmatmul.bf16.gmra.mxu1 %v9577_v27  ;;  %v10061_v27 = vpop.f32.mrf.mxu2 }
 0xd9d   :  { %11205 = vmatmul.msk.bf16.gmra.mxu3 %vm966_vm12, %v9411_v52  ;;  %v20383_v52 = vld [vmem:[#allocation107_spill] sm:$0xff] }
 0xda0   :  { %v19128_v37 = vpop.f32.mrf.mxu3 }
 0xda1   :  { %v10002_v63 = vpop.f32.mrf.mxu1 }
 0xda2   :  { %v9951_v35 = vpop.f32.mrf.mxu0 }
 0xda3   :  { %9985 = vmatmul.bf16.gmra.mxu0 %v9545_v43  ;;  %v9952_v60 = vadd.f32 %v9951_v35, %v19058_v19  ;;  %v19156_v19 = vld [vmem:[%s19306_s22] ss:$0 sm:$0xff] }
 0xda5   :  { %v10001_v8 = vadd.f32 %v10000_v50, %v9952_v60 }
 0xda7   :  { %v10050_v59 = vadd.f32 %v10049_v40, %v10001_v8 }
 0xda8   :  { %v19131_v29 = vpop.f32.mrf.mxu3 }
 0xdaa   :  { %v9953_v41 = vpop.f32.mrf.mxu0  ;;  %v10005_v31 = vpop.f32.mrf.mxu1 }
 0xdab   :  { %v9954_v49 = vadd.f32 %v9953_v41, %v19066_v47 }
 0xdad   :  { %11206 = vmatmul.msk.bf16.gmra.mxu3 %vm966_vm12, %v9412_v32  ;;  %v10003_v2 = vadd.f32 %v10002_v63, %v9954_v49  ;;  %v20384_v63 = vld [vmem:[#allocation106_spill] sm:$0xff] }
 0xdaf   :  { %v10052_v61 = vadd.f32 %v10051_v20, %v10003_v2 }
 0xdb0   :  { %v19134_v10 = vpop.f32.mrf.mxu3 }
 0xdb2   :  { %v10007_v46 = vpop.f32.mrf.mxu1 }
 0xdb8   :  { %v19136_v3 = vpop.f32.mrf.mxu3 }
 0xdbd   :  { %11207 = vmatmul.msk.bf16.gmra.mxu3 %vm966_vm12, %v9482_v62 }
 0xdc0   :  { %v9956_v5 = vpop.f32.mrf.mxu0  ;;  %v19142_v17 = vpop.f32.mrf.mxu3 }
 0xdc1   :  { %v9957_v47 = vadd.f32 %v9956_v5, %v19071_v51  ;;  %v10064_v5 = vpop.f32.mrf.mxu2 }
 0xdc3   :  { %v10006_v25 = vadd.f32 %v10005_v31, %v9957_v47 }
 0xdc5   :  { %v10055_v56 = vadd.f32 %v10054_v34, %v10006_v25 }
 0xdc8   :  { %v9958_v28 = vpop.f32.mrf.mxu0  ;;  %v19145_v1 = vpop.f32.mrf.mxu3 }
 0xdc9   :  { %v10010_v14 = vpop.f32.mrf.mxu1  ;;  %v9959_v33 = vadd.f32 %v9958_v28, %v19077_v7 }
 0xdcb   :  { %v10008_v58 = vadd.f32 %v10007_v46, %v9959_v33 }
 0xdcd   :  { %v10057_v40 = vadd.f32 %v10056_v44, %v10008_v58 }
 0xdd0   :  { %v9961_v4 = vpop.f32.mrf.mxu0  ;;  %v10098_v23 = vpop.f32.mrf.mxu3 }
 0xdd1   :  { %v10099_v30 = vadd.f32 %v10098_v23, %v10050_v59  ;;  %v10012_v0 = vpop.f32.mrf.mxu1  ;;  %v9962_v35 = vadd.f32 %v9961_v4, %v19087_v18  ;;  %v20385_v4 = vld [vmem:[#allocation86_spill] sm:$0xff] }
 0xdd3   :  { %v10142_v57 = vmul.f32 %v19151_v42, %v10099_v30  ;;  %v10011_v31 = vadd.f32 %v10010_v14, %v9962_v35 }
 0xdd5   :  { %v10162_v38 = vadd.f32 %v19156_v19, %v10142_v57  ;;  %v10060_v49 = vadd.f32 %v10059_v12, %v10011_v31  ;;  %v10066_v57 = vpop.f32.mrf.mxu2 }
 0xdd7   :  { %v10178_v54 = vmax.f32 %v10162_v38, 0.0 }
 0xdd8   :  { %v10100_v13 = vpop.f32.mrf.mxu3  ;;  %v9963_v22 = vpop.f32.mrf.mxu0 }
 0xdd9   :  { %v10194_v16 = vadd.f32 %v10178_v54, %v20382_v48  ;;  %v10101_v39 = vadd.f32 %v10100_v13, %v10052_v61  ;;  %v10015_v41 = vpop.f32.mrf.mxu1  ;;  %v9964_v8 = vadd.f32 %v9963_v22, %v19093_v45  ;;  %v20386_v13 = vld [vmem:[#allocation76_spill] sm:$0xff] }
 0xddb   :  { %v10143_v9 = vmul.f32 %v19151_v42, %v10101_v39  ;;  %10210 = vxpose.xlu0.b32.start [1/8] (short) (narrow) %v10194_v16, 64  ;;  %v10013_v30 = vadd.f32 %v10012_v0, %v9964_v8 }
 0xddd   :  { %v10163_v11 = vadd.f32 %v19156_v19, %v10143_v9  ;;  %v10062_v61 = vadd.f32 %v10061_v27, %v10013_v30  ;;  %v10069_v9 = vpop.f32.mrf.mxu2 }
 0xddf   :  { %v10179_v24 = vmax.f32 %v10163_v11, 0.0 }
 0xde0   :  { %v10103_v51 = vpop.f32.mrf.mxu3  ;;  %v9966_v15 = vpop.f32.mrf.mxu0 }
 0xde1   :  { %v10195_v26 = vadd.f32 %v10179_v24, %v20383_v52  ;;  %v10104_v53 = vadd.f32 %v10103_v51, %v10055_v56  ;;  %v10017_v23 = vpop.f32.mrf.mxu1  ;;  %v9967_v47 = vadd.f32 %v9966_v15, %v19100_v36  ;;  %v20387_v56 = vld [vmem:[#allocation39_spill] sm:$0xff] }
 0xde3   :  { %v10144_v32 = vmul.f32 %v19151_v42, %v10104_v53  ;;  %10211 = vxpose.xlu0.b32.cont [2/8] (short) (narrow) %v10195_v26, 64  ;;  %v10016_v48 = vadd.f32 %v10015_v41, %v9967_v47 }
 0xde5   :  { %v10164_v43 = vadd.f32 %v19156_v19, %v10144_v32  ;;  %v10065_v33 = vadd.f32 %v10064_v5, %v10016_v48 }
 0xde7   :  { %v10180_v50 = vmax.f32 %v10164_v43, 0.0 }
 0xde8   :  { %v10105_v7 = vpop.f32.mrf.mxu3  ;;  %v9968_v28 = vpop.f32.mrf.mxu0 }
 0xde9   :  { %v10196_v20 = vadd.f32 %v10180_v50, %v20384_v63  ;;  %v10106_v62 = vadd.f32 %v10105_v7, %v10057_v40  ;;  %v10020_v39 = vpop.f32.mrf.mxu1  ;;  %v9969_v11 = vadd.f32 %v9968_v28, %v19106_v6  ;;  %v10071_v6 = vpop.f32.mrf.mxu2  ;;  %v20388_v50 = vld [vmem:[#allocation73_spill] sm:$0xff] }
 0xdeb   :  { %v10145_v34 = vmul.f32 %v19151_v42, %v10106_v62  ;;  %10212 = vxpose.xlu0.b32.cont [3/8] (short) (narrow) %v10196_v20, 64  ;;  %v10018_v26 = vadd.f32 %v10017_v23, %v9969_v11 }
 0xded   :  { %v10165_v60 = vadd.f32 %v19156_v19, %v10145_v34  ;;  %v10067_v43 = vadd.f32 %v10066_v57, %v10018_v26  ;;  %v20390_v57 = vld [vmem:[#allocation45_spill] sm:$0xff] }
 0xdef   :  { %v10181_v46 = vmax.f32 %v10165_v60, 0.0  ;;  %v20389_v60 = vld [vmem:[#allocation17_spill] sm:$0xff] }
 0xdf0   :  { %v10108_v18 = vpop.f32.mrf.mxu3  ;;  %v9971_v38 = vpop.f32.mrf.mxu0 }
 0xdf1   :  { %v10197_v44 = vadd.f32 %v10181_v46, %v20385_v4  ;;  %v10109_v59 = vadd.f32 %v10108_v18, %v10060_v49  ;;  %v10022_v27 = vpop.f32.mrf.mxu1  ;;  %v9972_v58 = vadd.f32 %v9971_v38, %v19115_v21  ;;  %v10074_v49 = vpop.f32.mrf.mxu2 }
 0xdf3   :  { %v10146_v2 = vmul.f32 %v19151_v42, %v10109_v59  ;;  %10213 = vxpose.xlu0.b32.cont [4/8] (short) (narrow) %v10197_v44, 64  ;;  %v10021_v63 = vadd.f32 %v10020_v39, %v9972_v58  ;;  %v20391_v39 = vld [vmem:[#allocation14_spill] sm:$0xff] }
 0xdf5   :  { %v10166_v14 = vadd.f32 %v19156_v19, %v10146_v2  ;;  %v10070_v34 = vadd.f32 %v10069_v9, %v10021_v63 }
 0xdf7   :  { %v10182_v54 = vmax.f32 %v10166_v14, 0.0 }
 0xdf8   :  { %v10110_v45 = vpop.f32.mrf.mxu3  ;;  %v9973_v24 = vpop.f32.mrf.mxu0 }
 0xdf9   :  { %v10198_v22 = vadd.f32 %v10182_v54, %v20386_v13  ;;  %v10111_v12 = vadd.f32 %v10110_v45, %v10062_v61  ;;  %v9974_v5 = vadd.f32 %v9973_v24, %v19120_v55  ;;  %v10025_v28 = vpop.f32.mrf.mxu1  ;;  %v10076_v45 = vpop.f32.mrf.mxu2 }
 0xdfb   :  { %v10147_v16 = vmul.f32 %v19151_v42, %v10111_v12  ;;  %10214 = vxpose.xlu0.b32.cont [5/8] (short) (narrow) %v10198_v22, 64  ;;  %v10023_v18 = vadd.f32 %v10022_v27, %v9974_v5 }
 0xdfd   :  { %v10167_v25 = vadd.f32 %v19156_v19, %v10147_v16  ;;  %v10072_v2 = vadd.f32 %v10071_v6, %v10023_v18 }
 0xdff   :  { %v10183_v0 = vmax.f32 %v10167_v25, 0.0 }
 0xe00   :  { %v10113_v36 = vpop.f32.mrf.mxu3  ;;  %v9976_v7 = vpop.f32.mrf.mxu0 }
 0xe01   :  { %v10199_v51 = vadd.f32 %v10183_v0, %v20387_v56  ;;  %v10114_v52 = vadd.f32 %v10113_v36, %v10065_v33  ;;  %v9977_v23 = vadd.f32 %v9976_v7, %v19128_v37  ;;  %v10027_v47 = vpop.f32.mrf.mxu1  ;;  %v10079_v36 = vpop.f32.mrf.mxu2 }
 0xe03   :  { %v10148_v53 = vmul.f32 %v19151_v42, %v10114_v52  ;;  %10215 = vxpose.xlu0.b32.cont [6/8] (short) (narrow) %v10199_v51, 64  ;;  %v10026_v54 = vadd.f32 %v10025_v28, %v9977_v23 }
 0xe05   :  { %v10168_v15 = vadd.f32 %v19156_v19, %v10148_v53  ;;  %v10075_v16 = vadd.f32 %v10074_v49, %v10026_v54  ;;  %v20392_v53 = vld [vmem:[#allocation63_spill] sm:$0xff] }
 0xe07   :  { %v10184_v32 = vmax.f32 %v10168_v15, 0.0 }
 0xe08   :  { %v10115_v35 = vpop.f32.mrf.mxu3  ;;  %v9978_v44 = vpop.f32.mrf.mxu0 }
 0xe09   :  { %v10200_v40 = vadd.f32 %v10184_v32, %v20388_v50  ;;  %v10116_v41 = vadd.f32 %v10115_v35, %v10067_v43  ;;  %v9979_v12 = vadd.f32 %v9978_v44, %v19131_v29  ;;  %v10030_v33 = vpop.f32.mrf.mxu1 }
 0xe0b   :  { %v10149_v20 = vmul.f32 %v19151_v42, %v10116_v41  ;;  %10216 = vxpose.xlu0.b32.cont [7/8] (short) (narrow) %v10200_v40, 64  ;;  %v10028_v11 = vadd.f32 %v10027_v47, %v9979_v12 }
 0xe0d   :  { %v10169_v62 = vadd.f32 %v19156_v19, %v10149_v20  ;;  %v10077_v52 = vadd.f32 %v10076_v45, %v10028_v11  ;;  %v10081_v20 = vpop.f32.mrf.mxu2 }
 0xe0f   :  { %v10185_v31 = vmax.f32 %v10169_v62, 0.0 }
 0xe10   :  { %v10118_v21 = vpop.f32.mrf.mxu3  ;;  %v9981_v22 = vpop.f32.mrf.mxu0 }
 0xe11   :  { %v10201_v8 = vadd.f32 %v10185_v31, %v20389_v60  ;;  %v10119_v46 = vadd.f32 %v10118_v21, %v10070_v34  ;;  %v9982_v56 = vadd.f32 %v9981_v22, %v19134_v10  ;;  %v10032_v35 = vpop.f32.mrf.mxu1  ;;  %v20393_v10 = vld [vmem:[#allocation24_spill] sm:$0xff] }
 0xe13   :  { %v10150_v4 = vmul.f32 %v19151_v42, %v10119_v46  ;;  %10217 = vxpose.xlu0.b32.end [8/8] (short) (narrow) %v10201_v8, 64  ;;  %v10031_v58 = vadd.f32 %v10030_v33, %v9982_v56  ;;  %v20394_v46 = vld [vmem:[#allocation50_spill] sm:$0xff] }
 0xe15   :  { %v10170_v59 = vadd.f32 %v19156_v19, %v10150_v4  ;;  %v10080_v40 = vadd.f32 %v10079_v36, %v10031_v58 }
 0xe17   :  { %v10186_v30 = vmax.f32 %v10170_v59, 0.0  ;;  %v10084_v59 = vpop.f32.mrf.mxu2 }
 0xe18   :  { %v10120_v55 = vpop.f32.mrf.mxu3  ;;  %v9983_v26 = vpop.f32.mrf.mxu0 }
 0xe19   :  { %v10202_v14 = vadd.f32 %v10186_v30, %v20390_v57  ;;  %v10121_v38 = vadd.f32 %v10120_v55, %v10072_v2  ;;  %v9984_v6 = vadd.f32 %v9983_v26, %v19136_v3  ;;  %v10035_v8 = vpop.f32.mrf.mxu1 }
 0xe1b   :  { %v10151_v61 = vmul.f32 %v19151_v42, %v10121_v38  ;;  %10250 = vxpose.xlu2.b32.start [1/8] (short) (narrow) %v10202_v14, 64  ;;  %v10033_v5 = vadd.f32 %v10032_v35, %v9984_v6  ;;  %v20395_v14 = vld [vmem:[#allocation13_spill] sm:$0xff] }
 0xe1d   :  { %v10171_v13 = vadd.f32 %v19156_v19, %v10151_v61  ;;  %v10082_v60 = vadd.f32 %v10081_v20, %v10033_v5 }
 0xe1f   :  { %v10187_v48 = vmax.f32 %v10171_v13, 0.0  ;;  %v10086_v22 = vpop.f32.mrf.mxu2 }
 0xe20   :  { %v10123_v37 = vpop.f32.mrf.mxu3  ;;  %v9986_v62 = vpop.f32.mrf.mxu0 }
 0xe21   :  { %v10203_v25 = vadd.f32 %v10187_v48, %v20391_v39  ;;  %v10124_v9 = vadd.f32 %v10123_v37, %v10075_v16  ;;  %v9987_v28 = vadd.f32 %v9986_v62, %v19142_v17  ;;  %v10037_v54 = vpop.f32.mrf.mxu1  ;;  %v20396_v37 = vld [vmem:[#allocation59_spill] sm:$0xff] }
 0xe23   :  { %v10152_v0 = vmul.f32 %v19151_v42, %v10124_v9  ;;  %10251 = vxpose.xlu2.b32.cont [2/8] (short) (narrow) %v10203_v25, 64  ;;  %v10036_v4 = vadd.f32 %v10035_v8, %v9987_v28 }
 0xe25   :  { %v10172_v24 = vadd.f32 %v19156_v19, %v10152_v0  ;;  %v10085_v57 = vadd.f32 %v10084_v59, %v10036_v4  ;;  %v20397_v0 = vld [vmem:[#allocation89_spill] sm:$0xff] }
 0xe27   :  { %v10188_v51 = vmax.f32 %v10172_v24, 0.0 }
 0xe28   :  { %v10125_v29 = vpop.f32.mrf.mxu3  ;;  %v9988_v23 = vpop.f32.mrf.mxu0 }
 0xe29   :  { %v10204_v15 = vadd.f32 %v10188_v51, %v20392_v53  ;;  %v10126_v27 = vadd.f32 %v10125_v29, %v10077_v52  ;;  %v9989_v2 = vadd.f32 %v9988_v23, %v19145_v1 }
 0xe2b   :  { %v10153_v32 = vmul.f32 %v19151_v42, %v10126_v27  ;;  %10252 = vxpose.xlu2.b32.cont [3/8] (short) (narrow) %v10204_v15, 64  ;;  %v10038_v61 = vadd.f32 %v10037_v54, %v9989_v2 }
 0xe2d   :  { %v10173_v43 = vadd.f32 %v19156_v19, %v10153_v32  ;;  %v10087_v48 = vadd.f32 %v10086_v22, %v10038_v61 }
 0xe2f   :  { %v10189_v50 = vmax.f32 %v10173_v43, 0.0 }
 0xe30   :  { %v10128_v41 = vpop.f32.mrf.mxu3 }
 0xe31   :  { %v10205_v7 = vadd.f32 %v10189_v50, %v20393_v10  ;;  %v10129_v63 = vadd.f32 %v10128_v41, %v10080_v40 }
 0xe33   :  { %v10154_v31 = vmul.f32 %v19151_v42, %v10129_v63  ;;  %10253 = vxpose.xlu2.b32.cont [4/8] (short) (narrow) %v10205_v7, 64 }
 0xe35   :  { %v10174_v34 = vadd.f32 %v19156_v19, %v10154_v31 }
 0xe37   :  { %v10190_v21 = vmax.f32 %v10174_v34, 0.0 }
 0xe38   :  { %v10130_v3 = vpop.f32.mrf.mxu3 }
 0xe39   :  { %v10206_v49 = vadd.f32 %v10190_v21, %v20394_v46  ;;  %v10131_v18 = vadd.f32 %v10130_v3, %v10082_v60 }
 0xe3b   :  { %v10155_v44 = vmul.f32 %v19151_v42, %v10131_v18  ;;  %10254 = vxpose.xlu2.b32.cont [5/8] (short) (narrow) %v10206_v49, 64 }
 0xe3d   :  { %v10175_v30 = vadd.f32 %v19156_v19, %v10155_v44 }
 0xe3f   :  { %v10191_v55 = vmax.f32 %v10175_v30, 0.0 }
 0xe40   :  { %v10133_v17 = vpop.f32.mrf.mxu3 }
 0xe41   :  { %v10207_v38 = vadd.f32 %v10191_v55, %v20395_v14  ;;  %v10134_v47 = vadd.f32 %v10133_v17, %v10085_v57 }
 0xe43   :  { %v10156_v45 = vmul.f32 %v19151_v42, %v10134_v47  ;;  %10255 = vxpose.xlu2.b32.cont [6/8] (short) (narrow) %v10207_v38, 64 }
 0xe45   :  { %v10176_v13 = vadd.f32 %v19156_v19, %v10156_v45 }
 0xe47   :  { %v10192_v12 = vmax.f32 %v10176_v13, 0.0 }
 0xe48   :  { %v10135_v16 = vpop.f32.mrf.mxu3 }
 0xe49   :  { %v10208_v39 = vadd.f32 %v10192_v12, %v20396_v37  ;;  %v10136_v1 = vadd.f32 %v10135_v16, %v10087_v48 }
 0xe4b   :  { %v10157_v25 = vmul.f32 %v19151_v42, %v10136_v1  ;;  %10256 = vxpose.xlu2.b32.cont [7/8] (short) (narrow) %v10208_v39, 64 }
 0xe4d   :  { %v10177_v9 = vadd.f32 %v19156_v19, %v10157_v25 }
 0xe4f   :  { %v10193_v11 = vmax.f32 %v10177_v9, 0.0 }
 0xe51   :  { %v10209_v33 = vadd.f32 %v10193_v11, %v20397_v0 }
 0xe53   :  { %10257 = vxpose.xlu2.b32.end [8/8] (short) (narrow) %v10209_v33, 64 }
 0xe7f   :  { %v10226_v24 = vpop.trf.xlu0 }
 0xe80   :  { %10242 = vst.msk [vmem:[%s19307_s23] sm:$0xff] %vm966_vm12, %v10226_v24 }
 0xe87   :  { %v10227_v36 = vpop.trf.xlu0 }
 0xe88   :  { %10243 = vst.msk [vmem:[%s19307_s23 + $0x8] sm:$0xff] %vm966_vm12, %v10227_v36 }
 0xe8f   :  { %v10228_v42 = vpop.trf.xlu0 }
 0xe90   :  { %10244 = vst.msk [vmem:[%s19307_s23 + $0x10] sm:$0xff] %vm966_vm12, %v10228_v42 }
 0xe97   :  { %v10229_v19 = vpop.trf.xlu0 }
 0xe98   :  { %10245 = vst.msk [vmem:[%s19307_s23 + $0x18] sm:$0xff] %vm966_vm12, %v10229_v19 }
 0xe9f   :  { %v10230_v56 = vpop.trf.xlu0 }
 0xea0   :  { %10246 = vst.msk [vmem:[%s19307_s23 + $0x20] sm:$0xff] %vm966_vm12, %v10230_v56 }
 0xea7   :  { %v10231_v52 = vpop.trf.xlu0 }
 0xea8   :  { %10247 = vst.msk [vmem:[%s19307_s23 + $0x28] sm:$0xff] %vm966_vm12, %v10231_v52 }
 0xeaf   :  { %v10232_v29 = vpop.trf.xlu0 }
 0xeb0   :  { %10248 = vst.msk [vmem:[%s19307_s23 + $0x30] sm:$0xff] %vm966_vm12, %v10232_v29 }
 0xeb4   :  { %v10266_v51 = vpop.trf.xlu2 }
 0xeb5   :  { %11208 = vst.msk [vmem:[%s19307_s23 + $0x40] sm:$0xff] %vm966_vm12, %v10266_v51 }
 0xeb7   :  { %v10233_v15 = vpop.trf.xlu0 }
 0xeb8   :  { %10249 = vst.msk [vmem:[%s19307_s23 + $0x38] sm:$0xff] %vm966_vm12, %v10233_v15 }
 0xebc   :  { %v10267_v26 = vpop.trf.xlu2 }
 0xebd   :  { %11209 = vst.msk [vmem:[%s19307_s23 + $0x48] sm:$0xff] %vm966_vm12, %v10267_v26 }
 0xec4   :  { %v10268_v53 = vpop.trf.xlu2 }
 0xec5   :  { %11210 = vst.msk [vmem:[%s19307_s23 + $0x50] sm:$0xff] %vm966_vm12, %v10268_v53 }
 0xecc   :  { %v10269_v27 = vpop.trf.xlu2 }
 0xecd   :  { %11211 = vst.msk [vmem:[%s19307_s23 + $0x58] sm:$0xff] %vm966_vm12, %v10269_v27 }
 0xed4   :  { %v10270_v58 = vpop.trf.xlu2 }
 0xed5   :  { %11212 = vst.msk [vmem:[%s19307_s23 + $0x60] sm:$0xff] %vm966_vm12, %v10270_v58 }
 0xedc   :  { %v10271_v32 = vpop.trf.xlu2 }
 0xedd   :  { %11213 = vst.msk [vmem:[%s19307_s23 + $0x68] sm:$0xff] %vm966_vm12, %v10271_v32 }
 0xee4   :  { %v10272_v43 = vpop.trf.xlu2 }
 0xee5   :  { %11214 = vst.msk [vmem:[%s19307_s23 + $0x70] sm:$0xff] %vm966_vm12, %v10272_v43 }
 0xeec   :  { %v10273_v35 = vpop.trf.xlu2 }
 0xeed   :  { %11215 = vst.msk [vmem:[%s19307_s23 + $0x78] sm:$0xff] %vm966_vm12, %v10273_v35 }

</bundles_post_ra>
